<compile_context>
chip_gen: v7x
topology: tpu7x:2x2x1
jax: 0.10.0
libtpu: 0.0.40
codegen_flags: <defaults>
</compile_context>

<pallas_src>
import numpy as np
import jax
import jax.numpy as jnp
from jax import lax
from jax.experimental import pallas as pl
from jax.experimental.pallas import tpu as pltpu


# ----------------------------------------------------------------------------
# Host-side constant builders (streamed once with the weights)
# ----------------------------------------------------------------------------

def _tap_offsets(kh, kw):
    ph, pw = kh // 2, kw // 2
    return [(dy, dx) for dy in range(-ph, ph + 1) for dx in range(-pw, pw + 1)]


def _make_roll_masks(H, W, kh, kw):
    """(T, 1, H*W) 0/1 validity masks + lane-roll amounts per conv tap."""
    HW = H * W
    offs = _tap_offsets(kh, kw)
    masks = np.zeros((len(offs), 1, HW), np.float32)
    shifts = []
    for t, (dy, dx) in enumerate(offs):
        shifts.append((-(dy * W + dx)) % HW)
        for y in range(H):
            for x in range(W):
                if 0 <= y + dy < H and 0 <= x + dx < W:
                    masks[t, 0, y * W + x] = 1.0
    return masks, shifts


def _make_shift_matrices(H, W, kh, kw):
    """(T, H*W, H*W) combined shift+zero-pad matrices: patch = act @ S[t]."""
    HW = H * W
    offs = _tap_offsets(kh, kw)
    S = np.zeros((len(offs), HW, HW), np.float32)
    for t, (dy, dx) in enumerate(offs):
        for y in range(H):
            for x in range(W):
                yy, xx = y + dy, x + dx
                if 0 <= yy < H and 0 <= xx < W:
                    S[t, yy * W + xx, y * W + x] = 1.0
    return S


def _make_pool_matrix(H, W, dh, dw):
    """(H*W, Ho*Wo) matrix implementing avg_pool2d(kernel=stride=(dh, dw))."""
    Ho, Wo = H // dh, W // dw
    P = np.zeros((H * W, Ho * Wo), np.float32)
    inv = 1.0 / float(dh * dw)
    for y in range(H):
        for x in range(W):
            P[y * W + x, (y // dh) * Wo + (x // dw)] = inv
    return P


# ----------------------------------------------------------------------------
# In-kernel building blocks (operate on channel-major (C, H*W) f32 values)
# ----------------------------------------------------------------------------

def _conv_roll(a, w_ref, b_ref, mask_ref, shifts):
    """Implicit-GEMM 'same' conv via lane rotations (H*W multiple of 128)."""
    acc = None
    for t, s in enumerate(shifts):
        shifted = a if s == 0 else pltpu.roll(a, s, 1)
        patch = shifted * mask_ref[t]                     # zero-padding semantics
        c = jnp.dot(w_ref[t], patch, preferred_element_type=jnp.float32)
        acc = c if acc is None else acc + c
    return acc + b_ref[...]                               # bias (Cout, 1)


def _conv_shiftmat(a, w_ref, b_ref, s_ref):
    """Implicit-GEMM 'same' conv with shift+pad folded into (HW, HW) matmuls."""
    T = w_ref.shape[0]
    acc = None
    for t in range(T):
        patch = jnp.dot(a, s_ref[t], preferred_element_type=jnp.float32)
        c = jnp.dot(w_ref[t], patch, preferred_element_type=jnp.float32)
        acc = c if acc is None else acc + c
    return acc + b_ref[...]


def _gn_silu(a, gamma_ref, beta_ref, num_groups, eps=1e-5):
    """GroupNorm (per sample/group, biased var, eps=1e-5) followed by SiLU."""
    C, HW = a.shape
    cg = C // num_groups
    cidx = lax.broadcasted_iota(jnp.int32, (C, 1), 0)
    inv_n = 1.0 / float(cg * HW)
    mean_c = jnp.zeros((C, 1), jnp.float32)
    rstd_c = jnp.zeros((C, 1), jnp.float32)
    for g in range(num_groups):                           # num_groups <= 4, unrolled
        sel = jnp.where((cidx >= g * cg) & (cidx < (g + 1) * cg), 1.0, 0.0)
        mu = jnp.sum(a * sel) * inv_n
        var = jnp.sum(jnp.square(a - mu) * sel) * inv_n
        mean_c = mean_c + mu * sel
        rstd_c = rstd_c + lax.rsqrt(var + eps) * sel
    y = (a - mean_c) * (rstd_c * gamma_ref[...]) + beta_ref[...]
    return y * jax.nn.sigmoid(y)                          # SiLU


# ----------------------------------------------------------------------------
# Encoder definition (mirrors the PyTorch module's __init__ / forward)
# ----------------------------------------------------------------------------

class Args:
    def __init__(self):
        self.enc_arch = "16b1d2_2,8b1"
        self.widths = [8, 16]
        self.bottleneck = 2
        self.input_channels = 4
        self.p_dropout = 0.0     # Dropout(p=0) is identity (matches eval)
        self.embd_dim = 32       # unused: Encoder builds Blocks with condition=False


def parse_encoder_arch(args):
    stages = []
    for i, stage in enumerate(args.enc_arch.split(',')):
        start = stage.index('b') + 1
        end = stage.index('d') if 'd' in stage else None
        n_blocks = int(stage[start:end])
        if i == 0 and n_blocks == 0 and 'd' not in stage:
            # TODO(synk): stride-2 conv stem branch not exercised by this config.
            continue
        stages += [(args.widths[i], None, None) for _ in range(n_blocks)]
        if 'd' in stage:
            _down = stage.split('d')[1]
            dh, dw = _down.split('_')[0], _down.split('_')[1]
            dh = float(dh) if '.' in dh else int(dh)
            dw = float(dw) if '.' in dw else int(dw)
            stages += [(args.widths[i + 1], dh, dw)]
    blocks = []
    for i, (width, dh, dw) in enumerate(stages):
        prev_width = stages[max(0, i - 1)][0]
        blocks.append(dict(in_width=prev_width, out_width=width,
                           down_h=dh, down_w=dw))
    return blocks


def _init_conv_packed(key, cout, cin, kh, kw, scale=0.1):
    kw_, kb_ = jax.random.split(key)
    w_oihw = scale * jax.random.normal(kw_, (cout, cin, kh, kw), jnp.float32)
    b = scale * jax.random.normal(kb_, (cout,), jnp.float32)
    # pre-pack once (perf review): tap-major (kh*kw, Cout, Cin) + (Cout, 1) bias
    w_packed = jnp.transpose(w_oihw, (2, 3, 0, 1)).reshape(kh * kw, cout, cin)
    return w_packed, b.reshape(cout, 1)


def init_encoder_params(key, args, block_cfgs):
    params = {}
    key, kstem = jax.random.split(key)
    # stem: Conv2d(input_channels, widths[0], kernel_size=7, stride=1, padding=3)
    params['stem_w'], params['stem_b'] = _init_conv_packed(
        kstem, args.widths[0], args.input_channels, 7, 7)
    blocks = []
    for cfg in block_cfgs:
        in_w, out_w = cfg['in_width'], cfg['out_width']
        bneck = int(in_w / args.bottleneck)
        key, *ks = jax.random.split(key, 8)
        p = {
            'gn1_groups': min(32, in_w // 4),
            'gn1_gamma': 1.0 + 0.05 * jax.random.normal(ks[0], (in_w, 1), jnp.float32),
            'gn1_beta': 0.05 * jax.random.normal(ks[1], (in_w, 1), jnp.float32),
            'gn2_groups': min(32, bneck // 4),
            'gn2_gamma': 1.0 + 0.05 * jax.random.normal(ks[2], (bneck, 1), jnp.float32),
            'gn2_beta': 0.05 * jax.random.normal(ks[3], (bneck, 1), jnp.float32),
        }
        p['conv1_w'], p['conv1_b'] = _init_conv_packed(ks[4], bneck, in_w, 3, 3)
        # NOTE: torch zero-inits conv2 (zero_module); deterministic random weights
        # are used instead so the full compute path is exercised.
        p['conv2_w'], p['conv2_b'] = _init_conv_packed(ks[5], out_w, bneck, 3, 3)
        if in_w != out_w:
            wsk, bsk = _init_conv_packed(ks[6], out_w, in_w, 1, 1)
            p['skip_w'], p['skip_b'] = wsk.reshape(out_w, in_w), bsk
        blocks.append(p)
    params['blocks'] = blocks
    return params


# ----------------------------------------------------------------------------
# Fully fused forward pass (one pallas_call for the whole encoder)
# ----------------------------------------------------------------------------

def encoder_forward(x_nchw, params, block_cfgs):
    B, Cin, H, W = x_nchw.shape
    HW = H * W
    # NCHW -> channel-major flat (B, C, H*W): free reshape, no transpose.
    x2d = x_nchw.reshape(B, Cin, HW).astype(jnp.float32)

    inputs = [x2d]
    in_specs = [pl.BlockSpec((1, Cin, HW), lambda b: (b, 0, 0))]

    def add_const(arr):
        arr = jnp.asarray(arr, jnp.float32)
        idx = len(inputs)
        inputs.append(arr)
        in_specs.append(pl.BlockSpec(arr.shape, lambda b, _n=arr.ndim: (0,) * _n))
        return idx

    # ---- static plan -------------------------------------------------------
    shift_cache = {}

    def conv_plan(kh, hh, ww, w_packed, b_packed):
        key = (kh, hh, ww)
        if key not in shift_cache:
            if (hh * ww) % 128 == 0:
                masks, shifts = _make_roll_masks(hh, ww, kh, kh)
                shift_cache[key] = ('roll', add_const(masks), shifts)
            else:
                smat = _make_shift_matrices(hh, ww, kh, kh)
                shift_cache[key] = ('mat', add_const(smat), None)
        mode, aux_idx, shifts = shift_cache[key]
        return dict(mode=mode, aux=aux_idx, shifts=shifts,
                    w=add_const(w_packed), b=add_const(b_packed))

    stem_plan = conv_plan(7, H, W, params['stem_w'], params['stem_b'])

    # acts dict keeps only the LAST block at each output height
    out_h = []
    hh = H
    for cfg in block_cfgs:
        if cfg['down_h']:
            hh = hh // cfg['down_h']
        out_h.append(hh)
    last_at_h = {h: i for i, h in enumerate(out_h)}

    blk_plans = []
    curH, curW = H, W
    for i, (cfg, p) in enumerate(zip(block_cfgs, params['blocks'])):
        in_w, out_w = cfg['in_width'], cfg['out_width']
        bp = dict(
            g1=p['gn1_groups'], g2=p['gn2_groups'],
            gn1_g=add_const(p['gn1_gamma']), gn1_b=add_const(p['gn1_beta']),
            conv1=conv_plan(3, curH, curW, p['conv1_w'], p['conv1_b']),
            gn2_g=add_const(p['gn2_gamma']), gn2_b=add_const(p['gn2_beta']),
            conv2=conv_plan(3, curH, curW, p['conv2_w'], p['conv2_b']),
            skip=None, pool=None,
        )
        if in_w != out_w:
            bp['skip'] = (add_const(p['skip_w']), add_const(p['skip_b']))
        dh, dw = cfg['down_h'], cfg['down_w']
        if dh:
            if isinstance(dh, float):
                # TODO(synk): adaptive_avg_pool2d (float down rates) is not needed
                # for this integer config.
                raise NotImplementedError("adaptive_avg_pool2d (float down rate)")
            bp['pool'] = add_const(_make_pool_matrix(curH, curW, dh, dw))
            curH, curW = curH // dh, curW // dw
        bp['emit'] = (last_at_h[out_h[i]] == i)
        bp['out_shape'] = (out_w, curH, curW)
        blk_plans.append(bp)

    out_shapes, out_specs, out_meta = [], [], []
    for bp in blk_plans:
        if bp['emit']:
            co, ho, wo = bp['out_shape']
            out_shapes.append(jax.ShapeDtypeStruct((B, co, ho * wo), jnp.float32))
            out_specs.append(pl.BlockSpec((1, co, ho * wo), lambda b: (b, 0, 0)))
            out_meta.append((co, ho, wo))

    n_in = len(inputs)

    # ---- the single fused kernel -------------------------------------------
    def run_conv(a, plan, refs):
        w_ref, b_ref = refs[plan['w']], refs[plan['b']]
        if plan['mode'] == 'roll':
            return _conv_roll(a, w_ref, b_ref, refs[plan['aux']], plan['shifts'])
        return _conv_shiftmat(a, w_ref, b_ref, refs[plan['aux']])

    def kernel(*refs):
        in_refs = refs[:n_in]
        out_refs = refs[n_in:]
        a = in_refs[0][0]                                   # (Cin, H*W) channel-major
        a = run_conv(a, stem_plan, in_refs)                 # 7x7 stem, stride 1, pad 3
        oi = 0
        for bp in blk_plans:
            # self.conv: GroupNorm -> SiLU -> Conv2d(in, bneck, 3, pad=1)
            h = _gn_silu(a, in_refs[bp['gn1_g']], in_refs[bp['gn1_b']], bp['g1'])
            h = run_conv(h, bp['conv1'], in_refs)
            # condition=False: no pa_proj.  Dropout(p=0) == identity.
            # self.conv2: GroupNorm -> SiLU -> Conv2d(bneck, out, 3, pad=1)
            h = _gn_silu(h, in_refs[bp['gn2_g']], in_refs[bp['gn2_b']], bp['g2'])
            h = run_conv(h, bp['conv2'], in_refs)
            # residual: out + skip_conn(x)
            if bp['skip'] is not None:                      # 1x1 skip conv
                sw, sb = bp['skip']
                skip = jnp.dot(in_refs[sw][...], a,
                               preferred_element_type=jnp.float32) + in_refs[sb][...]
            else:
                skip = a
            a = h + skip
            if bp['pool'] is not None:                      # fused avg_pool2d
                a = jnp.dot(a, in_refs[bp['pool']][...],
                            preferred_element_type=jnp.float32)
            if bp['emit']:
                out_refs[oi][0] = a                         # (Cout, H*W): NCHW slab
                oi += 1

    outs = pl.pallas_call(
        kernel,
        out_shape=tuple(out_shapes),
        grid=(B,),
        in_specs=in_specs,
        out_specs=tuple(out_specs),
        compiler_params=pltpu.CompilerParams(dimension_semantics=("parallel",)),
    )(*inputs)
    if not isinstance(outs, (tuple, list)):
        outs = (outs,)

    acts = {}
    for out, (co, ho, wo) in zip(outs, out_meta):
        acts[ho] = out.reshape(B, co, ho, wo)               # NCHW via free reshape
    return acts


# ----------------------------------------------------------------------------
# main
# ----------------------------------------------------------------------------

if __name__ == "__main__":
    args = Args()
    block_cfgs = parse_encoder_arch(args)

    key = jax.random.PRNGKey(0)
    kparam, kx = jax.random.split(key)
    params = init_encoder_params(kparam, args, block_cfgs)

    x = jax.random.normal(kx, (2, args.input_channels, 16, 16), jnp.float32)

    acts = encoder_forward(x, params, block_cfgs)
    for v in acts.values():
        jax.block_until_ready(v)

    # sanity: expected resolutions/widths from the config "16b1d2_2,8b1"
    assert acts[16].shape == (2, 8, 16, 16), acts[16].shape
    assert acts[8].shape == (2, 16, 8, 8), acts[8].shape
    assert all(bool(jnp.all(jnp.isfinite(v))) for v in acts.values())

    print("KERNEL_OK")
</pallas_src>

<mosaic_0001>
module attributes {stable_mosaic.version = 11 : i64} {
  func.func @kernel(%arg0: i32, %arg1: memref<1x4x256xf32, #tpu.memory_space<vmem>>, %arg2: memref<49x1x256xf32, #tpu.memory_space<vmem>>, %arg3: memref<49x8x4xf32, #tpu.memory_space<vmem>>, %arg4: memref<8x1xf32, #tpu.memory_space<vmem>>, %arg5: memref<8x1xf32, #tpu.memory_space<vmem>>, %arg6: memref<8x1xf32, #tpu.memory_space<vmem>>, %arg7: memref<9x1x256xf32, #tpu.memory_space<vmem>>, %arg8: memref<9x4x8xf32, #tpu.memory_space<vmem>>, %arg9: memref<4x1xf32, #tpu.memory_space<vmem>>, %arg10: memref<4x1xf32, #tpu.memory_space<vmem>>, %arg11: memref<4x1xf32, #tpu.memory_space<vmem>>, %arg12: memref<9x8x4xf32, #tpu.memory_space<vmem>>, %arg13: memref<8x1xf32, #tpu.memory_space<vmem>>, %arg14: memref<8x1xf32, #tpu.memory_space<vmem>>, %arg15: memref<8x1xf32, #tpu.memory_space<vmem>>, %arg16: memref<9x4x8xf32, #tpu.memory_space<vmem>>, %arg17: memref<4x1xf32, #tpu.memory_space<vmem>>, %arg18: memref<4x1xf32, #tpu.memory_space<vmem>>, %arg19: memref<4x1xf32, #tpu.memory_space<vmem>>, %arg20: memref<9x16x4xf32, #tpu.memory_space<vmem>>, %arg21: memref<16x1xf32, #tpu.memory_space<vmem>>, %arg22: memref<16x8xf32, #tpu.memory_space<vmem>>, %arg23: memref<16x1xf32, #tpu.memory_space<vmem>>, %arg24: memref<256x64xf32, #tpu.memory_space<vmem>>, %arg25: memref<16x1xf32, #tpu.memory_space<vmem>>, %arg26: memref<16x1xf32, #tpu.memory_space<vmem>>, %arg27: memref<9x64x64xf32, #tpu.memory_space<vmem>>, %arg28: memref<9x8x16xf32, #tpu.memory_space<vmem>>, %arg29: memref<8x1xf32, #tpu.memory_space<vmem>>, %arg30: memref<8x1xf32, #tpu.memory_space<vmem>>, %arg31: memref<8x1xf32, #tpu.memory_space<vmem>>, %arg32: memref<9x16x8xf32, #tpu.memory_space<vmem>>, %arg33: memref<16x1xf32, #tpu.memory_space<vmem>>, %arg34: memref<1x8x256xf32, #tpu.memory_space<vmem>>, %arg35: memref<1x16x64xf32, #tpu.memory_space<vmem>>) attributes {dimension_semantics = [#tpu.dimension_semantics<parallel>], iteration_bounds = array<i64: 2>, scalar_prefetch = 0 : i64, scratch_operands = 0 : i64, tpu.core_type = #tpu.core_type<tc>, window_params = [{transform_indices = @transform_0, window_bounds = array<i64: 1, 4, 256>}, {pipeline_mode = #tpu.pipeline_mode<synchronous>, transform_indices = @transform_1, window_bounds = array<i64: 49, 1, 256>}, {pipeline_mode = #tpu.pipeline_mode<synchronous>, transform_indices = @transform_2, window_bounds = array<i64: 49, 8, 4>}, {pipeline_mode = #tpu.pipeline_mode<synchronous>, transform_indices = @transform_3, window_bounds = array<i64: 8, 1>}, {pipeline_mode = #tpu.pipeline_mode<synchronous>, transform_indices = @transform_4, window_bounds = array<i64: 8, 1>}, {pipeline_mode = #tpu.pipeline_mode<synchronous>, transform_indices = @transform_5, window_bounds = array<i64: 8, 1>}, {pipeline_mode = #tpu.pipeline_mode<synchronous>, transform_indices = @transform_6, window_bounds = array<i64: 9, 1, 256>}, {pipeline_mode = #tpu.pipeline_mode<synchronous>, transform_indices = @transform_7, window_bounds = array<i64: 9, 4, 8>}, {pipeline_mode = #tpu.pipeline_mode<synchronous>, transform_indices = @transform_8, window_bounds = array<i64: 4, 1>}, {pipeline_mode = #tpu.pipeline_mode<synchronous>, transform_indices = @transform_9, window_bounds = array<i64: 4, 1>}, {pipeline_mode = #tpu.pipeline_mode<synchronous>, transform_indices = @transform_10, window_bounds = array<i64: 4, 1>}, {pipeline_mode = #tpu.pipeline_mode<synchronous>, transform_indices = @transform_11, window_bounds = array<i64: 9, 8, 4>}, {pipeline_mode = #tpu.pipeline_mode<synchronous>, transform_indices = @transform_12, window_bounds = array<i64: 8, 1>}, {pipeline_mode = #tpu.pipeline_mode<synchronous>, transform_indices = @transform_13, window_bounds = array<i64: 8, 1>}, {pipeline_mode = #tpu.pipeline_mode<synchronous>, transform_indices = @transform_14, window_bounds = array<i64: 8, 1>}, {pipeline_mode = #tpu.pipeline_mode<synchronous>, transform_indices = @transform_15, window_bounds = array<i64: 9, 4, 8>}, {pipeline_mode = #tpu.pipeline_mode<synchronous>, transform_indices = @transform_16, window_bounds = array<i64: 4, 1>}, {pipeline_mode = #tpu.pipeline_mode<synchronous>, transform_indices = @transform_17, window_bounds = array<i64: 4, 1>}, {pipeline_mode = #tpu.pipeline_mode<synchronous>, transform_indices = @transform_18, window_bounds = array<i64: 4, 1>}, {pipeline_mode = #tpu.pipeline_mode<synchronous>, transform_indices = @transform_19, window_bounds = array<i64: 9, 16, 4>}, {pipeline_mode = #tpu.pipeline_mode<synchronous>, transform_indices = @transform_20, window_bounds = array<i64: 16, 1>}, {pipeline_mode = #tpu.pipeline_mode<synchronous>, transform_indices = @transform_21, window_bounds = array<i64: 16, 8>}, {pipeline_mode = #tpu.pipeline_mode<synchronous>, transform_indices = @transform_22, window_bounds = array<i64: 16, 1>}, {pipeline_mode = #tpu.pipeline_mode<synchronous>, transform_indices = @transform_23, window_bounds = array<i64: 256, 64>}, {pipeline_mode = #tpu.pipeline_mode<synchronous>, transform_indices = @transform_24, window_bounds = array<i64: 16, 1>}, {pipeline_mode = #tpu.pipeline_mode<synchronous>, transform_indices = @transform_25, window_bounds = array<i64: 16, 1>}, {pipeline_mode = #tpu.pipeline_mode<synchronous>, transform_indices = @transform_26, window_bounds = array<i64: 9, 64, 64>}, {pipeline_mode = #tpu.pipeline_mode<synchronous>, transform_indices = @transform_27, window_bounds = array<i64: 9, 8, 16>}, {pipeline_mode = #tpu.pipeline_mode<synchronous>, transform_indices = @transform_28, window_bounds = array<i64: 8, 1>}, {pipeline_mode = #tpu.pipeline_mode<synchronous>, transform_indices = @transform_29, window_bounds = array<i64: 8, 1>}, {pipeline_mode = #tpu.pipeline_mode<synchronous>, transform_indices = @transform_30, window_bounds = array<i64: 8, 1>}, {pipeline_mode = #tpu.pipeline_mode<synchronous>, transform_indices = @transform_31, window_bounds = array<i64: 9, 16, 8>}, {pipeline_mode = #tpu.pipeline_mode<synchronous>, transform_indices = @transform_32, window_bounds = array<i64: 16, 1>}, {transform_indices = @transform_33, window_bounds = array<i64: 1, 8, 256>}, {transform_indices = @transform_34, window_bounds = array<i64: 1, 16, 64>}]} {
    %c0 = arith.constant 0 : index
    %c0_0 = arith.constant 0 : index
    %c0_1 = arith.constant 0 : index
    %0 = vector.load %arg1[%c0, %c0_0, %c0_1] : memref<1x4x256xf32, #tpu.memory_space<vmem>>, vector<1x4x256xf32>
    %1 = vector.shape_cast %0 : vector<1x4x256xf32> to vector<4x256xf32>
    %c51_i32 = arith.constant 51 : i32
    %2 = tpu.dynamic_rotate %1 by %c51_i32 dim 1 : vector<4x256xf32>, i32 -> vector<4x256xf32>
    %c0_2 = arith.constant 0 : index
    %c0_3 = arith.constant 0 : index
    %c0_4 = arith.constant 0 : index
    %3 = vector.load %arg2[%c0_2, %c0_3, %c0_4] : memref<49x1x256xf32, #tpu.memory_space<vmem>>, vector<1x1x256xf32>
    %4 = vector.shape_cast %3 : vector<1x1x256xf32> to vector<1x256xf32>
    %5 = vector.broadcast %4 : vector<1x256xf32> to vector<4x256xf32>
    %6 = arith.mulf %2, %5 : vector<4x256xf32>
    %c0_5 = arith.constant 0 : index
    %c0_6 = arith.constant 0 : index
    %c0_7 = arith.constant 0 : index
    %7 = vector.load %arg3[%c0_5, %c0_6, %c0_7] : memref<49x8x4xf32, #tpu.memory_space<vmem>>, vector<1x8x4xf32>
    %8 = vector.shape_cast %7 : vector<1x8x4xf32> to vector<8x4xf32>
    %cst = arith.constant dense<0.000000e+00> : vector<8x256xf32>
    %9 = tpu.matmul %8, %6, %cst {dimension_numbers = #tpu.dot_dimension_numbers<[1], [0], [0], [1], [0, 0, 1, 1], [], []>} : vector<8x4xf32>, vector<4x256xf32>, vector<8x256xf32> -> vector<8x256xf32>
    %c50_i32 = arith.constant 50 : i32
    %10 = tpu.dynamic_rotate %1 by %c50_i32 dim 1 : vector<4x256xf32>, i32 -> vector<4x256xf32>
    %c1 = arith.constant 1 : index
    %c0_8 = arith.constant 0 : index
    %c0_9 = arith.constant 0 : index
    %11 = vector.load %arg2[%c1, %c0_8, %c0_9] : memref<49x1x256xf32, #tpu.memory_space<vmem>>, vector<1x1x256xf32>
    %12 = vector.shape_cast %11 : vector<1x1x256xf32> to vector<1x256xf32>
    %13 = vector.broadcast %12 : vector<1x256xf32> to vector<4x256xf32>
    %14 = arith.mulf %10, %13 : vector<4x256xf32>
    %c1_10 = arith.constant 1 : index
    %c0_11 = arith.constant 0 : index
    %c0_12 = arith.constant 0 : index
    %15 = vector.load %arg3[%c1_10, %c0_11, %c0_12] : memref<49x8x4xf32, #tpu.memory_space<vmem>>, vector<1x8x4xf32>
    %16 = vector.shape_cast %15 : vector<1x8x4xf32> to vector<8x4xf32>
    %cst_13 = arith.constant dense<0.000000e+00> : vector<8x256xf32>
    %17 = tpu.matmul %16, %14, %cst_13 {dimension_numbers = #tpu.dot_dimension_numbers<[1], [0], [0], [1], [0, 0, 1, 1], [], []>} : vector<8x4xf32>, vector<4x256xf32>, vector<8x256xf32> -> vector<8x256xf32>
    %18 = arith.addf %9, %17 : vector<8x256xf32>
    %c49_i32 = arith.constant 49 : i32
    %19 = tpu.dynamic_rotate %1 by %c49_i32 dim 1 : vector<4x256xf32>, i32 -> vector<4x256xf32>
    %c2 = arith.constant 2 : index
    %c0_14 = arith.constant 0 : index
    %c0_15 = arith.constant 0 : index
    %20 = vector.load %arg2[%c2, %c0_14, %c0_15] : memref<49x1x256xf32, #tpu.memory_space<vmem>>, vector<1x1x256xf32>
    %21 = vector.shape_cast %20 : vector<1x1x256xf32> to vector<1x256xf32>
    %22 = vector.broadcast %21 : vector<1x256xf32> to vector<4x256xf32>
    %23 = arith.mulf %19, %22 : vector<4x256xf32>
    %c2_16 = arith.constant 2 : index
    %c0_17 = arith.constant 0 : index
    %c0_18 = arith.constant 0 : index
    %24 = vector.load %arg3[%c2_16, %c0_17, %c0_18] : memref<49x8x4xf32, #tpu.memory_space<vmem>>, vector<1x8x4xf32>
    %25 = vector.shape_cast %24 : vector<1x8x4xf32> to vector<8x4xf32>
    %cst_19 = arith.constant dense<0.000000e+00> : vector<8x256xf32>
    %26 = tpu.matmul %25, %23, %cst_19 {dimension_numbers = #tpu.dot_dimension_numbers<[1], [0], [0], [1], [0, 0, 1, 1], [], []>} : vector<8x4xf32>, vector<4x256xf32>, vector<8x256xf32> -> vector<8x256xf32>
    %27 = arith.addf %18, %26 : vector<8x256xf32>
    %c48_i32 = arith.constant 48 : i32
    %28 = tpu.dynamic_rotate %1 by %c48_i32 dim 1 : vector<4x256xf32>, i32 -> vector<4x256xf32>
    %c3 = arith.constant 3 : index
    %c0_20 = arith.constant 0 : index
    %c0_21 = arith.constant 0 : index
    %29 = vector.load %arg2[%c3, %c0_20, %c0_21] : memref<49x1x256xf32, #tpu.memory_space<vmem>>, vector<1x1x256xf32>
    %30 = vector.shape_cast %29 : vector<1x1x256xf32> to vector<1x256xf32>
    %31 = vector.broadcast %30 : vector<1x256xf32> to vector<4x256xf32>
    %32 = arith.mulf %28, %31 : vector<4x256xf32>
    %c3_22 = arith.constant 3 : index
    %c0_23 = arith.constant 0 : index
    %c0_24 = arith.constant 0 : index
    %33 = vector.load %arg3[%c3_22, %c0_23, %c0_24] : memref<49x8x4xf32, #tpu.memory_space<vmem>>, vector<1x8x4xf32>
    %34 = vector.shape_cast %33 : vector<1x8x4xf32> to vector<8x4xf32>
    %cst_25 = arith.constant dense<0.000000e+00> : vector<8x256xf32>
    %35 = tpu.matmul %34, %32, %cst_25 {dimension_numbers = #tpu.dot_dimension_numbers<[1], [0], [0], [1], [0, 0, 1, 1], [], []>} : vector<8x4xf32>, vector<4x256xf32>, vector<8x256xf32> -> vector<8x256xf32>
    %36 = arith.addf %27, %35 : vector<8x256xf32>
    %c47_i32 = arith.constant 47 : i32
    %37 = tpu.dynamic_rotate %1 by %c47_i32 dim 1 : vector<4x256xf32>, i32 -> vector<4x256xf32>
    %c4 = arith.constant 4 : index
    %c0_26 = arith.constant 0 : index
    %c0_27 = arith.constant 0 : index
    %38 = vector.load %arg2[%c4, %c0_26, %c0_27] : memref<49x1x256xf32, #tpu.memory_space<vmem>>, vector<1x1x256xf32>
    %39 = vector.shape_cast %38 : vector<1x1x256xf32> to vector<1x256xf32>
    %40 = vector.broadcast %39 : vector<1x256xf32> to vector<4x256xf32>
    %41 = arith.mulf %37, %40 : vector<4x256xf32>
    %c4_28 = arith.constant 4 : index
    %c0_29 = arith.constant 0 : index
    %c0_30 = arith.constant 0 : index
    %42 = vector.load %arg3[%c4_28, %c0_29, %c0_30] : memref<49x8x4xf32, #tpu.memory_space<vmem>>, vector<1x8x4xf32>
    %43 = vector.shape_cast %42 : vector<1x8x4xf32> to vector<8x4xf32>
    %cst_31 = arith.constant dense<0.000000e+00> : vector<8x256xf32>
    %44 = tpu.matmul %43, %41, %cst_31 {dimension_numbers = #tpu.dot_dimension_numbers<[1], [0], [0], [1], [0, 0, 1, 1], [], []>} : vector<8x4xf32>, vector<4x256xf32>, vector<8x256xf32> -> vector<8x256xf32>
    %45 = arith.addf %36, %44 : vector<8x256xf32>
    %c46_i32 = arith.constant 46 : i32
    %46 = tpu.dynamic_rotate %1 by %c46_i32 dim 1 : vector<4x256xf32>, i32 -> vector<4x256xf32>
    %c5 = arith.constant 5 : index
    %c0_32 = arith.constant 0 : index
    %c0_33 = arith.constant 0 : index
    %47 = vector.load %arg2[%c5, %c0_32, %c0_33] : memref<49x1x256xf32, #tpu.memory_space<vmem>>, vector<1x1x256xf32>
    %48 = vector.shape_cast %47 : vector<1x1x256xf32> to vector<1x256xf32>
    %49 = vector.broadcast %48 : vector<1x256xf32> to vector<4x256xf32>
    %50 = arith.mulf %46, %49 : vector<4x256xf32>
    %c5_34 = arith.constant 5 : index
    %c0_35 = arith.constant 0 : index
    %c0_36 = arith.constant 0 : index
    %51 = vector.load %arg3[%c5_34, %c0_35, %c0_36] : memref<49x8x4xf32, #tpu.memory_space<vmem>>, vector<1x8x4xf32>
    %52 = vector.shape_cast %51 : vector<1x8x4xf32> to vector<8x4xf32>
    %cst_37 = arith.constant dense<0.000000e+00> : vector<8x256xf32>
    %53 = tpu.matmul %52, %50, %cst_37 {dimension_numbers = #tpu.dot_dimension_numbers<[1], [0], [0], [1], [0, 0, 1, 1], [], []>} : vector<8x4xf32>, vector<4x256xf32>, vector<8x256xf32> -> vector<8x256xf32>
    %54 = arith.addf %45, %53 : vector<8x256xf32>
    %c45_i32 = arith.constant 45 : i32
    %55 = tpu.dynamic_rotate %1 by %c45_i32 dim 1 : vector<4x256xf32>, i32 -> vector<4x256xf32>
    %c6 = arith.constant 6 : index
    %c0_38 = arith.constant 0 : index
    %c0_39 = arith.constant 0 : index
    %56 = vector.load %arg2[%c6, %c0_38, %c0_39] : memref<49x1x256xf32, #tpu.memory_space<vmem>>, vector<1x1x256xf32>
    %57 = vector.shape_cast %56 : vector<1x1x256xf32> to vector<1x256xf32>
    %58 = vector.broadcast %57 : vector<1x256xf32> to vector<4x256xf32>
    %59 = arith.mulf %55, %58 : vector<4x256xf32>
    %c6_40 = arith.constant 6 : index
    %c0_41 = arith.constant 0 : index
    %c0_42 = arith.constant 0 : index
    %60 = vector.load %arg3[%c6_40, %c0_41, %c0_42] : memref<49x8x4xf32, #tpu.memory_space<vmem>>, vector<1x8x4xf32>
    %61 = vector.shape_cast %60 : vector<1x8x4xf32> to vector<8x4xf32>
    %cst_43 = arith.constant dense<0.000000e+00> : vector<8x256xf32>
    %62 = tpu.matmul %61, %59, %cst_43 {dimension_numbers = #tpu.dot_dimension_numbers<[1], [0], [0], [1], [0, 0, 1, 1], [], []>} : vector<8x4xf32>, vector<4x256xf32>, vector<8x256xf32> -> vector<8x256xf32>
    %63 = arith.addf %54, %62 : vector<8x256xf32>
    %c35_i32 = arith.constant 35 : i32
    %64 = tpu.dynamic_rotate %1 by %c35_i32 dim 1 : vector<4x256xf32>, i32 -> vector<4x256xf32>
    %c7 = arith.constant 7 : index
    %c0_44 = arith.constant 0 : index
    %c0_45 = arith.constant 0 : index
    %65 = vector.load %arg2[%c7, %c0_44, %c0_45] : memref<49x1x256xf32, #tpu.memory_space<vmem>>, vector<1x1x256xf32>
    %66 = vector.shape_cast %65 : vector<1x1x256xf32> to vector<1x256xf32>
    %67 = vector.broadcast %66 : vector<1x256xf32> to vector<4x256xf32>
    %68 = arith.mulf %64, %67 : vector<4x256xf32>
    %c7_46 = arith.constant 7 : index
    %c0_47 = arith.constant 0 : index
    %c0_48 = arith.constant 0 : index
    %69 = vector.load %arg3[%c7_46, %c0_47, %c0_48] : memref<49x8x4xf32, #tpu.memory_space<vmem>>, vector<1x8x4xf32>
    %70 = vector.shape_cast %69 : vector<1x8x4xf32> to vector<8x4xf32>
    %cst_49 = arith.constant dense<0.000000e+00> : vector<8x256xf32>
    %71 = tpu.matmul %70, %68, %cst_49 {dimension_numbers = #tpu.dot_dimension_numbers<[1], [0], [0], [1], [0, 0, 1, 1], [], []>} : vector<8x4xf32>, vector<4x256xf32>, vector<8x256xf32> -> vector<8x256xf32>
    %72 = arith.addf %63, %71 : vector<8x256xf32>
    %c34_i32 = arith.constant 34 : i32
    %73 = tpu.dynamic_rotate %1 by %c34_i32 dim 1 : vector<4x256xf32>, i32 -> vector<4x256xf32>
    %c8 = arith.constant 8 : index
    %c0_50 = arith.constant 0 : index
    %c0_51 = arith.constant 0 : index
    %74 = vector.load %arg2[%c8, %c0_50, %c0_51] : memref<49x1x256xf32, #tpu.memory_space<vmem>>, vector<1x1x256xf32>
    %75 = vector.shape_cast %74 : vector<1x1x256xf32> to vector<1x256xf32>
    %76 = vector.broadcast %75 : vector<1x256xf32> to vector<4x256xf32>
    %77 = arith.mulf %73, %76 : vector<4x256xf32>
    %c8_52 = arith.constant 8 : index
    %c0_53 = arith.constant 0 : index
    %c0_54 = arith.constant 0 : index
    %78 = vector.load %arg3[%c8_52, %c0_53, %c0_54] : memref<49x8x4xf32, #tpu.memory_space<vmem>>, vector<1x8x4xf32>
    %79 = vector.shape_cast %78 : vector<1x8x4xf32> to vector<8x4xf32>
    %cst_55 = arith.constant dense<0.000000e+00> : vector<8x256xf32>
    %80 = tpu.matmul %79, %77, %cst_55 {dimension_numbers = #tpu.dot_dimension_numbers<[1], [0], [0], [1], [0, 0, 1, 1], [], []>} : vector<8x4xf32>, vector<4x256xf32>, vector<8x256xf32> -> vector<8x256xf32>
    %81 = arith.addf %72, %80 : vector<8x256xf32>
    %c33_i32 = arith.constant 33 : i32
    %82 = tpu.dynamic_rotate %1 by %c33_i32 dim 1 : vector<4x256xf32>, i32 -> vector<4x256xf32>
    %c9 = arith.constant 9 : index
    %c0_56 = arith.constant 0 : index
    %c0_57 = arith.constant 0 : index
    %83 = vector.load %arg2[%c9, %c0_56, %c0_57] : memref<49x1x256xf32, #tpu.memory_space<vmem>>, vector<1x1x256xf32>
    %84 = vector.shape_cast %83 : vector<1x1x256xf32> to vector<1x256xf32>
    %85 = vector.broadcast %84 : vector<1x256xf32> to vector<4x256xf32>
    %86 = arith.mulf %82, %85 : vector<4x256xf32>
    %c9_58 = arith.constant 9 : index
    %c0_59 = arith.constant 0 : index
    %c0_60 = arith.constant 0 : index
    %87 = vector.load %arg3[%c9_58, %c0_59, %c0_60] : memref<49x8x4xf32, #tpu.memory_space<vmem>>, vector<1x8x4xf32>
    %88 = vector.shape_cast %87 : vector<1x8x4xf32> to vector<8x4xf32>
    %cst_61 = arith.constant dense<0.000000e+00> : vector<8x256xf32>
    %89 = tpu.matmul %88, %86, %cst_61 {dimension_numbers = #tpu.dot_dimension_numbers<[1], [0], [0], [1], [0, 0, 1, 1], [], []>} : vector<8x4xf32>, vector<4x256xf32>, vector<8x256xf32> -> vector<8x256xf32>
    %90 = arith.addf %81, %89 : vector<8x256xf32>
    %c32_i32 = arith.constant 32 : i32
    %91 = tpu.dynamic_rotate %1 by %c32_i32 dim 1 : vector<4x256xf32>, i32 -> vector<4x256xf32>
    %c10 = arith.constant 10 : index
    %c0_62 = arith.constant 0 : index
    %c0_63 = arith.constant 0 : index
    %92 = vector.load %arg2[%c10, %c0_62, %c0_63] : memref<49x1x256xf32, #tpu.memory_space<vmem>>, vector<1x1x256xf32>
    %93 = vector.shape_cast %92 : vector<1x1x256xf32> to vector<1x256xf32>
    %94 = vector.broadcast %93 : vector<1x256xf32> to vector<4x256xf32>
    %95 = arith.mulf %91, %94 : vector<4x256xf32>
    %c10_64 = arith.constant 10 : index
    %c0_65 = arith.constant 0 : index
    %c0_66 = arith.constant 0 : index
    %96 = vector.load %arg3[%c10_64, %c0_65, %c0_66] : memref<49x8x4xf32, #tpu.memory_space<vmem>>, vector<1x8x4xf32>
    %97 = vector.shape_cast %96 : vector<1x8x4xf32> to vector<8x4xf32>
    %cst_67 = arith.constant dense<0.000000e+00> : vector<8x256xf32>
    %98 = tpu.matmul %97, %95, %cst_67 {dimension_numbers = #tpu.dot_dimension_numbers<[1], [0], [0], [1], [0, 0, 1, 1], [], []>} : vector<8x4xf32>, vector<4x256xf32>, vector<8x256xf32> -> vector<8x256xf32>
    %99 = arith.addf %90, %98 : vector<8x256xf32>
    %c31_i32 = arith.constant 31 : i32
    %100 = tpu.dynamic_rotate %1 by %c31_i32 dim 1 : vector<4x256xf32>, i32 -> vector<4x256xf32>
    %c11 = arith.constant 11 : index
    %c0_68 = arith.constant 0 : index
    %c0_69 = arith.constant 0 : index
    %101 = vector.load %arg2[%c11, %c0_68, %c0_69] : memref<49x1x256xf32, #tpu.memory_space<vmem>>, vector<1x1x256xf32>
    %102 = vector.shape_cast %101 : vector<1x1x256xf32> to vector<1x256xf32>
    %103 = vector.broadcast %102 : vector<1x256xf32> to vector<4x256xf32>
    %104 = arith.mulf %100, %103 : vector<4x256xf32>
    %c11_70 = arith.constant 11 : index
    %c0_71 = arith.constant 0 : index
    %c0_72 = arith.constant 0 : index
    %105 = vector.load %arg3[%c11_70, %c0_71, %c0_72] : memref<49x8x4xf32, #tpu.memory_space<vmem>>, vector<1x8x4xf32>
    %106 = vector.shape_cast %105 : vector<1x8x4xf32> to vector<8x4xf32>
    %cst_73 = arith.constant dense<0.000000e+00> : vector<8x256xf32>
    %107 = tpu.matmul %106, %104, %cst_73 {dimension_numbers = #tpu.dot_dimension_numbers<[1], [0], [0], [1], [0, 0, 1, 1], [], []>} : vector<8x4xf32>, vector<4x256xf32>, vector<8x256xf32> -> vector<8x256xf32>
    %108 = arith.addf %99, %107 : vector<8x256xf32>
    %c30_i32 = arith.constant 30 : i32
    %109 = tpu.dynamic_rotate %1 by %c30_i32 dim 1 : vector<4x256xf32>, i32 -> vector<4x256xf32>
    %c12 = arith.constant 12 : index
    %c0_74 = arith.constant 0 : index
    %c0_75 = arith.constant 0 : index
    %110 = vector.load %arg2[%c12, %c0_74, %c0_75] : memref<49x1x256xf32, #tpu.memory_space<vmem>>, vector<1x1x256xf32>
    %111 = vector.shape_cast %110 : vector<1x1x256xf32> to vector<1x256xf32>
    %112 = vector.broadcast %111 : vector<1x256xf32> to vector<4x256xf32>
    %113 = arith.mulf %109, %112 : vector<4x256xf32>
    %c12_76 = arith.constant 12 : index
    %c0_77 = arith.constant 0 : index
    %c0_78 = arith.constant 0 : index
    %114 = vector.load %arg3[%c12_76, %c0_77, %c0_78] : memref<49x8x4xf32, #tpu.memory_space<vmem>>, vector<1x8x4xf32>
    %115 = vector.shape_cast %114 : vector<1x8x4xf32> to vector<8x4xf32>
    %cst_79 = arith.constant dense<0.000000e+00> : vector<8x256xf32>
    %116 = tpu.matmul %115, %113, %cst_79 {dimension_numbers = #tpu.dot_dimension_numbers<[1], [0], [0], [1], [0, 0, 1, 1], [], []>} : vector<8x4xf32>, vector<4x256xf32>, vector<8x256xf32> -> vector<8x256xf32>
    %117 = arith.addf %108, %116 : vector<8x256xf32>
    %c29_i32 = arith.constant 29 : i32
    %118 = tpu.dynamic_rotate %1 by %c29_i32 dim 1 : vector<4x256xf32>, i32 -> vector<4x256xf32>
    %c13 = arith.constant 13 : index
    %c0_80 = arith.constant 0 : index
    %c0_81 = arith.constant 0 : index
    %119 = vector.load %arg2[%c13, %c0_80, %c0_81] : memref<49x1x256xf32, #tpu.memory_space<vmem>>, vector<1x1x256xf32>
    %120 = vector.shape_cast %119 : vector<1x1x256xf32> to vector<1x256xf32>
    %121 = vector.broadcast %120 : vector<1x256xf32> to vector<4x256xf32>
    %122 = arith.mulf %118, %121 : vector<4x256xf32>
    %c13_82 = arith.constant 13 : index
    %c0_83 = arith.constant 0 : index
    %c0_84 = arith.constant 0 : index
    %123 = vector.load %arg3[%c13_82, %c0_83, %c0_84] : memref<49x8x4xf32, #tpu.memory_space<vmem>>, vector<1x8x4xf32>
    %124 = vector.shape_cast %123 : vector<1x8x4xf32> to vector<8x4xf32>
    %cst_85 = arith.constant dense<0.000000e+00> : vector<8x256xf32>
    %125 = tpu.matmul %124, %122, %cst_85 {dimension_numbers = #tpu.dot_dimension_numbers<[1], [0], [0], [1], [0, 0, 1, 1], [], []>} : vector<8x4xf32>, vector<4x256xf32>, vector<8x256xf32> -> vector<8x256xf32>
    %126 = arith.addf %117, %125 : vector<8x256xf32>
    %c19_i32 = arith.constant 19 : i32
    %127 = tpu.dynamic_rotate %1 by %c19_i32 dim 1 : vector<4x256xf32>, i32 -> vector<4x256xf32>
    %c14 = arith.constant 14 : index
    %c0_86 = arith.constant 0 : index
    %c0_87 = arith.constant 0 : index
    %128 = vector.load %arg2[%c14, %c0_86, %c0_87] : memref<49x1x256xf32, #tpu.memory_space<vmem>>, vector<1x1x256xf32>
    %129 = vector.shape_cast %128 : vector<1x1x256xf32> to vector<1x256xf32>
    %130 = vector.broadcast %129 : vector<1x256xf32> to vector<4x256xf32>
    %131 = arith.mulf %127, %130 : vector<4x256xf32>
    %c14_88 = arith.constant 14 : index
    %c0_89 = arith.constant 0 : index
    %c0_90 = arith.constant 0 : index
    %132 = vector.load %arg3[%c14_88, %c0_89, %c0_90] : memref<49x8x4xf32, #tpu.memory_space<vmem>>, vector<1x8x4xf32>
    %133 = vector.shape_cast %132 : vector<1x8x4xf32> to vector<8x4xf32>
    %cst_91 = arith.constant dense<0.000000e+00> : vector<8x256xf32>
    %134 = tpu.matmul %133, %131, %cst_91 {dimension_numbers = #tpu.dot_dimension_numbers<[1], [0], [0], [1], [0, 0, 1, 1], [], []>} : vector<8x4xf32>, vector<4x256xf32>, vector<8x256xf32> -> vector<8x256xf32>
    %135 = arith.addf %126, %134 : vector<8x256xf32>
    %c18_i32 = arith.constant 18 : i32
    %136 = tpu.dynamic_rotate %1 by %c18_i32 dim 1 : vector<4x256xf32>, i32 -> vector<4x256xf32>
    %c15 = arith.constant 15 : index
    %c0_92 = arith.constant 0 : index
    %c0_93 = arith.constant 0 : index
    %137 = vector.load %arg2[%c15, %c0_92, %c0_93] : memref<49x1x256xf32, #tpu.memory_space<vmem>>, vector<1x1x256xf32>
    %138 = vector.shape_cast %137 : vector<1x1x256xf32> to vector<1x256xf32>
    %139 = vector.broadcast %138 : vector<1x256xf32> to vector<4x256xf32>
    %140 = arith.mulf %136, %139 : vector<4x256xf32>
    %c15_94 = arith.constant 15 : index
    %c0_95 = arith.constant 0 : index
    %c0_96 = arith.constant 0 : index
    %141 = vector.load %arg3[%c15_94, %c0_95, %c0_96] : memref<49x8x4xf32, #tpu.memory_space<vmem>>, vector<1x8x4xf32>
    %142 = vector.shape_cast %141 : vector<1x8x4xf32> to vector<8x4xf32>
    %cst_97 = arith.constant dense<0.000000e+00> : vector<8x256xf32>
    %143 = tpu.matmul %142, %140, %cst_97 {dimension_numbers = #tpu.dot_dimension_numbers<[1], [0], [0], [1], [0, 0, 1, 1], [], []>} : vector<8x4xf32>, vector<4x256xf32>, vector<8x256xf32> -> vector<8x256xf32>
    %144 = arith.addf %135, %143 : vector<8x256xf32>
    %c17_i32 = arith.constant 17 : i32
    %145 = tpu.dynamic_rotate %1 by %c17_i32 dim 1 : vector<4x256xf32>, i32 -> vector<4x256xf32>
    %c16 = arith.constant 16 : index
    %c0_98 = arith.constant 0 : index
    %c0_99 = arith.constant 0 : index
    %146 = vector.load %arg2[%c16, %c0_98, %c0_99] : memref<49x1x256xf32, #tpu.memory_space<vmem>>, vector<1x1x256xf32>
    %147 = vector.shape_cast %146 : vector<1x1x256xf32> to vector<1x256xf32>
    %148 = vector.broadcast %147 : vector<1x256xf32> to vector<4x256xf32>
    %149 = arith.mulf %145, %148 : vector<4x256xf32>
    %c16_100 = arith.constant 16 : index
    %c0_101 = arith.constant 0 : index
    %c0_102 = arith.constant 0 : index
    %150 = vector.load %arg3[%c16_100, %c0_101, %c0_102] : memref<49x8x4xf32, #tpu.memory_space<vmem>>, vector<1x8x4xf32>
    %151 = vector.shape_cast %150 : vector<1x8x4xf32> to vector<8x4xf32>
    %cst_103 = arith.constant dense<0.000000e+00> : vector<8x256xf32>
    %152 = tpu.matmul %151, %149, %cst_103 {dimension_numbers = #tpu.dot_dimension_numbers<[1], [0], [0], [1], [0, 0, 1, 1], [], []>} : vector<8x4xf32>, vector<4x256xf32>, vector<8x256xf32> -> vector<8x256xf32>
    %153 = arith.addf %144, %152 : vector<8x256xf32>
    %c16_i32 = arith.constant 16 : i32
    %154 = tpu.dynamic_rotate %1 by %c16_i32 dim 1 : vector<4x256xf32>, i32 -> vector<4x256xf32>
    %c17 = arith.constant 17 : index
    %c0_104 = arith.constant 0 : index
    %c0_105 = arith.constant 0 : index
    %155 = vector.load %arg2[%c17, %c0_104, %c0_105] : memref<49x1x256xf32, #tpu.memory_space<vmem>>, vector<1x1x256xf32>
    %156 = vector.shape_cast %155 : vector<1x1x256xf32> to vector<1x256xf32>
    %157 = vector.broadcast %156 : vector<1x256xf32> to vector<4x256xf32>
    %158 = arith.mulf %154, %157 : vector<4x256xf32>
    %c17_106 = arith.constant 17 : index
    %c0_107 = arith.constant 0 : index
    %c0_108 = arith.constant 0 : index
    %159 = vector.load %arg3[%c17_106, %c0_107, %c0_108] : memref<49x8x4xf32, #tpu.memory_space<vmem>>, vector<1x8x4xf32>
    %160 = vector.shape_cast %159 : vector<1x8x4xf32> to vector<8x4xf32>
    %cst_109 = arith.constant dense<0.000000e+00> : vector<8x256xf32>
    %161 = tpu.matmul %160, %158, %cst_109 {dimension_numbers = #tpu.dot_dimension_numbers<[1], [0], [0], [1], [0, 0, 1, 1], [], []>} : vector<8x4xf32>, vector<4x256xf32>, vector<8x256xf32> -> vector<8x256xf32>
    %162 = arith.addf %153, %161 : vector<8x256xf32>
    %c15_i32 = arith.constant 15 : i32
    %163 = tpu.dynamic_rotate %1 by %c15_i32 dim 1 : vector<4x256xf32>, i32 -> vector<4x256xf32>
    %c18 = arith.constant 18 : index
    %c0_110 = arith.constant 0 : index
    %c0_111 = arith.constant 0 : index
    %164 = vector.load %arg2[%c18, %c0_110, %c0_111] : memref<49x1x256xf32, #tpu.memory_space<vmem>>, vector<1x1x256xf32>
    %165 = vector.shape_cast %164 : vector<1x1x256xf32> to vector<1x256xf32>
    %166 = vector.broadcast %165 : vector<1x256xf32> to vector<4x256xf32>
    %167 = arith.mulf %163, %166 : vector<4x256xf32>
    %c18_112 = arith.constant 18 : index
    %c0_113 = arith.constant 0 : index
    %c0_114 = arith.constant 0 : index
    %168 = vector.load %arg3[%c18_112, %c0_113, %c0_114] : memref<49x8x4xf32, #tpu.memory_space<vmem>>, vector<1x8x4xf32>
    %169 = vector.shape_cast %168 : vector<1x8x4xf32> to vector<8x4xf32>
    %cst_115 = arith.constant dense<0.000000e+00> : vector<8x256xf32>
    %170 = tpu.matmul %169, %167, %cst_115 {dimension_numbers = #tpu.dot_dimension_numbers<[1], [0], [0], [1], [0, 0, 1, 1], [], []>} : vector<8x4xf32>, vector<4x256xf32>, vector<8x256xf32> -> vector<8x256xf32>
    %171 = arith.addf %162, %170 : vector<8x256xf32>
    %c14_i32 = arith.constant 14 : i32
    %172 = tpu.dynamic_rotate %1 by %c14_i32 dim 1 : vector<4x256xf32>, i32 -> vector<4x256xf32>
    %c19 = arith.constant 19 : index
    %c0_116 = arith.constant 0 : index
    %c0_117 = arith.constant 0 : index
    %173 = vector.load %arg2[%c19, %c0_116, %c0_117] : memref<49x1x256xf32, #tpu.memory_space<vmem>>, vector<1x1x256xf32>
    %174 = vector.shape_cast %173 : vector<1x1x256xf32> to vector<1x256xf32>
    %175 = vector.broadcast %174 : vector<1x256xf32> to vector<4x256xf32>
    %176 = arith.mulf %172, %175 : vector<4x256xf32>
    %c19_118 = arith.constant 19 : index
    %c0_119 = arith.constant 0 : index
    %c0_120 = arith.constant 0 : index
    %177 = vector.load %arg3[%c19_118, %c0_119, %c0_120] : memref<49x8x4xf32, #tpu.memory_space<vmem>>, vector<1x8x4xf32>
    %178 = vector.shape_cast %177 : vector<1x8x4xf32> to vector<8x4xf32>
    %cst_121 = arith.constant dense<0.000000e+00> : vector<8x256xf32>
    %179 = tpu.matmul %178, %176, %cst_121 {dimension_numbers = #tpu.dot_dimension_numbers<[1], [0], [0], [1], [0, 0, 1, 1], [], []>} : vector<8x4xf32>, vector<4x256xf32>, vector<8x256xf32> -> vector<8x256xf32>
    %180 = arith.addf %171, %179 : vector<8x256xf32>
    %c13_i32 = arith.constant 13 : i32
    %181 = tpu.dynamic_rotate %1 by %c13_i32 dim 1 : vector<4x256xf32>, i32 -> vector<4x256xf32>
    %c20 = arith.constant 20 : index
    %c0_122 = arith.constant 0 : index
    %c0_123 = arith.constant 0 : index
    %182 = vector.load %arg2[%c20, %c0_122, %c0_123] : memref<49x1x256xf32, #tpu.memory_space<vmem>>, vector<1x1x256xf32>
    %183 = vector.shape_cast %182 : vector<1x1x256xf32> to vector<1x256xf32>
    %184 = vector.broadcast %183 : vector<1x256xf32> to vector<4x256xf32>
    %185 = arith.mulf %181, %184 : vector<4x256xf32>
    %c20_124 = arith.constant 20 : index
    %c0_125 = arith.constant 0 : index
    %c0_126 = arith.constant 0 : index
    %186 = vector.load %arg3[%c20_124, %c0_125, %c0_126] : memref<49x8x4xf32, #tpu.memory_space<vmem>>, vector<1x8x4xf32>
    %187 = vector.shape_cast %186 : vector<1x8x4xf32> to vector<8x4xf32>
    %cst_127 = arith.constant dense<0.000000e+00> : vector<8x256xf32>
    %188 = tpu.matmul %187, %185, %cst_127 {dimension_numbers = #tpu.dot_dimension_numbers<[1], [0], [0], [1], [0, 0, 1, 1], [], []>} : vector<8x4xf32>, vector<4x256xf32>, vector<8x256xf32> -> vector<8x256xf32>
    %189 = arith.addf %180, %188 : vector<8x256xf32>
    %c3_i32 = arith.constant 3 : i32
    %190 = tpu.dynamic_rotate %1 by %c3_i32 dim 1 : vector<4x256xf32>, i32 -> vector<4x256xf32>
    %c21 = arith.constant 21 : index
    %c0_128 = arith.constant 0 : index
    %c0_129 = arith.constant 0 : index
    %191 = vector.load %arg2[%c21, %c0_128, %c0_129] : memref<49x1x256xf32, #tpu.memory_space<vmem>>, vector<1x1x256xf32>
    %192 = vector.shape_cast %191 : vector<1x1x256xf32> to vector<1x256xf32>
    %193 = vector.broadcast %192 : vector<1x256xf32> to vector<4x256xf32>
    %194 = arith.mulf %190, %193 : vector<4x256xf32>
    %c21_130 = arith.constant 21 : index
    %c0_131 = arith.constant 0 : index
    %c0_132 = arith.constant 0 : index
    %195 = vector.load %arg3[%c21_130, %c0_131, %c0_132] : memref<49x8x4xf32, #tpu.memory_space<vmem>>, vector<1x8x4xf32>
    %196 = vector.shape_cast %195 : vector<1x8x4xf32> to vector<8x4xf32>
    %cst_133 = arith.constant dense<0.000000e+00> : vector<8x256xf32>
    %197 = tpu.matmul %196, %194, %cst_133 {dimension_numbers = #tpu.dot_dimension_numbers<[1], [0], [0], [1], [0, 0, 1, 1], [], []>} : vector<8x4xf32>, vector<4x256xf32>, vector<8x256xf32> -> vector<8x256xf32>
    %198 = arith.addf %189, %197 : vector<8x256xf32>
    %c2_i32 = arith.constant 2 : i32
    %199 = tpu.dynamic_rotate %1 by %c2_i32 dim 1 : vector<4x256xf32>, i32 -> vector<4x256xf32>
    %c22 = arith.constant 22 : index
    %c0_134 = arith.constant 0 : index
    %c0_135 = arith.constant 0 : index
    %200 = vector.load %arg2[%c22, %c0_134, %c0_135] : memref<49x1x256xf32, #tpu.memory_space<vmem>>, vector<1x1x256xf32>
    %201 = vector.shape_cast %200 : vector<1x1x256xf32> to vector<1x256xf32>
    %202 = vector.broadcast %201 : vector<1x256xf32> to vector<4x256xf32>
    %203 = arith.mulf %199, %202 : vector<4x256xf32>
    %c22_136 = arith.constant 22 : index
    %c0_137 = arith.constant 0 : index
    %c0_138 = arith.constant 0 : index
    %204 = vector.load %arg3[%c22_136, %c0_137, %c0_138] : memref<49x8x4xf32, #tpu.memory_space<vmem>>, vector<1x8x4xf32>
    %205 = vector.shape_cast %204 : vector<1x8x4xf32> to vector<8x4xf32>
    %cst_139 = arith.constant dense<0.000000e+00> : vector<8x256xf32>
    %206 = tpu.matmul %205, %203, %cst_139 {dimension_numbers = #tpu.dot_dimension_numbers<[1], [0], [0], [1], [0, 0, 1, 1], [], []>} : vector<8x4xf32>, vector<4x256xf32>, vector<8x256xf32> -> vector<8x256xf32>
    %207 = arith.addf %198, %206 : vector<8x256xf32>
    %c1_i32 = arith.constant 1 : i32
    %208 = tpu.dynamic_rotate %1 by %c1_i32 dim 1 : vector<4x256xf32>, i32 -> vector<4x256xf32>
    %c23 = arith.constant 23 : index
    %c0_140 = arith.constant 0 : index
    %c0_141 = arith.constant 0 : index
    %209 = vector.load %arg2[%c23, %c0_140, %c0_141] : memref<49x1x256xf32, #tpu.memory_space<vmem>>, vector<1x1x256xf32>
    %210 = vector.shape_cast %209 : vector<1x1x256xf32> to vector<1x256xf32>
    %211 = vector.broadcast %210 : vector<1x256xf32> to vector<4x256xf32>
    %212 = arith.mulf %208, %211 : vector<4x256xf32>
    %c23_142 = arith.constant 23 : index
    %c0_143 = arith.constant 0 : index
    %c0_144 = arith.constant 0 : index
    %213 = vector.load %arg3[%c23_142, %c0_143, %c0_144] : memref<49x8x4xf32, #tpu.memory_space<vmem>>, vector<1x8x4xf32>
    %214 = vector.shape_cast %213 : vector<1x8x4xf32> to vector<8x4xf32>
    %cst_145 = arith.constant dense<0.000000e+00> : vector<8x256xf32>
    %215 = tpu.matmul %214, %212, %cst_145 {dimension_numbers = #tpu.dot_dimension_numbers<[1], [0], [0], [1], [0, 0, 1, 1], [], []>} : vector<8x4xf32>, vector<4x256xf32>, vector<8x256xf32> -> vector<8x256xf32>
    %216 = arith.addf %207, %215 : vector<8x256xf32>
    %c24 = arith.constant 24 : index
    %c0_146 = arith.constant 0 : index
    %c0_147 = arith.constant 0 : index
    %217 = vector.load %arg2[%c24, %c0_146, %c0_147] : memref<49x1x256xf32, #tpu.memory_space<vmem>>, vector<1x1x256xf32>
    %218 = vector.shape_cast %217 : vector<1x1x256xf32> to vector<1x256xf32>
    %219 = vector.broadcast %218 : vector<1x256xf32> to vector<4x256xf32>
    %220 = arith.mulf %1, %219 : vector<4x256xf32>
    %c24_148 = arith.constant 24 : index
    %c0_149 = arith.constant 0 : index
    %c0_150 = arith.constant 0 : index
    %221 = vector.load %arg3[%c24_148, %c0_149, %c0_150] : memref<49x8x4xf32, #tpu.memory_space<vmem>>, vector<1x8x4xf32>
    %222 = vector.shape_cast %221 : vector<1x8x4xf32> to vector<8x4xf32>
    %cst_151 = arith.constant dense<0.000000e+00> : vector<8x256xf32>
    %223 = tpu.matmul %222, %220, %cst_151 {dimension_numbers = #tpu.dot_dimension_numbers<[1], [0], [0], [1], [0, 0, 1, 1], [], []>} : vector<8x4xf32>, vector<4x256xf32>, vector<8x256xf32> -> vector<8x256xf32>
    %224 = arith.addf %216, %223 : vector<8x256xf32>
    %c255_i32 = arith.constant 255 : i32
    %225 = tpu.dynamic_rotate %1 by %c255_i32 dim 1 : vector<4x256xf32>, i32 -> vector<4x256xf32>
    %c25 = arith.constant 25 : index
    %c0_152 = arith.constant 0 : index
    %c0_153 = arith.constant 0 : index
    %226 = vector.load %arg2[%c25, %c0_152, %c0_153] : memref<49x1x256xf32, #tpu.memory_space<vmem>>, vector<1x1x256xf32>
    %227 = vector.shape_cast %226 : vector<1x1x256xf32> to vector<1x256xf32>
    %228 = vector.broadcast %227 : vector<1x256xf32> to vector<4x256xf32>
    %229 = arith.mulf %225, %228 : vector<4x256xf32>
    %c25_154 = arith.constant 25 : index
    %c0_155 = arith.constant 0 : index
    %c0_156 = arith.constant 0 : index
    %230 = vector.load %arg3[%c25_154, %c0_155, %c0_156] : memref<49x8x4xf32, #tpu.memory_space<vmem>>, vector<1x8x4xf32>
    %231 = vector.shape_cast %230 : vector<1x8x4xf32> to vector<8x4xf32>
    %cst_157 = arith.constant dense<0.000000e+00> : vector<8x256xf32>
    %232 = tpu.matmul %231, %229, %cst_157 {dimension_numbers = #tpu.dot_dimension_numbers<[1], [0], [0], [1], [0, 0, 1, 1], [], []>} : vector<8x4xf32>, vector<4x256xf32>, vector<8x256xf32> -> vector<8x256xf32>
    %233 = arith.addf %224, %232 : vector<8x256xf32>
    %c254_i32 = arith.constant 254 : i32
    %234 = tpu.dynamic_rotate %1 by %c254_i32 dim 1 : vector<4x256xf32>, i32 -> vector<4x256xf32>
    %c26 = arith.constant 26 : index
    %c0_158 = arith.constant 0 : index
    %c0_159 = arith.constant 0 : index
    %235 = vector.load %arg2[%c26, %c0_158, %c0_159] : memref<49x1x256xf32, #tpu.memory_space<vmem>>, vector<1x1x256xf32>
    %236 = vector.shape_cast %235 : vector<1x1x256xf32> to vector<1x256xf32>
    %237 = vector.broadcast %236 : vector<1x256xf32> to vector<4x256xf32>
    %238 = arith.mulf %234, %237 : vector<4x256xf32>
    %c26_160 = arith.constant 26 : index
    %c0_161 = arith.constant 0 : index
    %c0_162 = arith.constant 0 : index
    %239 = vector.load %arg3[%c26_160, %c0_161, %c0_162] : memref<49x8x4xf32, #tpu.memory_space<vmem>>, vector<1x8x4xf32>
    %240 = vector.shape_cast %239 : vector<1x8x4xf32> to vector<8x4xf32>
    %cst_163 = arith.constant dense<0.000000e+00> : vector<8x256xf32>
    %241 = tpu.matmul %240, %238, %cst_163 {dimension_numbers = #tpu.dot_dimension_numbers<[1], [0], [0], [1], [0, 0, 1, 1], [], []>} : vector<8x4xf32>, vector<4x256xf32>, vector<8x256xf32> -> vector<8x256xf32>
    %242 = arith.addf %233, %241 : vector<8x256xf32>
    %c253_i32 = arith.constant 253 : i32
    %243 = tpu.dynamic_rotate %1 by %c253_i32 dim 1 : vector<4x256xf32>, i32 -> vector<4x256xf32>
    %c27 = arith.constant 27 : index
    %c0_164 = arith.constant 0 : index
    %c0_165 = arith.constant 0 : index
    %244 = vector.load %arg2[%c27, %c0_164, %c0_165] : memref<49x1x256xf32, #tpu.memory_space<vmem>>, vector<1x1x256xf32>
    %245 = vector.shape_cast %244 : vector<1x1x256xf32> to vector<1x256xf32>
    %246 = vector.broadcast %245 : vector<1x256xf32> to vector<4x256xf32>
    %247 = arith.mulf %243, %246 : vector<4x256xf32>
    %c27_166 = arith.constant 27 : index
    %c0_167 = arith.constant 0 : index
    %c0_168 = arith.constant 0 : index
    %248 = vector.load %arg3[%c27_166, %c0_167, %c0_168] : memref<49x8x4xf32, #tpu.memory_space<vmem>>, vector<1x8x4xf32>
    %249 = vector.shape_cast %248 : vector<1x8x4xf32> to vector<8x4xf32>
    %cst_169 = arith.constant dense<0.000000e+00> : vector<8x256xf32>
    %250 = tpu.matmul %249, %247, %cst_169 {dimension_numbers = #tpu.dot_dimension_numbers<[1], [0], [0], [1], [0, 0, 1, 1], [], []>} : vector<8x4xf32>, vector<4x256xf32>, vector<8x256xf32> -> vector<8x256xf32>
    %251 = arith.addf %242, %250 : vector<8x256xf32>
    %c243_i32 = arith.constant 243 : i32
    %252 = tpu.dynamic_rotate %1 by %c243_i32 dim 1 : vector<4x256xf32>, i32 -> vector<4x256xf32>
    %c28 = arith.constant 28 : index
    %c0_170 = arith.constant 0 : index
    %c0_171 = arith.constant 0 : index
    %253 = vector.load %arg2[%c28, %c0_170, %c0_171] : memref<49x1x256xf32, #tpu.memory_space<vmem>>, vector<1x1x256xf32>
    %254 = vector.shape_cast %253 : vector<1x1x256xf32> to vector<1x256xf32>
    %255 = vector.broadcast %254 : vector<1x256xf32> to vector<4x256xf32>
    %256 = arith.mulf %252, %255 : vector<4x256xf32>
    %c28_172 = arith.constant 28 : index
    %c0_173 = arith.constant 0 : index
    %c0_174 = arith.constant 0 : index
    %257 = vector.load %arg3[%c28_172, %c0_173, %c0_174] : memref<49x8x4xf32, #tpu.memory_space<vmem>>, vector<1x8x4xf32>
    %258 = vector.shape_cast %257 : vector<1x8x4xf32> to vector<8x4xf32>
    %cst_175 = arith.constant dense<0.000000e+00> : vector<8x256xf32>
    %259 = tpu.matmul %258, %256, %cst_175 {dimension_numbers = #tpu.dot_dimension_numbers<[1], [0], [0], [1], [0, 0, 1, 1], [], []>} : vector<8x4xf32>, vector<4x256xf32>, vector<8x256xf32> -> vector<8x256xf32>
    %260 = arith.addf %251, %259 : vector<8x256xf32>
    %c242_i32 = arith.constant 242 : i32
    %261 = tpu.dynamic_rotate %1 by %c242_i32 dim 1 : vector<4x256xf32>, i32 -> vector<4x256xf32>
    %c29 = arith.constant 29 : index
    %c0_176 = arith.constant 0 : index
    %c0_177 = arith.constant 0 : index
    %262 = vector.load %arg2[%c29, %c0_176, %c0_177] : memref<49x1x256xf32, #tpu.memory_space<vmem>>, vector<1x1x256xf32>
    %263 = vector.shape_cast %262 : vector<1x1x256xf32> to vector<1x256xf32>
    %264 = vector.broadcast %263 : vector<1x256xf32> to vector<4x256xf32>
    %265 = arith.mulf %261, %264 : vector<4x256xf32>
    %c29_178 = arith.constant 29 : index
    %c0_179 = arith.constant 0 : index
    %c0_180 = arith.constant 0 : index
    %266 = vector.load %arg3[%c29_178, %c0_179, %c0_180] : memref<49x8x4xf32, #tpu.memory_space<vmem>>, vector<1x8x4xf32>
    %267 = vector.shape_cast %266 : vector<1x8x4xf32> to vector<8x4xf32>
    %cst_181 = arith.constant dense<0.000000e+00> : vector<8x256xf32>
    %268 = tpu.matmul %267, %265, %cst_181 {dimension_numbers = #tpu.dot_dimension_numbers<[1], [0], [0], [1], [0, 0, 1, 1], [], []>} : vector<8x4xf32>, vector<4x256xf32>, vector<8x256xf32> -> vector<8x256xf32>
    %269 = arith.addf %260, %268 : vector<8x256xf32>
    %c241_i32 = arith.constant 241 : i32
    %270 = tpu.dynamic_rotate %1 by %c241_i32 dim 1 : vector<4x256xf32>, i32 -> vector<4x256xf32>
    %c30 = arith.constant 30 : index
    %c0_182 = arith.constant 0 : index
    %c0_183 = arith.constant 0 : index
    %271 = vector.load %arg2[%c30, %c0_182, %c0_183] : memref<49x1x256xf32, #tpu.memory_space<vmem>>, vector<1x1x256xf32>
    %272 = vector.shape_cast %271 : vector<1x1x256xf32> to vector<1x256xf32>
    %273 = vector.broadcast %272 : vector<1x256xf32> to vector<4x256xf32>
    %274 = arith.mulf %270, %273 : vector<4x256xf32>
    %c30_184 = arith.constant 30 : index
    %c0_185 = arith.constant 0 : index
    %c0_186 = arith.constant 0 : index
    %275 = vector.load %arg3[%c30_184, %c0_185, %c0_186] : memref<49x8x4xf32, #tpu.memory_space<vmem>>, vector<1x8x4xf32>
    %276 = vector.shape_cast %275 : vector<1x8x4xf32> to vector<8x4xf32>
    %cst_187 = arith.constant dense<0.000000e+00> : vector<8x256xf32>
    %277 = tpu.matmul %276, %274, %cst_187 {dimension_numbers = #tpu.dot_dimension_numbers<[1], [0], [0], [1], [0, 0, 1, 1], [], []>} : vector<8x4xf32>, vector<4x256xf32>, vector<8x256xf32> -> vector<8x256xf32>
    %278 = arith.addf %269, %277 : vector<8x256xf32>
    %c240_i32 = arith.constant 240 : i32
    %279 = tpu.dynamic_rotate %1 by %c240_i32 dim 1 : vector<4x256xf32>, i32 -> vector<4x256xf32>
    %c31 = arith.constant 31 : index
    %c0_188 = arith.constant 0 : index
    %c0_189 = arith.constant 0 : index
    %280 = vector.load %arg2[%c31, %c0_188, %c0_189] : memref<49x1x256xf32, #tpu.memory_space<vmem>>, vector<1x1x256xf32>
    %281 = vector.shape_cast %280 : vector<1x1x256xf32> to vector<1x256xf32>
    %282 = vector.broadcast %281 : vector<1x256xf32> to vector<4x256xf32>
    %283 = arith.mulf %279, %282 : vector<4x256xf32>
    %c31_190 = arith.constant 31 : index
    %c0_191 = arith.constant 0 : index
    %c0_192 = arith.constant 0 : index
    %284 = vector.load %arg3[%c31_190, %c0_191, %c0_192] : memref<49x8x4xf32, #tpu.memory_space<vmem>>, vector<1x8x4xf32>
    %285 = vector.shape_cast %284 : vector<1x8x4xf32> to vector<8x4xf32>
    %cst_193 = arith.constant dense<0.000000e+00> : vector<8x256xf32>
    %286 = tpu.matmul %285, %283, %cst_193 {dimension_numbers = #tpu.dot_dimension_numbers<[1], [0], [0], [1], [0, 0, 1, 1], [], []>} : vector<8x4xf32>, vector<4x256xf32>, vector<8x256xf32> -> vector<8x256xf32>
    %287 = arith.addf %278, %286 : vector<8x256xf32>
    %c239_i32 = arith.constant 239 : i32
    %288 = tpu.dynamic_rotate %1 by %c239_i32 dim 1 : vector<4x256xf32>, i32 -> vector<4x256xf32>
    %c32 = arith.constant 32 : index
    %c0_194 = arith.constant 0 : index
    %c0_195 = arith.constant 0 : index
    %289 = vector.load %arg2[%c32, %c0_194, %c0_195] : memref<49x1x256xf32, #tpu.memory_space<vmem>>, vector<1x1x256xf32>
    %290 = vector.shape_cast %289 : vector<1x1x256xf32> to vector<1x256xf32>
    %291 = vector.broadcast %290 : vector<1x256xf32> to vector<4x256xf32>
    %292 = arith.mulf %288, %291 : vector<4x256xf32>
    %c32_196 = arith.constant 32 : index
    %c0_197 = arith.constant 0 : index
    %c0_198 = arith.constant 0 : index
    %293 = vector.load %arg3[%c32_196, %c0_197, %c0_198] : memref<49x8x4xf32, #tpu.memory_space<vmem>>, vector<1x8x4xf32>
    %294 = vector.shape_cast %293 : vector<1x8x4xf32> to vector<8x4xf32>
    %cst_199 = arith.constant dense<0.000000e+00> : vector<8x256xf32>
    %295 = tpu.matmul %294, %292, %cst_199 {dimension_numbers = #tpu.dot_dimension_numbers<[1], [0], [0], [1], [0, 0, 1, 1], [], []>} : vector<8x4xf32>, vector<4x256xf32>, vector<8x256xf32> -> vector<8x256xf32>
    %296 = arith.addf %287, %295 : vector<8x256xf32>
    %c238_i32 = arith.constant 238 : i32
    %297 = tpu.dynamic_rotate %1 by %c238_i32 dim 1 : vector<4x256xf32>, i32 -> vector<4x256xf32>
    %c33 = arith.constant 33 : index
    %c0_200 = arith.constant 0 : index
    %c0_201 = arith.constant 0 : index
    %298 = vector.load %arg2[%c33, %c0_200, %c0_201] : memref<49x1x256xf32, #tpu.memory_space<vmem>>, vector<1x1x256xf32>
    %299 = vector.shape_cast %298 : vector<1x1x256xf32> to vector<1x256xf32>
    %300 = vector.broadcast %299 : vector<1x256xf32> to vector<4x256xf32>
    %301 = arith.mulf %297, %300 : vector<4x256xf32>
    %c33_202 = arith.constant 33 : index
    %c0_203 = arith.constant 0 : index
    %c0_204 = arith.constant 0 : index
    %302 = vector.load %arg3[%c33_202, %c0_203, %c0_204] : memref<49x8x4xf32, #tpu.memory_space<vmem>>, vector<1x8x4xf32>
    %303 = vector.shape_cast %302 : vector<1x8x4xf32> to vector<8x4xf32>
    %cst_205 = arith.constant dense<0.000000e+00> : vector<8x256xf32>
    %304 = tpu.matmul %303, %301, %cst_205 {dimension_numbers = #tpu.dot_dimension_numbers<[1], [0], [0], [1], [0, 0, 1, 1], [], []>} : vector<8x4xf32>, vector<4x256xf32>, vector<8x256xf32> -> vector<8x256xf32>
    %305 = arith.addf %296, %304 : vector<8x256xf32>
    %c237_i32 = arith.constant 237 : i32
    %306 = tpu.dynamic_rotate %1 by %c237_i32 dim 1 : vector<4x256xf32>, i32 -> vector<4x256xf32>
    %c34 = arith.constant 34 : index
    %c0_206 = arith.constant 0 : index
    %c0_207 = arith.constant 0 : index
    %307 = vector.load %arg2[%c34, %c0_206, %c0_207] : memref<49x1x256xf32, #tpu.memory_space<vmem>>, vector<1x1x256xf32>
    %308 = vector.shape_cast %307 : vector<1x1x256xf32> to vector<1x256xf32>
    %309 = vector.broadcast %308 : vector<1x256xf32> to vector<4x256xf32>
    %310 = arith.mulf %306, %309 : vector<4x256xf32>
    %c34_208 = arith.constant 34 : index
    %c0_209 = arith.constant 0 : index
    %c0_210 = arith.constant 0 : index
    %311 = vector.load %arg3[%c34_208, %c0_209, %c0_210] : memref<49x8x4xf32, #tpu.memory_space<vmem>>, vector<1x8x4xf32>
    %312 = vector.shape_cast %311 : vector<1x8x4xf32> to vector<8x4xf32>
    %cst_211 = arith.constant dense<0.000000e+00> : vector<8x256xf32>
    %313 = tpu.matmul %312, %310, %cst_211 {dimension_numbers = #tpu.dot_dimension_numbers<[1], [0], [0], [1], [0, 0, 1, 1], [], []>} : vector<8x4xf32>, vector<4x256xf32>, vector<8x256xf32> -> vector<8x256xf32>
    %314 = arith.addf %305, %313 : vector<8x256xf32>
    %c227_i32 = arith.constant 227 : i32
    %315 = tpu.dynamic_rotate %1 by %c227_i32 dim 1 : vector<4x256xf32>, i32 -> vector<4x256xf32>
    %c35 = arith.constant 35 : index
    %c0_212 = arith.constant 0 : index
    %c0_213 = arith.constant 0 : index
    %316 = vector.load %arg2[%c35, %c0_212, %c0_213] : memref<49x1x256xf32, #tpu.memory_space<vmem>>, vector<1x1x256xf32>
    %317 = vector.shape_cast %316 : vector<1x1x256xf32> to vector<1x256xf32>
    %318 = vector.broadcast %317 : vector<1x256xf32> to vector<4x256xf32>
    %319 = arith.mulf %315, %318 : vector<4x256xf32>
    %c35_214 = arith.constant 35 : index
    %c0_215 = arith.constant 0 : index
    %c0_216 = arith.constant 0 : index
    %320 = vector.load %arg3[%c35_214, %c0_215, %c0_216] : memref<49x8x4xf32, #tpu.memory_space<vmem>>, vector<1x8x4xf32>
    %321 = vector.shape_cast %320 : vector<1x8x4xf32> to vector<8x4xf32>
    %cst_217 = arith.constant dense<0.000000e+00> : vector<8x256xf32>
    %322 = tpu.matmul %321, %319, %cst_217 {dimension_numbers = #tpu.dot_dimension_numbers<[1], [0], [0], [1], [0, 0, 1, 1], [], []>} : vector<8x4xf32>, vector<4x256xf32>, vector<8x256xf32> -> vector<8x256xf32>
    %323 = arith.addf %314, %322 : vector<8x256xf32>
    %c226_i32 = arith.constant 226 : i32
    %324 = tpu.dynamic_rotate %1 by %c226_i32 dim 1 : vector<4x256xf32>, i32 -> vector<4x256xf32>
    %c36 = arith.constant 36 : index
    %c0_218 = arith.constant 0 : index
    %c0_219 = arith.constant 0 : index
    %325 = vector.load %arg2[%c36, %c0_218, %c0_219] : memref<49x1x256xf32, #tpu.memory_space<vmem>>, vector<1x1x256xf32>
    %326 = vector.shape_cast %325 : vector<1x1x256xf32> to vector<1x256xf32>
    %327 = vector.broadcast %326 : vector<1x256xf32> to vector<4x256xf32>
    %328 = arith.mulf %324, %327 : vector<4x256xf32>
    %c36_220 = arith.constant 36 : index
    %c0_221 = arith.constant 0 : index
    %c0_222 = arith.constant 0 : index
    %329 = vector.load %arg3[%c36_220, %c0_221, %c0_222] : memref<49x8x4xf32, #tpu.memory_space<vmem>>, vector<1x8x4xf32>
    %330 = vector.shape_cast %329 : vector<1x8x4xf32> to vector<8x4xf32>
    %cst_223 = arith.constant dense<0.000000e+00> : vector<8x256xf32>
    %331 = tpu.matmul %330, %328, %cst_223 {dimension_numbers = #tpu.dot_dimension_numbers<[1], [0], [0], [1], [0, 0, 1, 1], [], []>} : vector<8x4xf32>, vector<4x256xf32>, vector<8x256xf32> -> vector<8x256xf32>
    %332 = arith.addf %323, %331 : vector<8x256xf32>
    %c225_i32 = arith.constant 225 : i32
    %333 = tpu.dynamic_rotate %1 by %c225_i32 dim 1 : vector<4x256xf32>, i32 -> vector<4x256xf32>
    %c37 = arith.constant 37 : index
    %c0_224 = arith.constant 0 : index
    %c0_225 = arith.constant 0 : index
    %334 = vector.load %arg2[%c37, %c0_224, %c0_225] : memref<49x1x256xf32, #tpu.memory_space<vmem>>, vector<1x1x256xf32>
    %335 = vector.shape_cast %334 : vector<1x1x256xf32> to vector<1x256xf32>
    %336 = vector.broadcast %335 : vector<1x256xf32> to vector<4x256xf32>
    %337 = arith.mulf %333, %336 : vector<4x256xf32>
    %c37_226 = arith.constant 37 : index
    %c0_227 = arith.constant 0 : index
    %c0_228 = arith.constant 0 : index
    %338 = vector.load %arg3[%c37_226, %c0_227, %c0_228] : memref<49x8x4xf32, #tpu.memory_space<vmem>>, vector<1x8x4xf32>
    %339 = vector.shape_cast %338 : vector<1x8x4xf32> to vector<8x4xf32>
    %cst_229 = arith.constant dense<0.000000e+00> : vector<8x256xf32>
    %340 = tpu.matmul %339, %337, %cst_229 {dimension_numbers = #tpu.dot_dimension_numbers<[1], [0], [0], [1], [0, 0, 1, 1], [], []>} : vector<8x4xf32>, vector<4x256xf32>, vector<8x256xf32> -> vector<8x256xf32>
    %341 = arith.addf %332, %340 : vector<8x256xf32>
    %c224_i32 = arith.constant 224 : i32
    %342 = tpu.dynamic_rotate %1 by %c224_i32 dim 1 : vector<4x256xf32>, i32 -> vector<4x256xf32>
    %c38 = arith.constant 38 : index
    %c0_230 = arith.constant 0 : index
    %c0_231 = arith.constant 0 : index
    %343 = vector.load %arg2[%c38, %c0_230, %c0_231] : memref<49x1x256xf32, #tpu.memory_space<vmem>>, vector<1x1x256xf32>
    %344 = vector.shape_cast %343 : vector<1x1x256xf32> to vector<1x256xf32>
    %345 = vector.broadcast %344 : vector<1x256xf32> to vector<4x256xf32>
    %346 = arith.mulf %342, %345 : vector<4x256xf32>
    %c38_232 = arith.constant 38 : index
    %c0_233 = arith.constant 0 : index
    %c0_234 = arith.constant 0 : index
    %347 = vector.load %arg3[%c38_232, %c0_233, %c0_234] : memref<49x8x4xf32, #tpu.memory_space<vmem>>, vector<1x8x4xf32>
    %348 = vector.shape_cast %347 : vector<1x8x4xf32> to vector<8x4xf32>
    %cst_235 = arith.constant dense<0.000000e+00> : vector<8x256xf32>
    %349 = tpu.matmul %348, %346, %cst_235 {dimension_numbers = #tpu.dot_dimension_numbers<[1], [0], [0], [1], [0, 0, 1, 1], [], []>} : vector<8x4xf32>, vector<4x256xf32>, vector<8x256xf32> -> vector<8x256xf32>
    %350 = arith.addf %341, %349 : vector<8x256xf32>
    %c223_i32 = arith.constant 223 : i32
    %351 = tpu.dynamic_rotate %1 by %c223_i32 dim 1 : vector<4x256xf32>, i32 -> vector<4x256xf32>
    %c39 = arith.constant 39 : index
    %c0_236 = arith.constant 0 : index
    %c0_237 = arith.constant 0 : index
    %352 = vector.load %arg2[%c39, %c0_236, %c0_237] : memref<49x1x256xf32, #tpu.memory_space<vmem>>, vector<1x1x256xf32>
    %353 = vector.shape_cast %352 : vector<1x1x256xf32> to vector<1x256xf32>
    %354 = vector.broadcast %353 : vector<1x256xf32> to vector<4x256xf32>
    %355 = arith.mulf %351, %354 : vector<4x256xf32>
    %c39_238 = arith.constant 39 : index
    %c0_239 = arith.constant 0 : index
    %c0_240 = arith.constant 0 : index
    %356 = vector.load %arg3[%c39_238, %c0_239, %c0_240] : memref<49x8x4xf32, #tpu.memory_space<vmem>>, vector<1x8x4xf32>
    %357 = vector.shape_cast %356 : vector<1x8x4xf32> to vector<8x4xf32>
    %cst_241 = arith.constant dense<0.000000e+00> : vector<8x256xf32>
    %358 = tpu.matmul %357, %355, %cst_241 {dimension_numbers = #tpu.dot_dimension_numbers<[1], [0], [0], [1], [0, 0, 1, 1], [], []>} : vector<8x4xf32>, vector<4x256xf32>, vector<8x256xf32> -> vector<8x256xf32>
    %359 = arith.addf %350, %358 : vector<8x256xf32>
    %c222_i32 = arith.constant 222 : i32
    %360 = tpu.dynamic_rotate %1 by %c222_i32 dim 1 : vector<4x256xf32>, i32 -> vector<4x256xf32>
    %c40 = arith.constant 40 : index
    %c0_242 = arith.constant 0 : index
    %c0_243 = arith.constant 0 : index
    %361 = vector.load %arg2[%c40, %c0_242, %c0_243] : memref<49x1x256xf32, #tpu.memory_space<vmem>>, vector<1x1x256xf32>
    %362 = vector.shape_cast %361 : vector<1x1x256xf32> to vector<1x256xf32>
    %363 = vector.broadcast %362 : vector<1x256xf32> to vector<4x256xf32>
    %364 = arith.mulf %360, %363 : vector<4x256xf32>
    %c40_244 = arith.constant 40 : index
    %c0_245 = arith.constant 0 : index
    %c0_246 = arith.constant 0 : index
    %365 = vector.load %arg3[%c40_244, %c0_245, %c0_246] : memref<49x8x4xf32, #tpu.memory_space<vmem>>, vector<1x8x4xf32>
    %366 = vector.shape_cast %365 : vector<1x8x4xf32> to vector<8x4xf32>
    %cst_247 = arith.constant dense<0.000000e+00> : vector<8x256xf32>
    %367 = tpu.matmul %366, %364, %cst_247 {dimension_numbers = #tpu.dot_dimension_numbers<[1], [0], [0], [1], [0, 0, 1, 1], [], []>} : vector<8x4xf32>, vector<4x256xf32>, vector<8x256xf32> -> vector<8x256xf32>
    %368 = arith.addf %359, %367 : vector<8x256xf32>
    %c221_i32 = arith.constant 221 : i32
    %369 = tpu.dynamic_rotate %1 by %c221_i32 dim 1 : vector<4x256xf32>, i32 -> vector<4x256xf32>
    %c41 = arith.constant 41 : index
    %c0_248 = arith.constant 0 : index
    %c0_249 = arith.constant 0 : index
    %370 = vector.load %arg2[%c41, %c0_248, %c0_249] : memref<49x1x256xf32, #tpu.memory_space<vmem>>, vector<1x1x256xf32>
    %371 = vector.shape_cast %370 : vector<1x1x256xf32> to vector<1x256xf32>
    %372 = vector.broadcast %371 : vector<1x256xf32> to vector<4x256xf32>
    %373 = arith.mulf %369, %372 : vector<4x256xf32>
    %c41_250 = arith.constant 41 : index
    %c0_251 = arith.constant 0 : index
    %c0_252 = arith.constant 0 : index
    %374 = vector.load %arg3[%c41_250, %c0_251, %c0_252] : memref<49x8x4xf32, #tpu.memory_space<vmem>>, vector<1x8x4xf32>
    %375 = vector.shape_cast %374 : vector<1x8x4xf32> to vector<8x4xf32>
    %cst_253 = arith.constant dense<0.000000e+00> : vector<8x256xf32>
    %376 = tpu.matmul %375, %373, %cst_253 {dimension_numbers = #tpu.dot_dimension_numbers<[1], [0], [0], [1], [0, 0, 1, 1], [], []>} : vector<8x4xf32>, vector<4x256xf32>, vector<8x256xf32> -> vector<8x256xf32>
    %377 = arith.addf %368, %376 : vector<8x256xf32>
    %c211_i32 = arith.constant 211 : i32
    %378 = tpu.dynamic_rotate %1 by %c211_i32 dim 1 : vector<4x256xf32>, i32 -> vector<4x256xf32>
    %c42 = arith.constant 42 : index
    %c0_254 = arith.constant 0 : index
    %c0_255 = arith.constant 0 : index
    %379 = vector.load %arg2[%c42, %c0_254, %c0_255] : memref<49x1x256xf32, #tpu.memory_space<vmem>>, vector<1x1x256xf32>
    %380 = vector.shape_cast %379 : vector<1x1x256xf32> to vector<1x256xf32>
    %381 = vector.broadcast %380 : vector<1x256xf32> to vector<4x256xf32>
    %382 = arith.mulf %378, %381 : vector<4x256xf32>
    %c42_256 = arith.constant 42 : index
    %c0_257 = arith.constant 0 : index
    %c0_258 = arith.constant 0 : index
    %383 = vector.load %arg3[%c42_256, %c0_257, %c0_258] : memref<49x8x4xf32, #tpu.memory_space<vmem>>, vector<1x8x4xf32>
    %384 = vector.shape_cast %383 : vector<1x8x4xf32> to vector<8x4xf32>
    %cst_259 = arith.constant dense<0.000000e+00> : vector<8x256xf32>
    %385 = tpu.matmul %384, %382, %cst_259 {dimension_numbers = #tpu.dot_dimension_numbers<[1], [0], [0], [1], [0, 0, 1, 1], [], []>} : vector<8x4xf32>, vector<4x256xf32>, vector<8x256xf32> -> vector<8x256xf32>
    %386 = arith.addf %377, %385 : vector<8x256xf32>
    %c210_i32 = arith.constant 210 : i32
    %387 = tpu.dynamic_rotate %1 by %c210_i32 dim 1 : vector<4x256xf32>, i32 -> vector<4x256xf32>
    %c43 = arith.constant 43 : index
    %c0_260 = arith.constant 0 : index
    %c0_261 = arith.constant 0 : index
    %388 = vector.load %arg2[%c43, %c0_260, %c0_261] : memref<49x1x256xf32, #tpu.memory_space<vmem>>, vector<1x1x256xf32>
    %389 = vector.shape_cast %388 : vector<1x1x256xf32> to vector<1x256xf32>
    %390 = vector.broadcast %389 : vector<1x256xf32> to vector<4x256xf32>
    %391 = arith.mulf %387, %390 : vector<4x256xf32>
    %c43_262 = arith.constant 43 : index
    %c0_263 = arith.constant 0 : index
    %c0_264 = arith.constant 0 : index
    %392 = vector.load %arg3[%c43_262, %c0_263, %c0_264] : memref<49x8x4xf32, #tpu.memory_space<vmem>>, vector<1x8x4xf32>
    %393 = vector.shape_cast %392 : vector<1x8x4xf32> to vector<8x4xf32>
    %cst_265 = arith.constant dense<0.000000e+00> : vector<8x256xf32>
    %394 = tpu.matmul %393, %391, %cst_265 {dimension_numbers = #tpu.dot_dimension_numbers<[1], [0], [0], [1], [0, 0, 1, 1], [], []>} : vector<8x4xf32>, vector<4x256xf32>, vector<8x256xf32> -> vector<8x256xf32>
    %395 = arith.addf %386, %394 : vector<8x256xf32>
    %c209_i32 = arith.constant 209 : i32
    %396 = tpu.dynamic_rotate %1 by %c209_i32 dim 1 : vector<4x256xf32>, i32 -> vector<4x256xf32>
    %c44 = arith.constant 44 : index
    %c0_266 = arith.constant 0 : index
    %c0_267 = arith.constant 0 : index
    %397 = vector.load %arg2[%c44, %c0_266, %c0_267] : memref<49x1x256xf32, #tpu.memory_space<vmem>>, vector<1x1x256xf32>
    %398 = vector.shape_cast %397 : vector<1x1x256xf32> to vector<1x256xf32>
    %399 = vector.broadcast %398 : vector<1x256xf32> to vector<4x256xf32>
    %400 = arith.mulf %396, %399 : vector<4x256xf32>
    %c44_268 = arith.constant 44 : index
    %c0_269 = arith.constant 0 : index
    %c0_270 = arith.constant 0 : index
    %401 = vector.load %arg3[%c44_268, %c0_269, %c0_270] : memref<49x8x4xf32, #tpu.memory_space<vmem>>, vector<1x8x4xf32>
    %402 = vector.shape_cast %401 : vector<1x8x4xf32> to vector<8x4xf32>
    %cst_271 = arith.constant dense<0.000000e+00> : vector<8x256xf32>
    %403 = tpu.matmul %402, %400, %cst_271 {dimension_numbers = #tpu.dot_dimension_numbers<[1], [0], [0], [1], [0, 0, 1, 1], [], []>} : vector<8x4xf32>, vector<4x256xf32>, vector<8x256xf32> -> vector<8x256xf32>
    %404 = arith.addf %395, %403 : vector<8x256xf32>
    %c208_i32 = arith.constant 208 : i32
    %405 = tpu.dynamic_rotate %1 by %c208_i32 dim 1 : vector<4x256xf32>, i32 -> vector<4x256xf32>
    %c45 = arith.constant 45 : index
    %c0_272 = arith.constant 0 : index
    %c0_273 = arith.constant 0 : index
    %406 = vector.load %arg2[%c45, %c0_272, %c0_273] : memref<49x1x256xf32, #tpu.memory_space<vmem>>, vector<1x1x256xf32>
    %407 = vector.shape_cast %406 : vector<1x1x256xf32> to vector<1x256xf32>
    %408 = vector.broadcast %407 : vector<1x256xf32> to vector<4x256xf32>
    %409 = arith.mulf %405, %408 : vector<4x256xf32>
    %c45_274 = arith.constant 45 : index
    %c0_275 = arith.constant 0 : index
    %c0_276 = arith.constant 0 : index
    %410 = vector.load %arg3[%c45_274, %c0_275, %c0_276] : memref<49x8x4xf32, #tpu.memory_space<vmem>>, vector<1x8x4xf32>
    %411 = vector.shape_cast %410 : vector<1x8x4xf32> to vector<8x4xf32>
    %cst_277 = arith.constant dense<0.000000e+00> : vector<8x256xf32>
    %412 = tpu.matmul %411, %409, %cst_277 {dimension_numbers = #tpu.dot_dimension_numbers<[1], [0], [0], [1], [0, 0, 1, 1], [], []>} : vector<8x4xf32>, vector<4x256xf32>, vector<8x256xf32> -> vector<8x256xf32>
    %413 = arith.addf %404, %412 : vector<8x256xf32>
    %c207_i32 = arith.constant 207 : i32
    %414 = tpu.dynamic_rotate %1 by %c207_i32 dim 1 : vector<4x256xf32>, i32 -> vector<4x256xf32>
    %c46 = arith.constant 46 : index
    %c0_278 = arith.constant 0 : index
    %c0_279 = arith.constant 0 : index
    %415 = vector.load %arg2[%c46, %c0_278, %c0_279] : memref<49x1x256xf32, #tpu.memory_space<vmem>>, vector<1x1x256xf32>
    %416 = vector.shape_cast %415 : vector<1x1x256xf32> to vector<1x256xf32>
    %417 = vector.broadcast %416 : vector<1x256xf32> to vector<4x256xf32>
    %418 = arith.mulf %414, %417 : vector<4x256xf32>
    %c46_280 = arith.constant 46 : index
    %c0_281 = arith.constant 0 : index
    %c0_282 = arith.constant 0 : index
    %419 = vector.load %arg3[%c46_280, %c0_281, %c0_282] : memref<49x8x4xf32, #tpu.memory_space<vmem>>, vector<1x8x4xf32>
    %420 = vector.shape_cast %419 : vector<1x8x4xf32> to vector<8x4xf32>
    %cst_283 = arith.constant dense<0.000000e+00> : vector<8x256xf32>
    %421 = tpu.matmul %420, %418, %cst_283 {dimension_numbers = #tpu.dot_dimension_numbers<[1], [0], [0], [1], [0, 0, 1, 1], [], []>} : vector<8x4xf32>, vector<4x256xf32>, vector<8x256xf32> -> vector<8x256xf32>
    %422 = arith.addf %413, %421 : vector<8x256xf32>
    %c206_i32 = arith.constant 206 : i32
    %423 = tpu.dynamic_rotate %1 by %c206_i32 dim 1 : vector<4x256xf32>, i32 -> vector<4x256xf32>
    %c47 = arith.constant 47 : index
    %c0_284 = arith.constant 0 : index
    %c0_285 = arith.constant 0 : index
    %424 = vector.load %arg2[%c47, %c0_284, %c0_285] : memref<49x1x256xf32, #tpu.memory_space<vmem>>, vector<1x1x256xf32>
    %425 = vector.shape_cast %424 : vector<1x1x256xf32> to vector<1x256xf32>
    %426 = vector.broadcast %425 : vector<1x256xf32> to vector<4x256xf32>
    %427 = arith.mulf %423, %426 : vector<4x256xf32>
    %c47_286 = arith.constant 47 : index
    %c0_287 = arith.constant 0 : index
    %c0_288 = arith.constant 0 : index
    %428 = vector.load %arg3[%c47_286, %c0_287, %c0_288] : memref<49x8x4xf32, #tpu.memory_space<vmem>>, vector<1x8x4xf32>
    %429 = vector.shape_cast %428 : vector<1x8x4xf32> to vector<8x4xf32>
    %cst_289 = arith.constant dense<0.000000e+00> : vector<8x256xf32>
    %430 = tpu.matmul %429, %427, %cst_289 {dimension_numbers = #tpu.dot_dimension_numbers<[1], [0], [0], [1], [0, 0, 1, 1], [], []>} : vector<8x4xf32>, vector<4x256xf32>, vector<8x256xf32> -> vector<8x256xf32>
    %431 = arith.addf %422, %430 : vector<8x256xf32>
    %c205_i32 = arith.constant 205 : i32
    %432 = tpu.dynamic_rotate %1 by %c205_i32 dim 1 : vector<4x256xf32>, i32 -> vector<4x256xf32>
    %c48 = arith.constant 48 : index
    %c0_290 = arith.constant 0 : index
    %c0_291 = arith.constant 0 : index
    %433 = vector.load %arg2[%c48, %c0_290, %c0_291] : memref<49x1x256xf32, #tpu.memory_space<vmem>>, vector<1x1x256xf32>
    %434 = vector.shape_cast %433 : vector<1x1x256xf32> to vector<1x256xf32>
    %435 = vector.broadcast %434 : vector<1x256xf32> to vector<4x256xf32>
    %436 = arith.mulf %432, %435 : vector<4x256xf32>
    %c48_292 = arith.constant 48 : index
    %c0_293 = arith.constant 0 : index
    %c0_294 = arith.constant 0 : index
    %437 = vector.load %arg3[%c48_292, %c0_293, %c0_294] : memref<49x8x4xf32, #tpu.memory_space<vmem>>, vector<1x8x4xf32>
    %438 = vector.shape_cast %437 : vector<1x8x4xf32> to vector<8x4xf32>
    %cst_295 = arith.constant dense<0.000000e+00> : vector<8x256xf32>
    %439 = tpu.matmul %438, %436, %cst_295 {dimension_numbers = #tpu.dot_dimension_numbers<[1], [0], [0], [1], [0, 0, 1, 1], [], []>} : vector<8x4xf32>, vector<4x256xf32>, vector<8x256xf32> -> vector<8x256xf32>
    %440 = arith.addf %431, %439 : vector<8x256xf32>
    %c0_296 = arith.constant 0 : index
    %c0_297 = arith.constant 0 : index
    %441 = vector.load %arg4[%c0_296, %c0_297] : memref<8x1xf32, #tpu.memory_space<vmem>>, vector<8x1xf32>
    %442 = vector.broadcast %441 : vector<8x1xf32> to vector<8x256xf32>
    %443 = arith.addf %440, %442 : vector<8x256xf32>
    %444 = tpu.iota {dimensions = array<i32: 0>} : vector<8x1xi32>
    %cst_298 = arith.constant 0.000000e+00 : f32
    %445 = vector.broadcast %cst_298 : f32 to vector<8x1xf32>
    %cst_299 = arith.constant 0.000000e+00 : f32
    %446 = vector.broadcast %cst_299 : f32 to vector<8x1xf32>
    %c0_i32 = arith.constant 0 : i32
    %447 = vector.broadcast %c0_i32 : i32 to vector<8x1xi32>
    %448 = arith.cmpi sge, %444, %447 : vector<8x1xi32>
    %c4_i32 = arith.constant 4 : i32
    %449 = vector.broadcast %c4_i32 : i32 to vector<8x1xi32>
    %450 = arith.cmpi slt, %444, %449 : vector<8x1xi32>
    %451 = arith.andi %448, %450 : vector<8x1xi1>
    %cst_300 = arith.constant 1.000000e+00 : f32
    %cst_301 = arith.constant 0.000000e+00 : f32
    %452 = vector.broadcast %cst_300 : f32 to vector<8x1xf32>
    %453 = vector.broadcast %cst_301 : f32 to vector<8x1xf32>
    %454 = arith.select %451, %452, %453 : vector<8x1xi1>, vector<8x1xf32>
    %455 = vector.broadcast %454 : vector<8x1xf32> to vector<8x256xf32>
    %456 = arith.mulf %443, %455 : vector<8x256xf32>
    %457 = vector.shape_cast %456 : vector<8x256xf32> to vector<1x8x256xf32>
    %cst_302 = arith.constant dense<0.000000e+00> : vector<1xf32>
    %458 = vector.multi_reduction <add>, %457, %cst_302 [1, 2] : vector<1x8x256xf32> to vector<1xf32>
    %459 = vector.shape_cast %458 : vector<1xf32> to vector<1x1x1xf32>
    %460 = vector.extract %459[0, 0, 0] : f32 from vector<1x1x1xf32>
    %cst_303 = arith.constant 9.765625E-4 : f32
    %461 = arith.mulf %460, %cst_303 : f32
    %462 = vector.broadcast %461 : f32 to vector<8x256xf32>
    %463 = arith.subf %443, %462 : vector<8x256xf32>
    %464 = arith.mulf %463, %463 : vector<8x256xf32>
    %465 = vector.broadcast %454 : vector<8x1xf32> to vector<8x256xf32>
    %466 = arith.mulf %464, %465 : vector<8x256xf32>
    %467 = vector.shape_cast %466 : vector<8x256xf32> to vector<1x8x256xf32>
    %cst_304 = arith.constant dense<0.000000e+00> : vector<1xf32>
    %468 = vector.multi_reduction <add>, %467, %cst_304 [1, 2] : vector<1x8x256xf32> to vector<1xf32>
    %469 = vector.shape_cast %468 : vector<1xf32> to vector<1x1x1xf32>
    %470 = vector.extract %469[0, 0, 0] : f32 from vector<1x1x1xf32>
    %cst_305 = arith.constant 9.765625E-4 : f32
    %471 = arith.mulf %470, %cst_305 : f32
    %472 = vector.broadcast %461 : f32 to vector<8x1xf32>
    %473 = arith.mulf %472, %454 : vector<8x1xf32>
    %474 = arith.addf %445, %473 : vector<8x1xf32>
    %cst_306 = arith.constant 9.99999974E-6 : f32
    %475 = arith.addf %471, %cst_306 : f32
    %476 = math.rsqrt %475 : f32
    %477 = vector.broadcast %476 : f32 to vector<8x1xf32>
    %478 = arith.mulf %477, %454 : vector<8x1xf32>
    %479 = arith.addf %446, %478 : vector<8x1xf32>
    %c4_i32_307 = arith.constant 4 : i32
    %480 = vector.broadcast %c4_i32_307 : i32 to vector<8x1xi32>
    %481 = arith.cmpi sge, %444, %480 : vector<8x1xi32>
    %c8_i32 = arith.constant 8 : i32
    %482 = vector.broadcast %c8_i32 : i32 to vector<8x1xi32>
    %483 = arith.cmpi slt, %444, %482 : vector<8x1xi32>
    %484 = arith.andi %481, %483 : vector<8x1xi1>
    %cst_308 = arith.constant 1.000000e+00 : f32
    %cst_309 = arith.constant 0.000000e+00 : f32
    %485 = vector.broadcast %cst_308 : f32 to vector<8x1xf32>
    %486 = vector.broadcast %cst_309 : f32 to vector<8x1xf32>
    %487 = arith.select %484, %485, %486 : vector<8x1xi1>, vector<8x1xf32>
    %488 = vector.broadcast %487 : vector<8x1xf32> to vector<8x256xf32>
    %489 = arith.mulf %443, %488 : vector<8x256xf32>
    %490 = vector.shape_cast %489 : vector<8x256xf32> to vector<1x8x256xf32>
    %cst_310 = arith.constant dense<0.000000e+00> : vector<1xf32>
    %491 = vector.multi_reduction <add>, %490, %cst_310 [1, 2] : vector<1x8x256xf32> to vector<1xf32>
    %492 = vector.shape_cast %491 : vector<1xf32> to vector<1x1x1xf32>
    %493 = vector.extract %492[0, 0, 0] : f32 from vector<1x1x1xf32>
    %cst_311 = arith.constant 9.765625E-4 : f32
    %494 = arith.mulf %493, %cst_311 : f32
    %495 = vector.broadcast %494 : f32 to vector<8x256xf32>
    %496 = arith.subf %443, %495 : vector<8x256xf32>
    %497 = arith.mulf %496, %496 : vector<8x256xf32>
    %498 = vector.broadcast %487 : vector<8x1xf32> to vector<8x256xf32>
    %499 = arith.mulf %497, %498 : vector<8x256xf32>
    %500 = vector.shape_cast %499 : vector<8x256xf32> to vector<1x8x256xf32>
    %cst_312 = arith.constant dense<0.000000e+00> : vector<1xf32>
    %501 = vector.multi_reduction <add>, %500, %cst_312 [1, 2] : vector<1x8x256xf32> to vector<1xf32>
    %502 = vector.shape_cast %501 : vector<1xf32> to vector<1x1x1xf32>
    %503 = vector.extract %502[0, 0, 0] : f32 from vector<1x1x1xf32>
    %cst_313 = arith.constant 9.765625E-4 : f32
    %504 = arith.mulf %503, %cst_313 : f32
    %505 = vector.broadcast %494 : f32 to vector<8x1xf32>
    %506 = arith.mulf %505, %487 : vector<8x1xf32>
    %507 = arith.addf %474, %506 : vector<8x1xf32>
    %cst_314 = arith.constant 9.99999974E-6 : f32
    %508 = arith.addf %504, %cst_314 : f32
    %509 = math.rsqrt %508 : f32
    %510 = vector.broadcast %509 : f32 to vector<8x1xf32>
    %511 = arith.mulf %510, %487 : vector<8x1xf32>
    %512 = arith.addf %479, %511 : vector<8x1xf32>
    %513 = vector.broadcast %507 : vector<8x1xf32> to vector<8x256xf32>
    %514 = arith.subf %443, %513 : vector<8x256xf32>
    %c0_315 = arith.constant 0 : index
    %c0_316 = arith.constant 0 : index
    %515 = vector.load %arg5[%c0_315, %c0_316] : memref<8x1xf32, #tpu.memory_space<vmem>>, vector<8x1xf32>
    %516 = arith.mulf %512, %515 : vector<8x1xf32>
    %517 = vector.broadcast %516 : vector<8x1xf32> to vector<8x256xf32>
    %518 = arith.mulf %514, %517 : vector<8x256xf32>
    %c0_317 = arith.constant 0 : index
    %c0_318 = arith.constant 0 : index
    %519 = vector.load %arg6[%c0_317, %c0_318] : memref<8x1xf32, #tpu.memory_space<vmem>>, vector<8x1xf32>
    %520 = vector.broadcast %519 : vector<8x1xf32> to vector<8x256xf32>
    %521 = arith.addf %518, %520 : vector<8x256xf32>
    %522 = arith.negf %521 : vector<8x256xf32>
    %523 = math.exp %522 : vector<8x256xf32>
    %cst_319 = arith.constant 1.000000e+00 : f32
    %524 = vector.broadcast %cst_319 : f32 to vector<8x256xf32>
    %525 = arith.addf %524, %523 : vector<8x256xf32>
    %526 = arith.divf %524, %525 : vector<8x256xf32>
    %527 = arith.mulf %521, %526 : vector<8x256xf32>
    %c17_i32_320 = arith.constant 17 : i32
    %528 = tpu.dynamic_rotate %527 by %c17_i32_320 dim 1 : vector<8x256xf32>, i32 -> vector<8x256xf32>
    %c0_321 = arith.constant 0 : index
    %c0_322 = arith.constant 0 : index
    %c0_323 = arith.constant 0 : index
    %529 = vector.load %arg7[%c0_321, %c0_322, %c0_323] : memref<9x1x256xf32, #tpu.memory_space<vmem>>, vector<1x1x256xf32>
    %530 = vector.shape_cast %529 : vector<1x1x256xf32> to vector<1x256xf32>
    %531 = vector.broadcast %530 : vector<1x256xf32> to vector<8x256xf32>
    %532 = arith.mulf %528, %531 : vector<8x256xf32>
    %c0_324 = arith.constant 0 : index
    %c0_325 = arith.constant 0 : index
    %c0_326 = arith.constant 0 : index
    %533 = vector.load %arg8[%c0_324, %c0_325, %c0_326] : memref<9x4x8xf32, #tpu.memory_space<vmem>>, vector<1x4x8xf32>
    %534 = vector.shape_cast %533 : vector<1x4x8xf32> to vector<4x8xf32>
    %cst_327 = arith.constant dense<0.000000e+00> : vector<4x256xf32>
    %535 = tpu.matmul %534, %532, %cst_327 {dimension_numbers = #tpu.dot_dimension_numbers<[1], [0], [0], [1], [0, 0, 1, 1], [], []>} : vector<4x8xf32>, vector<8x256xf32>, vector<4x256xf32> -> vector<4x256xf32>
    %c16_i32_328 = arith.constant 16 : i32
    %536 = tpu.dynamic_rotate %527 by %c16_i32_328 dim 1 : vector<8x256xf32>, i32 -> vector<8x256xf32>
    %c1_329 = arith.constant 1 : index
    %c0_330 = arith.constant 0 : index
    %c0_331 = arith.constant 0 : index
    %537 = vector.load %arg7[%c1_329, %c0_330, %c0_331] : memref<9x1x256xf32, #tpu.memory_space<vmem>>, vector<1x1x256xf32>
    %538 = vector.shape_cast %537 : vector<1x1x256xf32> to vector<1x256xf32>
    %539 = vector.broadcast %538 : vector<1x256xf32> to vector<8x256xf32>
    %540 = arith.mulf %536, %539 : vector<8x256xf32>
    %c1_332 = arith.constant 1 : index
    %c0_333 = arith.constant 0 : index
    %c0_334 = arith.constant 0 : index
    %541 = vector.load %arg8[%c1_332, %c0_333, %c0_334] : memref<9x4x8xf32, #tpu.memory_space<vmem>>, vector<1x4x8xf32>
    %542 = vector.shape_cast %541 : vector<1x4x8xf32> to vector<4x8xf32>
    %cst_335 = arith.constant dense<0.000000e+00> : vector<4x256xf32>
    %543 = tpu.matmul %542, %540, %cst_335 {dimension_numbers = #tpu.dot_dimension_numbers<[1], [0], [0], [1], [0, 0, 1, 1], [], []>} : vector<4x8xf32>, vector<8x256xf32>, vector<4x256xf32> -> vector<4x256xf32>
    %544 = arith.addf %535, %543 : vector<4x256xf32>
    %c15_i32_336 = arith.constant 15 : i32
    %545 = tpu.dynamic_rotate %527 by %c15_i32_336 dim 1 : vector<8x256xf32>, i32 -> vector<8x256xf32>
    %c2_337 = arith.constant 2 : index
    %c0_338 = arith.constant 0 : index
    %c0_339 = arith.constant 0 : index
    %546 = vector.load %arg7[%c2_337, %c0_338, %c0_339] : memref<9x1x256xf32, #tpu.memory_space<vmem>>, vector<1x1x256xf32>
    %547 = vector.shape_cast %546 : vector<1x1x256xf32> to vector<1x256xf32>
    %548 = vector.broadcast %547 : vector<1x256xf32> to vector<8x256xf32>
    %549 = arith.mulf %545, %548 : vector<8x256xf32>
    %c2_340 = arith.constant 2 : index
    %c0_341 = arith.constant 0 : index
    %c0_342 = arith.constant 0 : index
    %550 = vector.load %arg8[%c2_340, %c0_341, %c0_342] : memref<9x4x8xf32, #tpu.memory_space<vmem>>, vector<1x4x8xf32>
    %551 = vector.shape_cast %550 : vector<1x4x8xf32> to vector<4x8xf32>
    %cst_343 = arith.constant dense<0.000000e+00> : vector<4x256xf32>
    %552 = tpu.matmul %551, %549, %cst_343 {dimension_numbers = #tpu.dot_dimension_numbers<[1], [0], [0], [1], [0, 0, 1, 1], [], []>} : vector<4x8xf32>, vector<8x256xf32>, vector<4x256xf32> -> vector<4x256xf32>
    %553 = arith.addf %544, %552 : vector<4x256xf32>
    %c1_i32_344 = arith.constant 1 : i32
    %554 = tpu.dynamic_rotate %527 by %c1_i32_344 dim 1 : vector<8x256xf32>, i32 -> vector<8x256xf32>
    %c3_345 = arith.constant 3 : index
    %c0_346 = arith.constant 0 : index
    %c0_347 = arith.constant 0 : index
    %555 = vector.load %arg7[%c3_345, %c0_346, %c0_347] : memref<9x1x256xf32, #tpu.memory_space<vmem>>, vector<1x1x256xf32>
    %556 = vector.shape_cast %555 : vector<1x1x256xf32> to vector<1x256xf32>
    %557 = vector.broadcast %556 : vector<1x256xf32> to vector<8x256xf32>
    %558 = arith.mulf %554, %557 : vector<8x256xf32>
    %c3_348 = arith.constant 3 : index
    %c0_349 = arith.constant 0 : index
    %c0_350 = arith.constant 0 : index
    %559 = vector.load %arg8[%c3_348, %c0_349, %c0_350] : memref<9x4x8xf32, #tpu.memory_space<vmem>>, vector<1x4x8xf32>
    %560 = vector.shape_cast %559 : vector<1x4x8xf32> to vector<4x8xf32>
    %cst_351 = arith.constant dense<0.000000e+00> : vector<4x256xf32>
    %561 = tpu.matmul %560, %558, %cst_351 {dimension_numbers = #tpu.dot_dimension_numbers<[1], [0], [0], [1], [0, 0, 1, 1], [], []>} : vector<4x8xf32>, vector<8x256xf32>, vector<4x256xf32> -> vector<4x256xf32>
    %562 = arith.addf %553, %561 : vector<4x256xf32>
    %c4_352 = arith.constant 4 : index
    %c0_353 = arith.constant 0 : index
    %c0_354 = arith.constant 0 : index
    %563 = vector.load %arg7[%c4_352, %c0_353, %c0_354] : memref<9x1x256xf32, #tpu.memory_space<vmem>>, vector<1x1x256xf32>
    %564 = vector.shape_cast %563 : vector<1x1x256xf32> to vector<1x256xf32>
    %565 = vector.broadcast %564 : vector<1x256xf32> to vector<8x256xf32>
    %566 = arith.mulf %527, %565 : vector<8x256xf32>
    %c4_355 = arith.constant 4 : index
    %c0_356 = arith.constant 0 : index
    %c0_357 = arith.constant 0 : index
    %567 = vector.load %arg8[%c4_355, %c0_356, %c0_357] : memref<9x4x8xf32, #tpu.memory_space<vmem>>, vector<1x4x8xf32>
    %568 = vector.shape_cast %567 : vector<1x4x8xf32> to vector<4x8xf32>
    %cst_358 = arith.constant dense<0.000000e+00> : vector<4x256xf32>
    %569 = tpu.matmul %568, %566, %cst_358 {dimension_numbers = #tpu.dot_dimension_numbers<[1], [0], [0], [1], [0, 0, 1, 1], [], []>} : vector<4x8xf32>, vector<8x256xf32>, vector<4x256xf32> -> vector<4x256xf32>
    %570 = arith.addf %562, %569 : vector<4x256xf32>
    %c255_i32_359 = arith.constant 255 : i32
    %571 = tpu.dynamic_rotate %527 by %c255_i32_359 dim 1 : vector<8x256xf32>, i32 -> vector<8x256xf32>
    %c5_360 = arith.constant 5 : index
    %c0_361 = arith.constant 0 : index
    %c0_362 = arith.constant 0 : index
    %572 = vector.load %arg7[%c5_360, %c0_361, %c0_362] : memref<9x1x256xf32, #tpu.memory_space<vmem>>, vector<1x1x256xf32>
    %573 = vector.shape_cast %572 : vector<1x1x256xf32> to vector<1x256xf32>
    %574 = vector.broadcast %573 : vector<1x256xf32> to vector<8x256xf32>
    %575 = arith.mulf %571, %574 : vector<8x256xf32>
    %c5_363 = arith.constant 5 : index
    %c0_364 = arith.constant 0 : index
    %c0_365 = arith.constant 0 : index
    %576 = vector.load %arg8[%c5_363, %c0_364, %c0_365] : memref<9x4x8xf32, #tpu.memory_space<vmem>>, vector<1x4x8xf32>
    %577 = vector.shape_cast %576 : vector<1x4x8xf32> to vector<4x8xf32>
    %cst_366 = arith.constant dense<0.000000e+00> : vector<4x256xf32>
    %578 = tpu.matmul %577, %575, %cst_366 {dimension_numbers = #tpu.dot_dimension_numbers<[1], [0], [0], [1], [0, 0, 1, 1], [], []>} : vector<4x8xf32>, vector<8x256xf32>, vector<4x256xf32> -> vector<4x256xf32>
    %579 = arith.addf %570, %578 : vector<4x256xf32>
    %c241_i32_367 = arith.constant 241 : i32
    %580 = tpu.dynamic_rotate %527 by %c241_i32_367 dim 1 : vector<8x256xf32>, i32 -> vector<8x256xf32>
    %c6_368 = arith.constant 6 : index
    %c0_369 = arith.constant 0 : index
    %c0_370 = arith.constant 0 : index
    %581 = vector.load %arg7[%c6_368, %c0_369, %c0_370] : memref<9x1x256xf32, #tpu.memory_space<vmem>>, vector<1x1x256xf32>
    %582 = vector.shape_cast %581 : vector<1x1x256xf32> to vector<1x256xf32>
    %583 = vector.broadcast %582 : vector<1x256xf32> to vector<8x256xf32>
    %584 = arith.mulf %580, %583 : vector<8x256xf32>
    %c6_371 = arith.constant 6 : index
    %c0_372 = arith.constant 0 : index
    %c0_373 = arith.constant 0 : index
    %585 = vector.load %arg8[%c6_371, %c0_372, %c0_373] : memref<9x4x8xf32, #tpu.memory_space<vmem>>, vector<1x4x8xf32>
    %586 = vector.shape_cast %585 : vector<1x4x8xf32> to vector<4x8xf32>
    %cst_374 = arith.constant dense<0.000000e+00> : vector<4x256xf32>
    %587 = tpu.matmul %586, %584, %cst_374 {dimension_numbers = #tpu.dot_dimension_numbers<[1], [0], [0], [1], [0, 0, 1, 1], [], []>} : vector<4x8xf32>, vector<8x256xf32>, vector<4x256xf32> -> vector<4x256xf32>
    %588 = arith.addf %579, %587 : vector<4x256xf32>
    %c240_i32_375 = arith.constant 240 : i32
    %589 = tpu.dynamic_rotate %527 by %c240_i32_375 dim 1 : vector<8x256xf32>, i32 -> vector<8x256xf32>
    %c7_376 = arith.constant 7 : index
    %c0_377 = arith.constant 0 : index
    %c0_378 = arith.constant 0 : index
    %590 = vector.load %arg7[%c7_376, %c0_377, %c0_378] : memref<9x1x256xf32, #tpu.memory_space<vmem>>, vector<1x1x256xf32>
    %591 = vector.shape_cast %590 : vector<1x1x256xf32> to vector<1x256xf32>
    %592 = vector.broadcast %591 : vector<1x256xf32> to vector<8x256xf32>
    %593 = arith.mulf %589, %592 : vector<8x256xf32>
    %c7_379 = arith.constant 7 : index
    %c0_380 = arith.constant 0 : index
    %c0_381 = arith.constant 0 : index
    %594 = vector.load %arg8[%c7_379, %c0_380, %c0_381] : memref<9x4x8xf32, #tpu.memory_space<vmem>>, vector<1x4x8xf32>
    %595 = vector.shape_cast %594 : vector<1x4x8xf32> to vector<4x8xf32>
    %cst_382 = arith.constant dense<0.000000e+00> : vector<4x256xf32>
    %596 = tpu.matmul %595, %593, %cst_382 {dimension_numbers = #tpu.dot_dimension_numbers<[1], [0], [0], [1], [0, 0, 1, 1], [], []>} : vector<4x8xf32>, vector<8x256xf32>, vector<4x256xf32> -> vector<4x256xf32>
    %597 = arith.addf %588, %596 : vector<4x256xf32>
    %c239_i32_383 = arith.constant 239 : i32
    %598 = tpu.dynamic_rotate %527 by %c239_i32_383 dim 1 : vector<8x256xf32>, i32 -> vector<8x256xf32>
    %c8_384 = arith.constant 8 : index
    %c0_385 = arith.constant 0 : index
    %c0_386 = arith.constant 0 : index
    %599 = vector.load %arg7[%c8_384, %c0_385, %c0_386] : memref<9x1x256xf32, #tpu.memory_space<vmem>>, vector<1x1x256xf32>
    %600 = vector.shape_cast %599 : vector<1x1x256xf32> to vector<1x256xf32>
    %601 = vector.broadcast %600 : vector<1x256xf32> to vector<8x256xf32>
    %602 = arith.mulf %598, %601 : vector<8x256xf32>
    %c8_387 = arith.constant 8 : index
    %c0_388 = arith.constant 0 : index
    %c0_389 = arith.constant 0 : index
    %603 = vector.load %arg8[%c8_387, %c0_388, %c0_389] : memref<9x4x8xf32, #tpu.memory_space<vmem>>, vector<1x4x8xf32>
    %604 = vector.shape_cast %603 : vector<1x4x8xf32> to vector<4x8xf32>
    %cst_390 = arith.constant dense<0.000000e+00> : vector<4x256xf32>
    %605 = tpu.matmul %604, %602, %cst_390 {dimension_numbers = #tpu.dot_dimension_numbers<[1], [0], [0], [1], [0, 0, 1, 1], [], []>} : vector<4x8xf32>, vector<8x256xf32>, vector<4x256xf32> -> vector<4x256xf32>
    %606 = arith.addf %597, %605 : vector<4x256xf32>
    %c0_391 = arith.constant 0 : index
    %c0_392 = arith.constant 0 : index
    %607 = vector.load %arg9[%c0_391, %c0_392] : memref<4x1xf32, #tpu.memory_space<vmem>>, vector<4x1xf32>
    %608 = vector.broadcast %607 : vector<4x1xf32> to vector<4x256xf32>
    %609 = arith.addf %606, %608 : vector<4x256xf32>
    %610 = tpu.iota {dimensions = array<i32: 0>} : vector<4x1xi32>
    %cst_393 = arith.constant 0.000000e+00 : f32
    %611 = vector.broadcast %cst_393 : f32 to vector<4x1xf32>
    %cst_394 = arith.constant 0.000000e+00 : f32
    %612 = vector.broadcast %cst_394 : f32 to vector<4x1xf32>
    %c0_i32_395 = arith.constant 0 : i32
    %613 = vector.broadcast %c0_i32_395 : i32 to vector<4x1xi32>
    %614 = arith.cmpi sge, %610, %613 : vector<4x1xi32>
    %c4_i32_396 = arith.constant 4 : i32
    %615 = vector.broadcast %c4_i32_396 : i32 to vector<4x1xi32>
    %616 = arith.cmpi slt, %610, %615 : vector<4x1xi32>
    %617 = arith.andi %614, %616 : vector<4x1xi1>
    %cst_397 = arith.constant 1.000000e+00 : f32
    %cst_398 = arith.constant 0.000000e+00 : f32
    %618 = vector.broadcast %cst_397 : f32 to vector<4x1xf32>
    %619 = vector.broadcast %cst_398 : f32 to vector<4x1xf32>
    %620 = arith.select %617, %618, %619 : vector<4x1xi1>, vector<4x1xf32>
    %621 = vector.broadcast %620 : vector<4x1xf32> to vector<4x256xf32>
    %622 = arith.mulf %609, %621 : vector<4x256xf32>
    %623 = vector.shape_cast %622 : vector<4x256xf32> to vector<1x4x256xf32>
    %cst_399 = arith.constant dense<0.000000e+00> : vector<1xf32>
    %624 = vector.multi_reduction <add>, %623, %cst_399 [1, 2] : vector<1x4x256xf32> to vector<1xf32>
    %625 = vector.shape_cast %624 : vector<1xf32> to vector<1x1x1xf32>
    %626 = vector.extract %625[0, 0, 0] : f32 from vector<1x1x1xf32>
    %cst_400 = arith.constant 9.765625E-4 : f32
    %627 = arith.mulf %626, %cst_400 : f32
    %628 = vector.broadcast %627 : f32 to vector<4x256xf32>
    %629 = arith.subf %609, %628 : vector<4x256xf32>
    %630 = arith.mulf %629, %629 : vector<4x256xf32>
    %631 = vector.broadcast %620 : vector<4x1xf32> to vector<4x256xf32>
    %632 = arith.mulf %630, %631 : vector<4x256xf32>
    %633 = vector.shape_cast %632 : vector<4x256xf32> to vector<1x4x256xf32>
    %cst_401 = arith.constant dense<0.000000e+00> : vector<1xf32>
    %634 = vector.multi_reduction <add>, %633, %cst_401 [1, 2] : vector<1x4x256xf32> to vector<1xf32>
    %635 = vector.shape_cast %634 : vector<1xf32> to vector<1x1x1xf32>
    %636 = vector.extract %635[0, 0, 0] : f32 from vector<1x1x1xf32>
    %cst_402 = arith.constant 9.765625E-4 : f32
    %637 = arith.mulf %636, %cst_402 : f32
    %638 = vector.broadcast %627 : f32 to vector<4x1xf32>
    %639 = arith.mulf %638, %620 : vector<4x1xf32>
    %640 = arith.addf %611, %639 : vector<4x1xf32>
    %cst_403 = arith.constant 9.99999974E-6 : f32
    %641 = arith.addf %637, %cst_403 : f32
    %642 = math.rsqrt %641 : f32
    %643 = vector.broadcast %642 : f32 to vector<4x1xf32>
    %644 = arith.mulf %643, %620 : vector<4x1xf32>
    %645 = arith.addf %612, %644 : vector<4x1xf32>
    %646 = vector.broadcast %640 : vector<4x1xf32> to vector<4x256xf32>
    %647 = arith.subf %609, %646 : vector<4x256xf32>
    %c0_404 = arith.constant 0 : index
    %c0_405 = arith.constant 0 : index
    %648 = vector.load %arg10[%c0_404, %c0_405] : memref<4x1xf32, #tpu.memory_space<vmem>>, vector<4x1xf32>
    %649 = arith.mulf %645, %648 : vector<4x1xf32>
    %650 = vector.broadcast %649 : vector<4x1xf32> to vector<4x256xf32>
    %651 = arith.mulf %647, %650 : vector<4x256xf32>
    %c0_406 = arith.constant 0 : index
    %c0_407 = arith.constant 0 : index
    %652 = vector.load %arg11[%c0_406, %c0_407] : memref<4x1xf32, #tpu.memory_space<vmem>>, vector<4x1xf32>
    %653 = vector.broadcast %652 : vector<4x1xf32> to vector<4x256xf32>
    %654 = arith.addf %651, %653 : vector<4x256xf32>
    %655 = arith.negf %654 : vector<4x256xf32>
    %656 = math.exp %655 : vector<4x256xf32>
    %cst_408 = arith.constant 1.000000e+00 : f32
    %657 = vector.broadcast %cst_408 : f32 to vector<4x256xf32>
    %658 = arith.addf %657, %656 : vector<4x256xf32>
    %659 = arith.divf %657, %658 : vector<4x256xf32>
    %660 = arith.mulf %654, %659 : vector<4x256xf32>
    %c17_i32_409 = arith.constant 17 : i32
    %661 = tpu.dynamic_rotate %660 by %c17_i32_409 dim 1 : vector<4x256xf32>, i32 -> vector<4x256xf32>
    %c0_410 = arith.constant 0 : index
    %c0_411 = arith.constant 0 : index
    %c0_412 = arith.constant 0 : index
    %662 = vector.load %arg7[%c0_410, %c0_411, %c0_412] : memref<9x1x256xf32, #tpu.memory_space<vmem>>, vector<1x1x256xf32>
    %663 = vector.shape_cast %662 : vector<1x1x256xf32> to vector<1x256xf32>
    %664 = vector.broadcast %663 : vector<1x256xf32> to vector<4x256xf32>
    %665 = arith.mulf %661, %664 : vector<4x256xf32>
    %c0_413 = arith.constant 0 : index
    %c0_414 = arith.constant 0 : index
    %c0_415 = arith.constant 0 : index
    %666 = vector.load %arg12[%c0_413, %c0_414, %c0_415] : memref<9x8x4xf32, #tpu.memory_space<vmem>>, vector<1x8x4xf32>
    %667 = vector.shape_cast %666 : vector<1x8x4xf32> to vector<8x4xf32>
    %cst_416 = arith.constant dense<0.000000e+00> : vector<8x256xf32>
    %668 = tpu.matmul %667, %665, %cst_416 {dimension_numbers = #tpu.dot_dimension_numbers<[1], [0], [0], [1], [0, 0, 1, 1], [], []>} : vector<8x4xf32>, vector<4x256xf32>, vector<8x256xf32> -> vector<8x256xf32>
    %c16_i32_417 = arith.constant 16 : i32
    %669 = tpu.dynamic_rotate %660 by %c16_i32_417 dim 1 : vector<4x256xf32>, i32 -> vector<4x256xf32>
    %c1_418 = arith.constant 1 : index
    %c0_419 = arith.constant 0 : index
    %c0_420 = arith.constant 0 : index
    %670 = vector.load %arg7[%c1_418, %c0_419, %c0_420] : memref<9x1x256xf32, #tpu.memory_space<vmem>>, vector<1x1x256xf32>
    %671 = vector.shape_cast %670 : vector<1x1x256xf32> to vector<1x256xf32>
    %672 = vector.broadcast %671 : vector<1x256xf32> to vector<4x256xf32>
    %673 = arith.mulf %669, %672 : vector<4x256xf32>
    %c1_421 = arith.constant 1 : index
    %c0_422 = arith.constant 0 : index
    %c0_423 = arith.constant 0 : index
    %674 = vector.load %arg12[%c1_421, %c0_422, %c0_423] : memref<9x8x4xf32, #tpu.memory_space<vmem>>, vector<1x8x4xf32>
    %675 = vector.shape_cast %674 : vector<1x8x4xf32> to vector<8x4xf32>
    %cst_424 = arith.constant dense<0.000000e+00> : vector<8x256xf32>
    %676 = tpu.matmul %675, %673, %cst_424 {dimension_numbers = #tpu.dot_dimension_numbers<[1], [0], [0], [1], [0, 0, 1, 1], [], []>} : vector<8x4xf32>, vector<4x256xf32>, vector<8x256xf32> -> vector<8x256xf32>
    %677 = arith.addf %668, %676 : vector<8x256xf32>
    %c15_i32_425 = arith.constant 15 : i32
    %678 = tpu.dynamic_rotate %660 by %c15_i32_425 dim 1 : vector<4x256xf32>, i32 -> vector<4x256xf32>
    %c2_426 = arith.constant 2 : index
    %c0_427 = arith.constant 0 : index
    %c0_428 = arith.constant 0 : index
    %679 = vector.load %arg7[%c2_426, %c0_427, %c0_428] : memref<9x1x256xf32, #tpu.memory_space<vmem>>, vector<1x1x256xf32>
    %680 = vector.shape_cast %679 : vector<1x1x256xf32> to vector<1x256xf32>
    %681 = vector.broadcast %680 : vector<1x256xf32> to vector<4x256xf32>
    %682 = arith.mulf %678, %681 : vector<4x256xf32>
    %c2_429 = arith.constant 2 : index
    %c0_430 = arith.constant 0 : index
    %c0_431 = arith.constant 0 : index
    %683 = vector.load %arg12[%c2_429, %c0_430, %c0_431] : memref<9x8x4xf32, #tpu.memory_space<vmem>>, vector<1x8x4xf32>
    %684 = vector.shape_cast %683 : vector<1x8x4xf32> to vector<8x4xf32>
    %cst_432 = arith.constant dense<0.000000e+00> : vector<8x256xf32>
    %685 = tpu.matmul %684, %682, %cst_432 {dimension_numbers = #tpu.dot_dimension_numbers<[1], [0], [0], [1], [0, 0, 1, 1], [], []>} : vector<8x4xf32>, vector<4x256xf32>, vector<8x256xf32> -> vector<8x256xf32>
    %686 = arith.addf %677, %685 : vector<8x256xf32>
    %c1_i32_433 = arith.constant 1 : i32
    %687 = tpu.dynamic_rotate %660 by %c1_i32_433 dim 1 : vector<4x256xf32>, i32 -> vector<4x256xf32>
    %c3_434 = arith.constant 3 : index
    %c0_435 = arith.constant 0 : index
    %c0_436 = arith.constant 0 : index
    %688 = vector.load %arg7[%c3_434, %c0_435, %c0_436] : memref<9x1x256xf32, #tpu.memory_space<vmem>>, vector<1x1x256xf32>
    %689 = vector.shape_cast %688 : vector<1x1x256xf32> to vector<1x256xf32>
    %690 = vector.broadcast %689 : vector<1x256xf32> to vector<4x256xf32>
    %691 = arith.mulf %687, %690 : vector<4x256xf32>
    %c3_437 = arith.constant 3 : index
    %c0_438 = arith.constant 0 : index
    %c0_439 = arith.constant 0 : index
    %692 = vector.load %arg12[%c3_437, %c0_438, %c0_439] : memref<9x8x4xf32, #tpu.memory_space<vmem>>, vector<1x8x4xf32>
    %693 = vector.shape_cast %692 : vector<1x8x4xf32> to vector<8x4xf32>
    %cst_440 = arith.constant dense<0.000000e+00> : vector<8x256xf32>
    %694 = tpu.matmul %693, %691, %cst_440 {dimension_numbers = #tpu.dot_dimension_numbers<[1], [0], [0], [1], [0, 0, 1, 1], [], []>} : vector<8x4xf32>, vector<4x256xf32>, vector<8x256xf32> -> vector<8x256xf32>
    %695 = arith.addf %686, %694 : vector<8x256xf32>
    %c4_441 = arith.constant 4 : index
    %c0_442 = arith.constant 0 : index
    %c0_443 = arith.constant 0 : index
    %696 = vector.load %arg7[%c4_441, %c0_442, %c0_443] : memref<9x1x256xf32, #tpu.memory_space<vmem>>, vector<1x1x256xf32>
    %697 = vector.shape_cast %696 : vector<1x1x256xf32> to vector<1x256xf32>
    %698 = vector.broadcast %697 : vector<1x256xf32> to vector<4x256xf32>
    %699 = arith.mulf %660, %698 : vector<4x256xf32>
    %c4_444 = arith.constant 4 : index
    %c0_445 = arith.constant 0 : index
    %c0_446 = arith.constant 0 : index
    %700 = vector.load %arg12[%c4_444, %c0_445, %c0_446] : memref<9x8x4xf32, #tpu.memory_space<vmem>>, vector<1x8x4xf32>
    %701 = vector.shape_cast %700 : vector<1x8x4xf32> to vector<8x4xf32>
    %cst_447 = arith.constant dense<0.000000e+00> : vector<8x256xf32>
    %702 = tpu.matmul %701, %699, %cst_447 {dimension_numbers = #tpu.dot_dimension_numbers<[1], [0], [0], [1], [0, 0, 1, 1], [], []>} : vector<8x4xf32>, vector<4x256xf32>, vector<8x256xf32> -> vector<8x256xf32>
    %703 = arith.addf %695, %702 : vector<8x256xf32>
    %c255_i32_448 = arith.constant 255 : i32
    %704 = tpu.dynamic_rotate %660 by %c255_i32_448 dim 1 : vector<4x256xf32>, i32 -> vector<4x256xf32>
    %c5_449 = arith.constant 5 : index
    %c0_450 = arith.constant 0 : index
    %c0_451 = arith.constant 0 : index
    %705 = vector.load %arg7[%c5_449, %c0_450, %c0_451] : memref<9x1x256xf32, #tpu.memory_space<vmem>>, vector<1x1x256xf32>
    %706 = vector.shape_cast %705 : vector<1x1x256xf32> to vector<1x256xf32>
    %707 = vector.broadcast %706 : vector<1x256xf32> to vector<4x256xf32>
    %708 = arith.mulf %704, %707 : vector<4x256xf32>
    %c5_452 = arith.constant 5 : index
    %c0_453 = arith.constant 0 : index
    %c0_454 = arith.constant 0 : index
    %709 = vector.load %arg12[%c5_452, %c0_453, %c0_454] : memref<9x8x4xf32, #tpu.memory_space<vmem>>, vector<1x8x4xf32>
    %710 = vector.shape_cast %709 : vector<1x8x4xf32> to vector<8x4xf32>
    %cst_455 = arith.constant dense<0.000000e+00> : vector<8x256xf32>
    %711 = tpu.matmul %710, %708, %cst_455 {dimension_numbers = #tpu.dot_dimension_numbers<[1], [0], [0], [1], [0, 0, 1, 1], [], []>} : vector<8x4xf32>, vector<4x256xf32>, vector<8x256xf32> -> vector<8x256xf32>
    %712 = arith.addf %703, %711 : vector<8x256xf32>
    %c241_i32_456 = arith.constant 241 : i32
    %713 = tpu.dynamic_rotate %660 by %c241_i32_456 dim 1 : vector<4x256xf32>, i32 -> vector<4x256xf32>
    %c6_457 = arith.constant 6 : index
    %c0_458 = arith.constant 0 : index
    %c0_459 = arith.constant 0 : index
    %714 = vector.load %arg7[%c6_457, %c0_458, %c0_459] : memref<9x1x256xf32, #tpu.memory_space<vmem>>, vector<1x1x256xf32>
    %715 = vector.shape_cast %714 : vector<1x1x256xf32> to vector<1x256xf32>
    %716 = vector.broadcast %715 : vector<1x256xf32> to vector<4x256xf32>
    %717 = arith.mulf %713, %716 : vector<4x256xf32>
    %c6_460 = arith.constant 6 : index
    %c0_461 = arith.constant 0 : index
    %c0_462 = arith.constant 0 : index
    %718 = vector.load %arg12[%c6_460, %c0_461, %c0_462] : memref<9x8x4xf32, #tpu.memory_space<vmem>>, vector<1x8x4xf32>
    %719 = vector.shape_cast %718 : vector<1x8x4xf32> to vector<8x4xf32>
    %cst_463 = arith.constant dense<0.000000e+00> : vector<8x256xf32>
    %720 = tpu.matmul %719, %717, %cst_463 {dimension_numbers = #tpu.dot_dimension_numbers<[1], [0], [0], [1], [0, 0, 1, 1], [], []>} : vector<8x4xf32>, vector<4x256xf32>, vector<8x256xf32> -> vector<8x256xf32>
    %721 = arith.addf %712, %720 : vector<8x256xf32>
    %c240_i32_464 = arith.constant 240 : i32
    %722 = tpu.dynamic_rotate %660 by %c240_i32_464 dim 1 : vector<4x256xf32>, i32 -> vector<4x256xf32>
    %c7_465 = arith.constant 7 : index
    %c0_466 = arith.constant 0 : index
    %c0_467 = arith.constant 0 : index
    %723 = vector.load %arg7[%c7_465, %c0_466, %c0_467] : memref<9x1x256xf32, #tpu.memory_space<vmem>>, vector<1x1x256xf32>
    %724 = vector.shape_cast %723 : vector<1x1x256xf32> to vector<1x256xf32>
    %725 = vector.broadcast %724 : vector<1x256xf32> to vector<4x256xf32>
    %726 = arith.mulf %722, %725 : vector<4x256xf32>
    %c7_468 = arith.constant 7 : index
    %c0_469 = arith.constant 0 : index
    %c0_470 = arith.constant 0 : index
    %727 = vector.load %arg12[%c7_468, %c0_469, %c0_470] : memref<9x8x4xf32, #tpu.memory_space<vmem>>, vector<1x8x4xf32>
    %728 = vector.shape_cast %727 : vector<1x8x4xf32> to vector<8x4xf32>
    %cst_471 = arith.constant dense<0.000000e+00> : vector<8x256xf32>
    %729 = tpu.matmul %728, %726, %cst_471 {dimension_numbers = #tpu.dot_dimension_numbers<[1], [0], [0], [1], [0, 0, 1, 1], [], []>} : vector<8x4xf32>, vector<4x256xf32>, vector<8x256xf32> -> vector<8x256xf32>
    %730 = arith.addf %721, %729 : vector<8x256xf32>
    %c239_i32_472 = arith.constant 239 : i32
    %731 = tpu.dynamic_rotate %660 by %c239_i32_472 dim 1 : vector<4x256xf32>, i32 -> vector<4x256xf32>
    %c8_473 = arith.constant 8 : index
    %c0_474 = arith.constant 0 : index
    %c0_475 = arith.constant 0 : index
    %732 = vector.load %arg7[%c8_473, %c0_474, %c0_475] : memref<9x1x256xf32, #tpu.memory_space<vmem>>, vector<1x1x256xf32>
    %733 = vector.shape_cast %732 : vector<1x1x256xf32> to vector<1x256xf32>
    %734 = vector.broadcast %733 : vector<1x256xf32> to vector<4x256xf32>
    %735 = arith.mulf %731, %734 : vector<4x256xf32>
    %c8_476 = arith.constant 8 : index
    %c0_477 = arith.constant 0 : index
    %c0_478 = arith.constant 0 : index
    %736 = vector.load %arg12[%c8_476, %c0_477, %c0_478] : memref<9x8x4xf32, #tpu.memory_space<vmem>>, vector<1x8x4xf32>
    %737 = vector.shape_cast %736 : vector<1x8x4xf32> to vector<8x4xf32>
    %cst_479 = arith.constant dense<0.000000e+00> : vector<8x256xf32>
    %738 = tpu.matmul %737, %735, %cst_479 {dimension_numbers = #tpu.dot_dimension_numbers<[1], [0], [0], [1], [0, 0, 1, 1], [], []>} : vector<8x4xf32>, vector<4x256xf32>, vector<8x256xf32> -> vector<8x256xf32>
    %739 = arith.addf %730, %738 : vector<8x256xf32>
    %c0_480 = arith.constant 0 : index
    %c0_481 = arith.constant 0 : index
    %740 = vector.load %arg13[%c0_480, %c0_481] : memref<8x1xf32, #tpu.memory_space<vmem>>, vector<8x1xf32>
    %741 = vector.broadcast %740 : vector<8x1xf32> to vector<8x256xf32>
    %742 = arith.addf %739, %741 : vector<8x256xf32>
    %743 = arith.addf %742, %443 : vector<8x256xf32>
    %c0_482 = arith.constant 0 : index
    %c0_483 = arith.constant 0 : index
    %c0_484 = arith.constant 0 : index
    %744 = vector.load %arg34[%c0_482, %c0_483, %c0_484] : memref<1x8x256xf32, #tpu.memory_space<vmem>>, vector<1x8x256xf32>
    %745 = vector.shape_cast %744 : vector<1x8x256xf32> to vector<8x256xf32>
    %746 = vector.shape_cast %743 : vector<8x256xf32> to vector<1x8x256xf32>
    tpu.vector_store %arg34[%c0_482, %c0_483, %c0_484], %746 {strides = array<i32>} : memref<1x8x256xf32, #tpu.memory_space<vmem>>, vector<1x8x256xf32>,
    %747 = tpu.iota {dimensions = array<i32: 0>} : vector<8x1xi32>
    %cst_485 = arith.constant 0.000000e+00 : f32
    %748 = vector.broadcast %cst_485 : f32 to vector<8x1xf32>
    %cst_486 = arith.constant 0.000000e+00 : f32
    %749 = vector.broadcast %cst_486 : f32 to vector<8x1xf32>
    %c0_i32_487 = arith.constant 0 : i32
    %750 = vector.broadcast %c0_i32_487 : i32 to vector<8x1xi32>
    %751 = arith.cmpi sge, %747, %750 : vector<8x1xi32>
    %c4_i32_488 = arith.constant 4 : i32
    %752 = vector.broadcast %c4_i32_488 : i32 to vector<8x1xi32>
    %753 = arith.cmpi slt, %747, %752 : vector<8x1xi32>
    %754 = arith.andi %751, %753 : vector<8x1xi1>
    %cst_489 = arith.constant 1.000000e+00 : f32
    %cst_490 = arith.constant 0.000000e+00 : f32
    %755 = vector.broadcast %cst_489 : f32 to vector<8x1xf32>
    %756 = vector.broadcast %cst_490 : f32 to vector<8x1xf32>
    %757 = arith.select %754, %755, %756 : vector<8x1xi1>, vector<8x1xf32>
    %758 = vector.broadcast %757 : vector<8x1xf32> to vector<8x256xf32>
    %759 = arith.mulf %743, %758 : vector<8x256xf32>
    %760 = vector.shape_cast %759 : vector<8x256xf32> to vector<1x8x256xf32>
    %cst_491 = arith.constant dense<0.000000e+00> : vector<1xf32>
    %761 = vector.multi_reduction <add>, %760, %cst_491 [1, 2] : vector<1x8x256xf32> to vector<1xf32>
    %762 = vector.shape_cast %761 : vector<1xf32> to vector<1x1x1xf32>
    %763 = vector.extract %762[0, 0, 0] : f32 from vector<1x1x1xf32>
    %cst_492 = arith.constant 9.765625E-4 : f32
    %764 = arith.mulf %763, %cst_492 : f32
    %765 = vector.broadcast %764 : f32 to vector<8x256xf32>
    %766 = arith.subf %743, %765 : vector<8x256xf32>
    %767 = arith.mulf %766, %766 : vector<8x256xf32>
    %768 = vector.broadcast %757 : vector<8x1xf32> to vector<8x256xf32>
    %769 = arith.mulf %767, %768 : vector<8x256xf32>
    %770 = vector.shape_cast %769 : vector<8x256xf32> to vector<1x8x256xf32>
    %cst_493 = arith.constant dense<0.000000e+00> : vector<1xf32>
    %771 = vector.multi_reduction <add>, %770, %cst_493 [1, 2] : vector<1x8x256xf32> to vector<1xf32>
    %772 = vector.shape_cast %771 : vector<1xf32> to vector<1x1x1xf32>
    %773 = vector.extract %772[0, 0, 0] : f32 from vector<1x1x1xf32>
    %cst_494 = arith.constant 9.765625E-4 : f32
    %774 = arith.mulf %773, %cst_494 : f32
    %775 = vector.broadcast %764 : f32 to vector<8x1xf32>
    %776 = arith.mulf %775, %757 : vector<8x1xf32>
    %777 = arith.addf %748, %776 : vector<8x1xf32>
    %cst_495 = arith.constant 9.99999974E-6 : f32
    %778 = arith.addf %774, %cst_495 : f32
    %779 = math.rsqrt %778 : f32
    %780 = vector.broadcast %779 : f32 to vector<8x1xf32>
    %781 = arith.mulf %780, %757 : vector<8x1xf32>
    %782 = arith.addf %749, %781 : vector<8x1xf32>
    %c4_i32_496 = arith.constant 4 : i32
    %783 = vector.broadcast %c4_i32_496 : i32 to vector<8x1xi32>
    %784 = arith.cmpi sge, %747, %783 : vector<8x1xi32>
    %c8_i32_497 = arith.constant 8 : i32
    %785 = vector.broadcast %c8_i32_497 : i32 to vector<8x1xi32>
    %786 = arith.cmpi slt, %747, %785 : vector<8x1xi32>
    %787 = arith.andi %784, %786 : vector<8x1xi1>
    %cst_498 = arith.constant 1.000000e+00 : f32
    %cst_499 = arith.constant 0.000000e+00 : f32
    %788 = vector.broadcast %cst_498 : f32 to vector<8x1xf32>
    %789 = vector.broadcast %cst_499 : f32 to vector<8x1xf32>
    %790 = arith.select %787, %788, %789 : vector<8x1xi1>, vector<8x1xf32>
    %791 = vector.broadcast %790 : vector<8x1xf32> to vector<8x256xf32>
    %792 = arith.mulf %743, %791 : vector<8x256xf32>
    %793 = vector.shape_cast %792 : vector<8x256xf32> to vector<1x8x256xf32>
    %cst_500 = arith.constant dense<0.000000e+00> : vector<1xf32>
    %794 = vector.multi_reduction <add>, %793, %cst_500 [1, 2] : vector<1x8x256xf32> to vector<1xf32>
    %795 = vector.shape_cast %794 : vector<1xf32> to vector<1x1x1xf32>
    %796 = vector.extract %795[0, 0, 0] : f32 from vector<1x1x1xf32>
    %cst_501 = arith.constant 9.765625E-4 : f32
    %797 = arith.mulf %796, %cst_501 : f32
    %798 = vector.broadcast %797 : f32 to vector<8x256xf32>
    %799 = arith.subf %743, %798 : vector<8x256xf32>
    %800 = arith.mulf %799, %799 : vector<8x256xf32>
    %801 = vector.broadcast %790 : vector<8x1xf32> to vector<8x256xf32>
    %802 = arith.mulf %800, %801 : vector<8x256xf32>
    %803 = vector.shape_cast %802 : vector<8x256xf32> to vector<1x8x256xf32>
    %cst_502 = arith.constant dense<0.000000e+00> : vector<1xf32>
    %804 = vector.multi_reduction <add>, %803, %cst_502 [1, 2] : vector<1x8x256xf32> to vector<1xf32>
    %805 = vector.shape_cast %804 : vector<1xf32> to vector<1x1x1xf32>
    %806 = vector.extract %805[0, 0, 0] : f32 from vector<1x1x1xf32>
    %cst_503 = arith.constant 9.765625E-4 : f32
    %807 = arith.mulf %806, %cst_503 : f32
    %808 = vector.broadcast %797 : f32 to vector<8x1xf32>
    %809 = arith.mulf %808, %790 : vector<8x1xf32>
    %810 = arith.addf %777, %809 : vector<8x1xf32>
    %cst_504 = arith.constant 9.99999974E-6 : f32
    %811 = arith.addf %807, %cst_504 : f32
    %812 = math.rsqrt %811 : f32
    %813 = vector.broadcast %812 : f32 to vector<8x1xf32>
    %814 = arith.mulf %813, %790 : vector<8x1xf32>
    %815 = arith.addf %782, %814 : vector<8x1xf32>
    %816 = vector.broadcast %810 : vector<8x1xf32> to vector<8x256xf32>
    %817 = arith.subf %743, %816 : vector<8x256xf32>
    %c0_505 = arith.constant 0 : index
    %c0_506 = arith.constant 0 : index
    %818 = vector.load %arg14[%c0_505, %c0_506] : memref<8x1xf32, #tpu.memory_space<vmem>>, vector<8x1xf32>
    %819 = arith.mulf %815, %818 : vector<8x1xf32>
    %820 = vector.broadcast %819 : vector<8x1xf32> to vector<8x256xf32>
    %821 = arith.mulf %817, %820 : vector<8x256xf32>
    %c0_507 = arith.constant 0 : index
    %c0_508 = arith.constant 0 : index
    %822 = vector.load %arg15[%c0_507, %c0_508] : memref<8x1xf32, #tpu.memory_space<vmem>>, vector<8x1xf32>
    %823 = vector.broadcast %822 : vector<8x1xf32> to vector<8x256xf32>
    %824 = arith.addf %821, %823 : vector<8x256xf32>
    %825 = arith.negf %824 : vector<8x256xf32>
    %826 = math.exp %825 : vector<8x256xf32>
    %cst_509 = arith.constant 1.000000e+00 : f32
    %827 = vector.broadcast %cst_509 : f32 to vector<8x256xf32>
    %828 = arith.addf %827, %826 : vector<8x256xf32>
    %829 = arith.divf %827, %828 : vector<8x256xf32>
    %830 = arith.mulf %824, %829 : vector<8x256xf32>
    %c17_i32_510 = arith.constant 17 : i32
    %831 = tpu.dynamic_rotate %830 by %c17_i32_510 dim 1 : vector<8x256xf32>, i32 -> vector<8x256xf32>
    %c0_511 = arith.constant 0 : index
    %c0_512 = arith.constant 0 : index
    %c0_513 = arith.constant 0 : index
    %832 = vector.load %arg7[%c0_511, %c0_512, %c0_513] : memref<9x1x256xf32, #tpu.memory_space<vmem>>, vector<1x1x256xf32>
    %833 = vector.shape_cast %832 : vector<1x1x256xf32> to vector<1x256xf32>
    %834 = vector.broadcast %833 : vector<1x256xf32> to vector<8x256xf32>
    %835 = arith.mulf %831, %834 : vector<8x256xf32>
    %c0_514 = arith.constant 0 : index
    %c0_515 = arith.constant 0 : index
    %c0_516 = arith.constant 0 : index
    %836 = vector.load %arg16[%c0_514, %c0_515, %c0_516] : memref<9x4x8xf32, #tpu.memory_space<vmem>>, vector<1x4x8xf32>
    %837 = vector.shape_cast %836 : vector<1x4x8xf32> to vector<4x8xf32>
    %cst_517 = arith.constant dense<0.000000e+00> : vector<4x256xf32>
    %838 = tpu.matmul %837, %835, %cst_517 {dimension_numbers = #tpu.dot_dimension_numbers<[1], [0], [0], [1], [0, 0, 1, 1], [], []>} : vector<4x8xf32>, vector<8x256xf32>, vector<4x256xf32> -> vector<4x256xf32>
    %c16_i32_518 = arith.constant 16 : i32
    %839 = tpu.dynamic_rotate %830 by %c16_i32_518 dim 1 : vector<8x256xf32>, i32 -> vector<8x256xf32>
    %c1_519 = arith.constant 1 : index
    %c0_520 = arith.constant 0 : index
    %c0_521 = arith.constant 0 : index
    %840 = vector.load %arg7[%c1_519, %c0_520, %c0_521] : memref<9x1x256xf32, #tpu.memory_space<vmem>>, vector<1x1x256xf32>
    %841 = vector.shape_cast %840 : vector<1x1x256xf32> to vector<1x256xf32>
    %842 = vector.broadcast %841 : vector<1x256xf32> to vector<8x256xf32>
    %843 = arith.mulf %839, %842 : vector<8x256xf32>
    %c1_522 = arith.constant 1 : index
    %c0_523 = arith.constant 0 : index
    %c0_524 = arith.constant 0 : index
    %844 = vector.load %arg16[%c1_522, %c0_523, %c0_524] : memref<9x4x8xf32, #tpu.memory_space<vmem>>, vector<1x4x8xf32>
    %845 = vector.shape_cast %844 : vector<1x4x8xf32> to vector<4x8xf32>
    %cst_525 = arith.constant dense<0.000000e+00> : vector<4x256xf32>
    %846 = tpu.matmul %845, %843, %cst_525 {dimension_numbers = #tpu.dot_dimension_numbers<[1], [0], [0], [1], [0, 0, 1, 1], [], []>} : vector<4x8xf32>, vector<8x256xf32>, vector<4x256xf32> -> vector<4x256xf32>
    %847 = arith.addf %838, %846 : vector<4x256xf32>
    %c15_i32_526 = arith.constant 15 : i32
    %848 = tpu.dynamic_rotate %830 by %c15_i32_526 dim 1 : vector<8x256xf32>, i32 -> vector<8x256xf32>
    %c2_527 = arith.constant 2 : index
    %c0_528 = arith.constant 0 : index
    %c0_529 = arith.constant 0 : index
    %849 = vector.load %arg7[%c2_527, %c0_528, %c0_529] : memref<9x1x256xf32, #tpu.memory_space<vmem>>, vector<1x1x256xf32>
    %850 = vector.shape_cast %849 : vector<1x1x256xf32> to vector<1x256xf32>
    %851 = vector.broadcast %850 : vector<1x256xf32> to vector<8x256xf32>
    %852 = arith.mulf %848, %851 : vector<8x256xf32>
    %c2_530 = arith.constant 2 : index
    %c0_531 = arith.constant 0 : index
    %c0_532 = arith.constant 0 : index
    %853 = vector.load %arg16[%c2_530, %c0_531, %c0_532] : memref<9x4x8xf32, #tpu.memory_space<vmem>>, vector<1x4x8xf32>
    %854 = vector.shape_cast %853 : vector<1x4x8xf32> to vector<4x8xf32>
    %cst_533 = arith.constant dense<0.000000e+00> : vector<4x256xf32>
    %855 = tpu.matmul %854, %852, %cst_533 {dimension_numbers = #tpu.dot_dimension_numbers<[1], [0], [0], [1], [0, 0, 1, 1], [], []>} : vector<4x8xf32>, vector<8x256xf32>, vector<4x256xf32> -> vector<4x256xf32>
    %856 = arith.addf %847, %855 : vector<4x256xf32>
    %c1_i32_534 = arith.constant 1 : i32
    %857 = tpu.dynamic_rotate %830 by %c1_i32_534 dim 1 : vector<8x256xf32>, i32 -> vector<8x256xf32>
    %c3_535 = arith.constant 3 : index
    %c0_536 = arith.constant 0 : index
    %c0_537 = arith.constant 0 : index
    %858 = vector.load %arg7[%c3_535, %c0_536, %c0_537] : memref<9x1x256xf32, #tpu.memory_space<vmem>>, vector<1x1x256xf32>
    %859 = vector.shape_cast %858 : vector<1x1x256xf32> to vector<1x256xf32>
    %860 = vector.broadcast %859 : vector<1x256xf32> to vector<8x256xf32>
    %861 = arith.mulf %857, %860 : vector<8x256xf32>
    %c3_538 = arith.constant 3 : index
    %c0_539 = arith.constant 0 : index
    %c0_540 = arith.constant 0 : index
    %862 = vector.load %arg16[%c3_538, %c0_539, %c0_540] : memref<9x4x8xf32, #tpu.memory_space<vmem>>, vector<1x4x8xf32>
    %863 = vector.shape_cast %862 : vector<1x4x8xf32> to vector<4x8xf32>
    %cst_541 = arith.constant dense<0.000000e+00> : vector<4x256xf32>
    %864 = tpu.matmul %863, %861, %cst_541 {dimension_numbers = #tpu.dot_dimension_numbers<[1], [0], [0], [1], [0, 0, 1, 1], [], []>} : vector<4x8xf32>, vector<8x256xf32>, vector<4x256xf32> -> vector<4x256xf32>
    %865 = arith.addf %856, %864 : vector<4x256xf32>
    %c4_542 = arith.constant 4 : index
    %c0_543 = arith.constant 0 : index
    %c0_544 = arith.constant 0 : index
    %866 = vector.load %arg7[%c4_542, %c0_543, %c0_544] : memref<9x1x256xf32, #tpu.memory_space<vmem>>, vector<1x1x256xf32>
    %867 = vector.shape_cast %866 : vector<1x1x256xf32> to vector<1x256xf32>
    %868 = vector.broadcast %867 : vector<1x256xf32> to vector<8x256xf32>
    %869 = arith.mulf %830, %868 : vector<8x256xf32>
    %c4_545 = arith.constant 4 : index
    %c0_546 = arith.constant 0 : index
    %c0_547 = arith.constant 0 : index
    %870 = vector.load %arg16[%c4_545, %c0_546, %c0_547] : memref<9x4x8xf32, #tpu.memory_space<vmem>>, vector<1x4x8xf32>
    %871 = vector.shape_cast %870 : vector<1x4x8xf32> to vector<4x8xf32>
    %cst_548 = arith.constant dense<0.000000e+00> : vector<4x256xf32>
    %872 = tpu.matmul %871, %869, %cst_548 {dimension_numbers = #tpu.dot_dimension_numbers<[1], [0], [0], [1], [0, 0, 1, 1], [], []>} : vector<4x8xf32>, vector<8x256xf32>, vector<4x256xf32> -> vector<4x256xf32>
    %873 = arith.addf %865, %872 : vector<4x256xf32>
    %c255_i32_549 = arith.constant 255 : i32
    %874 = tpu.dynamic_rotate %830 by %c255_i32_549 dim 1 : vector<8x256xf32>, i32 -> vector<8x256xf32>
    %c5_550 = arith.constant 5 : index
    %c0_551 = arith.constant 0 : index
    %c0_552 = arith.constant 0 : index
    %875 = vector.load %arg7[%c5_550, %c0_551, %c0_552] : memref<9x1x256xf32, #tpu.memory_space<vmem>>, vector<1x1x256xf32>
    %876 = vector.shape_cast %875 : vector<1x1x256xf32> to vector<1x256xf32>
    %877 = vector.broadcast %876 : vector<1x256xf32> to vector<8x256xf32>
    %878 = arith.mulf %874, %877 : vector<8x256xf32>
    %c5_553 = arith.constant 5 : index
    %c0_554 = arith.constant 0 : index
    %c0_555 = arith.constant 0 : index
    %879 = vector.load %arg16[%c5_553, %c0_554, %c0_555] : memref<9x4x8xf32, #tpu.memory_space<vmem>>, vector<1x4x8xf32>
    %880 = vector.shape_cast %879 : vector<1x4x8xf32> to vector<4x8xf32>
    %cst_556 = arith.constant dense<0.000000e+00> : vector<4x256xf32>
    %881 = tpu.matmul %880, %878, %cst_556 {dimension_numbers = #tpu.dot_dimension_numbers<[1], [0], [0], [1], [0, 0, 1, 1], [], []>} : vector<4x8xf32>, vector<8x256xf32>, vector<4x256xf32> -> vector<4x256xf32>
    %882 = arith.addf %873, %881 : vector<4x256xf32>
    %c241_i32_557 = arith.constant 241 : i32
    %883 = tpu.dynamic_rotate %830 by %c241_i32_557 dim 1 : vector<8x256xf32>, i32 -> vector<8x256xf32>
    %c6_558 = arith.constant 6 : index
    %c0_559 = arith.constant 0 : index
    %c0_560 = arith.constant 0 : index
    %884 = vector.load %arg7[%c6_558, %c0_559, %c0_560] : memref<9x1x256xf32, #tpu.memory_space<vmem>>, vector<1x1x256xf32>
    %885 = vector.shape_cast %884 : vector<1x1x256xf32> to vector<1x256xf32>
    %886 = vector.broadcast %885 : vector<1x256xf32> to vector<8x256xf32>
    %887 = arith.mulf %883, %886 : vector<8x256xf32>
    %c6_561 = arith.constant 6 : index
    %c0_562 = arith.constant 0 : index
    %c0_563 = arith.constant 0 : index
    %888 = vector.load %arg16[%c6_561, %c0_562, %c0_563] : memref<9x4x8xf32, #tpu.memory_space<vmem>>, vector<1x4x8xf32>
    %889 = vector.shape_cast %888 : vector<1x4x8xf32> to vector<4x8xf32>
    %cst_564 = arith.constant dense<0.000000e+00> : vector<4x256xf32>
    %890 = tpu.matmul %889, %887, %cst_564 {dimension_numbers = #tpu.dot_dimension_numbers<[1], [0], [0], [1], [0, 0, 1, 1], [], []>} : vector<4x8xf32>, vector<8x256xf32>, vector<4x256xf32> -> vector<4x256xf32>
    %891 = arith.addf %882, %890 : vector<4x256xf32>
    %c240_i32_565 = arith.constant 240 : i32
    %892 = tpu.dynamic_rotate %830 by %c240_i32_565 dim 1 : vector<8x256xf32>, i32 -> vector<8x256xf32>
    %c7_566 = arith.constant 7 : index
    %c0_567 = arith.constant 0 : index
    %c0_568 = arith.constant 0 : index
    %893 = vector.load %arg7[%c7_566, %c0_567, %c0_568] : memref<9x1x256xf32, #tpu.memory_space<vmem>>, vector<1x1x256xf32>
    %894 = vector.shape_cast %893 : vector<1x1x256xf32> to vector<1x256xf32>
    %895 = vector.broadcast %894 : vector<1x256xf32> to vector<8x256xf32>
    %896 = arith.mulf %892, %895 : vector<8x256xf32>
    %c7_569 = arith.constant 7 : index
    %c0_570 = arith.constant 0 : index
    %c0_571 = arith.constant 0 : index
    %897 = vector.load %arg16[%c7_569, %c0_570, %c0_571] : memref<9x4x8xf32, #tpu.memory_space<vmem>>, vector<1x4x8xf32>
    %898 = vector.shape_cast %897 : vector<1x4x8xf32> to vector<4x8xf32>
    %cst_572 = arith.constant dense<0.000000e+00> : vector<4x256xf32>
    %899 = tpu.matmul %898, %896, %cst_572 {dimension_numbers = #tpu.dot_dimension_numbers<[1], [0], [0], [1], [0, 0, 1, 1], [], []>} : vector<4x8xf32>, vector<8x256xf32>, vector<4x256xf32> -> vector<4x256xf32>
    %900 = arith.addf %891, %899 : vector<4x256xf32>
    %c239_i32_573 = arith.constant 239 : i32
    %901 = tpu.dynamic_rotate %830 by %c239_i32_573 dim 1 : vector<8x256xf32>, i32 -> vector<8x256xf32>
    %c8_574 = arith.constant 8 : index
    %c0_575 = arith.constant 0 : index
    %c0_576 = arith.constant 0 : index
    %902 = vector.load %arg7[%c8_574, %c0_575, %c0_576] : memref<9x1x256xf32, #tpu.memory_space<vmem>>, vector<1x1x256xf32>
    %903 = vector.shape_cast %902 : vector<1x1x256xf32> to vector<1x256xf32>
    %904 = vector.broadcast %903 : vector<1x256xf32> to vector<8x256xf32>
    %905 = arith.mulf %901, %904 : vector<8x256xf32>
    %c8_577 = arith.constant 8 : index
    %c0_578 = arith.constant 0 : index
    %c0_579 = arith.constant 0 : index
    %906 = vector.load %arg16[%c8_577, %c0_578, %c0_579] : memref<9x4x8xf32, #tpu.memory_space<vmem>>, vector<1x4x8xf32>
    %907 = vector.shape_cast %906 : vector<1x4x8xf32> to vector<4x8xf32>
    %cst_580 = arith.constant dense<0.000000e+00> : vector<4x256xf32>
    %908 = tpu.matmul %907, %905, %cst_580 {dimension_numbers = #tpu.dot_dimension_numbers<[1], [0], [0], [1], [0, 0, 1, 1], [], []>} : vector<4x8xf32>, vector<8x256xf32>, vector<4x256xf32> -> vector<4x256xf32>
    %909 = arith.addf %900, %908 : vector<4x256xf32>
    %c0_581 = arith.constant 0 : index
    %c0_582 = arith.constant 0 : index
    %910 = vector.load %arg17[%c0_581, %c0_582] : memref<4x1xf32, #tpu.memory_space<vmem>>, vector<4x1xf32>
    %911 = vector.broadcast %910 : vector<4x1xf32> to vector<4x256xf32>
    %912 = arith.addf %909, %911 : vector<4x256xf32>
    %913 = tpu.iota {dimensions = array<i32: 0>} : vector<4x1xi32>
    %cst_583 = arith.constant 0.000000e+00 : f32
    %914 = vector.broadcast %cst_583 : f32 to vector<4x1xf32>
    %cst_584 = arith.constant 0.000000e+00 : f32
    %915 = vector.broadcast %cst_584 : f32 to vector<4x1xf32>
    %c0_i32_585 = arith.constant 0 : i32
    %916 = vector.broadcast %c0_i32_585 : i32 to vector<4x1xi32>
    %917 = arith.cmpi sge, %913, %916 : vector<4x1xi32>
    %c4_i32_586 = arith.constant 4 : i32
    %918 = vector.broadcast %c4_i32_586 : i32 to vector<4x1xi32>
    %919 = arith.cmpi slt, %913, %918 : vector<4x1xi32>
    %920 = arith.andi %917, %919 : vector<4x1xi1>
    %cst_587 = arith.constant 1.000000e+00 : f32
    %cst_588 = arith.constant 0.000000e+00 : f32
    %921 = vector.broadcast %cst_587 : f32 to vector<4x1xf32>
    %922 = vector.broadcast %cst_588 : f32 to vector<4x1xf32>
    %923 = arith.select %920, %921, %922 : vector<4x1xi1>, vector<4x1xf32>
    %924 = vector.broadcast %923 : vector<4x1xf32> to vector<4x256xf32>
    %925 = arith.mulf %912, %924 : vector<4x256xf32>
    %926 = vector.shape_cast %925 : vector<4x256xf32> to vector<1x4x256xf32>
    %cst_589 = arith.constant dense<0.000000e+00> : vector<1xf32>
    %927 = vector.multi_reduction <add>, %926, %cst_589 [1, 2] : vector<1x4x256xf32> to vector<1xf32>
    %928 = vector.shape_cast %927 : vector<1xf32> to vector<1x1x1xf32>
    %929 = vector.extract %928[0, 0, 0] : f32 from vector<1x1x1xf32>
    %cst_590 = arith.constant 9.765625E-4 : f32
    %930 = arith.mulf %929, %cst_590 : f32
    %931 = vector.broadcast %930 : f32 to vector<4x256xf32>
    %932 = arith.subf %912, %931 : vector<4x256xf32>
    %933 = arith.mulf %932, %932 : vector<4x256xf32>
    %934 = vector.broadcast %923 : vector<4x1xf32> to vector<4x256xf32>
    %935 = arith.mulf %933, %934 : vector<4x256xf32>
    %936 = vector.shape_cast %935 : vector<4x256xf32> to vector<1x4x256xf32>
    %cst_591 = arith.constant dense<0.000000e+00> : vector<1xf32>
    %937 = vector.multi_reduction <add>, %936, %cst_591 [1, 2] : vector<1x4x256xf32> to vector<1xf32>
    %938 = vector.shape_cast %937 : vector<1xf32> to vector<1x1x1xf32>
    %939 = vector.extract %938[0, 0, 0] : f32 from vector<1x1x1xf32>
    %cst_592 = arith.constant 9.765625E-4 : f32
    %940 = arith.mulf %939, %cst_592 : f32
    %941 = vector.broadcast %930 : f32 to vector<4x1xf32>
    %942 = arith.mulf %941, %923 : vector<4x1xf32>
    %943 = arith.addf %914, %942 : vector<4x1xf32>
    %cst_593 = arith.constant 9.99999974E-6 : f32
    %944 = arith.addf %940, %cst_593 : f32
    %945 = math.rsqrt %944 : f32
    %946 = vector.broadcast %945 : f32 to vector<4x1xf32>
    %947 = arith.mulf %946, %923 : vector<4x1xf32>
    %948 = arith.addf %915, %947 : vector<4x1xf32>
    %949 = vector.broadcast %943 : vector<4x1xf32> to vector<4x256xf32>
    %950 = arith.subf %912, %949 : vector<4x256xf32>
    %c0_594 = arith.constant 0 : index
    %c0_595 = arith.constant 0 : index
    %951 = vector.load %arg18[%c0_594, %c0_595] : memref<4x1xf32, #tpu.memory_space<vmem>>, vector<4x1xf32>
    %952 = arith.mulf %948, %951 : vector<4x1xf32>
    %953 = vector.broadcast %952 : vector<4x1xf32> to vector<4x256xf32>
    %954 = arith.mulf %950, %953 : vector<4x256xf32>
    %c0_596 = arith.constant 0 : index
    %c0_597 = arith.constant 0 : index
    %955 = vector.load %arg19[%c0_596, %c0_597] : memref<4x1xf32, #tpu.memory_space<vmem>>, vector<4x1xf32>
    %956 = vector.broadcast %955 : vector<4x1xf32> to vector<4x256xf32>
    %957 = arith.addf %954, %956 : vector<4x256xf32>
    %958 = arith.negf %957 : vector<4x256xf32>
    %959 = math.exp %958 : vector<4x256xf32>
    %cst_598 = arith.constant 1.000000e+00 : f32
    %960 = vector.broadcast %cst_598 : f32 to vector<4x256xf32>
    %961 = arith.addf %960, %959 : vector<4x256xf32>
    %962 = arith.divf %960, %961 : vector<4x256xf32>
    %963 = arith.mulf %957, %962 : vector<4x256xf32>
    %c17_i32_599 = arith.constant 17 : i32
    %964 = tpu.dynamic_rotate %963 by %c17_i32_599 dim 1 : vector<4x256xf32>, i32 -> vector<4x256xf32>
    %c0_600 = arith.constant 0 : index
    %c0_601 = arith.constant 0 : index
    %c0_602 = arith.constant 0 : index
    %965 = vector.load %arg7[%c0_600, %c0_601, %c0_602] : memref<9x1x256xf32, #tpu.memory_space<vmem>>, vector<1x1x256xf32>
    %966 = vector.shape_cast %965 : vector<1x1x256xf32> to vector<1x256xf32>
    %967 = vector.broadcast %966 : vector<1x256xf32> to vector<4x256xf32>
    %968 = arith.mulf %964, %967 : vector<4x256xf32>
    %c0_603 = arith.constant 0 : index
    %c0_604 = arith.constant 0 : index
    %c0_605 = arith.constant 0 : index
    %969 = vector.load %arg20[%c0_603, %c0_604, %c0_605] : memref<9x16x4xf32, #tpu.memory_space<vmem>>, vector<1x16x4xf32>
    %970 = vector.shape_cast %969 : vector<1x16x4xf32> to vector<16x4xf32>
    %cst_606 = arith.constant dense<0.000000e+00> : vector<16x256xf32>
    %971 = tpu.matmul %970, %968, %cst_606 {dimension_numbers = #tpu.dot_dimension_numbers<[1], [0], [0], [1], [0, 0, 1, 1], [], []>} : vector<16x4xf32>, vector<4x256xf32>, vector<16x256xf32> -> vector<16x256xf32>
    %c16_i32_607 = arith.constant 16 : i32
    %972 = tpu.dynamic_rotate %963 by %c16_i32_607 dim 1 : vector<4x256xf32>, i32 -> vector<4x256xf32>
    %c1_608 = arith.constant 1 : index
    %c0_609 = arith.constant 0 : index
    %c0_610 = arith.constant 0 : index
    %973 = vector.load %arg7[%c1_608, %c0_609, %c0_610] : memref<9x1x256xf32, #tpu.memory_space<vmem>>, vector<1x1x256xf32>
    %974 = vector.shape_cast %973 : vector<1x1x256xf32> to vector<1x256xf32>
    %975 = vector.broadcast %974 : vector<1x256xf32> to vector<4x256xf32>
    %976 = arith.mulf %972, %975 : vector<4x256xf32>
    %c1_611 = arith.constant 1 : index
    %c0_612 = arith.constant 0 : index
    %c0_613 = arith.constant 0 : index
    %977 = vector.load %arg20[%c1_611, %c0_612, %c0_613] : memref<9x16x4xf32, #tpu.memory_space<vmem>>, vector<1x16x4xf32>
    %978 = vector.shape_cast %977 : vector<1x16x4xf32> to vector<16x4xf32>
    %cst_614 = arith.constant dense<0.000000e+00> : vector<16x256xf32>
    %979 = tpu.matmul %978, %976, %cst_614 {dimension_numbers = #tpu.dot_dimension_numbers<[1], [0], [0], [1], [0, 0, 1, 1], [], []>} : vector<16x4xf32>, vector<4x256xf32>, vector<16x256xf32> -> vector<16x256xf32>
    %980 = arith.addf %971, %979 : vector<16x256xf32>
    %c15_i32_615 = arith.constant 15 : i32
    %981 = tpu.dynamic_rotate %963 by %c15_i32_615 dim 1 : vector<4x256xf32>, i32 -> vector<4x256xf32>
    %c2_616 = arith.constant 2 : index
    %c0_617 = arith.constant 0 : index
    %c0_618 = arith.constant 0 : index
    %982 = vector.load %arg7[%c2_616, %c0_617, %c0_618] : memref<9x1x256xf32, #tpu.memory_space<vmem>>, vector<1x1x256xf32>
    %983 = vector.shape_cast %982 : vector<1x1x256xf32> to vector<1x256xf32>
    %984 = vector.broadcast %983 : vector<1x256xf32> to vector<4x256xf32>
    %985 = arith.mulf %981, %984 : vector<4x256xf32>
    %c2_619 = arith.constant 2 : index
    %c0_620 = arith.constant 0 : index
    %c0_621 = arith.constant 0 : index
    %986 = vector.load %arg20[%c2_619, %c0_620, %c0_621] : memref<9x16x4xf32, #tpu.memory_space<vmem>>, vector<1x16x4xf32>
    %987 = vector.shape_cast %986 : vector<1x16x4xf32> to vector<16x4xf32>
    %cst_622 = arith.constant dense<0.000000e+00> : vector<16x256xf32>
    %988 = tpu.matmul %987, %985, %cst_622 {dimension_numbers = #tpu.dot_dimension_numbers<[1], [0], [0], [1], [0, 0, 1, 1], [], []>} : vector<16x4xf32>, vector<4x256xf32>, vector<16x256xf32> -> vector<16x256xf32>
    %989 = arith.addf %980, %988 : vector<16x256xf32>
    %c1_i32_623 = arith.constant 1 : i32
    %990 = tpu.dynamic_rotate %963 by %c1_i32_623 dim 1 : vector<4x256xf32>, i32 -> vector<4x256xf32>
    %c3_624 = arith.constant 3 : index
    %c0_625 = arith.constant 0 : index
    %c0_626 = arith.constant 0 : index
    %991 = vector.load %arg7[%c3_624, %c0_625, %c0_626] : memref<9x1x256xf32, #tpu.memory_space<vmem>>, vector<1x1x256xf32>
    %992 = vector.shape_cast %991 : vector<1x1x256xf32> to vector<1x256xf32>
    %993 = vector.broadcast %992 : vector<1x256xf32> to vector<4x256xf32>
    %994 = arith.mulf %990, %993 : vector<4x256xf32>
    %c3_627 = arith.constant 3 : index
    %c0_628 = arith.constant 0 : index
    %c0_629 = arith.constant 0 : index
    %995 = vector.load %arg20[%c3_627, %c0_628, %c0_629] : memref<9x16x4xf32, #tpu.memory_space<vmem>>, vector<1x16x4xf32>
    %996 = vector.shape_cast %995 : vector<1x16x4xf32> to vector<16x4xf32>
    %cst_630 = arith.constant dense<0.000000e+00> : vector<16x256xf32>
    %997 = tpu.matmul %996, %994, %cst_630 {dimension_numbers = #tpu.dot_dimension_numbers<[1], [0], [0], [1], [0, 0, 1, 1], [], []>} : vector<16x4xf32>, vector<4x256xf32>, vector<16x256xf32> -> vector<16x256xf32>
    %998 = arith.addf %989, %997 : vector<16x256xf32>
    %c4_631 = arith.constant 4 : index
    %c0_632 = arith.constant 0 : index
    %c0_633 = arith.constant 0 : index
    %999 = vector.load %arg7[%c4_631, %c0_632, %c0_633] : memref<9x1x256xf32, #tpu.memory_space<vmem>>, vector<1x1x256xf32>
    %1000 = vector.shape_cast %999 : vector<1x1x256xf32> to vector<1x256xf32>
    %1001 = vector.broadcast %1000 : vector<1x256xf32> to vector<4x256xf32>
    %1002 = arith.mulf %963, %1001 : vector<4x256xf32>
    %c4_634 = arith.constant 4 : index
    %c0_635 = arith.constant 0 : index
    %c0_636 = arith.constant 0 : index
    %1003 = vector.load %arg20[%c4_634, %c0_635, %c0_636] : memref<9x16x4xf32, #tpu.memory_space<vmem>>, vector<1x16x4xf32>
    %1004 = vector.shape_cast %1003 : vector<1x16x4xf32> to vector<16x4xf32>
    %cst_637 = arith.constant dense<0.000000e+00> : vector<16x256xf32>
    %1005 = tpu.matmul %1004, %1002, %cst_637 {dimension_numbers = #tpu.dot_dimension_numbers<[1], [0], [0], [1], [0, 0, 1, 1], [], []>} : vector<16x4xf32>, vector<4x256xf32>, vector<16x256xf32> -> vector<16x256xf32>
    %1006 = arith.addf %998, %1005 : vector<16x256xf32>
    %c255_i32_638 = arith.constant 255 : i32
    %1007 = tpu.dynamic_rotate %963 by %c255_i32_638 dim 1 : vector<4x256xf32>, i32 -> vector<4x256xf32>
    %c5_639 = arith.constant 5 : index
    %c0_640 = arith.constant 0 : index
    %c0_641 = arith.constant 0 : index
    %1008 = vector.load %arg7[%c5_639, %c0_640, %c0_641] : memref<9x1x256xf32, #tpu.memory_space<vmem>>, vector<1x1x256xf32>
    %1009 = vector.shape_cast %1008 : vector<1x1x256xf32> to vector<1x256xf32>
    %1010 = vector.broadcast %1009 : vector<1x256xf32> to vector<4x256xf32>
    %1011 = arith.mulf %1007, %1010 : vector<4x256xf32>
    %c5_642 = arith.constant 5 : index
    %c0_643 = arith.constant 0 : index
    %c0_644 = arith.constant 0 : index
    %1012 = vector.load %arg20[%c5_642, %c0_643, %c0_644] : memref<9x16x4xf32, #tpu.memory_space<vmem>>, vector<1x16x4xf32>
    %1013 = vector.shape_cast %1012 : vector<1x16x4xf32> to vector<16x4xf32>
    %cst_645 = arith.constant dense<0.000000e+00> : vector<16x256xf32>
    %1014 = tpu.matmul %1013, %1011, %cst_645 {dimension_numbers = #tpu.dot_dimension_numbers<[1], [0], [0], [1], [0, 0, 1, 1], [], []>} : vector<16x4xf32>, vector<4x256xf32>, vector<16x256xf32> -> vector<16x256xf32>
    %1015 = arith.addf %1006, %1014 : vector<16x256xf32>
    %c241_i32_646 = arith.constant 241 : i32
    %1016 = tpu.dynamic_rotate %963 by %c241_i32_646 dim 1 : vector<4x256xf32>, i32 -> vector<4x256xf32>
    %c6_647 = arith.constant 6 : index
    %c0_648 = arith.constant 0 : index
    %c0_649 = arith.constant 0 : index
    %1017 = vector.load %arg7[%c6_647, %c0_648, %c0_649] : memref<9x1x256xf32, #tpu.memory_space<vmem>>, vector<1x1x256xf32>
    %1018 = vector.shape_cast %1017 : vector<1x1x256xf32> to vector<1x256xf32>
    %1019 = vector.broadcast %1018 : vector<1x256xf32> to vector<4x256xf32>
    %1020 = arith.mulf %1016, %1019 : vector<4x256xf32>
    %c6_650 = arith.constant 6 : index
    %c0_651 = arith.constant 0 : index
    %c0_652 = arith.constant 0 : index
    %1021 = vector.load %arg20[%c6_650, %c0_651, %c0_652] : memref<9x16x4xf32, #tpu.memory_space<vmem>>, vector<1x16x4xf32>
    %1022 = vector.shape_cast %1021 : vector<1x16x4xf32> to vector<16x4xf32>
    %cst_653 = arith.constant dense<0.000000e+00> : vector<16x256xf32>
    %1023 = tpu.matmul %1022, %1020, %cst_653 {dimension_numbers = #tpu.dot_dimension_numbers<[1], [0], [0], [1], [0, 0, 1, 1], [], []>} : vector<16x4xf32>, vector<4x256xf32>, vector<16x256xf32> -> vector<16x256xf32>
    %1024 = arith.addf %1015, %1023 : vector<16x256xf32>
    %c240_i32_654 = arith.constant 240 : i32
    %1025 = tpu.dynamic_rotate %963 by %c240_i32_654 dim 1 : vector<4x256xf32>, i32 -> vector<4x256xf32>
    %c7_655 = arith.constant 7 : index
    %c0_656 = arith.constant 0 : index
    %c0_657 = arith.constant 0 : index
    %1026 = vector.load %arg7[%c7_655, %c0_656, %c0_657] : memref<9x1x256xf32, #tpu.memory_space<vmem>>, vector<1x1x256xf32>
    %1027 = vector.shape_cast %1026 : vector<1x1x256xf32> to vector<1x256xf32>
    %1028 = vector.broadcast %1027 : vector<1x256xf32> to vector<4x256xf32>
    %1029 = arith.mulf %1025, %1028 : vector<4x256xf32>
    %c7_658 = arith.constant 7 : index
    %c0_659 = arith.constant 0 : index
    %c0_660 = arith.constant 0 : index
    %1030 = vector.load %arg20[%c7_658, %c0_659, %c0_660] : memref<9x16x4xf32, #tpu.memory_space<vmem>>, vector<1x16x4xf32>
    %1031 = vector.shape_cast %1030 : vector<1x16x4xf32> to vector<16x4xf32>
    %cst_661 = arith.constant dense<0.000000e+00> : vector<16x256xf32>
    %1032 = tpu.matmul %1031, %1029, %cst_661 {dimension_numbers = #tpu.dot_dimension_numbers<[1], [0], [0], [1], [0, 0, 1, 1], [], []>} : vector<16x4xf32>, vector<4x256xf32>, vector<16x256xf32> -> vector<16x256xf32>
    %1033 = arith.addf %1024, %1032 : vector<16x256xf32>
    %c239_i32_662 = arith.constant 239 : i32
    %1034 = tpu.dynamic_rotate %963 by %c239_i32_662 dim 1 : vector<4x256xf32>, i32 -> vector<4x256xf32>
    %c8_663 = arith.constant 8 : index
    %c0_664 = arith.constant 0 : index
    %c0_665 = arith.constant 0 : index
    %1035 = vector.load %arg7[%c8_663, %c0_664, %c0_665] : memref<9x1x256xf32, #tpu.memory_space<vmem>>, vector<1x1x256xf32>
    %1036 = vector.shape_cast %1035 : vector<1x1x256xf32> to vector<1x256xf32>
    %1037 = vector.broadcast %1036 : vector<1x256xf32> to vector<4x256xf32>
    %1038 = arith.mulf %1034, %1037 : vector<4x256xf32>
    %c8_666 = arith.constant 8 : index
    %c0_667 = arith.constant 0 : index
    %c0_668 = arith.constant 0 : index
    %1039 = vector.load %arg20[%c8_666, %c0_667, %c0_668] : memref<9x16x4xf32, #tpu.memory_space<vmem>>, vector<1x16x4xf32>
    %1040 = vector.shape_cast %1039 : vector<1x16x4xf32> to vector<16x4xf32>
    %cst_669 = arith.constant dense<0.000000e+00> : vector<16x256xf32>
    %1041 = tpu.matmul %1040, %1038, %cst_669 {dimension_numbers = #tpu.dot_dimension_numbers<[1], [0], [0], [1], [0, 0, 1, 1], [], []>} : vector<16x4xf32>, vector<4x256xf32>, vector<16x256xf32> -> vector<16x256xf32>
    %1042 = arith.addf %1033, %1041 : vector<16x256xf32>
    %c0_670 = arith.constant 0 : index
    %c0_671 = arith.constant 0 : index
    %1043 = vector.load %arg21[%c0_670, %c0_671] : memref<16x1xf32, #tpu.memory_space<vmem>>, vector<16x1xf32>
    %1044 = vector.broadcast %1043 : vector<16x1xf32> to vector<16x256xf32>
    %1045 = arith.addf %1042, %1044 : vector<16x256xf32>
    %c0_672 = arith.constant 0 : index
    %c0_673 = arith.constant 0 : index
    %1046 = vector.load %arg22[%c0_672, %c0_673] : memref<16x8xf32, #tpu.memory_space<vmem>>, vector<16x8xf32>
    %cst_674 = arith.constant dense<0.000000e+00> : vector<16x256xf32>
    %1047 = tpu.matmul %1046, %743, %cst_674 {dimension_numbers = #tpu.dot_dimension_numbers<[1], [0], [0], [1], [0, 0, 1, 1], [], []>} : vector<16x8xf32>, vector<8x256xf32>, vector<16x256xf32> -> vector<16x256xf32>
    %c0_675 = arith.constant 0 : index
    %c0_676 = arith.constant 0 : index
    %1048 = vector.load %arg23[%c0_675, %c0_676] : memref<16x1xf32, #tpu.memory_space<vmem>>, vector<16x1xf32>
    %1049 = vector.broadcast %1048 : vector<16x1xf32> to vector<16x256xf32>
    %1050 = arith.addf %1047, %1049 : vector<16x256xf32>
    %1051 = arith.addf %1045, %1050 : vector<16x256xf32>
    %c0_677 = arith.constant 0 : index
    %c0_678 = arith.constant 0 : index
    %1052 = vector.load %arg24[%c0_677, %c0_678] : memref<256x64xf32, #tpu.memory_space<vmem>>, vector<256x64xf32>
    %cst_679 = arith.constant dense<0.000000e+00> : vector<16x64xf32>
    %1053 = tpu.matmul %1051, %1052, %cst_679 {dimension_numbers = #tpu.dot_dimension_numbers<[1], [0], [0], [1], [0, 0, 1, 1], [], []>} : vector<16x256xf32>, vector<256x64xf32>, vector<16x64xf32> -> vector<16x64xf32>
    %1054 = tpu.iota {dimensions = array<i32: 0>} : vector<16x1xi32>
    %cst_680 = arith.constant 0.000000e+00 : f32
    %1055 = vector.broadcast %cst_680 : f32 to vector<16x1xf32>
    %cst_681 = arith.constant 0.000000e+00 : f32
    %1056 = vector.broadcast %cst_681 : f32 to vector<16x1xf32>
    %c0_i32_682 = arith.constant 0 : i32
    %1057 = vector.broadcast %c0_i32_682 : i32 to vector<16x1xi32>
    %1058 = arith.cmpi sge, %1054, %1057 : vector<16x1xi32>
    %c4_i32_683 = arith.constant 4 : i32
    %1059 = vector.broadcast %c4_i32_683 : i32 to vector<16x1xi32>
    %1060 = arith.cmpi slt, %1054, %1059 : vector<16x1xi32>
    %1061 = arith.andi %1058, %1060 : vector<16x1xi1>
    %cst_684 = arith.constant 1.000000e+00 : f32
    %cst_685 = arith.constant 0.000000e+00 : f32
    %1062 = vector.broadcast %cst_684 : f32 to vector<16x1xf32>
    %1063 = vector.broadcast %cst_685 : f32 to vector<16x1xf32>
    %1064 = arith.select %1061, %1062, %1063 : vector<16x1xi1>, vector<16x1xf32>
    %1065 = vector.broadcast %1064 : vector<16x1xf32> to vector<16x64xf32>
    %1066 = arith.mulf %1053, %1065 : vector<16x64xf32>
    %1067 = vector.shape_cast %1066 : vector<16x64xf32> to vector<1x16x64xf32>
    %cst_686 = arith.constant dense<0.000000e+00> : vector<1xf32>
    %1068 = vector.multi_reduction <add>, %1067, %cst_686 [1, 2] : vector<1x16x64xf32> to vector<1xf32>
    %1069 = vector.shape_cast %1068 : vector<1xf32> to vector<1x1x1xf32>
    %1070 = vector.extract %1069[0, 0, 0] : f32 from vector<1x1x1xf32>
    %cst_687 = arith.constant 3.906250e-03 : f32
    %1071 = arith.mulf %1070, %cst_687 : f32
    %1072 = vector.broadcast %1071 : f32 to vector<16x64xf32>
    %1073 = arith.subf %1053, %1072 : vector<16x64xf32>
    %1074 = arith.mulf %1073, %1073 : vector<16x64xf32>
    %1075 = vector.broadcast %1064 : vector<16x1xf32> to vector<16x64xf32>
    %1076 = arith.mulf %1074, %1075 : vector<16x64xf32>
    %1077 = vector.shape_cast %1076 : vector<16x64xf32> to vector<1x16x64xf32>
    %cst_688 = arith.constant dense<0.000000e+00> : vector<1xf32>
    %1078 = vector.multi_reduction <add>, %1077, %cst_688 [1, 2] : vector<1x16x64xf32> to vector<1xf32>
    %1079 = vector.shape_cast %1078 : vector<1xf32> to vector<1x1x1xf32>
    %1080 = vector.extract %1079[0, 0, 0] : f32 from vector<1x1x1xf32>
    %cst_689 = arith.constant 3.906250e-03 : f32
    %1081 = arith.mulf %1080, %cst_689 : f32
    %1082 = vector.broadcast %1071 : f32 to vector<16x1xf32>
    %1083 = arith.mulf %1082, %1064 : vector<16x1xf32>
    %1084 = arith.addf %1055, %1083 : vector<16x1xf32>
    %cst_690 = arith.constant 9.99999974E-6 : f32
    %1085 = arith.addf %1081, %cst_690 : f32
    %1086 = math.rsqrt %1085 : f32
    %1087 = vector.broadcast %1086 : f32 to vector<16x1xf32>
    %1088 = arith.mulf %1087, %1064 : vector<16x1xf32>
    %1089 = arith.addf %1056, %1088 : vector<16x1xf32>
    %c4_i32_691 = arith.constant 4 : i32
    %1090 = vector.broadcast %c4_i32_691 : i32 to vector<16x1xi32>
    %1091 = arith.cmpi sge, %1054, %1090 : vector<16x1xi32>
    %c8_i32_692 = arith.constant 8 : i32
    %1092 = vector.broadcast %c8_i32_692 : i32 to vector<16x1xi32>
    %1093 = arith.cmpi slt, %1054, %1092 : vector<16x1xi32>
    %1094 = arith.andi %1091, %1093 : vector<16x1xi1>
    %cst_693 = arith.constant 1.000000e+00 : f32
    %cst_694 = arith.constant 0.000000e+00 : f32
    %1095 = vector.broadcast %cst_693 : f32 to vector<16x1xf32>
    %1096 = vector.broadcast %cst_694 : f32 to vector<16x1xf32>
    %1097 = arith.select %1094, %1095, %1096 : vector<16x1xi1>, vector<16x1xf32>
    %1098 = vector.broadcast %1097 : vector<16x1xf32> to vector<16x64xf32>
    %1099 = arith.mulf %1053, %1098 : vector<16x64xf32>
    %1100 = vector.shape_cast %1099 : vector<16x64xf32> to vector<1x16x64xf32>
    %cst_695 = arith.constant dense<0.000000e+00> : vector<1xf32>
    %1101 = vector.multi_reduction <add>, %1100, %cst_695 [1, 2] : vector<1x16x64xf32> to vector<1xf32>
    %1102 = vector.shape_cast %1101 : vector<1xf32> to vector<1x1x1xf32>
    %1103 = vector.extract %1102[0, 0, 0] : f32 from vector<1x1x1xf32>
    %cst_696 = arith.constant 3.906250e-03 : f32
    %1104 = arith.mulf %1103, %cst_696 : f32
    %1105 = vector.broadcast %1104 : f32 to vector<16x64xf32>
    %1106 = arith.subf %1053, %1105 : vector<16x64xf32>
    %1107 = arith.mulf %1106, %1106 : vector<16x64xf32>
    %1108 = vector.broadcast %1097 : vector<16x1xf32> to vector<16x64xf32>
    %1109 = arith.mulf %1107, %1108 : vector<16x64xf32>
    %1110 = vector.shape_cast %1109 : vector<16x64xf32> to vector<1x16x64xf32>
    %cst_697 = arith.constant dense<0.000000e+00> : vector<1xf32>
    %1111 = vector.multi_reduction <add>, %1110, %cst_697 [1, 2] : vector<1x16x64xf32> to vector<1xf32>
    %1112 = vector.shape_cast %1111 : vector<1xf32> to vector<1x1x1xf32>
    %1113 = vector.extract %1112[0, 0, 0] : f32 from vector<1x1x1xf32>
    %cst_698 = arith.constant 3.906250e-03 : f32
    %1114 = arith.mulf %1113, %cst_698 : f32
    %1115 = vector.broadcast %1104 : f32 to vector<16x1xf32>
    %1116 = arith.mulf %1115, %1097 : vector<16x1xf32>
    %1117 = arith.addf %1084, %1116 : vector<16x1xf32>
    %cst_699 = arith.constant 9.99999974E-6 : f32
    %1118 = arith.addf %1114, %cst_699 : f32
    %1119 = math.rsqrt %1118 : f32
    %1120 = vector.broadcast %1119 : f32 to vector<16x1xf32>
    %1121 = arith.mulf %1120, %1097 : vector<16x1xf32>
    %1122 = arith.addf %1089, %1121 : vector<16x1xf32>
    %c8_i32_700 = arith.constant 8 : i32
    %1123 = vector.broadcast %c8_i32_700 : i32 to vector<16x1xi32>
    %1124 = arith.cmpi sge, %1054, %1123 : vector<16x1xi32>
    %c12_i32 = arith.constant 12 : i32
    %1125 = vector.broadcast %c12_i32 : i32 to vector<16x1xi32>
    %1126 = arith.cmpi slt, %1054, %1125 : vector<16x1xi32>
    %1127 = arith.andi %1124, %1126 : vector<16x1xi1>
    %cst_701 = arith.constant 1.000000e+00 : f32
    %cst_702 = arith.constant 0.000000e+00 : f32
    %1128 = vector.broadcast %cst_701 : f32 to vector<16x1xf32>
    %1129 = vector.broadcast %cst_702 : f32 to vector<16x1xf32>
    %1130 = arith.select %1127, %1128, %1129 : vector<16x1xi1>, vector<16x1xf32>
    %1131 = vector.broadcast %1130 : vector<16x1xf32> to vector<16x64xf32>
    %1132 = arith.mulf %1053, %1131 : vector<16x64xf32>
    %1133 = vector.shape_cast %1132 : vector<16x64xf32> to vector<1x16x64xf32>
    %cst_703 = arith.constant dense<0.000000e+00> : vector<1xf32>
    %1134 = vector.multi_reduction <add>, %1133, %cst_703 [1, 2] : vector<1x16x64xf32> to vector<1xf32>
    %1135 = vector.shape_cast %1134 : vector<1xf32> to vector<1x1x1xf32>
    %1136 = vector.extract %1135[0, 0, 0] : f32 from vector<1x1x1xf32>
    %cst_704 = arith.constant 3.906250e-03 : f32
    %1137 = arith.mulf %1136, %cst_704 : f32
    %1138 = vector.broadcast %1137 : f32 to vector<16x64xf32>
    %1139 = arith.subf %1053, %1138 : vector<16x64xf32>
    %1140 = arith.mulf %1139, %1139 : vector<16x64xf32>
    %1141 = vector.broadcast %1130 : vector<16x1xf32> to vector<16x64xf32>
    %1142 = arith.mulf %1140, %1141 : vector<16x64xf32>
    %1143 = vector.shape_cast %1142 : vector<16x64xf32> to vector<1x16x64xf32>
    %cst_705 = arith.constant dense<0.000000e+00> : vector<1xf32>
    %1144 = vector.multi_reduction <add>, %1143, %cst_705 [1, 2] : vector<1x16x64xf32> to vector<1xf32>
    %1145 = vector.shape_cast %1144 : vector<1xf32> to vector<1x1x1xf32>
    %1146 = vector.extract %1145[0, 0, 0] : f32 from vector<1x1x1xf32>
    %cst_706 = arith.constant 3.906250e-03 : f32
    %1147 = arith.mulf %1146, %cst_706 : f32
    %1148 = vector.broadcast %1137 : f32 to vector<16x1xf32>
    %1149 = arith.mulf %1148, %1130 : vector<16x1xf32>
    %1150 = arith.addf %1117, %1149 : vector<16x1xf32>
    %cst_707 = arith.constant 9.99999974E-6 : f32
    %1151 = arith.addf %1147, %cst_707 : f32
    %1152 = math.rsqrt %1151 : f32
    %1153 = vector.broadcast %1152 : f32 to vector<16x1xf32>
    %1154 = arith.mulf %1153, %1130 : vector<16x1xf32>
    %1155 = arith.addf %1122, %1154 : vector<16x1xf32>
    %c12_i32_708 = arith.constant 12 : i32
    %1156 = vector.broadcast %c12_i32_708 : i32 to vector<16x1xi32>
    %1157 = arith.cmpi sge, %1054, %1156 : vector<16x1xi32>
    %c16_i32_709 = arith.constant 16 : i32
    %1158 = vector.broadcast %c16_i32_709 : i32 to vector<16x1xi32>
    %1159 = arith.cmpi slt, %1054, %1158 : vector<16x1xi32>
    %1160 = arith.andi %1157, %1159 : vector<16x1xi1>
    %cst_710 = arith.constant 1.000000e+00 : f32
    %cst_711 = arith.constant 0.000000e+00 : f32
    %1161 = vector.broadcast %cst_710 : f32 to vector<16x1xf32>
    %1162 = vector.broadcast %cst_711 : f32 to vector<16x1xf32>
    %1163 = arith.select %1160, %1161, %1162 : vector<16x1xi1>, vector<16x1xf32>
    %1164 = vector.broadcast %1163 : vector<16x1xf32> to vector<16x64xf32>
    %1165 = arith.mulf %1053, %1164 : vector<16x64xf32>
    %1166 = vector.shape_cast %1165 : vector<16x64xf32> to vector<1x16x64xf32>
    %cst_712 = arith.constant dense<0.000000e+00> : vector<1xf32>
    %1167 = vector.multi_reduction <add>, %1166, %cst_712 [1, 2] : vector<1x16x64xf32> to vector<1xf32>
    %1168 = vector.shape_cast %1167 : vector<1xf32> to vector<1x1x1xf32>
    %1169 = vector.extract %1168[0, 0, 0] : f32 from vector<1x1x1xf32>
    %cst_713 = arith.constant 3.906250e-03 : f32
    %1170 = arith.mulf %1169, %cst_713 : f32
    %1171 = vector.broadcast %1170 : f32 to vector<16x64xf32>
    %1172 = arith.subf %1053, %1171 : vector<16x64xf32>
    %1173 = arith.mulf %1172, %1172 : vector<16x64xf32>
    %1174 = vector.broadcast %1163 : vector<16x1xf32> to vector<16x64xf32>
    %1175 = arith.mulf %1173, %1174 : vector<16x64xf32>
    %1176 = vector.shape_cast %1175 : vector<16x64xf32> to vector<1x16x64xf32>
    %cst_714 = arith.constant dense<0.000000e+00> : vector<1xf32>
    %1177 = vector.multi_reduction <add>, %1176, %cst_714 [1, 2] : vector<1x16x64xf32> to vector<1xf32>
    %1178 = vector.shape_cast %1177 : vector<1xf32> to vector<1x1x1xf32>
    %1179 = vector.extract %1178[0, 0, 0] : f32 from vector<1x1x1xf32>
    %cst_715 = arith.constant 3.906250e-03 : f32
    %1180 = arith.mulf %1179, %cst_715 : f32
    %1181 = vector.broadcast %1170 : f32 to vector<16x1xf32>
    %1182 = arith.mulf %1181, %1163 : vector<16x1xf32>
    %1183 = arith.addf %1150, %1182 : vector<16x1xf32>
    %cst_716 = arith.constant 9.99999974E-6 : f32
    %1184 = arith.addf %1180, %cst_716 : f32
    %1185 = math.rsqrt %1184 : f32
    %1186 = vector.broadcast %1185 : f32 to vector<16x1xf32>
    %1187 = arith.mulf %1186, %1163 : vector<16x1xf32>
    %1188 = arith.addf %1155, %1187 : vector<16x1xf32>
    %1189 = vector.broadcast %1183 : vector<16x1xf32> to vector<16x64xf32>
    %1190 = arith.subf %1053, %1189 : vector<16x64xf32>
    %c0_717 = arith.constant 0 : index
    %c0_718 = arith.constant 0 : index
    %1191 = vector.load %arg25[%c0_717, %c0_718] : memref<16x1xf32, #tpu.memory_space<vmem>>, vector<16x1xf32>
    %1192 = arith.mulf %1188, %1191 : vector<16x1xf32>
    %1193 = vector.broadcast %1192 : vector<16x1xf32> to vector<16x64xf32>
    %1194 = arith.mulf %1190, %1193 : vector<16x64xf32>
    %c0_719 = arith.constant 0 : index
    %c0_720 = arith.constant 0 : index
    %1195 = vector.load %arg26[%c0_719, %c0_720] : memref<16x1xf32, #tpu.memory_space<vmem>>, vector<16x1xf32>
    %1196 = vector.broadcast %1195 : vector<16x1xf32> to vector<16x64xf32>
    %1197 = arith.addf %1194, %1196 : vector<16x64xf32>
    %1198 = arith.negf %1197 : vector<16x64xf32>
    %1199 = math.exp %1198 : vector<16x64xf32>
    %cst_721 = arith.constant 1.000000e+00 : f32
    %1200 = vector.broadcast %cst_721 : f32 to vector<16x64xf32>
    %1201 = arith.addf %1200, %1199 : vector<16x64xf32>
    %1202 = arith.divf %1200, %1201 : vector<16x64xf32>
    %1203 = arith.mulf %1197, %1202 : vector<16x64xf32>
    %c0_722 = arith.constant 0 : index
    %c0_723 = arith.constant 0 : index
    %c0_724 = arith.constant 0 : index
    %1204 = vector.load %arg27[%c0_722, %c0_723, %c0_724] : memref<9x64x64xf32, #tpu.memory_space<vmem>>, vector<1x64x64xf32>
    %1205 = vector.shape_cast %1204 : vector<1x64x64xf32> to vector<64x64xf32>
    %cst_725 = arith.constant dense<0.000000e+00> : vector<16x64xf32>
    %1206 = tpu.matmul %1203, %1205, %cst_725 {dimension_numbers = #tpu.dot_dimension_numbers<[1], [0], [0], [1], [0, 0, 1, 1], [], []>} : vector<16x64xf32>, vector<64x64xf32>, vector<16x64xf32> -> vector<16x64xf32>
    %c0_726 = arith.constant 0 : index
    %c0_727 = arith.constant 0 : index
    %c0_728 = arith.constant 0 : index
    %1207 = vector.load %arg28[%c0_726, %c0_727, %c0_728] : memref<9x8x16xf32, #tpu.memory_space<vmem>>, vector<1x8x16xf32>
    %1208 = vector.shape_cast %1207 : vector<1x8x16xf32> to vector<8x16xf32>
    %cst_729 = arith.constant dense<0.000000e+00> : vector<8x64xf32>
    %1209 = tpu.matmul %1208, %1206, %cst_729 {dimension_numbers = #tpu.dot_dimension_numbers<[1], [0], [0], [1], [0, 0, 1, 1], [], []>} : vector<8x16xf32>, vector<16x64xf32>, vector<8x64xf32> -> vector<8x64xf32>
    %c1_730 = arith.constant 1 : index
    %c0_731 = arith.constant 0 : index
    %c0_732 = arith.constant 0 : index
    %1210 = vector.load %arg27[%c1_730, %c0_731, %c0_732] : memref<9x64x64xf32, #tpu.memory_space<vmem>>, vector<1x64x64xf32>
    %1211 = vector.shape_cast %1210 : vector<1x64x64xf32> to vector<64x64xf32>
    %cst_733 = arith.constant dense<0.000000e+00> : vector<16x64xf32>
    %1212 = tpu.matmul %1203, %1211, %cst_733 {dimension_numbers = #tpu.dot_dimension_numbers<[1], [0], [0], [1], [0, 0, 1, 1], [], []>} : vector<16x64xf32>, vector<64x64xf32>, vector<16x64xf32> -> vector<16x64xf32>
    %c1_734 = arith.constant 1 : index
    %c0_735 = arith.constant 0 : index
    %c0_736 = arith.constant 0 : index
    %1213 = vector.load %arg28[%c1_734, %c0_735, %c0_736] : memref<9x8x16xf32, #tpu.memory_space<vmem>>, vector<1x8x16xf32>
    %1214 = vector.shape_cast %1213 : vector<1x8x16xf32> to vector<8x16xf32>
    %cst_737 = arith.constant dense<0.000000e+00> : vector<8x64xf32>
    %1215 = tpu.matmul %1214, %1212, %cst_737 {dimension_numbers = #tpu.dot_dimension_numbers<[1], [0], [0], [1], [0, 0, 1, 1], [], []>} : vector<8x16xf32>, vector<16x64xf32>, vector<8x64xf32> -> vector<8x64xf32>
    %1216 = arith.addf %1209, %1215 : vector<8x64xf32>
    %c2_738 = arith.constant 2 : index
    %c0_739 = arith.constant 0 : index
    %c0_740 = arith.constant 0 : index
    %1217 = vector.load %arg27[%c2_738, %c0_739, %c0_740] : memref<9x64x64xf32, #tpu.memory_space<vmem>>, vector<1x64x64xf32>
    %1218 = vector.shape_cast %1217 : vector<1x64x64xf32> to vector<64x64xf32>
    %cst_741 = arith.constant dense<0.000000e+00> : vector<16x64xf32>
    %1219 = tpu.matmul %1203, %1218, %cst_741 {dimension_numbers = #tpu.dot_dimension_numbers<[1], [0], [0], [1], [0, 0, 1, 1], [], []>} : vector<16x64xf32>, vector<64x64xf32>, vector<16x64xf32> -> vector<16x64xf32>
    %c2_742 = arith.constant 2 : index
    %c0_743 = arith.constant 0 : index
    %c0_744 = arith.constant 0 : index
    %1220 = vector.load %arg28[%c2_742, %c0_743, %c0_744] : memref<9x8x16xf32, #tpu.memory_space<vmem>>, vector<1x8x16xf32>
    %1221 = vector.shape_cast %1220 : vector<1x8x16xf32> to vector<8x16xf32>
    %cst_745 = arith.constant dense<0.000000e+00> : vector<8x64xf32>
    %1222 = tpu.matmul %1221, %1219, %cst_745 {dimension_numbers = #tpu.dot_dimension_numbers<[1], [0], [0], [1], [0, 0, 1, 1], [], []>} : vector<8x16xf32>, vector<16x64xf32>, vector<8x64xf32> -> vector<8x64xf32>
    %1223 = arith.addf %1216, %1222 : vector<8x64xf32>
    %c3_746 = arith.constant 3 : index
    %c0_747 = arith.constant 0 : index
    %c0_748 = arith.constant 0 : index
    %1224 = vector.load %arg27[%c3_746, %c0_747, %c0_748] : memref<9x64x64xf32, #tpu.memory_space<vmem>>, vector<1x64x64xf32>
    %1225 = vector.shape_cast %1224 : vector<1x64x64xf32> to vector<64x64xf32>
    %cst_749 = arith.constant dense<0.000000e+00> : vector<16x64xf32>
    %1226 = tpu.matmul %1203, %1225, %cst_749 {dimension_numbers = #tpu.dot_dimension_numbers<[1], [0], [0], [1], [0, 0, 1, 1], [], []>} : vector<16x64xf32>, vector<64x64xf32>, vector<16x64xf32> -> vector<16x64xf32>
    %c3_750 = arith.constant 3 : index
    %c0_751 = arith.constant 0 : index
    %c0_752 = arith.constant 0 : index
    %1227 = vector.load %arg28[%c3_750, %c0_751, %c0_752] : memref<9x8x16xf32, #tpu.memory_space<vmem>>, vector<1x8x16xf32>
    %1228 = vector.shape_cast %1227 : vector<1x8x16xf32> to vector<8x16xf32>
    %cst_753 = arith.constant dense<0.000000e+00> : vector<8x64xf32>
    %1229 = tpu.matmul %1228, %1226, %cst_753 {dimension_numbers = #tpu.dot_dimension_numbers<[1], [0], [0], [1], [0, 0, 1, 1], [], []>} : vector<8x16xf32>, vector<16x64xf32>, vector<8x64xf32> -> vector<8x64xf32>
    %1230 = arith.addf %1223, %1229 : vector<8x64xf32>
    %c4_754 = arith.constant 4 : index
    %c0_755 = arith.constant 0 : index
    %c0_756 = arith.constant 0 : index
    %1231 = vector.load %arg27[%c4_754, %c0_755, %c0_756] : memref<9x64x64xf32, #tpu.memory_space<vmem>>, vector<1x64x64xf32>
    %1232 = vector.shape_cast %1231 : vector<1x64x64xf32> to vector<64x64xf32>
    %cst_757 = arith.constant dense<0.000000e+00> : vector<16x64xf32>
    %1233 = tpu.matmul %1203, %1232, %cst_757 {dimension_numbers = #tpu.dot_dimension_numbers<[1], [0], [0], [1], [0, 0, 1, 1], [], []>} : vector<16x64xf32>, vector<64x64xf32>, vector<16x64xf32> -> vector<16x64xf32>
    %c4_758 = arith.constant 4 : index
    %c0_759 = arith.constant 0 : index
    %c0_760 = arith.constant 0 : index
    %1234 = vector.load %arg28[%c4_758, %c0_759, %c0_760] : memref<9x8x16xf32, #tpu.memory_space<vmem>>, vector<1x8x16xf32>
    %1235 = vector.shape_cast %1234 : vector<1x8x16xf32> to vector<8x16xf32>
    %cst_761 = arith.constant dense<0.000000e+00> : vector<8x64xf32>
    %1236 = tpu.matmul %1235, %1233, %cst_761 {dimension_numbers = #tpu.dot_dimension_numbers<[1], [0], [0], [1], [0, 0, 1, 1], [], []>} : vector<8x16xf32>, vector<16x64xf32>, vector<8x64xf32> -> vector<8x64xf32>
    %1237 = arith.addf %1230, %1236 : vector<8x64xf32>
    %c5_762 = arith.constant 5 : index
    %c0_763 = arith.constant 0 : index
    %c0_764 = arith.constant 0 : index
    %1238 = vector.load %arg27[%c5_762, %c0_763, %c0_764] : memref<9x64x64xf32, #tpu.memory_space<vmem>>, vector<1x64x64xf32>
    %1239 = vector.shape_cast %1238 : vector<1x64x64xf32> to vector<64x64xf32>
    %cst_765 = arith.constant dense<0.000000e+00> : vector<16x64xf32>
    %1240 = tpu.matmul %1203, %1239, %cst_765 {dimension_numbers = #tpu.dot_dimension_numbers<[1], [0], [0], [1], [0, 0, 1, 1], [], []>} : vector<16x64xf32>, vector<64x64xf32>, vector<16x64xf32> -> vector<16x64xf32>
    %c5_766 = arith.constant 5 : index
    %c0_767 = arith.constant 0 : index
    %c0_768 = arith.constant 0 : index
    %1241 = vector.load %arg28[%c5_766, %c0_767, %c0_768] : memref<9x8x16xf32, #tpu.memory_space<vmem>>, vector<1x8x16xf32>
    %1242 = vector.shape_cast %1241 : vector<1x8x16xf32> to vector<8x16xf32>
    %cst_769 = arith.constant dense<0.000000e+00> : vector<8x64xf32>
    %1243 = tpu.matmul %1242, %1240, %cst_769 {dimension_numbers = #tpu.dot_dimension_numbers<[1], [0], [0], [1], [0, 0, 1, 1], [], []>} : vector<8x16xf32>, vector<16x64xf32>, vector<8x64xf32> -> vector<8x64xf32>
    %1244 = arith.addf %1237, %1243 : vector<8x64xf32>
    %c6_770 = arith.constant 6 : index
    %c0_771 = arith.constant 0 : index
    %c0_772 = arith.constant 0 : index
    %1245 = vector.load %arg27[%c6_770, %c0_771, %c0_772] : memref<9x64x64xf32, #tpu.memory_space<vmem>>, vector<1x64x64xf32>
    %1246 = vector.shape_cast %1245 : vector<1x64x64xf32> to vector<64x64xf32>
    %cst_773 = arith.constant dense<0.000000e+00> : vector<16x64xf32>
    %1247 = tpu.matmul %1203, %1246, %cst_773 {dimension_numbers = #tpu.dot_dimension_numbers<[1], [0], [0], [1], [0, 0, 1, 1], [], []>} : vector<16x64xf32>, vector<64x64xf32>, vector<16x64xf32> -> vector<16x64xf32>
    %c6_774 = arith.constant 6 : index
    %c0_775 = arith.constant 0 : index
    %c0_776 = arith.constant 0 : index
    %1248 = vector.load %arg28[%c6_774, %c0_775, %c0_776] : memref<9x8x16xf32, #tpu.memory_space<vmem>>, vector<1x8x16xf32>
    %1249 = vector.shape_cast %1248 : vector<1x8x16xf32> to vector<8x16xf32>
    %cst_777 = arith.constant dense<0.000000e+00> : vector<8x64xf32>
    %1250 = tpu.matmul %1249, %1247, %cst_777 {dimension_numbers = #tpu.dot_dimension_numbers<[1], [0], [0], [1], [0, 0, 1, 1], [], []>} : vector<8x16xf32>, vector<16x64xf32>, vector<8x64xf32> -> vector<8x64xf32>
    %1251 = arith.addf %1244, %1250 : vector<8x64xf32>
    %c7_778 = arith.constant 7 : index
    %c0_779 = arith.constant 0 : index
    %c0_780 = arith.constant 0 : index
    %1252 = vector.load %arg27[%c7_778, %c0_779, %c0_780] : memref<9x64x64xf32, #tpu.memory_space<vmem>>, vector<1x64x64xf32>
    %1253 = vector.shape_cast %1252 : vector<1x64x64xf32> to vector<64x64xf32>
    %cst_781 = arith.constant dense<0.000000e+00> : vector<16x64xf32>
    %1254 = tpu.matmul %1203, %1253, %cst_781 {dimension_numbers = #tpu.dot_dimension_numbers<[1], [0], [0], [1], [0, 0, 1, 1], [], []>} : vector<16x64xf32>, vector<64x64xf32>, vector<16x64xf32> -> vector<16x64xf32>
    %c7_782 = arith.constant 7 : index
    %c0_783 = arith.constant 0 : index
    %c0_784 = arith.constant 0 : index
    %1255 = vector.load %arg28[%c7_782, %c0_783, %c0_784] : memref<9x8x16xf32, #tpu.memory_space<vmem>>, vector<1x8x16xf32>
    %1256 = vector.shape_cast %1255 : vector<1x8x16xf32> to vector<8x16xf32>
    %cst_785 = arith.constant dense<0.000000e+00> : vector<8x64xf32>
    %1257 = tpu.matmul %1256, %1254, %cst_785 {dimension_numbers = #tpu.dot_dimension_numbers<[1], [0], [0], [1], [0, 0, 1, 1], [], []>} : vector<8x16xf32>, vector<16x64xf32>, vector<8x64xf32> -> vector<8x64xf32>
    %1258 = arith.addf %1251, %1257 : vector<8x64xf32>
    %c8_786 = arith.constant 8 : index
    %c0_787 = arith.constant 0 : index
    %c0_788 = arith.constant 0 : index
    %1259 = vector.load %arg27[%c8_786, %c0_787, %c0_788] : memref<9x64x64xf32, #tpu.memory_space<vmem>>, vector<1x64x64xf32>
    %1260 = vector.shape_cast %1259 : vector<1x64x64xf32> to vector<64x64xf32>
    %cst_789 = arith.constant dense<0.000000e+00> : vector<16x64xf32>
    %1261 = tpu.matmul %1203, %1260, %cst_789 {dimension_numbers = #tpu.dot_dimension_numbers<[1], [0], [0], [1], [0, 0, 1, 1], [], []>} : vector<16x64xf32>, vector<64x64xf32>, vector<16x64xf32> -> vector<16x64xf32>
    %c8_790 = arith.constant 8 : index
    %c0_791 = arith.constant 0 : index
    %c0_792 = arith.constant 0 : index
    %1262 = vector.load %arg28[%c8_790, %c0_791, %c0_792] : memref<9x8x16xf32, #tpu.memory_space<vmem>>, vector<1x8x16xf32>
    %1263 = vector.shape_cast %1262 : vector<1x8x16xf32> to vector<8x16xf32>
    %cst_793 = arith.constant dense<0.000000e+00> : vector<8x64xf32>
    %1264 = tpu.matmul %1263, %1261, %cst_793 {dimension_numbers = #tpu.dot_dimension_numbers<[1], [0], [0], [1], [0, 0, 1, 1], [], []>} : vector<8x16xf32>, vector<16x64xf32>, vector<8x64xf32> -> vector<8x64xf32>
    %1265 = arith.addf %1258, %1264 : vector<8x64xf32>
    %c0_794 = arith.constant 0 : index
    %c0_795 = arith.constant 0 : index
    %1266 = vector.load %arg29[%c0_794, %c0_795] : memref<8x1xf32, #tpu.memory_space<vmem>>, vector<8x1xf32>
    %1267 = vector.broadcast %1266 : vector<8x1xf32> to vector<8x64xf32>
    %1268 = arith.addf %1265, %1267 : vector<8x64xf32>
    %1269 = tpu.iota {dimensions = array<i32: 0>} : vector<8x1xi32>
    %cst_796 = arith.constant 0.000000e+00 : f32
    %1270 = vector.broadcast %cst_796 : f32 to vector<8x1xf32>
    %cst_797 = arith.constant 0.000000e+00 : f32
    %1271 = vector.broadcast %cst_797 : f32 to vector<8x1xf32>
    %c0_i32_798 = arith.constant 0 : i32
    %1272 = vector.broadcast %c0_i32_798 : i32 to vector<8x1xi32>
    %1273 = arith.cmpi sge, %1269, %1272 : vector<8x1xi32>
    %c4_i32_799 = arith.constant 4 : i32
    %1274 = vector.broadcast %c4_i32_799 : i32 to vector<8x1xi32>
    %1275 = arith.cmpi slt, %1269, %1274 : vector<8x1xi32>
    %1276 = arith.andi %1273, %1275 : vector<8x1xi1>
    %cst_800 = arith.constant 1.000000e+00 : f32
    %cst_801 = arith.constant 0.000000e+00 : f32
    %1277 = vector.broadcast %cst_800 : f32 to vector<8x1xf32>
    %1278 = vector.broadcast %cst_801 : f32 to vector<8x1xf32>
    %1279 = arith.select %1276, %1277, %1278 : vector<8x1xi1>, vector<8x1xf32>
    %1280 = vector.broadcast %1279 : vector<8x1xf32> to vector<8x64xf32>
    %1281 = arith.mulf %1268, %1280 : vector<8x64xf32>
    %1282 = vector.shape_cast %1281 : vector<8x64xf32> to vector<1x8x64xf32>
    %cst_802 = arith.constant dense<0.000000e+00> : vector<1xf32>
    %1283 = vector.multi_reduction <add>, %1282, %cst_802 [1, 2] : vector<1x8x64xf32> to vector<1xf32>
    %1284 = vector.shape_cast %1283 : vector<1xf32> to vector<1x1x1xf32>
    %1285 = vector.extract %1284[0, 0, 0] : f32 from vector<1x1x1xf32>
    %cst_803 = arith.constant 3.906250e-03 : f32
    %1286 = arith.mulf %1285, %cst_803 : f32
    %1287 = vector.broadcast %1286 : f32 to vector<8x64xf32>
    %1288 = arith.subf %1268, %1287 : vector<8x64xf32>
    %1289 = arith.mulf %1288, %1288 : vector<8x64xf32>
    %1290 = vector.broadcast %1279 : vector<8x1xf32> to vector<8x64xf32>
    %1291 = arith.mulf %1289, %1290 : vector<8x64xf32>
    %1292 = vector.shape_cast %1291 : vector<8x64xf32> to vector<1x8x64xf32>
    %cst_804 = arith.constant dense<0.000000e+00> : vector<1xf32>
    %1293 = vector.multi_reduction <add>, %1292, %cst_804 [1, 2] : vector<1x8x64xf32> to vector<1xf32>
    %1294 = vector.shape_cast %1293 : vector<1xf32> to vector<1x1x1xf32>
    %1295 = vector.extract %1294[0, 0, 0] : f32 from vector<1x1x1xf32>
    %cst_805 = arith.constant 3.906250e-03 : f32
    %1296 = arith.mulf %1295, %cst_805 : f32
    %1297 = vector.broadcast %1286 : f32 to vector<8x1xf32>
    %1298 = arith.mulf %1297, %1279 : vector<8x1xf32>
    %1299 = arith.addf %1270, %1298 : vector<8x1xf32>
    %cst_806 = arith.constant 9.99999974E-6 : f32
    %1300 = arith.addf %1296, %cst_806 : f32
    %1301 = math.rsqrt %1300 : f32
    %1302 = vector.broadcast %1301 : f32 to vector<8x1xf32>
    %1303 = arith.mulf %1302, %1279 : vector<8x1xf32>
    %1304 = arith.addf %1271, %1303 : vector<8x1xf32>
    %c4_i32_807 = arith.constant 4 : i32
    %1305 = vector.broadcast %c4_i32_807 : i32 to vector<8x1xi32>
    %1306 = arith.cmpi sge, %1269, %1305 : vector<8x1xi32>
    %c8_i32_808 = arith.constant 8 : i32
    %1307 = vector.broadcast %c8_i32_808 : i32 to vector<8x1xi32>
    %1308 = arith.cmpi slt, %1269, %1307 : vector<8x1xi32>
    %1309 = arith.andi %1306, %1308 : vector<8x1xi1>
    %cst_809 = arith.constant 1.000000e+00 : f32
    %cst_810 = arith.constant 0.000000e+00 : f32
    %1310 = vector.broadcast %cst_809 : f32 to vector<8x1xf32>
    %1311 = vector.broadcast %cst_810 : f32 to vector<8x1xf32>
    %1312 = arith.select %1309, %1310, %1311 : vector<8x1xi1>, vector<8x1xf32>
    %1313 = vector.broadcast %1312 : vector<8x1xf32> to vector<8x64xf32>
    %1314 = arith.mulf %1268, %1313 : vector<8x64xf32>
    %1315 = vector.shape_cast %1314 : vector<8x64xf32> to vector<1x8x64xf32>
    %cst_811 = arith.constant dense<0.000000e+00> : vector<1xf32>
    %1316 = vector.multi_reduction <add>, %1315, %cst_811 [1, 2] : vector<1x8x64xf32> to vector<1xf32>
    %1317 = vector.shape_cast %1316 : vector<1xf32> to vector<1x1x1xf32>
    %1318 = vector.extract %1317[0, 0, 0] : f32 from vector<1x1x1xf32>
    %cst_812 = arith.constant 3.906250e-03 : f32
    %1319 = arith.mulf %1318, %cst_812 : f32
    %1320 = vector.broadcast %1319 : f32 to vector<8x64xf32>
    %1321 = arith.subf %1268, %1320 : vector<8x64xf32>
    %1322 = arith.mulf %1321, %1321 : vector<8x64xf32>
    %1323 = vector.broadcast %1312 : vector<8x1xf32> to vector<8x64xf32>
    %1324 = arith.mulf %1322, %1323 : vector<8x64xf32>
    %1325 = vector.shape_cast %1324 : vector<8x64xf32> to vector<1x8x64xf32>
    %cst_813 = arith.constant dense<0.000000e+00> : vector<1xf32>
    %1326 = vector.multi_reduction <add>, %1325, %cst_813 [1, 2] : vector<1x8x64xf32> to vector<1xf32>
    %1327 = vector.shape_cast %1326 : vector<1xf32> to vector<1x1x1xf32>
    %1328 = vector.extract %1327[0, 0, 0] : f32 from vector<1x1x1xf32>
    %cst_814 = arith.constant 3.906250e-03 : f32
    %1329 = arith.mulf %1328, %cst_814 : f32
    %1330 = vector.broadcast %1319 : f32 to vector<8x1xf32>
    %1331 = arith.mulf %1330, %1312 : vector<8x1xf32>
    %1332 = arith.addf %1299, %1331 : vector<8x1xf32>
    %cst_815 = arith.constant 9.99999974E-6 : f32
    %1333 = arith.addf %1329, %cst_815 : f32
    %1334 = math.rsqrt %1333 : f32
    %1335 = vector.broadcast %1334 : f32 to vector<8x1xf32>
    %1336 = arith.mulf %1335, %1312 : vector<8x1xf32>
    %1337 = arith.addf %1304, %1336 : vector<8x1xf32>
    %1338 = vector.broadcast %1332 : vector<8x1xf32> to vector<8x64xf32>
    %1339 = arith.subf %1268, %1338 : vector<8x64xf32>
    %c0_816 = arith.constant 0 : index
    %c0_817 = arith.constant 0 : index
    %1340 = vector.load %arg30[%c0_816, %c0_817] : memref<8x1xf32, #tpu.memory_space<vmem>>, vector<8x1xf32>
    %1341 = arith.mulf %1337, %1340 : vector<8x1xf32>
    %1342 = vector.broadcast %1341 : vector<8x1xf32> to vector<8x64xf32>
    %1343 = arith.mulf %1339, %1342 : vector<8x64xf32>
    %c0_818 = arith.constant 0 : index
    %c0_819 = arith.constant 0 : index
    %1344 = vector.load %arg31[%c0_818, %c0_819] : memref<8x1xf32, #tpu.memory_space<vmem>>, vector<8x1xf32>
    %1345 = vector.broadcast %1344 : vector<8x1xf32> to vector<8x64xf32>
    %1346 = arith.addf %1343, %1345 : vector<8x64xf32>
    %1347 = arith.negf %1346 : vector<8x64xf32>
    %1348 = math.exp %1347 : vector<8x64xf32>
    %cst_820 = arith.constant 1.000000e+00 : f32
    %1349 = vector.broadcast %cst_820 : f32 to vector<8x64xf32>
    %1350 = arith.addf %1349, %1348 : vector<8x64xf32>
    %1351 = arith.divf %1349, %1350 : vector<8x64xf32>
    %1352 = arith.mulf %1346, %1351 : vector<8x64xf32>
    %c0_821 = arith.constant 0 : index
    %c0_822 = arith.constant 0 : index
    %c0_823 = arith.constant 0 : index
    %1353 = vector.load %arg27[%c0_821, %c0_822, %c0_823] : memref<9x64x64xf32, #tpu.memory_space<vmem>>, vector<1x64x64xf32>
    %1354 = vector.shape_cast %1353 : vector<1x64x64xf32> to vector<64x64xf32>
    %cst_824 = arith.constant dense<0.000000e+00> : vector<8x64xf32>
    %1355 = tpu.matmul %1352, %1354, %cst_824 {dimension_numbers = #tpu.dot_dimension_numbers<[1], [0], [0], [1], [0, 0, 1, 1], [], []>} : vector<8x64xf32>, vector<64x64xf32>, vector<8x64xf32> -> vector<8x64xf32>
    %c0_825 = arith.constant 0 : index
    %c0_826 = arith.constant 0 : index
    %c0_827 = arith.constant 0 : index
    %1356 = vector.load %arg32[%c0_825, %c0_826, %c0_827] : memref<9x16x8xf32, #tpu.memory_space<vmem>>, vector<1x16x8xf32>
    %1357 = vector.shape_cast %1356 : vector<1x16x8xf32> to vector<16x8xf32>
    %cst_828 = arith.constant dense<0.000000e+00> : vector<16x64xf32>
    %1358 = tpu.matmul %1357, %1355, %cst_828 {dimension_numbers = #tpu.dot_dimension_numbers<[1], [0], [0], [1], [0, 0, 1, 1], [], []>} : vector<16x8xf32>, vector<8x64xf32>, vector<16x64xf32> -> vector<16x64xf32>
    %c1_829 = arith.constant 1 : index
    %c0_830 = arith.constant 0 : index
    %c0_831 = arith.constant 0 : index
    %1359 = vector.load %arg27[%c1_829, %c0_830, %c0_831] : memref<9x64x64xf32, #tpu.memory_space<vmem>>, vector<1x64x64xf32>
    %1360 = vector.shape_cast %1359 : vector<1x64x64xf32> to vector<64x64xf32>
    %cst_832 = arith.constant dense<0.000000e+00> : vector<8x64xf32>
    %1361 = tpu.matmul %1352, %1360, %cst_832 {dimension_numbers = #tpu.dot_dimension_numbers<[1], [0], [0], [1], [0, 0, 1, 1], [], []>} : vector<8x64xf32>, vector<64x64xf32>, vector<8x64xf32> -> vector<8x64xf32>
    %c1_833 = arith.constant 1 : index
    %c0_834 = arith.constant 0 : index
    %c0_835 = arith.constant 0 : index
    %1362 = vector.load %arg32[%c1_833, %c0_834, %c0_835] : memref<9x16x8xf32, #tpu.memory_space<vmem>>, vector<1x16x8xf32>
    %1363 = vector.shape_cast %1362 : vector<1x16x8xf32> to vector<16x8xf32>
    %cst_836 = arith.constant dense<0.000000e+00> : vector<16x64xf32>
    %1364 = tpu.matmul %1363, %1361, %cst_836 {dimension_numbers = #tpu.dot_dimension_numbers<[1], [0], [0], [1], [0, 0, 1, 1], [], []>} : vector<16x8xf32>, vector<8x64xf32>, vector<16x64xf32> -> vector<16x64xf32>
    %1365 = arith.addf %1358, %1364 : vector<16x64xf32>
    %c2_837 = arith.constant 2 : index
    %c0_838 = arith.constant 0 : index
    %c0_839 = arith.constant 0 : index
    %1366 = vector.load %arg27[%c2_837, %c0_838, %c0_839] : memref<9x64x64xf32, #tpu.memory_space<vmem>>, vector<1x64x64xf32>
    %1367 = vector.shape_cast %1366 : vector<1x64x64xf32> to vector<64x64xf32>
    %cst_840 = arith.constant dense<0.000000e+00> : vector<8x64xf32>
    %1368 = tpu.matmul %1352, %1367, %cst_840 {dimension_numbers = #tpu.dot_dimension_numbers<[1], [0], [0], [1], [0, 0, 1, 1], [], []>} : vector<8x64xf32>, vector<64x64xf32>, vector<8x64xf32> -> vector<8x64xf32>
    %c2_841 = arith.constant 2 : index
    %c0_842 = arith.constant 0 : index
    %c0_843 = arith.constant 0 : index
    %1369 = vector.load %arg32[%c2_841, %c0_842, %c0_843] : memref<9x16x8xf32, #tpu.memory_space<vmem>>, vector<1x16x8xf32>
    %1370 = vector.shape_cast %1369 : vector<1x16x8xf32> to vector<16x8xf32>
    %cst_844 = arith.constant dense<0.000000e+00> : vector<16x64xf32>
    %1371 = tpu.matmul %1370, %1368, %cst_844 {dimension_numbers = #tpu.dot_dimension_numbers<[1], [0], [0], [1], [0, 0, 1, 1], [], []>} : vector<16x8xf32>, vector<8x64xf32>, vector<16x64xf32> -> vector<16x64xf32>
    %1372 = arith.addf %1365, %1371 : vector<16x64xf32>
    %c3_845 = arith.constant 3 : index
    %c0_846 = arith.constant 0 : index
    %c0_847 = arith.constant 0 : index
    %1373 = vector.load %arg27[%c3_845, %c0_846, %c0_847] : memref<9x64x64xf32, #tpu.memory_space<vmem>>, vector<1x64x64xf32>
    %1374 = vector.shape_cast %1373 : vector<1x64x64xf32> to vector<64x64xf32>
    %cst_848 = arith.constant dense<0.000000e+00> : vector<8x64xf32>
    %1375 = tpu.matmul %1352, %1374, %cst_848 {dimension_numbers = #tpu.dot_dimension_numbers<[1], [0], [0], [1], [0, 0, 1, 1], [], []>} : vector<8x64xf32>, vector<64x64xf32>, vector<8x64xf32> -> vector<8x64xf32>
    %c3_849 = arith.constant 3 : index
    %c0_850 = arith.constant 0 : index
    %c0_851 = arith.constant 0 : index
    %1376 = vector.load %arg32[%c3_849, %c0_850, %c0_851] : memref<9x16x8xf32, #tpu.memory_space<vmem>>, vector<1x16x8xf32>
    %1377 = vector.shape_cast %1376 : vector<1x16x8xf32> to vector<16x8xf32>
    %cst_852 = arith.constant dense<0.000000e+00> : vector<16x64xf32>
    %1378 = tpu.matmul %1377, %1375, %cst_852 {dimension_numbers = #tpu.dot_dimension_numbers<[1], [0], [0], [1], [0, 0, 1, 1], [], []>} : vector<16x8xf32>, vector<8x64xf32>, vector<16x64xf32> -> vector<16x64xf32>
    %1379 = arith.addf %1372, %1378 : vector<16x64xf32>
    %c4_853 = arith.constant 4 : index
    %c0_854 = arith.constant 0 : index
    %c0_855 = arith.constant 0 : index
    %1380 = vector.load %arg27[%c4_853, %c0_854, %c0_855] : memref<9x64x64xf32, #tpu.memory_space<vmem>>, vector<1x64x64xf32>
    %1381 = vector.shape_cast %1380 : vector<1x64x64xf32> to vector<64x64xf32>
    %cst_856 = arith.constant dense<0.000000e+00> : vector<8x64xf32>
    %1382 = tpu.matmul %1352, %1381, %cst_856 {dimension_numbers = #tpu.dot_dimension_numbers<[1], [0], [0], [1], [0, 0, 1, 1], [], []>} : vector<8x64xf32>, vector<64x64xf32>, vector<8x64xf32> -> vector<8x64xf32>
    %c4_857 = arith.constant 4 : index
    %c0_858 = arith.constant 0 : index
    %c0_859 = arith.constant 0 : index
    %1383 = vector.load %arg32[%c4_857, %c0_858, %c0_859] : memref<9x16x8xf32, #tpu.memory_space<vmem>>, vector<1x16x8xf32>
    %1384 = vector.shape_cast %1383 : vector<1x16x8xf32> to vector<16x8xf32>
    %cst_860 = arith.constant dense<0.000000e+00> : vector<16x64xf32>
    %1385 = tpu.matmul %1384, %1382, %cst_860 {dimension_numbers = #tpu.dot_dimension_numbers<[1], [0], [0], [1], [0, 0, 1, 1], [], []>} : vector<16x8xf32>, vector<8x64xf32>, vector<16x64xf32> -> vector<16x64xf32>
    %1386 = arith.addf %1379, %1385 : vector<16x64xf32>
    %c5_861 = arith.constant 5 : index
    %c0_862 = arith.constant 0 : index
    %c0_863 = arith.constant 0 : index
    %1387 = vector.load %arg27[%c5_861, %c0_862, %c0_863] : memref<9x64x64xf32, #tpu.memory_space<vmem>>, vector<1x64x64xf32>
    %1388 = vector.shape_cast %1387 : vector<1x64x64xf32> to vector<64x64xf32>
    %cst_864 = arith.constant dense<0.000000e+00> : vector<8x64xf32>
    %1389 = tpu.matmul %1352, %1388, %cst_864 {dimension_numbers = #tpu.dot_dimension_numbers<[1], [0], [0], [1], [0, 0, 1, 1], [], []>} : vector<8x64xf32>, vector<64x64xf32>, vector<8x64xf32> -> vector<8x64xf32>
    %c5_865 = arith.constant 5 : index
    %c0_866 = arith.constant 0 : index
    %c0_867 = arith.constant 0 : index
    %1390 = vector.load %arg32[%c5_865, %c0_866, %c0_867] : memref<9x16x8xf32, #tpu.memory_space<vmem>>, vector<1x16x8xf32>
    %1391 = vector.shape_cast %1390 : vector<1x16x8xf32> to vector<16x8xf32>
    %cst_868 = arith.constant dense<0.000000e+00> : vector<16x64xf32>
    %1392 = tpu.matmul %1391, %1389, %cst_868 {dimension_numbers = #tpu.dot_dimension_numbers<[1], [0], [0], [1], [0, 0, 1, 1], [], []>} : vector<16x8xf32>, vector<8x64xf32>, vector<16x64xf32> -> vector<16x64xf32>
    %1393 = arith.addf %1386, %1392 : vector<16x64xf32>
    %c6_869 = arith.constant 6 : index
    %c0_870 = arith.constant 0 : index
    %c0_871 = arith.constant 0 : index
    %1394 = vector.load %arg27[%c6_869, %c0_870, %c0_871] : memref<9x64x64xf32, #tpu.memory_space<vmem>>, vector<1x64x64xf32>
    %1395 = vector.shape_cast %1394 : vector<1x64x64xf32> to vector<64x64xf32>
    %cst_872 = arith.constant dense<0.000000e+00> : vector<8x64xf32>
    %1396 = tpu.matmul %1352, %1395, %cst_872 {dimension_numbers = #tpu.dot_dimension_numbers<[1], [0], [0], [1], [0, 0, 1, 1], [], []>} : vector<8x64xf32>, vector<64x64xf32>, vector<8x64xf32> -> vector<8x64xf32>
    %c6_873 = arith.constant 6 : index
    %c0_874 = arith.constant 0 : index
    %c0_875 = arith.constant 0 : index
    %1397 = vector.load %arg32[%c6_873, %c0_874, %c0_875] : memref<9x16x8xf32, #tpu.memory_space<vmem>>, vector<1x16x8xf32>
    %1398 = vector.shape_cast %1397 : vector<1x16x8xf32> to vector<16x8xf32>
    %cst_876 = arith.constant dense<0.000000e+00> : vector<16x64xf32>
    %1399 = tpu.matmul %1398, %1396, %cst_876 {dimension_numbers = #tpu.dot_dimension_numbers<[1], [0], [0], [1], [0, 0, 1, 1], [], []>} : vector<16x8xf32>, vector<8x64xf32>, vector<16x64xf32> -> vector<16x64xf32>
    %1400 = arith.addf %1393, %1399 : vector<16x64xf32>
    %c7_877 = arith.constant 7 : index
    %c0_878 = arith.constant 0 : index
    %c0_879 = arith.constant 0 : index
    %1401 = vector.load %arg27[%c7_877, %c0_878, %c0_879] : memref<9x64x64xf32, #tpu.memory_space<vmem>>, vector<1x64x64xf32>
    %1402 = vector.shape_cast %1401 : vector<1x64x64xf32> to vector<64x64xf32>
    %cst_880 = arith.constant dense<0.000000e+00> : vector<8x64xf32>
    %1403 = tpu.matmul %1352, %1402, %cst_880 {dimension_numbers = #tpu.dot_dimension_numbers<[1], [0], [0], [1], [0, 0, 1, 1], [], []>} : vector<8x64xf32>, vector<64x64xf32>, vector<8x64xf32> -> vector<8x64xf32>
    %c7_881 = arith.constant 7 : index
    %c0_882 = arith.constant 0 : index
    %c0_883 = arith.constant 0 : index
    %1404 = vector.load %arg32[%c7_881, %c0_882, %c0_883] : memref<9x16x8xf32, #tpu.memory_space<vmem>>, vector<1x16x8xf32>
    %1405 = vector.shape_cast %1404 : vector<1x16x8xf32> to vector<16x8xf32>
    %cst_884 = arith.constant dense<0.000000e+00> : vector<16x64xf32>
    %1406 = tpu.matmul %1405, %1403, %cst_884 {dimension_numbers = #tpu.dot_dimension_numbers<[1], [0], [0], [1], [0, 0, 1, 1], [], []>} : vector<16x8xf32>, vector<8x64xf32>, vector<16x64xf32> -> vector<16x64xf32>
    %1407 = arith.addf %1400, %1406 : vector<16x64xf32>
    %c8_885 = arith.constant 8 : index
    %c0_886 = arith.constant 0 : index
    %c0_887 = arith.constant 0 : index
    %1408 = vector.load %arg27[%c8_885, %c0_886, %c0_887] : memref<9x64x64xf32, #tpu.memory_space<vmem>>, vector<1x64x64xf32>
    %1409 = vector.shape_cast %1408 : vector<1x64x64xf32> to vector<64x64xf32>
    %cst_888 = arith.constant dense<0.000000e+00> : vector<8x64xf32>
    %1410 = tpu.matmul %1352, %1409, %cst_888 {dimension_numbers = #tpu.dot_dimension_numbers<[1], [0], [0], [1], [0, 0, 1, 1], [], []>} : vector<8x64xf32>, vector<64x64xf32>, vector<8x64xf32> -> vector<8x64xf32>
    %c8_889 = arith.constant 8 : index
    %c0_890 = arith.constant 0 : index
    %c0_891 = arith.constant 0 : index
    %1411 = vector.load %arg32[%c8_889, %c0_890, %c0_891] : memref<9x16x8xf32, #tpu.memory_space<vmem>>, vector<1x16x8xf32>
    %1412 = vector.shape_cast %1411 : vector<1x16x8xf32> to vector<16x8xf32>
    %cst_892 = arith.constant dense<0.000000e+00> : vector<16x64xf32>
    %1413 = tpu.matmul %1412, %1410, %cst_892 {dimension_numbers = #tpu.dot_dimension_numbers<[1], [0], [0], [1], [0, 0, 1, 1], [], []>} : vector<16x8xf32>, vector<8x64xf32>, vector<16x64xf32> -> vector<16x64xf32>
    %1414 = arith.addf %1407, %1413 : vector<16x64xf32>
    %c0_893 = arith.constant 0 : index
    %c0_894 = arith.constant 0 : index
    %1415 = vector.load %arg33[%c0_893, %c0_894] : memref<16x1xf32, #tpu.memory_space<vmem>>, vector<16x1xf32>
    %1416 = vector.broadcast %1415 : vector<16x1xf32> to vector<16x64xf32>
    %1417 = arith.addf %1414, %1416 : vector<16x64xf32>
    %1418 = arith.addf %1417, %1053 : vector<16x64xf32>
    %c0_895 = arith.constant 0 : index
    %c0_896 = arith.constant 0 : index
    %c0_897 = arith.constant 0 : index
    %1419 = vector.load %arg35[%c0_895, %c0_896, %c0_897] : memref<1x16x64xf32, #tpu.memory_space<vmem>>, vector<1x16x64xf32>
    %1420 = vector.shape_cast %1419 : vector<1x16x64xf32> to vector<16x64xf32>
    %1421 = vector.shape_cast %1418 : vector<16x64xf32> to vector<1x16x64xf32>
    tpu.vector_store %arg35[%c0_895, %c0_896, %c0_897], %1421 {strides = array<i32>} : memref<1x16x64xf32, #tpu.memory_space<vmem>>, vector<1x16x64xf32>,
    return
  }
  func.func @transform_0(%arg0: i32) -> (i32, i32, i32) {
    %c0_i32 = arith.constant 0 : i32
    %c0_i32_0 = arith.constant 0 : i32
    %c0_i32_1 = arith.constant 0 : i32
    return %arg0, %c0_i32, %c0_i32_0 : i32, i32, i32
  }
  func.func @transform_1(%arg0: i32) -> (i32, i32, i32) {
    %c0_i32 = arith.constant 0 : i32
    %c0_i32_0 = arith.constant 0 : i32
    %c0_i32_1 = arith.constant 0 : i32
    %c0_i32_2 = arith.constant 0 : i32
    return %c0_i32, %c0_i32_0, %c0_i32_1 : i32, i32, i32
  }
  func.func @transform_2(%arg0: i32) -> (i32, i32, i32) {
    %c0_i32 = arith.constant 0 : i32
    %c0_i32_0 = arith.constant 0 : i32
    %c0_i32_1 = arith.constant 0 : i32
    %c0_i32_2 = arith.constant 0 : i32
    return %c0_i32, %c0_i32_0, %c0_i32_1 : i32, i32, i32
  }
  func.func @transform_3(%arg0: i32) -> (i32, i32) {
    %c0_i32 = arith.constant 0 : i32
    %c0_i32_0 = arith.constant 0 : i32
    %c0_i32_1 = arith.constant 0 : i32
    return %c0_i32, %c0_i32_0 : i32, i32
  }
  func.func @transform_4(%arg0: i32) -> (i32, i32) {
    %c0_i32 = arith.constant 0 : i32
    %c0_i32_0 = arith.constant 0 : i32
    %c0_i32_1 = arith.constant 0 : i32
    return %c0_i32, %c0_i32_0 : i32, i32
  }
  func.func @transform_5(%arg0: i32) -> (i32, i32) {
    %c0_i32 = arith.constant 0 : i32
    %c0_i32_0 = arith.constant 0 : i32
    %c0_i32_1 = arith.constant 0 : i32
    return %c0_i32, %c0_i32_0 : i32, i32
  }
  func.func @transform_6(%arg0: i32) -> (i32, i32, i32) {
    %c0_i32 = arith.constant 0 : i32
    %c0_i32_0 = arith.constant 0 : i32
    %c0_i32_1 = arith.constant 0 : i32
    %c0_i32_2 = arith.constant 0 : i32
    return %c0_i32, %c0_i32_0, %c0_i32_1 : i32, i32, i32
  }
  func.func @transform_7(%arg0: i32) -> (i32, i32, i32) {
    %c0_i32 = arith.constant 0 : i32
    %c0_i32_0 = arith.constant 0 : i32
    %c0_i32_1 = arith.constant 0 : i32
    %c0_i32_2 = arith.constant 0 : i32
    return %c0_i32, %c0_i32_0, %c0_i32_1 : i32, i32, i32
  }
  func.func @transform_8(%arg0: i32) -> (i32, i32) {
    %c0_i32 = arith.constant 0 : i32
    %c0_i32_0 = arith.constant 0 : i32
    %c0_i32_1 = arith.constant 0 : i32
    return %c0_i32, %c0_i32_0 : i32, i32
  }
  func.func @transform_9(%arg0: i32) -> (i32, i32) {
    %c0_i32 = arith.constant 0 : i32
    %c0_i32_0 = arith.constant 0 : i32
    %c0_i32_1 = arith.constant 0 : i32
    return %c0_i32, %c0_i32_0 : i32, i32
  }
  func.func @transform_10(%arg0: i32) -> (i32, i32) {
    %c0_i32 = arith.constant 0 : i32
    %c0_i32_0 = arith.constant 0 : i32
    %c0_i32_1 = arith.constant 0 : i32
    return %c0_i32, %c0_i32_0 : i32, i32
  }
  func.func @transform_11(%arg0: i32) -> (i32, i32, i32) {
    %c0_i32 = arith.constant 0 : i32
    %c0_i32_0 = arith.constant 0 : i32
    %c0_i32_1 = arith.constant 0 : i32
    %c0_i32_2 = arith.constant 0 : i32
    return %c0_i32, %c0_i32_0, %c0_i32_1 : i32, i32, i32
  }
  func.func @transform_12(%arg0: i32) -> (i32, i32) {
    %c0_i32 = arith.constant 0 : i32
    %c0_i32_0 = arith.constant 0 : i32
    %c0_i32_1 = arith.constant 0 : i32
    return %c0_i32, %c0_i32_0 : i32, i32
  }
  func.func @transform_13(%arg0: i32) -> (i32, i32) {
    %c0_i32 = arith.constant 0 : i32
    %c0_i32_0 = arith.constant 0 : i32
    %c0_i32_1 = arith.constant 0 : i32
    return %c0_i32, %c0_i32_0 : i32, i32
  }
  func.func @transform_14(%arg0: i32) -> (i32, i32) {
    %c0_i32 = arith.constant 0 : i32
    %c0_i32_0 = arith.constant 0 : i32
    %c0_i32_1 = arith.constant 0 : i32
    return %c0_i32, %c0_i32_0 : i32, i32
  }
  func.func @transform_15(%arg0: i32) -> (i32, i32, i32) {
    %c0_i32 = arith.constant 0 : i32
    %c0_i32_0 = arith.constant 0 : i32
    %c0_i32_1 = arith.constant 0 : i32
    %c0_i32_2 = arith.constant 0 : i32
    return %c0_i32, %c0_i32_0, %c0_i32_1 : i32, i32, i32
  }
  func.func @transform_16(%arg0: i32) -> (i32, i32) {
    %c0_i32 = arith.constant 0 : i32
    %c0_i32_0 = arith.constant 0 : i32
    %c0_i32_1 = arith.constant 0 : i32
    return %c0_i32, %c0_i32_0 : i32, i32
  }
  func.func @transform_17(%arg0: i32) -> (i32, i32) {
    %c0_i32 = arith.constant 0 : i32
    %c0_i32_0 = arith.constant 0 : i32
    %c0_i32_1 = arith.constant 0 : i32
    return %c0_i32, %c0_i32_0 : i32, i32
  }
  func.func @transform_18(%arg0: i32) -> (i32, i32) {
    %c0_i32 = arith.constant 0 : i32
    %c0_i32_0 = arith.constant 0 : i32
    %c0_i32_1 = arith.constant 0 : i32
    return %c0_i32, %c0_i32_0 : i32, i32
  }
  func.func @transform_19(%arg0: i32) -> (i32, i32, i32) {
    %c0_i32 = arith.constant 0 : i32
    %c0_i32_0 = arith.constant 0 : i32
    %c0_i32_1 = arith.constant 0 : i32
    %c0_i32_2 = arith.constant 0 : i32
    return %c0_i32, %c0_i32_0, %c0_i32_1 : i32, i32, i32
  }
  func.func @transform_20(%arg0: i32) -> (i32, i32) {
    %c0_i32 = arith.constant 0 : i32
    %c0_i32_0 = arith.constant 0 : i32
    %c0_i32_1 = arith.constant 0 : i32
    return %c0_i32, %c0_i32_0 : i32, i32
  }
  func.func @transform_21(%arg0: i32) -> (i32, i32) {
    %c0_i32 = arith.constant 0 : i32
    %c0_i32_0 = arith.constant 0 : i32
    %c0_i32_1 = arith.constant 0 : i32
    return %c0_i32, %c0_i32_0 : i32, i32
  }
  func.func @transform_22(%arg0: i32) -> (i32, i32) {
    %c0_i32 = arith.constant 0 : i32
    %c0_i32_0 = arith.constant 0 : i32
    %c0_i32_1 = arith.constant 0 : i32
    return %c0_i32, %c0_i32_0 : i32, i32
  }
  func.func @transform_23(%arg0: i32) -> (i32, i32) {
    %c0_i32 = arith.constant 0 : i32
    %c0_i32_0 = arith.constant 0 : i32
    %c0_i32_1 = arith.constant 0 : i32
    return %c0_i32, %c0_i32_0 : i32, i32
  }
  func.func @transform_24(%arg0: i32) -> (i32, i32) {
    %c0_i32 = arith.constant 0 : i32
    %c0_i32_0 = arith.constant 0 : i32
    %c0_i32_1 = arith.constant 0 : i32
    return %c0_i32, %c0_i32_0 : i32, i32
  }
  func.func @transform_25(%arg0: i32) -> (i32, i32) {
    %c0_i32 = arith.constant 0 : i32
    %c0_i32_0 = arith.constant 0 : i32
    %c0_i32_1 = arith.constant 0 : i32
    return %c0_i32, %c0_i32_0 : i32, i32
  }
  func.func @transform_26(%arg0: i32) -> (i32, i32, i32) {
    %c0_i32 = arith.constant 0 : i32
    %c0_i32_0 = arith.constant 0 : i32
    %c0_i32_1 = arith.constant 0 : i32
    %c0_i32_2 = arith.constant 0 : i32
    return %c0_i32, %c0_i32_0, %c0_i32_1 : i32, i32, i32
  }
  func.func @transform_27(%arg0: i32) -> (i32, i32, i32) {
    %c0_i32 = arith.constant 0 : i32
    %c0_i32_0 = arith.constant 0 : i32
    %c0_i32_1 = arith.constant 0 : i32
    %c0_i32_2 = arith.constant 0 : i32
    return %c0_i32, %c0_i32_0, %c0_i32_1 : i32, i32, i32
  }
  func.func @transform_28(%arg0: i32) -> (i32, i32) {
    %c0_i32 = arith.constant 0 : i32
    %c0_i32_0 = arith.constant 0 : i32
    %c0_i32_1 = arith.constant 0 : i32
    return %c0_i32, %c0_i32_0 : i32, i32
  }
  func.func @transform_29(%arg0: i32) -> (i32, i32) {
    %c0_i32 = arith.constant 0 : i32
    %c0_i32_0 = arith.constant 0 : i32
    %c0_i32_1 = arith.constant 0 : i32
    return %c0_i32, %c0_i32_0 : i32, i32
  }
  func.func @transform_30(%arg0: i32) -> (i32, i32) {
    %c0_i32 = arith.constant 0 : i32
    %c0_i32_0 = arith.constant 0 : i32
    %c0_i32_1 = arith.constant 0 : i32
    return %c0_i32, %c0_i32_0 : i32, i32
  }
  func.func @transform_31(%arg0: i32) -> (i32, i32, i32) {
    %c0_i32 = arith.constant 0 : i32
    %c0_i32_0 = arith.constant 0 : i32
    %c0_i32_1 = arith.constant 0 : i32
    %c0_i32_2 = arith.constant 0 : i32
    return %c0_i32, %c0_i32_0, %c0_i32_1 : i32, i32, i32
  }
  func.func @transform_32(%arg0: i32) -> (i32, i32) {
    %c0_i32 = arith.constant 0 : i32
    %c0_i32_0 = arith.constant 0 : i32
    %c0_i32_1 = arith.constant 0 : i32
    return %c0_i32, %c0_i32_0 : i32, i32
  }
  func.func @transform_33(%arg0: i32) -> (i32, i32, i32) {
    %c0_i32 = arith.constant 0 : i32
    %c0_i32_0 = arith.constant 0 : i32
    %c0_i32_1 = arith.constant 0 : i32
    return %arg0, %c0_i32, %c0_i32_0 : i32, i32, i32
  }
  func.func @transform_34(%arg0: i32) -> (i32, i32, i32) {
    %c0_i32 = arith.constant 0 : i32
    %c0_i32_0 = arith.constant 0 : i32
    %c0_i32_1 = arith.constant 0 : i32
    return %arg0, %c0_i32, %c0_i32_0 : i32, i32, i32
  }
}

</mosaic_0001>

<bundles_post_ra>
// kernel: tpu_custom_call.1
= control target key start
LH: loop header
LB: loop body
LE: loop exit
PB: predicated region body
PF: predicated region fallthrough
CT: control target
= control target key end

     0   :  { %s15922_s6 = smov 1   ;;  %s15923_s10 = smov 2   ;;  %s18394_s0 = inlined_call_operand.smem [shape: u32[35], index: -1, kind: input, shape index: {}] }
   0x1   :  { %s16020_s5 = sld [smem:[%s18394_s0]]   ;;  %s15924_s14 = smov 3  }
   0x2   :  { %s16025_s9 = sld [smem:[%s18394_s0 + %s15922_s6]]   ;;  %s15925_s18 = smov 4  }
   0x3   :  { %s16030_s13 = sld [smem:[%s18394_s0 + %s15923_s10]]   ;;  %s15926_s22 = smov 5  }
   0x4   :  { %s16035_s17 = sld [smem:[%s18394_s0 + %s15924_s14]]   ;;  %s15927_s26 = smov 6  }
   0x5   :  { %s16040_s21 = sld [smem:[%s18394_s0 + %s15925_s18]]   ;;  %s15928_s30 = smov 7  }
   0x6   :  { %s16045_s25 = sld [smem:[%s18394_s0 + %s15926_s22]]   ;;  %s15929_s4 = smov 8  }
   0x7   :  { %18431 = sst [smem:[#allocation8_spill]] %s16020_s5  ;;  %s15930_s10 = smov 9  }
   0x8   :  { %18432 = sst [smem:[#allocation9_spill]] %s16025_s9  ;;  %s15931_s15 = smov 10  }
   0x9   :  { %18433 = sst [smem:[#allocation10_spill]] %s16030_s13  ;;  %s15932_s20 = smov 11  }
   0xa   :  { %18434 = sst [smem:[#allocation11_spill]] %s16035_s17  ;;  %s15934_s1 = smov 13  }
   0xb   :  { %18435 = sst [smem:[#allocation12_spill]] %s16040_s21  ;;  %s15935_s7 = smov 14  }
   0xc   :  { %s16050_s29 = sld [smem:[%s18394_s0 + %s15927_s26]]   ;;  %s15933_s26 = smov 12  }
   0xd   :  { %s16055_s3 = sld [smem:[%s18394_s0 + %s15928_s30]]   ;;  %s15937_s22 = smov 16  }
   0xe   :  { %s16060_s8 = sld [smem:[%s18394_s0 + %s15929_s4]]   ;;  %s15938_s28 = smov 17  }
   0xf   :  { %s16065_s14 = sld [smem:[%s18394_s0 + %s15930_s10]]  }
  0x10   :  { %s16070_s19 = sld [smem:[%s18394_s0 + %s15931_s15]]   ;;  %s15936_s15 = smov 15  }
  0x11   :  { %s16075_s24 = sld [smem:[%s18394_s0 + %s15932_s20]]  }
  0x12   :  { %s16080_s30 = sld [smem:[%s18394_s0 + %s15933_s26]]  }
  0x13   :  { %18436 = sst [smem:[#allocation13_spill]] %s16055_s3 }
  0x14   :  { %18437 = sst [smem:[#allocation14_spill]] %s16060_s8 }
  0x15   :  { %18438 = sst [smem:[#allocation15_spill]] %s16065_s14 }
  0x16   :  { %18439 = sst [smem:[#allocation16_spill]] %s16070_s19 }
  0x17   :  { %18440 = sst [smem:[#allocation17_spill]] %s16075_s24 }
  0x18   :  { %s16085_s6 = sld [smem:[%s18394_s0 + %s15934_s1]]  }
  0x19   :  { %s16090_s12 = sld [smem:[%s18394_s0 + %s15935_s7]]   ;;  %s15939_s7 = smov 18  }
  0x1a   :  { %s16095_s20 = sld [smem:[%s18394_s0 + %s15936_s15]]   ;;  %s15940_s15 = smov 19  }
  0x1b   :  { %s16100_s27 = sld [smem:[%s18394_s0 + %s15937_s22]]   ;;  %s15941_s22 = smov 20  }
  0x1c   :  { %s16105_s4 = sld [smem:[%s18394_s0 + %s15938_s28]]   ;;  %s15942_s28 = smov 21  }
  0x1e   :  { %18441 = sst [smem:[#allocation18_spill]] %s16085_s6 }
  0x1f   :  { %s16110_s6 = sld [smem:[%s18394_s0 + %s15939_s7]]   ;;  %s15943_s7 = smov 22  }
  0x20   :  { %18442 = sst [smem:[#allocation19_spill]] %s16095_s20 }
  0x21   :  { %18443 = sst [smem:[#allocation20_spill]] %s16100_s27 }
  0x22   :  { %18444 = sst [smem:[#allocation21_spill]] %s16105_s4 }
  0x23   :  { %s16115_s20 = sld [smem:[%s18394_s0 + %s15940_s15]]   ;;  %s15944_s15 = smov 23  }
  0x24   :  { %s16120_s27 = sld [smem:[%s18394_s0 + %s15941_s22]]   ;;  %s15945_s22 = smov 24  }
  0x25   :  { %18445 = sst [smem:[#allocation22_spill]] %s16110_s6 }
  0x26   :  { %s16125_s4 = sld [smem:[%s18394_s0 + %s15942_s28]]   ;;  %s15946_s28 = smov 25  }
  0x27   :  { %s16130_s6 = sld [smem:[%s18394_s0 + %s15943_s7]]   ;;  %s15947_s7 = smov 26  }
  0x29   :  { %18446 = sst [smem:[#allocation23_spill]] %s16115_s20 }
  0x2a   :  { %18447 = sst [smem:[#allocation24_spill]] %s16120_s27 }
  0x2b   :  { %s16135_s20 = sld [smem:[%s18394_s0 + %s15944_s15]]   ;;  %s15948_s15 = smov 27  }
  0x2c   :  { %18448 = sst [smem:[#allocation25_spill]] %s16125_s4 }
  0x2d   :  { %18449 = sst [smem:[#allocation26_spill]] %s16130_s6 }
  0x2e   :  { %s16140_s27 = sld [smem:[%s18394_s0 + %s15945_s22]]   ;;  %s15949_s22 = smov 28  }
  0x2f   :  { %s16145_s4 = sld [smem:[%s18394_s0 + %s15946_s28]]   ;;  %s15950_s28 = smov 29  }
  0x30   :  { %s16150_s6 = sld [smem:[%s18394_s0 + %s15947_s7]]   ;;  %s15951_s7 = smov 30  }
  0x31   :  { %18450 = sst [smem:[#allocation27_spill]] %s16135_s20 }
  0x32   :  { %s16155_s20 = sld [smem:[%s18394_s0 + %s15948_s15]]   ;;  %s15952_s15 = smov 31  }
  0x34   :  { %18451 = sst [smem:[#allocation28_spill]] %s16140_s27 }
  0x35   :  { %18452 = sst [smem:[#allocation29_spill]] %s16145_s4 }
  0x36   :  { %18453 = sst [smem:[#allocation30_spill]] %s16150_s6 }
  0x37   :  { %s16160_s27 = sld [smem:[%s18394_s0 + %s15949_s22]]   ;;  %s15953_s22 = smov 32  }
  0x38   :  { %18454 = sst [smem:[#allocation31_spill]] %s16155_s20 }
  0x39   :  { %s16165_s4 = sld [smem:[%s18394_s0 + %s15950_s28]]   ;;  %s15954_s28 = smov 33  }
  0x3a   :  { %s16170_s6 = sld [smem:[%s18394_s0 + %s15951_s7]]   ;;  %s15955_s7 = smov 34  }
  0x3b   :  { %s16175_s20 = sld [smem:[%s18394_s0 + %s15952_s15]]  }
  0x3d   :  { %18455 = sst [smem:[#allocation32_spill]] %s16160_s27 }
  0x3e   :  { %s16180_s27 = sld [smem:[%s18394_s0 + %s15953_s22]]  }
  0x3f   :  { %18456 = sst [smem:[#allocation33_spill]] %s16165_s4 }
  0x40   :  { %18457 = sst [smem:[#allocation34_spill]] %s16170_s6 }
  0x41   :  { %s16185_s4 = sld [smem:[%s18394_s0 + %s15954_s28]]  }
  0x42   :  { %s16190_s6 = sld [smem:[%s18394_s0 + %s15955_s7]]  }
  0x43   :  { %75 = vsyncpa [#allocation3], 0 }
  0x44   :  { %77 = vsyncpa [#allocation3 + $0x1], 0 }
  0x45   :  { %78 = vsyncpa [#allocation5], 0 }
  0x46   :  { %80 = vsyncpa [#allocation5 + $0x1], 0  ;;  %s16192_s15 = smov 0   ;;  %s16194_s16 = smov 0  }
  0x47   :  { %s16196_s18 = smov 0   ;;  %s16198_s22 = smov 0  }
  0x48 LB: > { %s18458_s24 = sld [smem:[#allocation17_spill]]  ;;  %s18459_s13 = sld [smem:[#allocation10_spill]]  ;;  %s15920_s22 = sphi %s16198_s22, %s18503_s22   ;;  %s15916_s18 = sphi %s16196_s18, %s18500_s18   ;;  %s15912_s16 = sphi %s16194_s16, %s18502_s16   ;;  %s15908_s15 = sphi %s16192_s15, %s18501_s15  }
  0x49   : > { %s18460_s3 = sld [smem:[#allocation13_spill]]  ;;  %s18461_s9 = sld [smem:[#allocation9_spill]] }
  0x4a   : > { %18462 = sst [smem:[#allocation35_spill]] %s15916_s18  ;;  %s16213_s0 = sadd.s32 4294967295, %s15920_s22  }
  0x4b   : > { %s13769_s23 = sadd.s32 4294967294, %s15920_s22   ;;  %s16217_s26 = sadd.s32 1, %s15920_s22  }
  0x4c   : > { %s791_s28 = sadd.s32 1, %s15916_s18  ;;  %s788_s1 = ssub.s32 %s15920_s22, %s16217_s26 }
  0x4d   : > { %p801_p0 = scmp.ne.s32.totalorder %s15916_s18, %s15912_s16  ;;  %p789_p1 = scmp.eq.s32.totalorder %s788_s1, 0 }
  0x4e   : > { %p802_p2 = scmp.eq.s32.totalorder %s16213_s0, 1  ;;  %p807_p3 = scmp.ne.s32.totalorder %s15912_s16, %s15908_s15 }
  0x4f   : > { %p808_p4 = scmp.eq.s32.totalorder %s13769_s23, 1  ;;  %p13772_p7 = scmp.ge.s32.totalorder %s15920_s22, 1 }
  0x50   : > { %s16228_s2 = scalar_select %p789_p1, %s15916_s18, %s791_s28  }
  0x51   : > { %p16230_p5 = por %p802_p2, %p801_p0  ;;  %p16234_p6 = por %p808_p4, %p807_p3 }
  0x52   : > { %18463 = sst [smem:[#allocation36_spill]] %s16228_s2  ;;  %p956_p8 = scmp.lt.s32.totalorder %s15920_s22, 3 }
  0x54   : > { %p957_p9 = pnand %p13772_p7, %p956_p8 }
  0x55   : > { %s18466_s5 = sld [smem:[#allocation8_spill]] (!%p957_p9)  ;;  %p1047_p10 = scmp.lt.s32.totalorder (!%p957_p9), %s16213_s0, 1  ;;  %v15956_v0 = vmov (!%p957_p9), 0.0   ;;  %v1060_v3 = vlaneseq (!%p957_p9)  ;;  %v1065_v8 = vld [vmem:[%s18461_s9] sm:$0x3] (!%p957_p9)  ;;  %vm1108_vm2 = vcmask (!%p957_p9), 1043456  }
  0x56   : > { %960 = sbr.rel (%p957_p9) target bundleno = 11330 (0x2c42), region = 152  ;;  %1179 = vmatprep.mubr.f32.mxu0 (!%p957_p9), %v15956_v0  ;;  %6557 = vmatprep.mubr.f32.mxu1 (!%p957_p9), %v15956_v0  ;;  %s15957_s1 = smov (!%p957_p9), 51   ;;  %v13777_v9 = vld [vmem:[%s18461_s9 + $0x2] sm:$0x3] (!%p957_p9)  ;;  %v13785_v16 = vld [vmem:[%s18461_s9 + $0x4] sm:$0x3] (!%p957_p9) }
  0x57   : > { %s15958_s2 = smov (!%p957_p9), 50   ;;  %s15959_s18 = smov (!%p957_p9), 49   ;;  %v16315_v4 = vshrl.u32 (!%p957_p9), %v1060_v3, 7  ;;  %v16319_v5 = vand.u32 (!%p957_p9), 127, %v1060_v3  ;;  %v13778_v28 = vld [vmem:[%s18459_s13 + $0x8] sm:$0xff] (!%p957_p9)  ;;  %vm1104_vm4 = vcmask (!%p957_p9), 31744  }
  0x58   : > { %v13790_v32 = vld [vmem:[%s18461_s9 + $0x6] sm:$0x3] (!%p957_p9)  ;;  %v13795_v43 = vld [vmem:[%s18461_s9 + $0x8] sm:$0x3] (!%p957_p9)  ;;  %v13786_v51 = vld [vmem:[%s18459_s13 + $0x10] sm:$0xff] (!%p957_p9)  ;;  %s18467_s17 = sld [smem:[#allocation11_spill]] (!%p957_p9) }
  0x59   : > { %v16322_v6 = vsub.s32 (!%p957_p9), 0, %v16315_v4  ;;  %v16325_v7 = vsub.s32 (!%p957_p9), 1, %v16315_v4  ;;  %vm1062_vm0 = vcmp.lt.s32.totalorder (!%p957_p9), %v16319_v5, 51  ;;  %vm1084_vm1 = vcmp.lt.s32.totalorder (!%p957_p9), %v16319_v5, 50  ;;  %v1079_v41 = vld [vmem:[%s18459_s13] sm:$0xff] (!%p957_p9)  ;;  %v13791_v61 = vld [vmem:[%s18459_s13 + $0x18] sm:$0xff] (!%p957_p9) }
  0x5a   : > { %vm1270_vm3 = vcmp.lt.s32.totalorder (!%p957_p9), %v16319_v5, 49  ;;  %vm1376_vm5 = vcmp.lt.s32.totalorder (!%p957_p9), %v16319_v5, 48  ;;  %vm1482_vm6 = vcmp.lt.s32.totalorder (!%p957_p9), %v16319_v5, 47  ;;  %v13800_v53 = vld [vmem:[%s18461_s9 + $0xa] sm:$0x3] (!%p957_p9)  ;;  %vm1588_vm7 = vcmp.lt.s32.totalorder (!%p957_p9), %v16319_v5, 46 }
  0x5b   : > { %v1074_v12 = vrot.slane (!%p957_p9), %v1065_v8, %v16325_v7  ;;  %v1093_v13 = vrot.slane (!%p957_p9), %v13777_v9, %v16322_v6  ;;  %v1097_v14 = vrot.slane (!%p957_p9), %v13777_v9, %v16325_v7  ;;  %v1070_v15 = vrot.slane (!%p957_p9), %v1065_v8, %v16322_v6  ;;  %v13805_v63 = vld [vmem:[%s18461_s9 + $0xc] sm:$0x3] (!%p957_p9)  ;;  %s18468_s21 = sld [smem:[#allocation12_spill]] (!%p957_p9)  ;;  %s18470_s8 = sld [smem:[#allocation14_spill]] (!%p957_p9) }
  0x5c   : > { %v1283_v26 = vrot.slane (!%p957_p9), %v13785_v16, %v16325_v7  ;;  %v1279_v34 = vrot.slane (!%p957_p9), %v13785_v16, %v16322_v6  ;;  %v1389_v37 = vrot.slane (!%p957_p9), %v13790_v32, %v16325_v7  ;;  %v1385_v46 = vrot.slane (!%p957_p9), %v13790_v32, %v16322_v6  ;;  %v13810_v16 = vld [vmem:[%s18461_s9 + $0xe] sm:$0x3] (!%p957_p9)  ;;  %s18478_s19 = sld [smem:[#allocation16_spill]] (!%p957_p9)  ;;  %s18479_s14 = sld [smem:[#allocation15_spill]] (!%p957_p9) }
  0x5d   : > { %s1048_s11 = scalar_select %p1047_p10, %s16213_s0, 1  ;;  %v1495_v48 = vrot.slane %v13795_v43, %v16325_v7  ;;  %v1491_v56 = vrot.slane %v13795_v43, %v16322_v6  ;;  %v1601_v58 = vrot.slane %v13800_v53, %v16325_v7  ;;  %vm1694_vm8 = vcmp.lt.s32.totalorder %v16319_v5, 45 }
  0x5e   : > { %v1597_v9 = vrot.slane %v13800_v53, %v16322_v6  ;;  %vm1800_vm9 = vcmp.lt.s32.totalorder %v16319_v5, 35  ;;  %vm1906_vm10 = vcmp.lt.s32.totalorder %v16319_v5, 34  ;;  %vm2012_vm11 = vcmp.lt.s32.totalorder %v16319_v5, 33 }
  0x5f   : > { %s14320_s23 = sshll.u32 %s1048_s11, 3  ;;  %s15960_s11 = smov 48   ;;  %vm2118_vm12 = vcmp.lt.s32.totalorder %v16319_v5, 32  ;;  %vm2224_vm13 = vcmp.lt.s32.totalorder %v16319_v5, 31  ;;  %vm2330_vm14 = vcmp.lt.s32.totalorder %v16319_v5, 30  ;;  %vm2436_vm15 = vcmp.lt.s32.totalorder %v16319_v5, 29 }
  0x60   : > { %s1051_s28 = scalar_lea.vmem %s18466_s5, %s14320_s23  ;;  %s15961_s23 = smov 47  }
  0x61   : > { %v16245_v1 = vld [vmem:[%s1051_s28] sm:$0xff]  ;;  %s15962_s28 = smov 46   ;;  %s18476_s5 = smov 16  }
  0x62   : > { %1056 = vrot.lane.b32.xlu1 %v16245_v1, %s15957_s1  ;;  %1080 = vrot.lane.b32.xlu0 %v16245_v1, %s15958_s2  ;;  %v16251_v2 = vcombine.high %v16245_v1, %v16245_v1 }
  0x66   : > { %1058 = vrot.lane.b32.xlu1 %v16251_v2, %s15957_s1  ;;  %1082 = vrot.lane.b32.xlu0 %v16251_v2, %s15958_s2  ;;  %s15963_s2 = smov 45   ;;  %s15965_s1 = smov 34  }
  0x6a   : > { %1268 = vrot.lane.b32.xlu1 %v16251_v2, %s15959_s18  ;;  %1266 = vrot.lane.b32.xlu0 %v16245_v1, %s15959_s18  ;;  %s15964_s18 = smov 35  }
  0x6e   : > { %1374 = vrot.lane.b32.xlu1 %v16251_v2, %s15960_s11  ;;  %1372 = vrot.lane.b32.xlu0 %v16245_v1, %s15960_s11  ;;  %s15966_s11 = smov 33  }
  0x72   : > { %1480 = vrot.lane.b32.xlu1 %v16251_v2, %s15961_s23  ;;  %1478 = vrot.lane.b32.xlu0 %v16245_v1, %s15961_s23  ;;  %s15967_s23 = smov 32  }
  0x76   : > { %1586 = vrot.lane.b32.xlu1 %v16251_v2, %s15962_s28  ;;  %1584 = vrot.lane.b32.xlu0 %v16245_v1, %s15962_s28  ;;  %s15968_s28 = smov 31  }
  0x7a   : > { %1692 = vrot.lane.b32.xlu1 %v16251_v2, %s15963_s2  ;;  %1690 = vrot.lane.b32.xlu0 %v16245_v1, %s15963_s2  ;;  %s15969_s2 = smov 30  }
  0x7e   : > { %1798 = vrot.lane.b32.xlu1 %v16251_v2, %s15964_s18  ;;  %1796 = vrot.lane.b32.xlu0 %v16245_v1, %s15964_s18  ;;  %s15970_s18 = smov 29  }
  0x82   : > { %1904 = vrot.lane.b32.xlu1 %v16251_v2, %s15965_s1  ;;  %1902 = vrot.lane.b32.xlu0 %v16245_v1, %s15965_s1  ;;  %s15971_s1 = smov 19  }
  0x86   : > { %2010 = vrot.lane.b32.xlu1 %v16251_v2, %s15966_s11  ;;  %2008 = vrot.lane.b32.xlu0 %v16245_v1, %s15966_s11  ;;  %s15972_s11 = smov 18  }
  0x8a   : > { %2116 = vrot.lane.b32.xlu1 %v16251_v2, %s15967_s23  ;;  %2114 = vrot.lane.b32.xlu0 %v16245_v1, %s15967_s23  ;;  %s18408_s23 = smov 17  }
  0x8e   : > { %2222 = vrot.lane.b32.xlu1 %v16251_v2, %s15968_s28  ;;  %2220 = vrot.lane.b32.xlu0 %v16245_v1, %s15968_s28  ;;  %s18406_s28 = smov 16  }
  0x92   : > { %2328 = vrot.lane.b32.xlu1 %v16251_v2, %s15969_s2  ;;  %2326 = vrot.lane.b32.xlu0 %v16245_v1, %s15969_s2  ;;  %s18420_s2 = smov 15  }
  0x96   : > { %2434 = vrot.lane.b32.xlu1 %v16251_v2, %s15970_s18  ;;  %2432 = vrot.lane.b32.xlu0 %v16245_v1, %s15970_s18  ;;  %s15976_s18 = smov 14  }
  0x9a   : > { %2540 = vrot.lane.b32.xlu1 %v16251_v2, %s15971_s1  ;;  %2538 = vrot.lane.b32.xlu0 %v16245_v1, %s15971_s1  ;;  %s15977_s1 = smov 13  }
  0x9e   : > { %2646 = vrot.lane.b32.xlu1 %v16251_v2, %s15972_s11  ;;  %2644 = vrot.lane.b32.xlu0 %v16245_v1, %s15972_s11  ;;  %s15978_s11 = smov 3  }
  0xa2   : > { %2752 = vrot.lane.b32.xlu1 %v16251_v2, %s18408_s23  ;;  %2750 = vrot.lane.b32.xlu0 %v16245_v1, %s18408_s23  ;;  %s18418_s23 = smov 1  }
  0xa6   : > { %2858 = vrot.lane.b32.xlu1 %v16251_v2, %s18406_s28  ;;  %2856 = vrot.lane.b32.xlu0 %v16245_v1, %s18406_s28  ;;  %s15979_s28 = smov 2  }
  0xaa   : > { %2964 = vrot.lane.b32.xlu1 %v16251_v2, %s18420_s2  ;;  %2962 = vrot.lane.b32.xlu0 %v16245_v1, %s18420_s2 }
  0xae   : > { %3070 = vrot.lane.b32.xlu1 %v16251_v2, %s15976_s18  ;;  %3068 = vrot.lane.b32.xlu0 %v16245_v1, %s15976_s18  ;;  %s18416_s18 = smov 127  }
  0xb2   : > { %3176 = vrot.lane.b32.xlu1 %v16251_v2, %s15977_s1  ;;  %3174 = vrot.lane.b32.xlu0 %v16245_v1, %s15977_s1  ;;  %s15982_s1 = smov 126  }
  0xb6   : > { %3282 = vrot.lane.b32.xlu1 %v16251_v2, %s15978_s11  ;;  %3280 = vrot.lane.b32.xlu0 %v16245_v1, %s15978_s11  ;;  %s15984_s11 = smov 115  }
  0xba   : > { %3388 = vrot.lane.b32.xlu1 %v16251_v2, %s15979_s28  ;;  %3386 = vrot.lane.b32.xlu0 %v16245_v1, %s15979_s28  ;;  %s15983_s28 = smov 125  }
  0xbe   : > { %3494 = vrot.lane.b32.xlu1 %v16251_v2, %s18418_s23  ;;  %3492 = vrot.lane.b32.xlu0 %v16245_v1, %s18418_s23 }
  0xc2   : > { %3698 = vrot.lane.b32.xlu1 %v16251_v2, %s18416_s18  ;;  %3696 = vrot.lane.b32.xlu0 %v16245_v1, %s18416_s18 }
  0xc6   : > { %3804 = vrot.lane.b32.xlu1 %v16251_v2, %s15982_s1  ;;  %3802 = vrot.lane.b32.xlu0 %v16245_v1, %s15982_s1  ;;  %s15985_s1 = smov 114  }
  0xca   : > { %3910 = vrot.lane.b32.xlu1 %v16251_v2, %s15983_s28  ;;  %3908 = vrot.lane.b32.xlu0 %v16245_v1, %s15983_s28  ;;  %s18414_s28 = smov 113  }
  0xce   : > { %4016 = vrot.lane.b32.xlu1 %v16251_v2, %s15984_s11  ;;  %4014 = vrot.lane.b32.xlu0 %v16245_v1, %s15984_s11  ;;  %s18412_s11 = smov 112  }
  0xd2   : > { %4122 = vrot.lane.b32.xlu1 %v16251_v2, %s15985_s1  ;;  %4120 = vrot.lane.b32.xlu0 %v16245_v1, %s15985_s1  ;;  %s18410_s1 = smov 111  }
  0xd4   : > { %v1057_v10 = vpop.permute.xlu1 %1056  ;;  %v1081_v11 = vpop.permute.xlu0 %1080 }
  0xd6   : > { %4228 = vrot.lane.b32.xlu1 %v16251_v2, %s18414_s28  ;;  %4226 = vrot.lane.b32.xlu0 %v16245_v1, %s18414_s28 }
  0xd8   : > { %v1059_v17 = vpop.permute.xlu1 %1058  ;;  %v1083_v18 = vpop.permute.xlu0 %1082 }
  0xd9   : > { %v1063_v19 = vsel %vm1062_vm0, %v1057_v10, %v1059_v17  ;;  %v1064_v20 = vsel %vm1062_vm0, %v1059_v17, %v1057_v10  ;;  %v1086_v21 = vsel %vm1084_vm1, %v1083_v18, %v1081_v11  ;;  %v1085_v22 = vsel %vm1084_vm1, %v1081_v11, %v1083_v18 }
  0xda   : > { %v1078_v23 = vmul.f32 %v1074_v12, %v1063_v19  ;;  %v1101_v24 = vmul.f32 %v1097_v14, %v1085_v22  ;;  %v1100_v25 = vmul.f32 %v1093_v13, %v1086_v21  ;;  %4334 = vrot.lane.b32.xlu1 %v16251_v2, %s18412_s11  ;;  %v1077_v27 = vmul.f32 %v1070_v15, %v1064_v20  ;;  %v13796_v14 = vld [vmem:[%s18459_s13 + $0x20] sm:$0xff] }
  0xdb   : > { %4332 = vrot.lane.b32.xlu0 %v16245_v1, %s18412_s11  ;;  %v1707_v11 = vrot.slane %v13805_v63, %v16325_v7  ;;  %v1703_v19 = vrot.slane %v13805_v63, %v16322_v6  ;;  %v1813_v21 = vrot.slane %v13810_v16, %v16325_v7  ;;  %vm2542_vm0 = vcmp.lt.s32.totalorder %v16319_v5, 19 }
  0xdc   : > { %13779 = vmatprep.subr.msk.mxu0 %vm1108_vm2, %v1101_v24  ;;  %v1269_v29 = vpop.permute.xlu1 %1268  ;;  %v1267_v30 = vpop.permute.xlu0 %1266  ;;  %v13801_v24 = vld [vmem:[%s18459_s13 + $0x28] sm:$0xff]  ;;  %vm2648_vm1 = vcmp.lt.s32.totalorder %v16319_v5, 18 }
  0xdd   : > { %13780 = vmatpush1.msk.msra.mxu0 %vm1108_vm2, %v1100_v25  ;;  %v1271_v31 = vsel %vm1270_vm3, %v1267_v30, %v1269_v29  ;;  %v1272_v35 = vsel %vm1270_vm3, %v1269_v29, %v1267_v30  ;;  %v1809_v29 = vrot.slane %v13810_v16, %v16322_v6  ;;  %vm2754_vm3 = vcmp.lt.s32.totalorder %v16319_v5, 17 }
  0xde   : > { %13781 = vmatmul.mubr.msk.f32.vlgmr.msra.gmra.mrb[0].mxu0 %vm1104_vm4, %v13778_v28  ;;  %13782 = vmatprep.subr.msk.mxu0 %vm1108_vm2, %v1078_v23  ;;  %v1287_v33 = vmul.f32 %v1283_v26, %v1271_v31  ;;  %v1286_v40 = vmul.f32 %v1279_v34, %v1272_v35  ;;  %v13815_v26 = vld [vmem:[%s18461_s9 + $0x10] sm:$0x3] }
  0xdf   : > { %13783 = vmatpush1.msk.msra.mxu0 %vm1108_vm2, %v1077_v27  ;;  %1259 = vmatprep.mubr.f32.mxu0 %v15956_v0  ;;  %v1919_v31 = vrot.slane %v13815_v26, %v16325_v7  ;;  %v13806_v34 = vld [vmem:[%s18459_s13 + $0x30] sm:$0xff] }
  0xe0   : > { %13787 = vmatprep.subr.msk.mxu0 %vm1108_vm2, %v1287_v33  ;;  %v1375_v36 = vpop.permute.xlu1 %1374  ;;  %v1373_v38 = vpop.permute.xlu0 %1372  ;;  %4440 = vrot.lane.b32.xlu1 %v16251_v2, %s18410_s1 }
  0xe1   : > { %v1377_v39 = vsel %vm1376_vm5, %v1373_v38, %v1375_v36  ;;  %4438 = vrot.lane.b32.xlu0 %v16245_v1, %s18410_s1  ;;  %v1378_v47 = vsel %vm1376_vm5, %v1375_v36, %v1373_v38  ;;  %s15989_s1 = smov 110   ;;  %v13820_v36 = vld [vmem:[%s18461_s9 + $0x12] sm:$0x3]  ;;  %vm2860_vm5 = vcmp.lt.s32.totalorder %v16319_v5, 16 }
  0xe2   : > { %v1393_v42 = vmul.f32 %v1389_v37, %v1377_v39  ;;  %v1392_v50 = vmul.f32 %v1385_v46, %v1378_v47  ;;  %v1915_v39 = vrot.slane %v13815_v26, %v16322_v6  ;;  %v13825_v46 = vld [vmem:[%s18461_s9 + $0x14] sm:$0x3] }
  0xe4   : > { %v1481_v44 = vpop.permute.xlu1 %1480  ;;  %v1479_v45 = vpop.permute.xlu0 %1478  ;;  %4546 = vrot.lane.b32.xlu1 %v16251_v2, %s15989_s1 }
  0xe5   : > { %v1483_v49 = vsel %vm1482_vm6, %v1479_v45, %v1481_v44  ;;  %4544 = vrot.lane.b32.xlu0 %v16245_v1, %s15989_s1  ;;  %v1484_v57 = vsel %vm1482_vm6, %v1481_v44, %v1479_v45  ;;  %s15990_s1 = smov 109   ;;  %v13811_v44 = vld [vmem:[%s18459_s13 + $0x38] sm:$0xff]  ;;  %vm2966_vm6 = vcmp.lt.s32.totalorder %v16319_v5, 15 }
  0xe6   : > { %13784 = vmatmul.mubr.msk.f32.vlgmr.msra.gmra.mrb[0].mxu0 %vm1104_vm4, %v1079_v41  ;;  %v1499_v52 = vmul.f32 %v1495_v48, %v1483_v49  ;;  %v1498_v60 = vmul.f32 %v1491_v56, %v1484_v57  ;;  %v2025_v41 = vrot.slane %v13820_v36, %v16325_v7  ;;  %v2021_v49 = vrot.slane %v13820_v36, %v16322_v6  ;;  %v13830_v56 = vld [vmem:[%s18461_s9 + $0x16] sm:$0x3] }
  0xe7   : > { %13788 = vmatpush1.msk.msra.mxu0 %vm1108_vm2, %v1286_v40  ;;  %1363 = vmatprep.mubr.f32.mxu0 %v15956_v0 }
  0xe8   : > { %13792 = vmatprep.subr.msk.mxu0 %vm1108_vm2, %v1393_v42  ;;  %v1587_v54 = vpop.permute.xlu1 %1586  ;;  %v1585_v55 = vpop.permute.xlu0 %1584  ;;  %4652 = vrot.lane.b32.xlu1 %v16251_v2, %s15990_s1 }
  0xe9   : > { %v1589_v59 = vsel %vm1588_vm7, %v1585_v55, %v1587_v54  ;;  %4650 = vrot.lane.b32.xlu0 %v16245_v1, %s15990_s1  ;;  %v1590_v10 = vsel %vm1588_vm7, %v1587_v54, %v1585_v55  ;;  %s15991_s1 = smov 99   ;;  %v13816_v54 = vld [vmem:[%s18459_s13 + $0x40] sm:$0xff]  ;;  %vm3072_vm7 = vcmp.lt.s32.totalorder %v16319_v5, 14 }
  0xea   : > { %v1605_v62 = vmul.f32 %v1601_v58, %v1589_v59  ;;  %v1604_v13 = vmul.f32 %v1597_v9, %v1590_v10  ;;  %v2127_v59 = vrot.slane %v13825_v46, %v16322_v6  ;;  %v13835_v9 = vld [vmem:[%s18461_s9 + $0x18] sm:$0x3] }
  0xec   : > { %v1693_v3 = vpop.permute.xlu1 %1692  ;;  %v1691_v8 = vpop.permute.xlu0 %1690  ;;  %4758 = vrot.lane.b32.xlu1 %v16251_v2, %s15991_s1 }
  0xed   : > { %v1695_v12 = vsel %vm1694_vm8, %v1691_v8, %v1693_v3  ;;  %4756 = vrot.lane.b32.xlu0 %v16245_v1, %s15991_s1  ;;  %v1696_v20 = vsel %vm1694_vm8, %v1693_v3, %v1691_v8  ;;  %s15992_s1 = smov 98   ;;  %v13821_v3 = vld [vmem:[%s18459_s13 + $0x48] sm:$0xff]  ;;  %vm3178_vm8 = vcmp.lt.s32.totalorder %v16319_v5, 13 }
  0xee   : > { %13789 = vmatmul.mubr.msk.f32.vlgmr.msra.gmra.mrb[0].mxu0 %vm1104_vm4, %v13786_v51  ;;  %v1711_v15 = vmul.f32 %v1707_v11, %v1695_v12  ;;  %v1710_v23 = vmul.f32 %v1703_v19, %v1696_v20  ;;  %v2131_v51 = vrot.slane %v13825_v46, %v16325_v7  ;;  %v2233_v12 = vrot.slane %v13830_v56, %v16322_v6  ;;  %v13840_v19 = vld [vmem:[%s18461_s9 + $0x1a] sm:$0x3] }
  0xef   : > { %13793 = vmatpush1.msk.msra.mxu0 %vm1108_vm2, %v1392_v50  ;;  %1469 = vmatprep.mubr.f32.mxu0 %v15956_v0 }
  0xf0   : > { %13797 = vmatprep.subr.msk.mxu0 %vm1108_vm2, %v1499_v52  ;;  %v1799_v17 = vpop.permute.xlu1 %1798  ;;  %v1797_v18 = vpop.permute.xlu0 %1796  ;;  %4864 = vrot.lane.b32.xlu1 %v16251_v2, %s15992_s1 }
  0xf1   : > { %v1801_v22 = vsel %vm1800_vm9, %v1797_v18, %v1799_v17  ;;  %4862 = vrot.lane.b32.xlu0 %v16245_v1, %s15992_s1  ;;  %v1802_v30 = vsel %vm1800_vm9, %v1799_v17, %v1797_v18  ;;  %s15993_s1 = smov 97   ;;  %v13826_v17 = vld [vmem:[%s18459_s13 + $0x50] sm:$0xff]  ;;  %vm3284_vm9 = vcmp.lt.s32.totalorder %v16319_v5, 3 }
  0xf2   : > { %v1817_v25 = vmul.f32 %v1813_v21, %v1801_v22  ;;  %v1816_v33 = vmul.f32 %v1809_v29, %v1802_v30  ;;  %v2339_v22 = vrot.slane %v13835_v9, %v16322_v6  ;;  %v13845_v29 = vld [vmem:[%s18461_s9 + $0x1c] sm:$0x3] }
  0xf4   : > { %v1905_v27 = vpop.permute.xlu1 %1904  ;;  %v1903_v28 = vpop.permute.xlu0 %1902  ;;  %4970 = vrot.lane.b32.xlu1 %v16251_v2, %s15993_s1 }
  0xf5   : > { %v1907_v32 = vsel %vm1906_vm10, %v1903_v28, %v1905_v27  ;;  %4968 = vrot.lane.b32.xlu0 %v16245_v1, %s15993_s1  ;;  %v1908_v40 = vsel %vm1906_vm10, %v1905_v27, %v1903_v28  ;;  %s15994_s1 = smov 96   ;;  %v13831_v27 = vld [vmem:[%s18459_s13 + $0x58] sm:$0xff]  ;;  %vm3390_vm10 = vcmp.lt.s32.totalorder %v16319_v5, 2 }
  0xf6   : > { %13794 = vmatmul.mubr.msk.f32.vlgmr.msra.gmra.mrb[0].mxu0 %vm1104_vm4, %v13791_v61  ;;  %v1923_v35 = vmul.f32 %v1919_v31, %v1907_v32  ;;  %v1922_v43 = vmul.f32 %v1915_v39, %v1908_v40  ;;  %v2237_v61 = vrot.slane %v13830_v56, %v16325_v7  ;;  %v2445_v32 = vrot.slane %v13840_v19, %v16322_v6  ;;  %v13850_v39 = vld [vmem:[%s18461_s9 + $0x1e] sm:$0x3] }
  0xf7   : > { %13798 = vmatpush1.msk.msra.mxu0 %vm1108_vm2, %v1498_v60  ;;  %1575 = vmatprep.mubr.f32.mxu0 %v15956_v0 }
  0xf8   : > { %13802 = vmatprep.subr.msk.mxu0 %vm1108_vm2, %v1605_v62  ;;  %v2011_v37 = vpop.permute.xlu1 %2010  ;;  %v2009_v38 = vpop.permute.xlu0 %2008  ;;  %5076 = vrot.lane.b32.xlu1 %v16251_v2, %s15994_s1 }
  0xf9   : > { %v2013_v42 = vsel %vm2012_vm11, %v2009_v38, %v2011_v37  ;;  %5074 = vrot.lane.b32.xlu0 %v16245_v1, %s15994_s1  ;;  %v2014_v50 = vsel %vm2012_vm11, %v2011_v37, %v2009_v38  ;;  %s15995_s1 = smov 95   ;;  %v13836_v37 = vld [vmem:[%s18459_s13 + $0x60] sm:$0xff]  ;;  %vm3496_vm11 = vcmp.lt.s32.totalorder %v16319_v5, 1 }
  0xfa   : > { %v2029_v45 = vmul.f32 %v2025_v41, %v2013_v42  ;;  %v2028_v53 = vmul.f32 %v2021_v49, %v2014_v50  ;;  %v2551_v42 = vrot.slane %v13845_v29, %v16322_v6  ;;  %v13855_v49 = vld [vmem:[%s18461_s9 + $0x20] sm:$0x3] }
  0xfc   : > { %v2117_v47 = vpop.permute.xlu1 %2116  ;;  %v2115_v48 = vpop.permute.xlu0 %2114  ;;  %5182 = vrot.lane.b32.xlu1 %v16251_v2, %s15995_s1 }
  0xfd   : > { %v2119_v52 = vsel %vm2118_vm12, %v2115_v48, %v2117_v47  ;;  %5180 = vrot.lane.b32.xlu0 %v16245_v1, %s15995_s1  ;;  %v2120_v60 = vsel %vm2118_vm12, %v2117_v47, %v2115_v48  ;;  %s15996_s1 = smov 94   ;;  %v13841_v47 = vld [vmem:[%s18459_s13 + $0x68] sm:$0xff]  ;;  %vm3700_vm12 = vcmp.lt.s32.totalorder %v16319_v5, 127 }
  0xfe   : > { %13799 = vmatmul.mubr.msk.f32.vlgmr.msra.gmra.mrb[0].mxu0 %vm1104_vm4, %v13796_v14  ;;  %v2135_v55 = vmul.f32 %v2131_v51, %v2119_v52  ;;  %v2134_v63 = vmul.f32 %v2127_v59, %v2120_v60  ;;  %v2343_v14 = vrot.slane %v13835_v9, %v16325_v7  ;;  %v2657_v52 = vrot.slane %v13850_v39, %v16322_v6  ;;  %v13860_v59 = vld [vmem:[%s18461_s9 + $0x22] sm:$0x3] }
  0xff   : > { %13803 = vmatpush1.msk.msra.mxu0 %vm1108_vm2, %v1604_v13  ;;  %1681 = vmatprep.mubr.f32.mxu0 %v15956_v0 }
 0x100   : > { %13807 = vmatprep.subr.msk.mxu0 %vm1108_vm2, %v1711_v15  ;;  %v2223_v57 = vpop.permute.xlu1 %2222  ;;  %v2221_v58 = vpop.permute.xlu0 %2220  ;;  %5288 = vrot.lane.b32.xlu1 %v16251_v2, %s15996_s1 }
 0x101   : > { %v2225_v62 = vsel %vm2224_vm13, %v2221_v58, %v2223_v57  ;;  %5286 = vrot.lane.b32.xlu0 %v16245_v1, %s15996_s1  ;;  %v2226_v13 = vsel %vm2224_vm13, %v2223_v57, %v2221_v58  ;;  %s15997_s1 = smov 93   ;;  %v13846_v57 = vld [vmem:[%s18459_s13 + $0x70] sm:$0xff]  ;;  %vm3806_vm13 = vcmp.lt.s32.totalorder %v16319_v5, 126 }
 0x102   : > { %v2241_v8 = vmul.f32 %v2237_v61, %v2225_v62  ;;  %v2240_v16 = vmul.f32 %v2233_v12, %v2226_v13  ;;  %v2763_v62 = vrot.slane %v13855_v49, %v16322_v6  ;;  %v13865_v12 = vld [vmem:[%s18461_s9 + $0x24] sm:$0x3] }
 0x104   : > { %v2329_v10 = vpop.permute.xlu1 %2328  ;;  %v2327_v11 = vpop.permute.xlu0 %2326  ;;  %5394 = vrot.lane.b32.xlu1 %v16251_v2, %s15997_s1 }
 0x105   : > { %v2331_v15 = vsel %vm2330_vm14, %v2327_v11, %v2329_v10  ;;  %5392 = vrot.lane.b32.xlu0 %v16245_v1, %s15997_s1  ;;  %s15998_s1 = smov 83  }
 0x106   : > { %13804 = vmatmul.mubr.msk.f32.vlgmr.msra.gmra.mrb[0].mxu0 %vm1104_vm4, %v13801_v24  ;;  %v2347_v18 = vmul.f32 %v2343_v14, %v2331_v15  ;;  %v2449_v24 = vrot.slane %v13840_v19, %v16325_v7  ;;  %v2869_v15 = vrot.slane %v13860_v59, %v16322_v6 }
 0x107   : > { %13808 = vmatpush1.msk.msra.mxu0 %vm1108_vm2, %v1710_v23  ;;  %1787 = vmatprep.mubr.f32.mxu0 %v15956_v0  ;;  %v2332_v23 = vsel %vm2330_vm14, %v2329_v10, %v2327_v11  ;;  %v13851_v10 = vld [vmem:[%s18459_s13 + $0x78] sm:$0xff]  ;;  %vm3912_vm14 = vcmp.lt.s32.totalorder %v16319_v5, 125 }
 0x108   : > { %13812 = vmatprep.subr.msk.mxu0 %vm1108_vm2, %v1817_v25  ;;  %v2435_v20 = vpop.permute.xlu1 %2434  ;;  %v2433_v21 = vpop.permute.xlu0 %2432  ;;  %5500 = vrot.lane.b32.xlu1 %v16251_v2, %s15998_s1  ;;  %v2346_v26 = vmul.f32 %v2339_v22, %v2332_v23  ;;  %v13870_v22 = vld [vmem:[%s18461_s9 + $0x26] sm:$0x3] }
 0x109   : > { %v2437_v25 = vsel %vm2436_vm15, %v2433_v21, %v2435_v20  ;;  %5498 = vrot.lane.b32.xlu0 %v16245_v1, %s15998_s1  ;;  %s15999_s1 = smov 82  }
 0x10a   : > { %v2453_v28 = vmul.f32 %v2449_v24, %v2437_v25  ;;  %v2975_v25 = vrot.slane %v13865_v12, %v16322_v6 }
 0x10c   : > { %v2541_v30 = vpop.permute.xlu1 %2540  ;;  %v2539_v31 = vpop.permute.xlu0 %2538  ;;  %5606 = vrot.lane.b32.xlu1 %v16251_v2, %s15999_s1 }
 0x10d   : > { %5604 = vrot.lane.b32.xlu0 %v16245_v1, %s15999_s1  ;;  %s16000_s1 = smov 81  }
 0x10e   : > { %13809 = vmatmul.mubr.msk.f32.vlgmr.msra.gmra.mrb[0].mxu0 %vm1104_vm4, %v13806_v34  ;;  %v2555_v34 = vrot.slane %v13845_v29, %v16325_v7 }
 0x10f   : > { %13813 = vmatpush1.msk.msra.mxu0 %vm1108_vm2, %v1816_v33  ;;  %1893 = vmatprep.mubr.f32.mxu0 %v15956_v0  ;;  %v2438_v33 = vsel %vm2436_vm15, %v2435_v20, %v2433_v21  ;;  %v13856_v20 = vld [vmem:[%s18459_s13 + $0x80] sm:$0xff]  ;;  %vm4018_vm15 = vcmp.lt.s32.totalorder %v16319_v5, 115 }
 0x110   : > { %13817 = vmatprep.subr.msk.mxu0 %vm1108_vm2, %v1923_v35  ;;  %v2543_v35 = vsel %vm2542_vm0, %v2539_v31, %v2541_v30  ;;  %v2452_v36 = vmul.f32 %v2445_v32, %v2438_v33  ;;  %v2647_v40 = vpop.permute.xlu1 %2646  ;;  %v2645_v41 = vpop.permute.xlu0 %2644  ;;  %5712 = vrot.lane.b32.xlu1 %v16251_v2, %s16000_s1  ;;  %v13875_v32 = vld [vmem:[%s18461_s9 + $0x28] sm:$0x3] }
 0x111   : > { %v2559_v38 = vmul.f32 %v2555_v34, %v2543_v35  ;;  %5710 = vrot.lane.b32.xlu0 %v16245_v1, %s16000_s1  ;;  %s16001_s1 = smov 80  }
 0x114   : > { %v2753_v50 = vpop.permute.xlu1 %2752  ;;  %v2751_v51 = vpop.permute.xlu0 %2750  ;;  %5818 = vrot.lane.b32.xlu1 %v16251_v2, %s16001_s1 }
 0x115   : > { %5816 = vrot.lane.b32.xlu0 %v16245_v1, %s16001_s1  ;;  %s16002_s1 = smov 79  }
 0x116   : > { %13814 = vmatmul.mubr.msk.f32.vlgmr.msra.gmra.mrb[0].mxu0 %vm1104_vm4, %v13811_v44  ;;  %v2661_v44 = vrot.slane %v13850_v39, %v16325_v7  ;;  %v13866_v39 = vld [vmem:[%s18459_s13 + $0x90] sm:$0xff] }
 0x117   : > { %13818 = vmatpush1.msk.msra.mxu0 %vm1108_vm2, %v1922_v43  ;;  %1999 = vmatprep.mubr.f32.mxu0 %v15956_v0  ;;  %v2544_v43 = vsel %vm2542_vm0, %v2541_v30, %v2539_v31  ;;  %v13861_v30 = vld [vmem:[%s18459_s13 + $0x88] sm:$0xff]  ;;  %vm4124_vm0 = vcmp.lt.s32.totalorder %v16319_v5, 114 }
 0x118   : > { %13822 = vmatprep.subr.msk.mxu0 %vm1108_vm2, %v2029_v45  ;;  %v2649_v45 = vsel %vm2648_vm1, %v2645_v41, %v2647_v40  ;;  %v2558_v46 = vmul.f32 %v2551_v42, %v2544_v43  ;;  %v2859_v60 = vpop.permute.xlu1 %2858  ;;  %v2857_v61 = vpop.permute.xlu0 %2856  ;;  %5924 = vrot.lane.b32.xlu1 %v16251_v2, %s16002_s1 }
 0x119   : > { %v2665_v48 = vmul.f32 %v2661_v44, %v2649_v45  ;;  %5922 = vrot.lane.b32.xlu0 %v16245_v1, %s16002_s1  ;;  %s16003_s1 = smov 78   ;;  %v3187_v44 = vrot.slane %v13875_v32, %v16322_v6 }
 0x11c   : > { %v2965_v13 = vpop.permute.xlu1 %2964  ;;  %v2963_v14 = vpop.permute.xlu0 %2962  ;;  %6030 = vrot.lane.b32.xlu1 %v16251_v2, %s16003_s1 }
 0x11d   : > { %6028 = vrot.lane.b32.xlu0 %v16245_v1, %s16003_s1  ;;  %s16004_s1 = smov 77  }
 0x11e   : > { %13819 = vmatmul.mubr.msk.f32.vlgmr.msra.gmra.mrb[0].mxu0 %vm1104_vm4, %v13816_v54  ;;  %v2767_v54 = vrot.slane %v13855_v49, %v16325_v7  ;;  %v13871_v49 = vld [vmem:[%s18459_s13 + $0x98] sm:$0xff] }
 0x11f   : > { %13823 = vmatpush1.msk.msra.mxu0 %vm1108_vm2, %v2028_v53  ;;  %2105 = vmatprep.mubr.f32.mxu0 %v15956_v0  ;;  %v2650_v53 = vsel %vm2648_vm1, %v2647_v40, %v2645_v41  ;;  %v13880_v41 = vld [vmem:[%s18461_s9 + $0x2a] sm:$0x3]  ;;  %vm4230_vm1 = vcmp.lt.s32.totalorder %v16319_v5, 113 }
 0x120   : > { %13827 = vmatprep.subr.msk.mxu0 %vm1108_vm2, %v2135_v55  ;;  %v2755_v55 = vsel %vm2754_vm3, %v2751_v51, %v2753_v50  ;;  %v2664_v56 = vmul.f32 %v2657_v52, %v2650_v53  ;;  %v3071_v23 = vpop.permute.xlu1 %3070  ;;  %v3069_v24 = vpop.permute.xlu0 %3068  ;;  %6136 = vrot.lane.b32.xlu1 %v16251_v2, %s16004_s1  ;;  %v3081_v2 = vrot.slane %v13870_v22, %v16322_v6 }
 0x121   : > { %v2771_v58 = vmul.f32 %v2767_v54, %v2755_v55  ;;  %6134 = vrot.lane.b32.xlu0 %v16245_v1, %s16004_s1  ;;  %v3074_v35 = vsel %vm3072_vm7, %v3071_v23, %v3069_v24  ;;  %v3293_v54 = vrot.slane %v13880_v41, %v16322_v6 }
 0x124   : > { %v3177_v33 = vpop.permute.xlu1 %3176  ;;  %v3175_v34 = vpop.permute.xlu0 %3174 }
 0x125   : > { %v3180_v45 = vsel %vm3178_vm8, %v3177_v33, %v3175_v34 }
 0x126   : > { %13824 = vmatmul.mubr.msk.f32.vlgmr.msra.gmra.mrb[0].mxu0 %vm1104_vm4, %v13821_v3  ;;  %v2873_v3 = vrot.slane %v13860_v59, %v16325_v7  ;;  %v13876_v59 = vld [vmem:[%s18459_s13 + $0xa0] sm:$0xff] }
 0x127   : > { %13828 = vmatpush1.msk.msra.mxu0 %vm1108_vm2, %v2134_v63  ;;  %2211 = vmatprep.mubr.f32.mxu0 %v15956_v0  ;;  %v2756_v63 = vsel %vm2754_vm3, %v2753_v50, %v2751_v51  ;;  %v13885_v51 = vld [vmem:[%s18461_s9 + $0x2c] sm:$0x3] }
 0x128   : > { %13832 = vmatprep.subr.msk.mxu0 %vm1108_vm2, %v2241_v8  ;;  %v2861_v8 = vsel %vm2860_vm5, %v2857_v61, %v2859_v60  ;;  %v2770_v9 = vmul.f32 %v2763_v62, %v2756_v63  ;;  %v3283_v42 = vpop.permute.xlu1 %3282  ;;  %v3281_v43 = vpop.permute.xlu0 %3280  ;;  %v13895_v62 = vld [vmem:[%s18461_s9 + $0x30] sm:$0x3] }
 0x129   : > { %v2877_v11 = vmul.f32 %v2873_v3, %v2861_v8  ;;  %v3286_v55 = vsel %vm3284_vm9, %v3283_v42, %v3281_v43  ;;  %v3399_v8 = vrot.slane %v13885_v51, %v16322_v6 }
 0x12c   : > { %v3389_v52 = vpop.permute.xlu1 %3388  ;;  %v3387_v53 = vpop.permute.xlu0 %3386 }
 0x12e   : > { %13829 = vmatmul.mubr.msk.f32.vlgmr.msra.gmra.mrb[0].mxu0 %vm1104_vm4, %v13826_v17  ;;  %v2979_v17 = vrot.slane %v13865_v12, %v16325_v7  ;;  %v3608_v12 = vrot.slane %v13895_v62, %v16325_v7 }
 0x12f   : > { %13833 = vmatpush1.msk.msra.mxu0 %vm1108_vm2, %v2240_v16  ;;  %2317 = vmatprep.mubr.f32.mxu0 %v15956_v0  ;;  %v2862_v16 = vsel %vm2860_vm5, %v2859_v60, %v2857_v61  ;;  %v13890_v61 = vld [vmem:[%s18461_s9 + $0x2e] sm:$0x3] }
 0x130   : > { %13837 = vmatprep.subr.msk.mxu0 %vm1108_vm2, %v2347_v18  ;;  %v2967_v18 = vsel %vm2966_vm6, %v2963_v14, %v2965_v13  ;;  %v2876_v19 = vmul.f32 %v2869_v15, %v2862_v16  ;;  %v3495_v63 = vpop.permute.xlu1 %3494  ;;  %v3493_v3 = vpop.permute.xlu0 %3492  ;;  %v13881_v15 = vld [vmem:[%s18459_s13 + $0xa8] sm:$0xff] }
 0x131   : > { %v2983_v21 = vmul.f32 %v2979_v17, %v2967_v18  ;;  %v3505_v18 = vrot.slane %v13890_v61, %v16322_v6 }
 0x136   : > { %13834 = vmatmul.mubr.msk.f32.vlgmr.msra.gmra.mrb[0].mxu0 %vm1104_vm4, %v13831_v27  ;;  %v3085_v27 = vrot.slane %v13870_v22, %v16325_v7  ;;  %v13886_v22 = vld [vmem:[%s18459_s13 + $0xb0] sm:$0xff] }
 0x137   : > { %13838 = vmatpush1.msk.msra.mxu0 %vm1108_vm2, %v2346_v26  ;;  %2423 = vmatprep.mubr.f32.mxu0 %v15956_v0  ;;  %v2968_v26 = vsel %vm2966_vm6, %v2965_v13, %v2963_v14  ;;  %v3497_v13 = vsel %vm3496_vm11, %v3493_v3, %v3495_v63 }
 0x138   : > { %13842 = vmatprep.subr.msk.mxu0 %vm1108_vm2, %v2453_v28  ;;  %v3073_v28 = vsel %vm3072_vm7, %v3069_v24, %v3071_v23  ;;  %v2982_v29 = vmul.f32 %v2975_v25, %v2968_v26  ;;  %v13900_v24 = vld [vmem:[%s18461_s9 + $0x32] sm:$0x3]  ;;  %v3699_v25 = vpop.permute.xlu1 %3698  ;;  %v3697_v26 = vpop.permute.xlu0 %3696  ;;  %vm4336_vm7 = vcmp.lt.s32.totalorder %v16319_v5, 112 }
 0x139   : > { %v3089_v31 = vmul.f32 %v3085_v27, %v3073_v28  ;;  %v3713_v27 = vrot.slane %v13900_v24, %v16325_v7  ;;  %v13891_v28 = vld [vmem:[%s18459_s13 + $0xb8] sm:$0xff] }
 0x13e   : > { %13839 = vmatmul.mubr.msk.f32.vlgmr.msra.gmra.mrb[0].mxu0 %vm1104_vm4, %v13836_v37  ;;  %v3179_v37 = vsel %vm3178_vm8, %v3175_v34, %v3177_v33  ;;  %v3709_v33 = vrot.slane %v13900_v24, %v16322_v6  ;;  %v3701_v34 = vsel %vm3700_vm12, %v3697_v26, %v3699_v25  ;;  %vm4442_vm8 = vcmp.lt.s32.totalorder %v16319_v5, 111 }
 0x13f   : > { %13843 = vmatpush1.msk.msra.mxu0 %vm1108_vm2, %v2452_v36  ;;  %2529 = vmatprep.mubr.f32.mxu0 %v15956_v0  ;;  %v3191_v36 = vrot.slane %v13875_v32, %v16325_v7  ;;  %v3803_v32 = vpop.permute.xlu0 %3802 }
 0x140   : > { %13847 = vmatprep.subr.msk.mxu0 %vm1108_vm2, %v2559_v38  ;;  %v3088_v38 = vmul.f32 %v3081_v2, %v3074_v35 }
 0x141   : > { %v3195_v40 = vmul.f32 %v3191_v36, %v3179_v37  ;;  %v3716_v36 = vmul.f32 %v3709_v33, %v3701_v34  ;;  %v13896_v37 = vld [vmem:[%s18459_s13 + $0xc0] sm:$0xff] }
 0x146   : > { %13844 = vmatmul.mubr.msk.f32.vlgmr.msra.gmra.mrb[0].mxu0 %vm1104_vm4, %v13841_v47  ;;  %v3285_v47 = vsel %vm3284_vm9, %v3281_v43, %v3283_v42  ;;  %vm4548_vm9 = vcmp.lt.s32.totalorder %v16319_v5, 110 }
 0x147   : > { %13848 = vmatpush1.msk.msra.mxu0 %vm1108_vm2, %v2558_v46  ;;  %2635 = vmatprep.mubr.f32.mxu0 %v15956_v0  ;;  %v3297_v46 = vrot.slane %v13880_v41, %v16325_v7  ;;  %v3909_v41 = vpop.permute.xlu0 %3908 }
 0x148   : > { %13852 = vmatprep.subr.msk.mxu0 %vm1108_vm2, %v2665_v48  ;;  %v3194_v48 = vmul.f32 %v3187_v44, %v3180_v45 }
 0x149   : > { %v3301_v50 = vmul.f32 %v3297_v46, %v3285_v47  ;;  %v13901_v47 = vld [vmem:[%s18459_s13 + $0xc8] sm:$0xff] }
 0x14e   : > { %13849 = vmatmul.mubr.msk.f32.vlgmr.msra.gmra.mrb[0].mxu0 %vm1104_vm4, %v13846_v57  ;;  %v3391_v57 = vsel %vm3390_vm10, %v3387_v53, %v3389_v52 }
 0x14f   : > { %13853 = vmatpush1.msk.msra.mxu0 %vm1108_vm2, %v2664_v56  ;;  %2741 = vmatprep.mubr.f32.mxu0 %v15956_v0  ;;  %v3403_v56 = vrot.slane %v13885_v51, %v16325_v7  ;;  %v4015_v51 = vpop.permute.xlu0 %4014 }
 0x150   : > { %13857 = vmatprep.subr.msk.mxu0 %vm1108_vm2, %v2771_v58  ;;  %v3300_v58 = vmul.f32 %v3293_v54, %v3286_v55 }
 0x151   : > { %v3407_v60 = vmul.f32 %v3403_v56, %v3391_v57  ;;  %v13906_v57 = vld [vmem:[%s18459_s13 + $0xd0] sm:$0xff] }
 0x156   : > { %13854 = vmatmul.mubr.msk.f32.vlgmr.msra.gmra.mrb[0].mxu0 %vm1104_vm4, %v13851_v10  ;;  %v3509_v10 = vrot.slane %v13890_v61, %v16325_v7  ;;  %v4121_v61 = vpop.permute.xlu0 %4120 }
 0x157   : > { %13858 = vmatpush1.msk.msra.mxu0 %vm1108_vm2, %v2770_v9  ;;  %2847 = vmatprep.mubr.f32.mxu0 %v15956_v0  ;;  %v3392_v9 = vsel %vm3390_vm10, %v3389_v52, %v3387_v53  ;;  %vm4654_vm10 = vcmp.lt.s32.totalorder %v16319_v5, 109 }
 0x158   : > { %13862 = vmatprep.subr.msk.mxu0 %vm1108_vm2, %v2877_v11  ;;  %v3604_v11 = vrot.slane %v13895_v62, %v16322_v6  ;;  %v3406_v14 = vmul.f32 %v3399_v8, %v3392_v9  ;;  %v3513_v16 = vmul.f32 %v3509_v10, %v3497_v13  ;;  %v13911_v10 = vld [vmem:[%s18459_s13 + $0xd8] sm:$0xff] }
 0x15a   : > { %v3609_v17 = vcombine.low %v3604_v11, %v3608_v12  ;;  %v13925_v12 = vld [vmem:[%s18461_s9 + $0x3c] sm:$0x3] }
 0x15e   : > { %13859 = vmatmul.mubr.msk.f32.vlgmr.msra.gmra.mrb[0].mxu0 %vm1104_vm4, %v13856_v20  ;;  %v3611_v20 = vmul.f32 %v3609_v17, %v16245_v1  ;;  %v3702_v1 = vsel %vm3700_vm12, %v3699_v25, %v3697_v26  ;;  %v4243_v17 = vrot.slane %v13925_v12, %v16325_v7  ;;  %v4239_v25 = vrot.slane %v13925_v12, %v16322_v6 }
 0x15f   : > { %13863 = vmatpush1.msk.msra.mxu0 %vm1108_vm2, %v2876_v19  ;;  %2953 = vmatprep.mubr.f32.mxu0 %v15956_v0  ;;  %v3498_v19 = vsel %vm3496_vm11, %v3495_v63, %v3493_v3 }
 0x160   : > { %13867 = vmatprep.subr.msk.mxu0 %vm1108_vm2, %v2983_v21  ;;  %v3512_v21 = vmul.f32 %v3505_v18, %v3498_v19  ;;  %v3615_v23 = vcombine.high %v3611_v20, %v3611_v20 }
 0x166   : > { %13864 = vmatmul.mubr.msk.f32.vlgmr.msra.gmra.mrb[0].mxu0 %vm1104_vm4, %v13861_v30  ;;  %v13905_v30 = vld [vmem:[%s18461_s9 + $0x34] sm:$0x3] }
 0x167   : > { %13868 = vmatpush1.msk.msra.mxu0 %vm1108_vm2, %v2982_v29  ;;  %3059 = vmatprep.mubr.f32.mxu0 %v15956_v0  ;;  %v3717_v29 = vmul.f32 %v3713_v27, %v3702_v1  ;;  %v3819_v2 = vrot.slane %v13905_v30, %v16325_v7  ;;  %v3815_v42 = vrot.slane %v13905_v30, %v16322_v6 }
 0x168   : > { %13872 = vmatprep.subr.msk.mxu0 %vm1108_vm2, %v3089_v31  ;;  %v3805_v31 = vpop.permute.xlu1 %3804 }
 0x169   : > { %v3808_v35 = vsel %vm3806_vm13, %v3805_v31, %v3803_v32  ;;  %v3807_v43 = vsel %vm3806_vm13, %v3803_v32, %v3805_v31  ;;  %v13935_v31 = vld [vmem:[%s18461_s9 + $0x40] sm:$0x3]  ;;  %vm4760_vm13 = vcmp.lt.s32.totalorder %v16319_v5, 99 }
 0x16a   : > { %v3822_v46 = vmul.f32 %v3815_v42, %v3807_v43  ;;  %v4451_v43 = vrot.slane %v13935_v31, %v16322_v6 }
 0x16e   : > { %13869 = vmatmul.mubr.msk.f32.vlgmr.msra.gmra.mrb[0].mxu0 %vm1104_vm4, %v13866_v39  ;;  %v13910_v39 = vld [vmem:[%s18461_s9 + $0x36] sm:$0x3] }
 0x16f   : > { %13873 = vmatpush1.msk.msra.mxu0 %vm1108_vm2, %v3088_v38  ;;  %3165 = vmatprep.mubr.f32.mxu0 %v15956_v0  ;;  %v3823_v38 = vmul.f32 %v3819_v2, %v3808_v35  ;;  %v3925_v44 = vrot.slane %v13910_v39, %v16325_v7  ;;  %v3921_v52 = vrot.slane %v13910_v39, %v16322_v6 }
 0x170   : > { %13877 = vmatprep.subr.msk.mxu0 %vm1108_vm2, %v3195_v40  ;;  %v3911_v40 = vpop.permute.xlu1 %3910  ;;  %v4455_v35 = vrot.slane %v13935_v31, %v16325_v7 }
 0x171   : > { %v3914_v45 = vsel %vm3912_vm14, %v3911_v40, %v3909_v41  ;;  %v3913_v53 = vsel %vm3912_vm14, %v3909_v41, %v3911_v40  ;;  %v13940_v40 = vld [vmem:[%s18461_s9 + $0x42] sm:$0x3]  ;;  %vm4866_vm14 = vcmp.lt.s32.totalorder %v16319_v5, 98 }
 0x172   : > { %v3928_v56 = vmul.f32 %v3921_v52, %v3913_v53  ;;  %v4557_v53 = vrot.slane %v13940_v40, %v16322_v6 }
 0x176   : > { %13874 = vmatmul.mubr.msk.f32.vlgmr.msra.gmra.mrb[0].mxu0 %vm1104_vm4, %v13871_v49  ;;  %v13915_v49 = vld [vmem:[%s18461_s9 + $0x38] sm:$0x3] }
 0x177   : > { %13878 = vmatpush1.msk.msra.mxu0 %vm1108_vm2, %v3194_v48  ;;  %3271 = vmatprep.mubr.f32.mxu0 %v15956_v0  ;;  %v3929_v48 = vmul.f32 %v3925_v44, %v3914_v45  ;;  %v4031_v54 = vrot.slane %v13915_v49, %v16325_v7  ;;  %v4027_v62 = vrot.slane %v13915_v49, %v16322_v6 }
 0x178   : > { %13882 = vmatprep.subr.msk.mxu0 %vm1108_vm2, %v3301_v50  ;;  %v4017_v50 = vpop.permute.xlu1 %4016  ;;  %v4561_v45 = vrot.slane %v13940_v40, %v16325_v7 }
 0x179   : > { %v4020_v55 = vsel %vm4018_vm15, %v4017_v50, %v4015_v51  ;;  %v4019_v63 = vsel %vm4018_vm15, %v4015_v51, %v4017_v50  ;;  %v13945_v50 = vld [vmem:[%s18461_s9 + $0x44] sm:$0x3]  ;;  %vm4972_vm15 = vcmp.lt.s32.totalorder %v16319_v5, 97 }
 0x17a   : > { %v4034_v9 = vmul.f32 %v4027_v62, %v4019_v63  ;;  %v6240_v63 = vld [vmem:[%s18467_s17] sm:$0xff] }
 0x17e   : > { %13879 = vmatmul.mubr.msk.f32.vlgmr.msra.gmra.mrb[0].mxu0 %vm1104_vm4, %v13876_v59  ;;  %v13920_v59 = vld [vmem:[%s18461_s9 + $0x3a] sm:$0x3] }
 0x17f   : > { %13883 = vmatpush1.msk.msra.mxu0 %vm1108_vm2, %v3300_v58  ;;  %3377 = vmatprep.mubr.f32.mxu0 %v15956_v0  ;;  %v4035_v58 = vmul.f32 %v4031_v54, %v4020_v55  ;;  %v4137_v3 = vrot.slane %v13920_v59, %v16325_v7  ;;  %v4667_v55 = vrot.slane %v13945_v50, %v16325_v7 }
 0x180   : > { %13887 = vmatprep.subr.msk.mxu0 %vm1108_vm2, %v3407_v60  ;;  %v4123_v60 = vpop.permute.xlu1 %4122 }
 0x181   : > { %v4126_v8 = vsel %vm4124_vm0, %v4123_v60, %v4121_v61 }
 0x182   : > { %v4141_v11 = vmul.f32 %v4137_v3, %v4126_v8  ;;  %v4663_v3 = vrot.slane %v13945_v50, %v16322_v6 }
 0x184   : > { %v4229_v13 = vpop.permute.xlu1 %4228 }
 0x186   : > { %13884 = vmatmul.mubr.msk.f32.vlgmr.msra.gmra.mrb[0].mxu0 %vm1104_vm4, %v13881_v15  ;;  %v4133_v15 = vrot.slane %v13920_v59, %v16322_v6 }
 0x187   : > { %13888 = vmatpush1.msk.msra.mxu0 %vm1108_vm2, %v3406_v14  ;;  %3483 = vmatprep.mubr.f32.mxu0 %v15956_v0  ;;  %v4227_v14 = vpop.permute.xlu0 %4226 }
 0x188   : > { %13892 = vmatprep.subr.msk.mxu0 %vm1108_vm2, %v3513_v16  ;;  %v4125_v16 = vsel %vm4124_vm0, %v4121_v61, %v4123_v60  ;;  %v4232_v18 = vsel %vm4230_vm1, %v4229_v13, %v4227_v14  ;;  %v4231_v26 = vsel %vm4230_vm1, %v4227_v14, %v4229_v13  ;;  %v13950_v60 = vld [vmem:[%s18461_s9 + $0x46] sm:$0x3]  ;;  %v13941_v13 = vld [vmem:[%s18459_s13 + $0x108] sm:$0xff]  ;;  %vm5078_vm0 = vcmp.lt.s32.totalorder %v16319_v5, 96 }
 0x189   : > { %v4140_v19 = vmul.f32 %v4133_v15, %v4125_v16  ;;  %v13955_v15 = vld [vmem:[%s18461_s9 + $0x48] sm:$0x3] }
 0x18b   : > { %v4333_v24 = vpop.permute.xlu0 %4332 }
 0x18e   : > { %13889 = vmatmul.mubr.msk.f32.vlgmr.msra.gmra.mrb[0].mxu0 %vm1104_vm4, %v13886_v22  ;;  %v13930_v22 = vld [vmem:[%s18461_s9 + $0x3e] sm:$0x3] }
 0x18f   : > { %13893 = vmatpush1.msk.msra.mxu0 %vm1108_vm2, %v3512_v21  ;;  %3589 = vmatprep.mubr.f32.mxu0 %v15956_v0  ;;  %v4247_v21 = vmul.f32 %v4243_v17, %v4232_v18  ;;  %v4349_v27 = vrot.slane %v13930_v22, %v16325_v7  ;;  %v4439_v33 = vpop.permute.xlu0 %4438  ;;  %v4345_v34 = vrot.slane %v13930_v22, %v16322_v6 }
 0x190   : > { %13897 = vmatprep.subr.msk.mxu0 %vm1108_vm2, %v3615_v23  ;;  %v4335_v23 = vpop.permute.xlu1 %4334  ;;  %v4769_v18 = vrot.slane %v13950_v60, %v16322_v6 }
 0x191   : > { %v4338_v1 = vsel %vm4336_vm7, %v4335_v23, %v4333_v24  ;;  %v4337_v2 = vsel %vm4336_vm7, %v4333_v24, %v4335_v23  ;;  %v13946_v23 = vld [vmem:[%s18459_s13 + $0x110] sm:$0xff] }
 0x192   : > { %v4353_v30 = vmul.f32 %v4349_v27, %v4338_v1  ;;  %v4875_v1 = vrot.slane %v13955_v15, %v16322_v6 }
 0x193   : > { %v4545_v42 = vpop.permute.xlu0 %4544 }
 0x194   : > { %v4441_v32 = vpop.permute.xlu1 %4440 }
 0x195   : > { %v4443_v44 = vsel %vm4442_vm8, %v4439_v33, %v4441_v32 }
 0x196   : > { %13894 = vmatmul.mubr.msk.f32.vlgmr.msra.gmra.mrb[0].mxu0 %vm1104_vm4, %v13891_v28  ;;  %v4246_v28 = vmul.f32 %v4239_v25, %v4231_v26  ;;  %v13960_v25 = vld [vmem:[%s18461_s9 + $0x4a] sm:$0x3] }
 0x197   : > { %13898 = vmatpush1.msk.msra.mxu0 %vm1108_vm2, %v3611_v20  ;;  %3687 = vmatprep.mubr.f32.mxu0 %v15956_v0  ;;  %v13916_v20 = vld [vmem:[%s18459_s13 + $0xe0] sm:$0xff]  ;;  %v4651_v52 = vpop.permute.xlu0 %4650 }
 0x198   : > { %13902 = vmatprep.subr.msk.mxu0 %vm1108_vm2, %v3717_v29  ;;  %v13921_v29 = vld [vmem:[%s18459_s13 + $0xe8] sm:$0xff]  ;;  %v4547_v41 = vpop.permute.xlu1 %4546 }
 0x199   : > { %v4549_v54 = vsel %vm4548_vm9, %v4545_v42, %v4547_v41 }
 0x19b   : > { %v4757_v62 = vpop.permute.xlu0 %4756 }
 0x19c   : > { %v4653_v51 = vpop.permute.xlu1 %4652 }
 0x19d   : > { %v4655_v8 = vsel %vm4654_vm10, %v4651_v52, %v4653_v51 }
 0x19e   : > { %13899 = vmatmul.mubr.msk.f32.vlgmr.msra.gmra.mrb[0].mxu0 %vm1104_vm4, %v13896_v37  ;;  %v4352_v37 = vmul.f32 %v4345_v34, %v4337_v2  ;;  %v4670_v12 = vmul.f32 %v4663_v3, %v4655_v8  ;;  %v13965_v34 = vld [vmem:[%s18461_s9 + $0x4c] sm:$0x3] }
 0x19f   : > { %13903 = vmatpush1.msk.msra.mxu0 %vm1108_vm2, %v3716_v36  ;;  %3793 = vmatprep.mubr.f32.mxu0 %v15956_v0  ;;  %v4444_v36 = vsel %vm4442_vm8, %v4441_v32, %v4439_v33  ;;  %v4863_v17 = vpop.permute.xlu0 %4862  ;;  %v13951_v32 = vld [vmem:[%s18459_s13 + $0x118] sm:$0xff] }
 0x1a0   : > { %13907 = vmatprep.subr.msk.mxu0 %vm1108_vm2, %v3823_v38  ;;  %v13926_v38 = vld [vmem:[%s18459_s13 + $0xf0] sm:$0xff]  ;;  %v4459_v39 = vmul.f32 %v4455_v35, %v4444_v36  ;;  %v4759_v61 = vpop.permute.xlu1 %4758  ;;  %v4981_v36 = vrot.slane %v13960_v25, %v16322_v6 }
 0x1a3   : > { %v4969_v27 = vpop.permute.xlu0 %4968 }
 0x1a4   : > { %v4865_v16 = vpop.permute.xlu1 %4864 }
 0x1a6   : > { %13904 = vmatmul.mubr.msk.f32.vlgmr.msra.gmra.mrb[0].mxu0 %vm1104_vm4, %v13901_v47  ;;  %v4458_v47 = vmul.f32 %v4451_v43, %v4443_v44  ;;  %v13970_v43 = vld [vmem:[%s18461_s9 + $0x4e] sm:$0x3] }
 0x1a7   : > { %13908 = vmatpush1.msk.msra.mxu0 %vm1108_vm2, %v3822_v46  ;;  %3899 = vmatprep.mubr.f32.mxu0 %v15956_v0  ;;  %v4550_v46 = vsel %vm4548_vm9, %v4547_v41, %v4545_v42  ;;  %v5075_v35 = vpop.permute.xlu0 %5074  ;;  %v13956_v41 = vld [vmem:[%s18459_s13 + $0x120] sm:$0xff]  ;;  %vm5184_vm9 = vcmp.lt.s32.totalorder %v16319_v5, 95 }
 0x1a8   : > { %13912 = vmatprep.subr.msk.mxu0 %vm1108_vm2, %v3929_v48  ;;  %v13931_v48 = vld [vmem:[%s18459_s13 + $0xf8] sm:$0xff]  ;;  %v4565_v49 = vmul.f32 %v4561_v45, %v4550_v46  ;;  %v4971_v26 = vpop.permute.xlu1 %4970  ;;  %v5087_v46 = vrot.slane %v13965_v34, %v16322_v6 }
 0x1ab   : > { %v5181_v45 = vpop.permute.xlu0 %5180 }
 0x1ac   : > { %v5077_v2 = vpop.permute.xlu1 %5076 }
 0x1ae   : > { %13909 = vmatmul.mubr.msk.f32.vlgmr.msra.gmra.mrb[0].mxu0 %vm1104_vm4, %v13906_v57  ;;  %v4564_v57 = vmul.f32 %v4557_v53, %v4549_v54  ;;  %v13975_v53 = vld [vmem:[%s18461_s9 + $0x50] sm:$0x3] }
 0x1af   : > { %13913 = vmatpush1.msk.msra.mxu0 %vm1108_vm2, %v3928_v56  ;;  %4005 = vmatprep.mubr.f32.mxu0 %v15956_v0  ;;  %v4656_v56 = vsel %vm4654_vm10, %v4653_v51, %v4651_v52  ;;  %v13961_v51 = vld [vmem:[%s18459_s13 + $0x128] sm:$0xff]  ;;  %vm5290_vm10 = vcmp.lt.s32.totalorder %v16319_v5, 94 }
 0x1b0   : > { %13917 = vmatprep.subr.msk.mxu0 %vm1108_vm2, %v4035_v58  ;;  %v13936_v58 = vld [vmem:[%s18459_s13 + $0x100] sm:$0xff]  ;;  %v4671_v59 = vmul.f32 %v4667_v55, %v4656_v56  ;;  %v5183_v44 = vpop.permute.xlu1 %5182  ;;  %v5287_v55 = vpop.permute.xlu0 %5286  ;;  %v5193_v56 = vrot.slane %v13970_v43, %v16322_v6 }
 0x1b4   : > { %v5289_v54 = vpop.permute.xlu1 %5288  ;;  %v5393_v8 = vpop.permute.xlu0 %5392 }
 0x1b6   : > { %13914 = vmatmul.mubr.msk.f32.vlgmr.msra.gmra.mrb[0].mxu0 %vm1104_vm4, %v13911_v10  ;;  %v16005_v10 = vmov 0  }
 0x1b7   : > { %13918 = vmatpush1.msk.msra.mxu0 %vm1108_vm2, %v4034_v9  ;;  %4111 = vmatprep.mubr.f32.mxu0 %v15956_v0  ;;  %v4773_v9 = vrot.slane %v13950_v60, %v16325_v7 }
 0x1b8   : > { %13922 = vmatprep.subr.msk.mxu0 %vm1108_vm2, %v4141_v11  ;;  %15755 = vset.pattern.permute.xlu0 %v16005_v10  ;;  %v4762_v11 = vsel %vm4760_vm13, %v4759_v61, %v4757_v62  ;;  %v5395_v3 = vpop.permute.xlu1 %5394 }
 0x1b9   : > { %6243 = vperm.xlu0 %15755, %v6240_v63   ;;  %15756 = vset.pattern.permute.xlu1 %v16005_v10  ;;  %v4777_v14 = vmul.f32 %v4773_v9, %v4762_v11  ;;  %v13980_v63 = vld [vmem:[%s18461_s9 + $0x52] sm:$0x3]  ;;  %v5299_v9 = vrot.slane %v13975_v53, %v16322_v6  ;;  %v5291_v10 = vsel %vm5290_vm10, %v5287_v55, %v5289_v54 }
 0x1ba   : > { %v5409_v11 = vrot.slane %v13980_v63, %v16325_v7 }
 0x1be   : > { %13919 = vmatmul.mubr.msk.f32.vlgmr.msra.gmra.mrb[0].mxu0 %vm1104_vm4, %v13916_v20  ;;  %v4879_v20 = vrot.slane %v13955_v15, %v16325_v7 }
 0x1bf   : > { %13923 = vmatpush1.msk.msra.mxu0 %vm1108_vm2, %v4140_v19  ;;  %4217 = vmatprep.mubr.f32.mxu0 %v15956_v0  ;;  %v4761_v19 = vsel %vm4760_vm13, %v4757_v62, %v4759_v61  ;;  %v13966_v61 = vld [vmem:[%s18459_s13 + $0x130] sm:$0xff]  ;;  %vm5396_vm13 = vcmp.lt.s32.totalorder %v16319_v5, 93 }
 0x1c0   : > { %13927 = vmatprep.subr.msk.mxu0 %vm1108_vm2, %v4247_v21  ;;  %v4868_v21 = vsel %vm4866_vm14, %v4865_v16, %v4863_v17  ;;  %v4776_v22 = vmul.f32 %v4769_v18, %v4761_v19  ;;  %v5499_v18 = vpop.permute.xlu0 %5498  ;;  %v5405_v19 = vrot.slane %v13980_v63, %v16322_v6 }
 0x1c1   : > { %v4883_v24 = vmul.f32 %v4879_v20, %v4868_v21  ;;  %v5397_v20 = vsel %vm5396_vm13, %v5393_v8, %v5395_v3 }
 0x1c6   : > { %13924 = vmatmul.mubr.msk.f32.vlgmr.msra.gmra.mrb[0].mxu0 %vm1104_vm4, %v13921_v29  ;;  %v4985_v29 = vrot.slane %v13960_v25, %v16325_v7 }
 0x1c7   : > { %13928 = vmatpush1.msk.msra.mxu0 %vm1108_vm2, %v4246_v28  ;;  %4323 = vmatprep.mubr.f32.mxu0 %v15956_v0  ;;  %v4867_v28 = vsel %vm4866_vm14, %v4863_v17, %v4865_v16  ;;  %v13985_v16 = vld [vmem:[%s18461_s9 + $0x54] sm:$0x3]  ;;  %v5501_v17 = vpop.permute.xlu1 %5500  ;;  %vm5502_vm14 = vcmp.lt.s32.totalorder %v16319_v5, 83 }
 0x1c8   : > { %13932 = vmatprep.subr.msk.mxu0 %vm1108_vm2, %v4353_v30  ;;  %v4974_v30 = vsel %vm4972_vm15, %v4971_v26, %v4969_v27  ;;  %v4882_v31 = vmul.f32 %v4875_v1, %v4867_v28  ;;  %v5515_v21 = vrot.slane %v13985_v16, %v16325_v7  ;;  %v5605_v1 = vpop.permute.xlu0 %5604  ;;  %v5511_v28 = vrot.slane %v13985_v16, %v16322_v6 }
 0x1c9   : > { %v4989_v33 = vmul.f32 %v4985_v29, %v4974_v30  ;;  %v5503_v29 = vsel %vm5502_vm14, %v5499_v18, %v5501_v17 }
 0x1ce   : > { %13929 = vmatmul.mubr.msk.f32.vlgmr.msra.gmra.mrb[0].mxu0 %vm1104_vm4, %v13926_v38  ;;  %v5091_v38 = vrot.slane %v13965_v34, %v16325_v7 }
 0x1cf   : > { %13933 = vmatpush1.msk.msra.mxu0 %vm1108_vm2, %v4352_v37  ;;  %4429 = vmatprep.mubr.f32.mxu0 %v15956_v0  ;;  %v4973_v37 = vsel %vm4972_vm15, %v4969_v27, %v4971_v26  ;;  %v13990_v26 = vld [vmem:[%s18461_s9 + $0x56] sm:$0x3]  ;;  %v5607_v27 = vpop.permute.xlu1 %5606  ;;  %vm5608_vm15 = vcmp.lt.s32.totalorder %v16319_v5, 82 }
 0x1d0   : > { %13937 = vmatprep.subr.msk.mxu0 %vm1108_vm2, %v4459_v39  ;;  %v5080_v39 = vsel %vm5078_vm0, %v5077_v2, %v5075_v35  ;;  %v4988_v40 = vmul.f32 %v4981_v36, %v4973_v37  ;;  %v5621_v30 = vrot.slane %v13990_v26, %v16325_v7  ;;  %v5711_v36 = vpop.permute.xlu0 %5710  ;;  %v5617_v37 = vrot.slane %v13990_v26, %v16322_v6 }
 0x1d1   : > { %v5095_v42 = vmul.f32 %v5091_v38, %v5080_v39  ;;  %v5609_v38 = vsel %vm5608_vm15, %v5605_v1, %v5607_v27 }
 0x1d6   : > { %13934 = vmatmul.mubr.msk.f32.vlgmr.msra.gmra.mrb[0].mxu0 %vm1104_vm4, %v13931_v48  ;;  %v5197_v48 = vrot.slane %v13970_v43, %v16325_v7 }
 0x1d7   : > { %13938 = vmatpush1.msk.msra.mxu0 %vm1108_vm2, %v4458_v47  ;;  %4535 = vmatprep.mubr.f32.mxu0 %v15956_v0  ;;  %v5079_v47 = vsel %vm5078_vm0, %v5075_v35, %v5077_v2  ;;  %v13995_v2 = vld [vmem:[%s18461_s9 + $0x58] sm:$0x3]  ;;  %v5713_v35 = vpop.permute.xlu1 %5712  ;;  %vm5714_vm0 = vcmp.lt.s32.totalorder %v16319_v5, 81 }
 0x1d8   : > { %13942 = vmatprep.subr.msk.mxu0 %vm1108_vm2, %v4565_v49  ;;  %v5186_v49 = vsel %vm5184_vm9, %v5183_v44, %v5181_v45  ;;  %v5094_v50 = vmul.f32 %v5087_v46, %v5079_v47  ;;  %v5727_v39 = vrot.slane %v13995_v2, %v16325_v7  ;;  %v5817_v46 = vpop.permute.xlu0 %5816  ;;  %v5723_v47 = vrot.slane %v13995_v2, %v16322_v6 }
 0x1d9   : > { %v5201_v52 = vmul.f32 %v5197_v48, %v5186_v49  ;;  %v5715_v48 = vsel %vm5714_vm0, %v5711_v36, %v5713_v35 }
 0x1de   : > { %13939 = vmatmul.mubr.msk.f32.vlgmr.msra.gmra.mrb[0].mxu0 %vm1104_vm4, %v13936_v58  ;;  %v5303_v58 = vrot.slane %v13975_v53, %v16325_v7 }
 0x1df   : > { %13943 = vmatpush1.msk.msra.mxu0 %vm1108_vm2, %v4564_v57  ;;  %4641 = vmatprep.mubr.f32.mxu0 %v15956_v0  ;;  %v5185_v57 = vsel %vm5184_vm9, %v5181_v45, %v5183_v44  ;;  %v14000_v44 = vld [vmem:[%s18461_s9 + $0x5a] sm:$0x3]  ;;  %v5819_v45 = vpop.permute.xlu1 %5818  ;;  %vm5820_vm9 = vcmp.lt.s32.totalorder %v16319_v5, 80 }
 0x1e0   : > { %13947 = vmatprep.subr.msk.mxu0 %vm1108_vm2, %v4671_v59  ;;  %v5292_v59 = vsel %vm5290_vm10, %v5289_v54, %v5287_v55  ;;  %v5200_v60 = vmul.f32 %v5193_v56, %v5185_v57  ;;  %v5833_v49 = vrot.slane %v14000_v44, %v16325_v7  ;;  %v14005_v54 = vld [vmem:[%s18461_s9 + $0x5c] sm:$0x3]  ;;  %vm5926_vm10 = vcmp.lt.s32.totalorder %v16319_v5, 79  ;;  %v5923_v56 = vpop.permute.xlu0 %5922 }
 0x1e1   : > { %v5307_v62 = vmul.f32 %v5303_v58, %v5292_v59  ;;  %v5829_v57 = vrot.slane %v14000_v44, %v16322_v6  ;;  %v5821_v58 = vsel %vm5820_vm9, %v5817_v46, %v5819_v45  ;;  %v5939_v59 = vrot.slane %v14005_v54, %v16325_v7 }
 0x1e3   : > { %v5925_v55 = vpop.permute.xlu1 %5924 }
 0x1e6   : > { %13944 = vmatmul.mubr.msk.f32.vlgmr.msra.gmra.mrb[0].mxu0 %vm1104_vm4, %v13941_v13  ;;  %v5306_v13 = vmul.f32 %v5299_v9, %v5291_v10  ;;  %v6029_v9 = vpop.permute.xlu0 %6028  ;;  %v5935_v10 = vrot.slane %v14005_v54, %v16322_v6 }
 0x1e7   : > { %13948 = vmatpush1.msk.msra.mxu0 %vm1108_vm2, %v4670_v12  ;;  %4747 = vmatprep.mubr.f32.mxu0 %v15956_v0  ;;  %v5398_v12 = vsel %vm5396_vm13, %v5395_v3, %v5393_v8  ;;  %v14010_v3 = vld [vmem:[%s18461_s9 + $0x5e] sm:$0x3]  ;;  %v6031_v8 = vpop.permute.xlu1 %6030  ;;  %vm6032_vm13 = vcmp.lt.s32.totalorder %v16319_v5, 78 }
 0x1e8   : > { %13952 = vmatprep.subr.msk.mxu0 %vm1108_vm2, %v4777_v14  ;;  %v13971_v14 = vld [vmem:[%s18459_s13 + $0x138] sm:$0xff]  ;;  %v5413_v15 = vmul.f32 %v5409_v11, %v5398_v12  ;;  %v5927_v11 = vsel %vm5926_vm10, %v5923_v56, %v5925_v55  ;;  %v6045_v12 = vrot.slane %v14010_v3, %v16325_v7 }
 0x1ee   : > { %13949 = vmatmul.mubr.msk.f32.vlgmr.msra.gmra.mrb[0].mxu0 %vm1104_vm4, %v13946_v23  ;;  %v5412_v23 = vmul.f32 %v5405_v19, %v5397_v20  ;;  %v6135_v19 = vpop.permute.xlu0 %6134  ;;  %v6041_v20 = vrot.slane %v14010_v3, %v16322_v6 }
 0x1ef   : > { %13953 = vmatpush1.msk.msra.mxu0 %vm1108_vm2, %v4776_v22  ;;  %4853 = vmatprep.mubr.f32.mxu0 %v15956_v0  ;;  %v5504_v22 = vsel %vm5502_vm14, %v5501_v17, %v5499_v18  ;;  %v14015_v17 = vld [vmem:[%s18461_s9 + $0x60] sm:$0x3]  ;;  %v6137_v18 = vpop.permute.xlu1 %6136  ;;  %vm6138_vm14 = vcmp.lt.s32.totalorder %v16319_v5, 77  ;;  %s18477_s9 = smov 111  }
 0x1f0   : > { %13957 = vmatprep.subr.msk.mxu0 %vm1108_vm2, %v4883_v24  ;;  %v13976_v24 = vld [vmem:[%s18459_s13 + $0x140] sm:$0xff]  ;;  %v5519_v25 = vmul.f32 %v5515_v21, %v5504_v22  ;;  %v6033_v21 = vsel %vm6032_vm13, %v6029_v9, %v6031_v8  ;;  %v6151_v22 = vrot.slane %v14015_v17, %v16325_v7 }
 0x1f6   : > { %13954 = vmatmul.mubr.msk.f32.vlgmr.msra.gmra.mrb[0].mxu0 %vm1104_vm4, %v13951_v32  ;;  %v5518_v32 = vmul.f32 %v5511_v28, %v5503_v29  ;;  %v14011_v29 = vld [vmem:[%s18459_s13 + $0x178] sm:$0xff] }
 0x1f7   : > { %13958 = vmatpush1.msk.msra.mxu0 %vm1108_vm2, %v4882_v31  ;;  %4959 = vmatprep.mubr.f32.mxu0 %v15956_v0  ;;  %v5610_v31 = vsel %vm5608_vm15, %v5607_v27, %v5605_v1  ;;  %v6147_v27 = vrot.slane %v14015_v17, %v16322_v6  ;;  %v6139_v1 = vsel %vm6138_vm14, %v6135_v19, %v6137_v18  ;;  %vm6251_vm15 = vcmp.lt.s32.totalorder %v16315_v4, 4 }
 0x1f8   : > { %13962 = vmatprep.subr.msk.mxu0 %vm1108_vm2, %v4989_v33  ;;  %v13981_v33 = vld [vmem:[%s18459_s13 + $0x148] sm:$0xff]  ;;  %v5625_v34 = vmul.f32 %v5621_v30, %v5610_v31  ;;  %v14016_v30 = vld [vmem:[%s18459_s13 + $0x180] sm:$0xff] }
 0x1f9   : > { %v6154_v28 = vmul.f32 %v6147_v27, %v6139_v1  ;;  %v6349_v1 = vld [vmem:[%s16045_s25] sm:$0xff] }
 0x1fe   : > { %13959 = vmatmul.mubr.msk.f32.vlgmr.msra.gmra.mrb[0].mxu0 %vm1104_vm4, %v13956_v41  ;;  %v5624_v41 = vmul.f32 %v5617_v37, %v5609_v38 }
 0x1ff   : > { %13963 = vmatpush1.msk.msra.mxu0 %vm1108_vm2, %v4988_v40  ;;  %5065 = vmatprep.mubr.f32.mxu0 %v15956_v0  ;;  %v5716_v40 = vsel %vm5714_vm0, %v5713_v35, %v5711_v36  ;;  %vm6294_vm0 = vcmp.ge.s32.totalorder %v16315_v4, 4 }
 0x200   : > { %13967 = vmatprep.subr.msk.mxu0 %vm1108_vm2, %v5095_v42  ;;  %v13986_v42 = vld [vmem:[%s18459_s13 + $0x150] sm:$0xff]  ;;  %v5731_v43 = vmul.f32 %v5727_v39, %v5716_v40  ;;  %v17011_v37 = vsel %vm6294_vm0, 1.0, %v15956_v0 }
 0x206   : > { %13964 = vmatmul.mubr.msk.f32.vlgmr.msra.gmra.mrb[0].mxu0 %vm1104_vm4, %v13961_v51  ;;  %v5730_v51 = vmul.f32 %v5723_v47, %v5715_v48 }
 0x207   : > { %13968 = vmatpush1.msk.msra.mxu0 %vm1108_vm2, %v5094_v50  ;;  %5171 = vmatprep.mubr.f32.mxu0 %v15956_v0  ;;  %v5822_v50 = vsel %vm5820_vm9, %v5819_v45, %v5817_v46  ;;  %vm6415_vm9 = vcmask 64512  }
 0x208   : > { %13972 = vmatprep.subr.msk.mxu0 %vm1108_vm2, %v5201_v52  ;;  %v13991_v52 = vld [vmem:[%s18459_s13 + $0x158] sm:$0xff]  ;;  %v5837_v53 = vmul.f32 %v5833_v49, %v5822_v50 }
 0x20e   : > { %13969 = vmatmul.mubr.msk.f32.vlgmr.msra.gmra.mrb[0].mxu0 %vm1104_vm4, %v13966_v61  ;;  %v5836_v61 = vmul.f32 %v5829_v57, %v5821_v58 }
 0x20f   : > { %13973 = vmatpush1.msk.msra.mxu0 %vm1108_vm2, %v5200_v60  ;;  %5277 = vmatprep.mubr.f32.mxu0 %v15956_v0  ;;  %v5928_v60 = vsel %vm5926_vm10, %v5925_v55, %v5923_v56 }
 0x210   : > { %13977 = vmatprep.subr.msk.mxu0 %vm1108_vm2, %v5307_v62  ;;  %v13996_v62 = vld [vmem:[%s18459_s13 + $0x160] sm:$0xff]  ;;  %v5943_v63 = vmul.f32 %v5939_v59, %v5928_v60 }
 0x216   : > { %13974 = vmatmul.mubr.msk.f32.vlgmr.msra.gmra.mrb[0].mxu0 %vm1104_vm4, %v13971_v14  ;;  %v5942_v14 = vmul.f32 %v5935_v10, %v5927_v11 }
 0x217   : > { %13978 = vmatpush1.msk.msra.mxu0 %vm1108_vm2, %v5306_v13  ;;  %5383 = vmatprep.mubr.f32.mxu0 %v15956_v0  ;;  %v6034_v13 = vsel %vm6032_vm13, %v6031_v8, %v6029_v9 }
 0x218   : > { %13982 = vmatprep.subr.msk.mxu0 %vm1108_vm2, %v5413_v15  ;;  %v14001_v15 = vld [vmem:[%s18459_s13 + $0x168] sm:$0xff]  ;;  %v6049_v16 = vmul.f32 %v6045_v12, %v6034_v13 }
 0x21e   : > { %13979 = vmatmul.mubr.msk.f32.vlgmr.msra.gmra.mrb[0].mxu0 %vm1104_vm4, %v13976_v24  ;;  %v6048_v24 = vmul.f32 %v6041_v20, %v6033_v21 }
 0x21f   : > { %13983 = vmatpush1.msk.msra.mxu0 %vm1108_vm2, %v5412_v23  ;;  %5489 = vmatprep.mubr.f32.mxu0 %v15956_v0  ;;  %v6140_v23 = vsel %vm6138_vm14, %v6137_v18, %v6135_v19 }
 0x220   : > { %13987 = vmatprep.subr.msk.mxu0 %vm1108_vm2, %v5519_v25  ;;  %v14006_v25 = vld [vmem:[%s18459_s13 + $0x170] sm:$0xff]  ;;  %v6155_v26 = vmul.f32 %v6151_v22, %v6140_v23 }
 0x226   : > { %13984 = vmatmul.mubr.msk.f32.vlgmr.msra.gmra.mrb[0].mxu0 %vm1104_vm4, %v13981_v33  ;;  %v17001_v33 = vsel %vm6251_vm15, 1.0, %v15956_v0 }
 0x227   : > { %13988 = vmatpush1.msk.msra.mxu0 %vm1108_vm2, %v5518_v32  ;;  %5595 = vmatprep.mubr.f32.mxu0 %v15956_v0 }
 0x228   : > { %13992 = vmatprep.subr.msk.mxu0 %vm1108_vm2, %v5625_v34 }
 0x22e   : > { %13989 = vmatmul.mubr.msk.f32.vlgmr.msra.gmra.mrb[0].mxu0 %vm1104_vm4, %v13986_v42 }
 0x22f   : > { %13993 = vmatpush1.msk.msra.mxu0 %vm1108_vm2, %v5624_v41  ;;  %5701 = vmatprep.mubr.f32.mxu0 %v15956_v0 }
 0x230   : > { %13997 = vmatprep.subr.msk.mxu0 %vm1108_vm2, %v5731_v43 }
 0x236   : > { %13994 = vmatmul.mubr.msk.f32.vlgmr.msra.gmra.mrb[0].mxu0 %vm1104_vm4, %v13991_v52 }
 0x237   : > { %13998 = vmatpush1.msk.msra.mxu0 %vm1108_vm2, %v5730_v51  ;;  %5807 = vmatprep.mubr.f32.mxu0 %v15956_v0 }
 0x238   : > { %14002 = vmatprep.subr.msk.mxu0 %vm1108_vm2, %v5837_v53  ;;  %v6244_v31 = vpop.permute.xlu0 %6243 }
 0x23e   : > { %13999 = vmatmul.mubr.msk.f32.vlgmr.msra.gmra.mrb[0].mxu0 %vm1104_vm4, %v13996_v62 }
 0x23f   : > { %14003 = vmatpush1.msk.msra.mxu0 %vm1108_vm2, %v5836_v61  ;;  %5913 = vmatprep.mubr.f32.mxu0 %v15956_v0 }
 0x240   : > { %14007 = vmatprep.subr.msk.mxu0 %vm1108_vm2, %v5943_v63 }
 0x246   : > { %14004 = vmatmul.mubr.msk.f32.vlgmr.msra.gmra.mrb[0].mxu0 %vm1104_vm4, %v14001_v15 }
 0x247   : > { %14008 = vmatpush1.msk.msra.mxu0 %vm1108_vm2, %v5942_v14  ;;  %6019 = vmatprep.mubr.f32.mxu0 %v15956_v0 }
 0x248   : > { %14012 = vmatprep.subr.msk.mxu0 %vm1108_vm2, %v6049_v16 }
 0x24e   : > { %14009 = vmatmul.mubr.msk.f32.vlgmr.msra.gmra.mrb[0].mxu0 %vm1104_vm4, %v14006_v25 }
 0x24f   : > { %14013 = vmatpush1.msk.msra.mxu0 %vm1108_vm2, %v6048_v24  ;;  %6125 = vmatprep.mubr.f32.mxu0 %v15956_v0 }
 0x250   : > { %14017 = vmatprep.subr.msk.mxu0 %vm1108_vm2, %v6155_v26 }
 0x256   : > { %14014 = vmatmul.mubr.msk.f32.vlgmr.msra.gmra.mrb[0].mxu0 %vm1104_vm4, %v14011_v29 }
 0x257   : > { %14018 = vmatpush1.msk.msra.mxu0 %vm1108_vm2, %v6154_v28  ;;  %6231 = vmatprep.mubr.f32.mxu0 %v15956_v0 }
 0x25e   : > { %14019 = vmatmul.mubr.msk.f32.vlgmr.msra.gmra.mrb[0].mxu0 %vm1104_vm4, %v14016_v30 }
 0x25f   : > { %6483 = vmatprep.mubr.f32.mxu0 %v15956_v0 }
 0x331   : > { %v6233_v32 = vpop.f32.mrb[0].mxu0 }
 0x332   : > { %v17004_v34 = vadd.f32 %v6244_v31, %v6233_v32  ;;  %v6235_v2 = vpop.f32.mrb[1].mxu0 }
 0x333   : > { %v17006_v35 = vadd.f32 %v6244_v31, %v6235_v2 }
 0x334   : > { %v6254_v36 = vmul.f32 %v17001_v33, %v17004_v34  ;;  %v6298_v40 = vmul.f32 %v17011_v37, %v17004_v34 }
 0x335   : > { %v6255_v38 = vmul.f32 %v17001_v33, %v17006_v35  ;;  %v6299_v41 = vmul.f32 %v17011_v37, %v17006_v35 }
 0x337   : > { %v6256_v39 = vadd.f32 %v6255_v38, %v6254_v36  ;;  %v6300_v42 = vadd.f32 %v6299_v41, %v6298_v40 }
 0x339   : > { %6257 = vadd.xlane.f32.xlu1 %v6256_v39 }
 0x33d   : > { %6301 = vadd.xlane.f32.xlu1 %v6300_v42 }
 0x3c6   : > { %v6258_v43 = vpop.xlane.xlu1 %6257 }
 0x3c7   : > { %v6259_v44 = vrot.slane %v6258_v43, 4 }
 0x3c9   : > { %v6260_v45 = vadd.f32 %v6259_v44, %v6258_v43  ;;  %v6340_v44 = vld [vmem:[%s18468_s21] sm:$0xff] }
 0x3ca   : > { %v6302_v8 = vpop.xlane.xlu1 %6301 }
 0x3cb   : > { %v6261_v46 = vrot.slane %v6260_v45, 2  ;;  %v6303_v9 = vrot.slane %v6302_v8, 4 }
 0x3cd   : > { %v6262_v47 = vadd.f32 %v6261_v46, %v6260_v45  ;;  %v6304_v10 = vadd.f32 %v6303_v9, %v6302_v8  ;;  %v7251_v8 = vld [vmem:[%s18470_s8] sm:$0xf] }
 0x3ce   : > { %v6377_v9 = vld [vmem:[%s16050_s29] sm:$0x3] }
 0x3cf   : > { %v6263_v48 = vrot.slane %v6262_v47, 1  ;;  %v6305_v11 = vrot.slane %v6304_v10, 2 }
 0x3d1   : > { %v6264_v49 = vadd.f32 %v6263_v48, %v6262_v47  ;;  %v6306_v13 = vadd.f32 %v6305_v11, %v6304_v10 }
 0x3d3   : > { %15551 = vpush %v6264_v49  ;;  %v6307_v14 = vrot.slane %v6306_v13, 1 }
 0x3d5   : > { %v6308_v16 = vadd.f32 %v6307_v14, %v6306_v13  ;;  %v17070_v13 = vrot.slane %v6377_v9, %v16322_v6  ;;  %v14026_v14 = vld [vmem:[%s16050_s29 + $0x4] sm:$0x3] }
 0x404   : > { %s15552_s1 = spop %15551 }
 0x405   : > { %s6266_s11 = smul.f32 0.0009765625, %s15552_s1 }
 0x407   : > { %v6267_v50 = vstv %s6266_s11 }
 0x408   : > { %v6268_v51 = vsub.f32 %v17004_v34, %v6267_v50  ;;  %v6269_v52 = vsub.f32 %v17006_v35, %v6267_v50  ;;  %v6285_v18 = vmul.f32 %v6267_v50, %v17001_v33 }
 0x40a   : > { %v6270_v53 = vmul.f32 %v6268_v51, %v6268_v51  ;;  %v6271_v54 = vmul.f32 %v6269_v52, %v6269_v52 }
 0x40c   : > { %v6272_v55 = vmul.f32 %v6270_v53, %v17001_v33  ;;  %v6273_v56 = vmul.f32 %v6271_v54, %v17001_v33 }
 0x40e   : > { %v6274_v57 = vadd.f32 %v6273_v56, %v6272_v55 }
 0x410   : > { %6275 = vadd.xlane.f32.xlu0 %v6274_v57 }
 0x49d   : > { %v6276_v58 = vpop.xlane.xlu0 %6275 }
 0x49e   : > { %v6277_v59 = vrot.slane %v6276_v58, 4 }
 0x4a0   : > { %v6278_v60 = vadd.f32 %v6277_v59, %v6276_v58 }
 0x4a2   : > { %v6279_v61 = vrot.slane %v6278_v60, 2 }
 0x4a4   : > { %v6280_v62 = vadd.f32 %v6279_v61, %v6278_v60 }
 0x4a6   : > { %v6281_v63 = vrot.slane %v6280_v62, 1 }
 0x4a8   : > { %v6282_v3 = vadd.f32 %v6281_v63, %v6280_v62 }
 0x4aa   : > { %15553 = vpush %v6282_v3 }
 0x4db   : > { %s15554_s11 = spop %15553 }
 0x4dc   : > { %s6284_s1 = smul.f32 0.0009765625, %s15554_s11 }
 0x4de   : > { %s6287_s28 = sadd.f32 1e-05, %s6284_s1  ;;  %s18471_s1 = smov 17  }
 0x4e0   : > { %v6288_v12 = vstv %s6287_s28 }
 0x4e1   : > { %15758 = vrsqrt.f32 %v6288_v12  ;;  %v17067_v12 = vrot.slane %v6377_v9, %v16325_v7 }
 0x4eb   : > { %v15759_v15 = vpop.eup %15758 }
 0x4ec   : > { %15555 = vpush %v15759_v15 }
 0x4ed   : > { %15557 = vpush %v6308_v16 }
 0x51d   : > { %s17023_s18 = spop %15555 }
 0x51e   : > { %s15558_s23 = spop %15557  ;;  %v6291_v40 = vstv %s17023_s18  ;;  %s18469_s18 = smov 15  }
 0x51f   : > { %s6310_s2 = smul.f32 0.0009765625, %s15558_s23  ;;  %v6292_v42 = vmul.f32 %v6291_v40, %v17001_v33 }
 0x521   : > { %v6311_v17 = vstv %s6310_s2 }
 0x522   : > { %v6312_v19 = vsub.f32 %v17004_v34, %v6311_v17  ;;  %v6313_v20 = vsub.f32 %v17006_v35, %v6311_v17  ;;  %v6329_v21 = vmul.f32 %v6311_v17, %v17011_v37 }
 0x524   : > { %v6314_v22 = vmul.f32 %v6312_v19, %v6312_v19  ;;  %v6315_v23 = vmul.f32 %v6313_v20, %v6313_v20  ;;  %v6330_v24 = vadd.f32 %v6329_v21, %v6285_v18  ;;  %v17079_v20 = vrot.slane %v14026_v14, %v16322_v6 }
 0x526   : > { %v6316_v25 = vmul.f32 %v6314_v22, %v17011_v37  ;;  %v6317_v26 = vmul.f32 %v6315_v23, %v17011_v37  ;;  %v6338_v47 = vsub.f32 %v17004_v34, %v6330_v24  ;;  %v6339_v48 = vsub.f32 %v17006_v35, %v6330_v24  ;;  %v6391_v23 = vld [vmem:[%s18460_s3] sm:$0xf]  ;;  %v14029_v24 = vld [vmem:[%s16050_s29 + $0x6] sm:$0x3] }
 0x527   : > { %v17083_v22 = vrot.slane %v14026_v14, %v16325_v7 }
 0x528   : > { %v6318_v27 = vadd.f32 %v6317_v26, %v6316_v25 }
 0x52a   : > { %6319 = vadd.xlane.f32.xlu0 %v6318_v27 }
 0x540   : > { %6352 = vperm.xlu0 %15755, %v6349_v1  }
 0x5b7   : > { %v6320_v28 = vpop.xlane.xlu0 %6319 }
 0x5b8   : > { %v6321_v29 = vrot.slane %v6320_v28, 4 }
 0x5ba   : > { %v6322_v30 = vadd.f32 %v6321_v29, %v6320_v28 }
 0x5bc   : > { %v6323_v31 = vrot.slane %v6322_v30, 2 }
 0x5be   : > { %v6324_v32 = vadd.f32 %v6323_v31, %v6322_v30  ;;  %v17095_v30 = vrot.slane %v14029_v24, %v16325_v7  ;;  %v14032_v31 = vld [vmem:[%s16050_s29 + $0x8] sm:$0x3] }
 0x5bf   : > { %v6353_v52 = vpop.permute.xlu0 %6352  ;;  %v17108_v40 = vrot.slane %v14032_v31, %v16325_v7 }
 0x5c0   : > { %v6325_v2 = vrot.slane %v6324_v32, 1 }
 0x5c2   : > { %v6326_v36 = vadd.f32 %v6325_v2, %v6324_v32  ;;  %v17100_v2 = vrot.slane %v14029_v24, %v16322_v6 }
 0x5c4   : > { %15559 = vpush %v6326_v36 }
 0x5f5   : > { %s15560_s23 = spop %15559 }
 0x5f6   : > { %s6328_s2 = smul.f32 0.0009765625, %s15560_s23  ;;  %s18472_s23 = smov 1  }
 0x5f8   : > { %s6331_s28 = sadd.f32 1e-05, %s6328_s2  ;;  %s18473_s2 = smov 127  }
 0x5fa   : > { %v6332_v38 = vstv %s6331_s28  ;;  %s18474_s28 = smov 113  }
 0x5fb   : > { %15760 = vrsqrt.f32 %v6332_v38 }
 0x605   : > { %v15761_v39 = vpop.eup %15760 }
 0x606   : > { %15561 = vpush %v15761_v39 }
 0x637   : > { %s15562_s11 = spop %15561 }
 0x638   : > { %v6335_v41 = vstv %s15562_s11  ;;  %s18475_s11 = smov 112  }
 0x639   : > { %v6336_v43 = vmul.f32 %v6335_v41, %v17011_v37  ;;  %v14027_v41 = vld [vmem:[%s18460_s3 + $0x8] sm:$0xf] }
 0x63b   : > { %v6337_v45 = vadd.f32 %v6336_v43, %v6292_v42 }
 0x63d   : > { %v6341_v46 = vmul.f32 %v6340_v44, %v6337_v45 }
 0x63f   : > { %6344 = vperm.xlu1 %15756, %v6341_v46   ;;  %v14035_v46 = vld [vmem:[%s16050_s29 + $0xa] sm:$0x3] }
 0x6be   : > { %v6345_v49 = vpop.permute.xlu1 %6344 }
 0x6bf   : > { %v6347_v50 = vmul.f32 %v6345_v49, %v6338_v47  ;;  %v6348_v51 = vmul.f32 %v6345_v49, %v6339_v48  ;;  %v17117_v48 = vrot.slane %v14032_v31, %v16322_v6 }
 0x6c1   : > { %v6355_v53 = vadd.f32 %v6353_v52, %v6347_v50  ;;  %v6356_v54 = vadd.f32 %v6353_v52, %v6348_v51  ;;  %v17120_v50 = vrot.slane %v14035_v46, %v16325_v7  ;;  %v14030_v52 = vld [vmem:[%s18460_s3 + $0xc] sm:$0xf] }
 0x6c3   : > { %v14020_v55 = vmul.f32 -1.442695, %v6355_v53  ;;  %v14021_v56 = vmul.f32 -1.442695, %v6356_v54 }
 0x6c5   : > { %15762 = vpow2.f32 %v14020_v55 }
 0x6c6   : > { %15764 = vpow2.f32 %v14021_v56 }
 0x6cf   : > { %v15763_v57 = vpop.eup %15762 }
 0x6d0   : > { %v15765_v58 = vpop.eup %15764  ;;  %v6363_v59 = vadd.f32 1.0, %v15763_v57 }
 0x6d1   : > { %v6364_v60 = vadd.f32 1.0, %v15765_v58 }
 0x6d2   : > { %15766 = vrcp.f32 %v6363_v59  ;;  %v14038_v59 = vld [vmem:[%s16050_s29 + $0xc] sm:$0x3] }
 0x6d3   : > { %15768 = vrcp.f32 %v6364_v60  ;;  %v17148_v9 = vrot.slane %v14038_v59, %v16325_v7 }
 0x6dc   : > { %v15767_v61 = vpop.eup %15766 }
 0x6dd   : > { %v17038_v62 = vmul.f32 %v15767_v61, %v6355_v53  ;;  %v15769_v63 = vpop.eup %15768  ;;  %v14022_v53 = vld [vmem:[%s16050_s29 + $0x2] sm:$0x3] }
 0x6de   : > { %v6370_v3 = vmul.f32 %v15769_v63, %v6356_v54  ;;  %v17131_v57 = vrot.slane %v14022_v53, %v16322_v6  ;;  %v17134_v58 = vrot.slane %v14022_v53, %v16325_v7 }
 0x6df   : > { %6564 = vrot.lane.b32.xlu0 %v17038_v62, %s18469_s18  ;;  %6371 = vrot.lane.b32.xlu1 %v17038_v62, %s18471_s1  ;;  %v6775_v55 = vmul.f32 %v17117_v48, %v17038_v62 }
 0x6e0   : > { %v6776_v45 = vmul.f32 %v17108_v40, %v6370_v3 }
 0x6e3   : > { %6663 = vrot.lane.b32.xlu0 %v17038_v62, %s18472_s23  ;;  %6373 = vrot.lane.b32.xlu1 %v6370_v3, %s18471_s1 }
 0x6e7   : > { %6855 = vrot.lane.b32.xlu0 %v17038_v62, %s18473_s2  ;;  %6566 = vrot.lane.b32.xlu1 %v6370_v3, %s18469_s18 }
 0x6eb   : > { %6954 = vrot.lane.b32.xlu0 %v17038_v62, %s18474_s28  ;;  %6665 = vrot.lane.b32.xlu1 %v6370_v3, %s18472_s23 }
 0x6ef   : > { %7053 = vrot.lane.b32.xlu0 %v17038_v62, %s18475_s11  ;;  %6857 = vrot.lane.b32.xlu1 %v6370_v3, %s18473_s2 }
 0x6f3   : > { %6392 = vrot.lane.b32.xlu0 %v17038_v62, %s18476_s5  ;;  %6956 = vrot.lane.b32.xlu1 %v6370_v3, %s18474_s28 }
 0x6f7   : > { %7152 = vrot.lane.b32.xlu0 %v17038_v62, %s18477_s9  ;;  %7055 = vrot.lane.b32.xlu1 %v6370_v3, %s18475_s11  ;;  %v17139_v62 = vrot.slane %v14035_v46, %v16322_v6  ;;  %v14042_v46 = vld [vmem:[%s18460_s3 + $0x1c] sm:$0xf] }
 0x6fb   : > { %7254 = vperm.xlu0 %15755, %v7251_v8   ;;  %6394 = vrot.lane.b32.xlu1 %v6370_v3, %s18476_s5 }
 0x6ff   : > { %7154 = vrot.lane.b32.xlu1 %v6370_v3, %s18477_s9 }
 0x751   : > { %v6565_v10 = vpop.permute.xlu0 %6564  ;;  %v6372_v11 = vpop.permute.xlu1 %6371 }
 0x755   : > { %v6664_v15 = vpop.permute.xlu0 %6663  ;;  %v6374_v16 = vpop.permute.xlu1 %6373 }
 0x756   : > { %v6375_v17 = vsel %vm2754_vm3, %v6372_v11, %v6374_v16  ;;  %v6376_v18 = vsel %vm2754_vm3, %v6374_v16, %v6372_v11  ;;  %v14023_v16 = vld [vmem:[%s18460_s3 + $0x4] sm:$0xf] }
 0x757   : > { %v6390_v19 = vmul.f32 %v17067_v12, %v6375_v17  ;;  %v6389_v21 = vmul.f32 %v17070_v13, %v6376_v18 }
 0x759   : > { %6493 = vmatprep.subr.mxu1 %v6390_v19  ;;  %v6567_v25 = vpop.permute.xlu1 %6566  ;;  %v6856_v1 = vpop.permute.xlu0 %6855  ;;  %v14041_v19 = vld [vmem:[%s16050_s29 + $0xe] sm:$0x3] }
 0x75a   : > { %v6568_v26 = vsel %vm2966_vm6, %v6565_v10, %v6567_v25  ;;  %v6569_v27 = vsel %vm2966_vm6, %v6567_v25, %v6565_v10  ;;  %6494 = vmatpush1.msra.mxu1 %v6389_v21  ;;  %v17163_v21 = vrot.slane %v14038_v59, %v16322_v6  ;;  %v17168_v24 = vrot.slane %v14041_v19, %v16325_v7 }
 0x75b   : > { %v6583_v28 = vmul.f32 %v17079_v20, %v6569_v27  ;;  %14025 = vmatmul.mubr.msk.f32.vlgmr.msra.gmra.mrb[0].mxu1 %vm6415_vm9, %v6391_v23  ;;  %v6584_v29 = vmul.f32 %v17083_v22, %v6568_v26  ;;  %v14036_v26 = vld [vmem:[%s18460_s3 + $0x14] sm:$0xf]  ;;  %v17179_v31 = vrot.slane %v14041_v19, %v16322_v6 }
 0x75c   : > { %6654 = vmatprep.mubr.f32.mxu1 %v15956_v0 }
 0x75d   : > { %6590 = vmatprep.subr.mxu1 %v6584_v29  ;;  %v6666_v32 = vpop.permute.xlu1 %6665  ;;  %v6955_v42 = vpop.permute.xlu0 %6954 }
 0x75e   : > { %v6667_v36 = vsel %vm3496_vm11, %v6664_v15, %v6666_v32  ;;  %6591 = vmatpush1.msra.mxu1 %v6583_v28  ;;  %v6668_v38 = vsel %vm3496_vm11, %v6666_v32, %v6664_v15  ;;  %v14033_v15 = vld [vmem:[%s18460_s3 + $0x10] sm:$0xf] }
 0x75f   : > { %v6683_v39 = vmul.f32 %v17095_v30, %v6667_v36  ;;  %v6682_v44 = vmul.f32 %v17100_v2, %v6668_v38  ;;  %v14044_v28 = vld [vmem:[%s16050_s29 + $0x10] sm:$0x3] }
 0x760   : > { %v17184_v38 = vrot.slane %v14044_v28, %v16325_v7 }
 0x761   : > { %6689 = vmatprep.subr.mxu1 %v6683_v39  ;;  %v6858_v43 = vpop.permute.xlu1 %6857  ;;  %v7054_v49 = vpop.permute.xlu0 %7053 }
 0x762   : > { %v6860_v51 = vsel %vm3700_vm12, %v6858_v43, %v6856_v1  ;;  %v6859_v8 = vsel %vm3700_vm12, %v6856_v1, %v6858_v43 }
 0x763   : > { %14028 = vmatmul.mubr.msk.f32.vlgmr.msra.gmra.mrb[0].mxu1 %vm6415_vm9, %v14027_v41  ;;  %v6875_v56 = vmul.f32 %v17120_v50, %v6860_v51  ;;  %v6874_v17 = vmul.f32 %v17139_v62, %v6859_v8  ;;  %v14039_v41 = vld [vmem:[%s18460_s3 + $0x18] sm:$0xf] }
 0x764   : > { %6690 = vmatpush1.msra.mxu1 %v6682_v44  ;;  %6753 = vmatprep.mubr.f32.mxu1 %v15956_v0  ;;  %v17194_v44 = vrot.slane %v14044_v28, %v16322_v6 }
 0x765   : > { %6782 = vmatprep.subr.mxu1 %v6776_v45  ;;  %v6957_v47 = vpop.permute.xlu1 %6956  ;;  %v6393_v60 = vpop.permute.xlu0 %6392 }
 0x766   : > { %v6959_v14 = vsel %vm4230_vm1, %v6957_v47, %v6955_v42  ;;  %v6958_v23 = vsel %vm4230_vm1, %v6955_v42, %v6957_v47 }
 0x767   : > { %v6974_v18 = vmul.f32 %v17148_v9, %v6959_v14  ;;  %v6973_v27 = vmul.f32 %v17163_v21, %v6958_v23  ;;  %v7314_v14 = vld [vmem:[%s18478_s19] sm:$0xf] }
 0x769   : > { %v7056_v54 = vpop.permute.xlu1 %7055  ;;  %v7153_v32 = vpop.permute.xlu0 %7152 }
 0x76a   : > { %v7058_v25 = vsel %vm4336_vm7, %v7056_v54, %v7054_v49  ;;  %v7057_v36 = vsel %vm4336_vm7, %v7054_v49, %v7056_v54  ;;  %v14045_v49 = vld [vmem:[%s18460_s3 + $0x20] sm:$0xf] }
 0x76b   : > { %14031 = vmatmul.mubr.msk.f32.vlgmr.msra.gmra.mrb[0].mxu1 %vm6415_vm9, %v14030_v52  ;;  %v7073_v1 = vmul.f32 %v17168_v24, %v7058_v25  ;;  %v7072_v42 = vmul.f32 %v17179_v31, %v7057_v36 }
 0x76c   : > { %6783 = vmatpush1.msra.mxu1 %v6775_v55  ;;  %6846 = vmatprep.mubr.f32.mxu1 %v15956_v0 }
 0x76d   : > { %6881 = vmatprep.subr.mxu1 %v6875_v56  ;;  %v6395_v61 = vpop.permute.xlu1 %6394 }
 0x76e   : > { %v6396_v63 = vsel %vm2860_vm5, %v6393_v60, %v6395_v61  ;;  %v6397_v3 = vsel %vm2860_vm5, %v6395_v61, %v6393_v60 }
 0x76f   : > { %v6411_v10 = vmul.f32 %v17131_v57, %v6397_v3  ;;  %v6412_v11 = vmul.f32 %v17134_v58, %v6396_v63 }
 0x771   : > { %6419 = vmatprep.subr.mxu0 %v6412_v11  ;;  %v7155_v29 = vpop.permute.xlu1 %7154 }
 0x772   : > { %6420 = vmatpush1.msra.mxu0 %v6411_v10  ;;  %v7157_v39 = vsel %vm4442_vm8, %v7155_v29, %v7153_v32  ;;  %v7156_v45 = vsel %vm4442_vm8, %v7153_v32, %v7155_v29 }
 0x773   : > { %14034 = vmatmul.mubr.msk.f32.vlgmr.msra.gmra.mrb[0].mxu1 %vm6415_vm9, %v14033_v15  ;;  %14024 = vmatmul.mubr.msk.f32.vlgmr.msra.gmra.mrb[2].mxu0 %vm6415_vm9, %v14023_v16  ;;  %v7172_v43 = vmul.f32 %v17184_v38, %v7157_v39  ;;  %v7171_v47 = vmul.f32 %v17194_v44, %v7156_v45 }
 0x774   : > { %6882 = vmatpush1.msra.mxu1 %v6874_v17  ;;  %6945 = vmatprep.mubr.f32.mxu1 %v15956_v0 }
 0x775   : > { %6980 = vmatprep.subr.mxu1 %v6974_v18 }
 0x77a   : > { %v7255_v56 = vpop.permute.xlu0 %7254 }
 0x77b   : > { %14037 = vmatmul.mubr.msk.f32.vlgmr.msra.gmra.mrb[0].mxu1 %vm6415_vm9, %v14036_v26 }
 0x77c   : > { %6981 = vmatpush1.msra.mxu1 %v6973_v27  ;;  %7044 = vmatprep.mubr.f32.mxu1 %v15956_v0 }
 0x77d   : > { %7079 = vmatprep.subr.mxu1 %v7073_v1 }
 0x783   : > { %14040 = vmatmul.mubr.msk.f32.vlgmr.msra.gmra.mrb[0].mxu1 %vm6415_vm9, %v14039_v41 }
 0x784   : > { %7080 = vmatpush1.msra.mxu1 %v7072_v42  ;;  %7143 = vmatprep.mubr.f32.mxu1 %v15956_v0 }
 0x785   : > { %7178 = vmatprep.subr.mxu1 %v7172_v43 }
 0x78b   : > { %14043 = vmatmul.mubr.msk.f32.vlgmr.msra.gmra.mrb[0].mxu1 %vm6415_vm9, %v14042_v46 }
 0x78c   : > { %7179 = vmatpush1.msra.mxu1 %v7171_v47  ;;  %7242 = vmatprep.mubr.f32.mxu1 %v15956_v0 }
 0x793   : > { %14046 = vmatmul.mubr.msk.f32.vlgmr.msra.gmra.mrb[0].mxu1 %vm6415_vm9, %v14045_v49 }
 0x794   : > { %7428 = vmatprep.mubr.f32.mxu1 %v15956_v0 }
 0x846   : > { %v6485_v51 = vpop.f32.mrb[2].mxu0 }
 0x847   : > { %v6487_v52 = vpop.f32.mrb[3].mxu0 }
 0x866   : > { %v7244_v53 = vpop.f32.mrb[0].mxu1 }
 0x867   : > { %v15347_v54 = vadd.f32 %v7244_v53, %v6485_v51  ;;  %v7246_v55 = vpop.f32.mrb[1].mxu1 }
 0x868   : > { %v15348_v59 = vadd.f32 %v7246_v55, %v6487_v52 }
 0x869   : > { %v7257_v60 = vadd.f32 %v15347_v54, %v7255_v56 }
 0x86a   : > { %v7258_v61 = vadd.f32 %v15348_v59, %v7255_v56  ;;  %v7305_v56 = vld [vmem:[%s18479_s14] sm:$0xf] }
 0x86b   : > { %v7259_v63 = vmul.f32 %v7257_v60, %v17001_v33 }
 0x86c   : > { %v7260_v3 = vmul.f32 %v7258_v61, %v17001_v33 }
 0x86d   : > { %v7261_v8 = vsel %vm1108_vm2, %v7259_v63, 0.0 }
 0x86e   : > { %v7262_v10 = vsel %vm1108_vm2, %v7260_v3, 0.0 }
 0x86f   : > { %v7263_v11 = vadd.f32 %v7262_v10, %v7261_v8 }
 0x871   : > { %7264 = vadd.xlane.f32.xlu1 %v7263_v11 }
 0x882   : > { %7317 = vperm.xlu1 %15756, %v7314_v14  }
 0x8fe   : > { %v7265_v15 = vpop.xlane.xlu1 %7264 }
 0x8ff   : > { %v7266_v16 = vrot.slane %v7265_v15, 4 }
 0x901   : > { %v7267_v17 = vadd.f32 %v7266_v16, %v7265_v15 }
 0x902   : > { %v7318_v16 = vpop.permute.xlu1 %7317 }
 0x903   : > { %v7268_v18 = vrot.slane %v7267_v17, 2 }
 0x905   : > { %v7269_v19 = vadd.f32 %v7268_v18, %v7267_v17 }
 0x907   : > { %v7270_v23 = vrot.slane %v7269_v19, 1 }
 0x909   : > { %v7271_v25 = vadd.f32 %v7270_v23, %v7269_v19 }
 0x90b   : > { %15563 = vpush %v7271_v25 }
 0x93c   : > { %s15564_s3 = spop %15563 }
 0x93d   : > { %s7273_s8 = smul.f32 0.0009765625, %s15564_s3 }
 0x93f   : > { %v7274_v26 = vstv %s7273_s8 }
 0x940   : > { %v7275_v27 = vsub.f32 %v7257_v60, %v7274_v26  ;;  %v7276_v1 = vsub.f32 %v7258_v61, %v7274_v26  ;;  %v7294_v3 = vmul.f32 %v7274_v26, %v17001_v33 }
 0x942   : > { %v7277_v28 = vmul.f32 %v7275_v27, %v7275_v27  ;;  %v7278_v29 = vmul.f32 %v7276_v1, %v7276_v1  ;;  %v7303_v8 = vsub.f32 %v7257_v60, %v7294_v3  ;;  %v7304_v10 = vsub.f32 %v7258_v61, %v7294_v3 }
 0x944   : > { %v7279_v32 = vmul.f32 %v7277_v28, %v17001_v33  ;;  %v7280_v36 = vmul.f32 %v7278_v29, %v17001_v33 }
 0x946   : > { %v7281_v39 = vsel %vm1108_vm2, %v7279_v32, 0.0  ;;  %v7282_v41 = vsel %vm1108_vm2, %v7280_v36, 0.0  ;;  %v8153_v32 = vld [vmem:[%s16080_s30] sm:$0xff] }
 0x947   : > { %v7283_v42 = vadd.f32 %v7282_v41, %v7281_v39 }
 0x949   : > { %7284 = vadd.xlane.f32.xlu0 %v7283_v42 }
 0x9d6   : > { %v7285_v43 = vpop.xlane.xlu0 %7284 }
 0x9d7   : > { %v7286_v45 = vrot.slane %v7285_v43, 4 }
 0x9d9   : > { %v7287_v46 = vadd.f32 %v7286_v45, %v7285_v43 }
 0x9db   : > { %v7288_v47 = vrot.slane %v7287_v46, 2 }
 0x9dd   : > { %v7289_v49 = vadd.f32 %v7288_v47, %v7287_v46  ;;  %v14049_v47 = vld [vmem:[%s18458_s24 + $0x8] sm:$0xff] }
 0x9df   : > { %v7290_v51 = vrot.slane %v7289_v49, 1 }
 0x9e1   : > { %v7291_v52 = vadd.f32 %v7290_v51, %v7289_v49 }
 0x9e3   : > { %15565 = vpush %v7291_v52 }
 0xa14   : > { %s15566_s3 = spop %15565 }
 0xa15   : > { %s7293_s8 = smul.f32 0.0009765625, %s15566_s3 }
 0xa17   : > { %s7296_s13 = sadd.f32 1e-05, %s7293_s8 }
 0xa19   : > { %v7297_v53 = vstv %s7296_s13  ;;  %s17341_s13 = sand.u32 1, %s15912_s16  }
 0xa1a   : > { %15770 = vrsqrt.f32 %v7297_v53 }
 0xa24   : > { %v15771_v54 = vpop.eup %15770 }
 0xa25   : > { %15567 = vpush %v15771_v54 }
 0xa56   : > { %s15568_s17 = spop %15567 }
 0xa57   : > { %v7300_v55 = vstv %s15568_s17  ;;  %s18425_s17 = sshll.u32 %s17341_s13, 4 }
 0xa58   : > { %v7301_v59 = vmul.f32 %v7300_v55, %v17001_v33  ;;  %s17354_s3 = scalar_lea.vmem [#allocation2], %s18425_s17 }
 0xa5a   : > { %v7306_v63 = vmul.f32 %v7305_v56, %v7301_v59  ;;  %v7344_v59 = vld [vmem:[%s18458_s24] sm:$0xff] }
 0xa5c   : > { %7309 = vperm.xlu0 %15755, %v7306_v63  }
 0xadb   : > { %v7310_v11 = vpop.permute.xlu0 %7309 }
 0xadc   : > { %v7312_v14 = vmul.f32 %v7310_v11, %v7303_v8  ;;  %v7313_v15 = vmul.f32 %v7310_v11, %v7304_v10  ;;  %v14056_v11 = vld [vmem:[%s18458_s24 + $0x10] sm:$0xff] }
 0xade   : > { %v7320_v17 = vadd.f32 %v7318_v16, %v7312_v14  ;;  %v7321_v18 = vadd.f32 %v7318_v16, %v7313_v15 }
 0xae0   : > { %v14047_v19 = vmul.f32 -1.442695, %v7320_v17  ;;  %v14048_v23 = vmul.f32 -1.442695, %v7321_v18 }
 0xae2   : > { %15772 = vpow2.f32 %v14047_v19 }
 0xae3   : > { %15774 = vpow2.f32 %v14048_v23 }
 0xaec   : > { %v15773_v25 = vpop.eup %15772 }
 0xaed   : > { %v15775_v27 = vpop.eup %15774  ;;  %v7328_v1 = vadd.f32 1.0, %v15773_v25 }
 0xaee   : > { %v7329_v28 = vadd.f32 1.0, %v15775_v27 }
 0xaef   : > { %15776 = vrcp.f32 %v7328_v1 }
 0xaf0   : > { %15778 = vrcp.f32 %v7329_v28 }
 0xaf9   : > { %v15777_v29 = vpop.eup %15776 }
 0xafa   : > { %v15779_v26 = vpop.eup %15778  ;;  %v17217_v60 = vmul.f32 %v15777_v29, %v7320_v17  ;;  %v14060_v17 = vld [vmem:[%s18458_s24 + $0x18] sm:$0xff] }
 0xafb   : > { %v7335_v61 = vmul.f32 %v15779_v26, %v7321_v18 }
 0xafc   : > { %7345 = vrot.lane.b32.xlu1 %v17217_v60, %s18476_s5 }
 0xafd   : > { %7347 = vrot.lane.b32.xlu0 %v7335_v61, %s18476_s5  ;;  %v7700_v14 = vmul.f32 %v7335_v61, %v17108_v40 }
 0xb00   : > { %7336 = vrot.lane.b32.xlu1 %v17217_v60, %s18471_s1 }
 0xb01   : > { %7338 = vrot.lane.b32.xlu0 %v7335_v61, %s18471_s1 }
 0xb04   : > { %7515 = vrot.lane.b32.xlu1 %v17217_v60, %s18469_s18 }
 0xb05   : > { %7517 = vrot.lane.b32.xlu0 %v7335_v61, %s18469_s18 }
 0xb08   : > { %7607 = vrot.lane.b32.xlu1 %v17217_v60, %s18472_s23 }
 0xb09   : > { %7609 = vrot.lane.b32.xlu0 %v7335_v61, %s18472_s23 }
 0xb0c   : > { %7785 = vrot.lane.b32.xlu1 %v17217_v60, %s18473_s2 }
 0xb0d   : > { %7787 = vrot.lane.b32.xlu0 %v7335_v61, %s18473_s2 }
 0xb10   : > { %7877 = vrot.lane.b32.xlu1 %v17217_v60, %s18474_s28 }
 0xb11   : > { %7879 = vrot.lane.b32.xlu0 %v7335_v61, %s18474_s28 }
 0xb14   : > { %7969 = vrot.lane.b32.xlu1 %v17217_v60, %s18475_s11 }
 0xb15   : > { %7971 = vrot.lane.b32.xlu0 %v7335_v61, %s18475_s11 }
 0xb18   : > { %8061 = vrot.lane.b32.xlu1 %v17217_v60, %s18477_s9 }
 0xb19   : > { %8063 = vrot.lane.b32.xlu0 %v7335_v61, %s18477_s9 }
 0xb1c   : > { %8156 = vperm.xlu1 %15756, %v8153_v32  }
 0xb6e   : > { %v7346_v36 = vpop.permute.xlu1 %7345 }
 0xb6f   : > { %v7348_v39 = vpop.permute.xlu0 %7347 }
 0xb70   : > { %v7349_v41 = vsel %vm2860_vm5, %v7346_v36, %v7348_v39  ;;  %v7350_v42 = vsel %vm2860_vm5, %v7348_v39, %v7346_v36  ;;  %v14072_v39 = vld [vmem:[%s18458_s24 + $0x30] sm:$0xff] }
 0xb71   : > { %v7351_v43 = vmul.f32 %v7350_v42, %v17131_v57  ;;  %v7352_v45 = vmul.f32 %v7349_v41, %v17134_v58 }
 0xb72   : > { %v7337_v46 = vpop.permute.xlu1 %7336 }
 0xb73   : > { %v7339_v49 = vpop.permute.xlu0 %7338  ;;  %14050 = vmatprep.subr.msk.mxu1 %vm1108_vm2, %v7352_v45 }
 0xb74   : > { %v7340_v51 = vsel %vm2754_vm3, %v7337_v46, %v7339_v49  ;;  %v7341_v52 = vsel %vm2754_vm3, %v7339_v49, %v7337_v46  ;;  %14051 = vmatpush1.msk.msra.mxu1 %vm1108_vm2, %v7351_v43  ;;  %v14076_v43 = vld [vmem:[%s18458_s24 + $0x38] sm:$0xff] }
 0xb75   : > { %v7342_v53 = vmul.f32 %v7341_v52, %v17070_v13  ;;  %v7343_v57 = vmul.f32 %v7340_v51, %v17067_v12  ;;  %14052 = vmatmul.mubr.msk.f32.vlgmr.msra.gmra.mrb[2].mxu1 %vm1104_vm4, %v14049_v47 }
 0xb76   : > { %v7516_v58 = vpop.permute.xlu1 %7515  ;;  %7508 = vmatprep.mubr.f32.mxu1 %v15956_v0 }
 0xb77   : > { %v7518_v54 = vpop.permute.xlu0 %7517  ;;  %14053 = vmatprep.subr.msk.mxu1 %vm1108_vm2, %v7343_v57 }
 0xb78   : > { %v7519_v55 = vsel %vm2966_vm6, %v7516_v58, %v7518_v54  ;;  %14054 = vmatpush1.msk.msra.mxu1 %vm1108_vm2, %v7342_v53  ;;  %v7520_v56 = vsel %vm2966_vm6, %v7518_v54, %v7516_v58 }
 0xb79   : > { %v7522_v13 = vmul.f32 %v7519_v55, %v17083_v22  ;;  %v7521_v3 = vmul.f32 %v7520_v56, %v17079_v20 }
 0xb7a   : > { %v7608_v12 = vpop.permute.xlu1 %7607 }
 0xb7b   : > { %v7610_v63 = vpop.permute.xlu0 %7609  ;;  %14057 = vmatprep.subr.msk.mxu1 %vm1108_vm2, %v7522_v13 }
 0xb7c   : > { %v7611_v8 = vsel %vm3496_vm11, %v7608_v12, %v7610_v63  ;;  %v7612_v22 = vsel %vm3496_vm11, %v7610_v63, %v7608_v12 }
 0xb7d   : > { %v7614_v10 = vmul.f32 %v7611_v8, %v17095_v30  ;;  %14055 = vmatmul.mubr.msk.f32.vlgmr.msra.gmra.mrb[2].mxu1 %vm1104_vm4, %v7344_v59  ;;  %v7613_v20 = vmul.f32 %v7612_v22, %v17100_v2  ;;  %v7699_v2 = vmul.f32 %v17217_v60, %v17117_v48  ;;  %v14064_v48 = vld [vmem:[%s18458_s24 + $0x20] sm:$0xff] }
 0xb7e   : > { %14058 = vmatpush1.msk.msra.mxu1 %vm1108_vm2, %v7521_v3  ;;  %7598 = vmatprep.mubr.f32.mxu1 %v15956_v0  ;;  %v7786_v15 = vpop.permute.xlu1 %7785 }
 0xb7f   : > { %14061 = vmatprep.subr.msk.mxu1 %vm1108_vm2, %v7614_v10  ;;  %v7788_v30 = vpop.permute.xlu0 %7787 }
 0xb80   : > { %v7790_v16 = vsel %vm3700_vm12, %v7788_v30, %v7786_v15  ;;  %v7789_v23 = vsel %vm3700_vm12, %v7786_v15, %v7788_v30 }
 0xb81   : > { %v7792_v18 = vmul.f32 %v7790_v16, %v17120_v50  ;;  %v7791_v50 = vmul.f32 %v7789_v23, %v17139_v62  ;;  %v14068_v62 = vld [vmem:[%s18458_s24 + $0x28] sm:$0xff] }
 0xb82   : > { %v7878_v19 = vpop.permute.xlu1 %7877 }
 0xb83   : > { %v7880_v40 = vpop.permute.xlu0 %7879 }
 0xb84   : > { %v7882_v25 = vsel %vm4230_vm1, %v7880_v40, %v7878_v19  ;;  %v7881_v29 = vsel %vm4230_vm1, %v7878_v19, %v7880_v40 }
 0xb85   : > { %14059 = vmatmul.mubr.msk.f32.vlgmr.msra.gmra.mrb[2].mxu1 %vm1104_vm4, %v14056_v11  ;;  %v7884_v27 = vmul.f32 %v7882_v25, %v17148_v9  ;;  %v7883_v9 = vmul.f32 %v7881_v29, %v17163_v21 }
 0xb86   : > { %14062 = vmatpush1.msk.msra.mxu1 %vm1108_vm2, %v7613_v20  ;;  %7690 = vmatprep.mubr.f32.mxu1 %v15956_v0  ;;  %v7970_v28 = vpop.permute.xlu1 %7969 }
 0xb87   : > { %14065 = vmatprep.subr.msk.mxu1 %vm1108_vm2, %v7700_v14  ;;  %v7972_v1 = vpop.permute.xlu0 %7971 }
 0xb88   : > { %v7974_v26 = vsel %vm4336_vm7, %v7972_v1, %v7970_v28  ;;  %v7973_v36 = vsel %vm4336_vm7, %v7970_v28, %v7972_v1 }
 0xb89   : > { %v7976_v60 = vmul.f32 %v7974_v26, %v17168_v24  ;;  %v7975_v24 = vmul.f32 %v7973_v36, %v17179_v31  ;;  %v14080_v31 = vld [vmem:[%s18458_s24 + $0x40] sm:$0xff] }
 0xb8a   : > { %v8062_v32 = vpop.permute.xlu1 %8061 }
 0xb8b   : > { %v8064_v61 = vpop.permute.xlu0 %8063 }
 0xb8c   : > { %v8066_v21 = vsel %vm4442_vm8, %v8064_v61, %v8062_v32  ;;  %v8065_v42 = vsel %vm4442_vm8, %v8062_v32, %v8064_v61 }
 0xb8d   : > { %14063 = vmatmul.mubr.msk.f32.vlgmr.msra.gmra.mrb[2].mxu1 %vm1104_vm4, %v14060_v17  ;;  %v8068_v41 = vmul.f32 %v8066_v21, %v17184_v38  ;;  %v8067_v45 = vmul.f32 %v8065_v42, %v17194_v44 }
 0xb8e   : > { %14066 = vmatpush1.msk.msra.mxu1 %vm1108_vm2, %v7699_v2  ;;  %7776 = vmatprep.mubr.f32.mxu1 %v15956_v0 }
 0xb8f   : > { %14069 = vmatprep.subr.msk.mxu1 %vm1108_vm2, %v7792_v18 }
 0xb95   : > { %14067 = vmatmul.mubr.msk.f32.vlgmr.msra.gmra.mrb[2].mxu1 %vm1104_vm4, %v14064_v48 }
 0xb96   : > { %14070 = vmatpush1.msk.msra.mxu1 %vm1108_vm2, %v7791_v50  ;;  %7868 = vmatprep.mubr.f32.mxu1 %v15956_v0 }
 0xb97   : > { %14073 = vmatprep.subr.msk.mxu1 %vm1108_vm2, %v7884_v27 }
 0xb9b   : > { %v8157_v38 = vpop.permute.xlu1 %8156 }
 0xb9d   : > { %14071 = vmatmul.mubr.msk.f32.vlgmr.msra.gmra.mrb[2].mxu1 %vm1104_vm4, %v14068_v62 }
 0xb9e   : > { %14074 = vmatpush1.msk.msra.mxu1 %vm1108_vm2, %v7883_v9  ;;  %7960 = vmatprep.mubr.f32.mxu1 %v15956_v0 }
 0xb9f   : > { %14077 = vmatprep.subr.msk.mxu1 %vm1108_vm2, %v7976_v60 }
 0xba5   : > { %14075 = vmatmul.mubr.msk.f32.vlgmr.msra.gmra.mrb[2].mxu1 %vm1104_vm4, %v14072_v39 }
 0xba6   : > { %14078 = vmatpush1.msk.msra.mxu1 %vm1108_vm2, %v7975_v24  ;;  %8052 = vmatprep.mubr.f32.mxu1 %v15956_v0 }
 0xba7   : > { %14081 = vmatprep.subr.msk.mxu1 %vm1108_vm2, %v8068_v41 }
 0xbad   : > { %14079 = vmatmul.mubr.msk.f32.vlgmr.msra.gmra.mrb[2].mxu1 %vm1104_vm4, %v14076_v43 }
 0xbae   : > { %14082 = vmatpush1.msk.msra.mxu1 %vm1108_vm2, %v8067_v45  ;;  %8144 = vmatprep.mubr.f32.mxu1 %v15956_v0  ;;  %v8256_v45 = vld [vmem:[%s16090_s12] sm:$0xff] }
 0xbb5   : > { %14083 = vmatmul.mubr.msk.f32.vlgmr.msra.gmra.mrb[2].mxu1 %vm1104_vm4, %v14080_v31 }
 0xbb6   : > { %8388 = vmatprep.mubr.f32.mxu1 %v15956_v0 }
 0xc88   : > { %v8146_v46 = vpop.f32.mrb[2].mxu1 }
 0xc89   : > { %v8159_v47 = vadd.f32 %v8157_v38, %v8146_v46  ;;  %v8148_v44 = vpop.f32.mrb[3].mxu1 }
 0xc8a   : > { %v8160_v49 = vadd.f32 %v8157_v38, %v8148_v44 }
 0xc8b   : > { %v17345_v51 = vadd.f32 %v8159_v47, %v17004_v34 }
 0xc8c   : > { %v17348_v52 = vadd.f32 %v8160_v49, %v17006_v35 }
 0xc8d   : > { %v8165_v53 = vmul.f32 %v17345_v51, %v17001_v33  ;;  %8163 = vst [vmem:[%s17354_s3] sm:$0xff] %v17345_v51  ;;  %v8205_v35 = vmul.f32 %v17345_v51, %v17011_v37 }
 0xc8e   : > { %v8166_v57 = vmul.f32 %v17348_v52, %v17001_v33  ;;  %8164 = vst [vmem:[%s17354_s3 + $0x8] sm:$0xff] %v17348_v52  ;;  %v8206_v58 = vmul.f32 %v17348_v52, %v17011_v37 }
 0xc90   : > { %v8167_v34 = vadd.f32 %v8166_v57, %v8165_v53  ;;  %v8207_v54 = vadd.f32 %v8206_v58, %v8205_v35 }
 0xc92   : > { %8168 = vadd.xlane.f32.xlu0 %v8167_v34 }
 0xc96   : > { %8208 = vadd.xlane.f32.xlu0 %v8207_v54 }
 0xd1f   : > { %v8169_v55 = vpop.xlane.xlu0 %8168 }
 0xd20   : > { %v8170_v56 = vrot.slane %v8169_v55, 4 }
 0xd22   : > { %v8171_v13 = vadd.f32 %v8170_v56, %v8169_v55 }
 0xd23   : > { %v8209_v25 = vpop.xlane.xlu0 %8208 }
 0xd24   : > { %v8172_v12 = vrot.slane %v8171_v13, 2  ;;  %v8210_v48 = vrot.slane %v8209_v25, 4 }
 0xd26   : > { %v8173_v59 = vadd.f32 %v8172_v12, %v8171_v13  ;;  %v8211_v50 = vadd.f32 %v8210_v48, %v8209_v25  ;;  %v14086_v48 = vld [vmem:[%s16050_s29 + $0x2] sm:$0x3] }
 0xd28   : > { %v8174_v63 = vrot.slane %v8173_v59, 1  ;;  %v8212_v27 = vrot.slane %v8211_v50, 2 }
 0xd2a   : > { %v8175_v3 = vadd.f32 %v8174_v63, %v8173_v59  ;;  %v8213_v28 = vadd.f32 %v8212_v27, %v8211_v50  ;;  %v17424_v27 = vrot.slane %v14086_v48, %v16322_v6 }
 0xd2c   : > { %15569 = vpush %v8175_v3  ;;  %v8214_v29 = vrot.slane %v8213_v28, 1 }
 0xd2e   : > { %v8215_v62 = vadd.f32 %v8214_v29, %v8213_v28  ;;  %v8284_v28 = vld [vmem:[%s16050_s29] sm:$0x3] }
 0xd5d   : > { %s15570_s8 = spop %15569 }
 0xd5e   : > { %s8177_s17 = smul.f32 0.0009765625, %s15570_s8 }
 0xd60   : > { %v8178_v8 = vstv %s8177_s17 }
 0xd61   : > { %v8179_v10 = vsub.f32 %v17345_v51, %v8178_v8  ;;  %v8180_v22 = vsub.f32 %v17348_v52, %v8178_v8  ;;  %v8196_v60 = vmul.f32 %v8178_v8, %v17001_v33 }
 0xd63   : > { %v8181_v11 = vmul.f32 %v8179_v10, %v8179_v10  ;;  %v8182_v20 = vmul.f32 %v8180_v22, %v8180_v22 }
 0xd65   : > { %v8183_v14 = vmul.f32 %v8181_v11, %v17001_v33  ;;  %v8184_v30 = vmul.f32 %v8182_v20, %v17001_v33 }
 0xd67   : > { %v8185_v15 = vadd.f32 %v8184_v30, %v8183_v14 }
 0xd69   : > { %8186 = vadd.xlane.f32.xlu1 %v8185_v15 }
 0xdf6   : > { %v8187_v16 = vpop.xlane.xlu1 %8186 }
 0xdf7   : > { %v8188_v17 = vrot.slane %v8187_v16, 4 }
 0xdf9   : > { %v8189_v2 = vadd.f32 %v8188_v17, %v8187_v16 }
 0xdfb   : > { %v8190_v18 = vrot.slane %v8189_v2, 2 }
 0xdfd   : > { %v8191_v40 = vadd.f32 %v8190_v18, %v8189_v2 }
 0xdff   : > { %v8192_v19 = vrot.slane %v8191_v40, 1 }
 0xe01   : > { %v8193_v23 = vadd.f32 %v8192_v19, %v8191_v40 }
 0xe03   : > { %15571 = vpush %v8193_v23 }
 0xe34   : > { %s15572_s17 = spop %15571 }
 0xe35   : > { %s8195_s8 = smul.f32 0.0009765625, %s15572_s17 }
 0xe37   : > { %s8198_s14 = sadd.f32 1e-05, %s8195_s8 }
 0xe39   : > { %v8199_v1 = vstv %s8198_s14 }
 0xe3a   : > { %15780 = vrsqrt.f32 %v8199_v1  ;;  %v17427_v1 = vrot.slane %v14086_v48, %v16325_v7 }
 0xe44   : > { %v15781_v26 = vpop.eup %15780 }
 0xe45   : > { %15573 = vpush %v15781_v26 }
 0xe46   : > { %15575 = vpush %v8215_v62 }
 0xe76   : > { %s17370_s19 = spop %15573 }
 0xe77   : > { %s15576_s21 = spop %15575  ;;  %v8202_v35 = vstv %s17370_s19  ;;  %s18481_s19 = sld [smem:[#allocation20_spill]] }
 0xe78   : > { %s8217_s24 = smul.f32 0.0009765625, %s15576_s21  ;;  %s18480_s21 = sld [smem:[#allocation18_spill]]  ;;  %v8203_v54 = vmul.f32 %v8202_v35, %v17001_v33 }
 0xe7a   : > { %v8218_v9 = vstv %s8217_s24 }
 0xe7b   : > { %v8219_v61 = vsub.f32 %v17345_v51, %v8218_v9  ;;  %v8220_v32 = vsub.f32 %v17348_v52, %v8218_v9  ;;  %v8236_v36 = vmul.f32 %v8218_v9, %v17011_v37 }
 0xe7d   : > { %v8221_v21 = vmul.f32 %v8219_v61, %v8219_v61  ;;  %v8222_v39 = vmul.f32 %v8220_v32, %v8220_v32  ;;  %v8237_v24 = vadd.f32 %v8236_v36, %v8196_v60  ;;  %v9149_v25 = vld [vmem:[%s18481_s19] sm:$0xf]  ;;  %v17437_v32 = vrot.slane %v8284_v28, %v16322_v6 }
 0xe7e   : > { %v8247_v56 = vld [vmem:[%s18480_s21] sm:$0xff]  ;;  %s18482_s21 = sld [smem:[#allocation19_spill]]  ;;  %v17440_v36 = vrot.slane %v8284_v28, %v16325_v7 }
 0xe7f   : > { %v8223_v41 = vmul.f32 %v8221_v21, %v17011_v37  ;;  %v8224_v42 = vmul.f32 %v8222_v39, %v17011_v37  ;;  %v8245_v59 = vsub.f32 %v17345_v51, %v8237_v24  ;;  %v8246_v63 = vsub.f32 %v17348_v52, %v8237_v24  ;;  %v14090_v39 = vld [vmem:[%s16050_s29 + $0x4] sm:$0x3] }
 0xe81   : > { %v8225_v43 = vadd.f32 %v8224_v42, %v8223_v41 }
 0xe83   : > { %8226 = vadd.xlane.f32.xlu0 %v8225_v43 }
 0xe84   : > { %v14087_v21 = vld [vmem:[%s18482_s21 + $0x4] sm:$0xf]  ;;  %v8298_v35 = vld [vmem:[%s18482_s21] sm:$0xf] }
 0xe99   : > { %8259 = vperm.xlu0 %15755, %v8256_v45  }
 0xf10   : > { %v8227_v31 = vpop.xlane.xlu0 %8226 }
 0xf11   : > { %v8228_v38 = vrot.slane %v8227_v31, 4 }
 0xf13   : > { %v8229_v46 = vadd.f32 %v8228_v38, %v8227_v31  ;;  %v17452_v38 = vrot.slane %v14090_v39, %v16325_v7 }
 0xf15   : > { %v8230_v47 = vrot.slane %v8229_v46, 2 }
 0xf17   : > { %v8231_v44 = vadd.f32 %v8230_v47, %v8229_v46  ;;  %v14093_v46 = vld [vmem:[%s16050_s29 + $0x6] sm:$0x3] }
 0xf18   : > { %v8260_v22 = vpop.permute.xlu0 %8259 }
 0xf19   : > { %v8232_v49 = vrot.slane %v8231_v44, 1 }
 0xf1b   : > { %v8233_v53 = vadd.f32 %v8232_v49, %v8231_v44  ;;  %v17457_v44 = vrot.slane %v14090_v39, %v16322_v6 }
 0xf1d   : > { %15577 = vpush %v8233_v53 }
 0xf4e   : > { %s15578_s14 = spop %15577 }
 0xf4f   : > { %s8235_s24 = smul.f32 0.0009765625, %s15578_s14  ;;  %s18483_s14 = sld [smem:[#allocation22_spill]] }
 0xf51   : > { %s8238_s17 = sadd.f32 1e-05, %s8235_s24 }
 0xf53   : > { %v8239_v57 = vstv %s8238_s17 }
 0xf54   : > { %15782 = vrsqrt.f32 %v8239_v57 }
 0xf5e   : > { %v15783_v34 = vpop.eup %15782 }
 0xf5f   : > { %15579 = vpush %v15783_v34  ;;  %v17465_v34 = vrot.slane %v14093_v46, %v16325_v7 }
 0xf90   : > { %s15580_s8 = spop %15579 }
 0xf91   : > { %v8242_v58 = vstv %s15580_s8  ;;  %s18484_s8 = sld [smem:[#allocation21_spill]] }
 0xf92   : > { %v8243_v55 = vmul.f32 %v8242_v58, %v17011_v37 }
 0xf94   : > { %v8244_v13 = vadd.f32 %v8243_v55, %v8203_v54 }
 0xf96   : > { %v8248_v12 = vmul.f32 %v8247_v56, %v8244_v13 }
 0xf98   : > { %8251 = vperm.xlu1 %15756, %v8248_v12   ;;  %v14096_v12 = vld [vmem:[%s16050_s29 + $0x8] sm:$0x3] }
0x1017   : > { %v8252_v3 = vpop.permute.xlu1 %8251 }
0x1018   : > { %v8254_v8 = vmul.f32 %v8252_v3, %v8245_v59  ;;  %v8255_v10 = vmul.f32 %v8252_v3, %v8246_v63  ;;  %v17476_v59 = vrot.slane %v14093_v46, %v16322_v6  ;;  %v17481_v3 = vrot.slane %v14096_v12, %v16325_v7 }
0x101a   : > { %v8262_v11 = vadd.f32 %v8260_v22, %v8254_v8  ;;  %v8263_v20 = vadd.f32 %v8260_v22, %v8255_v10  ;;  %v14091_v8 = vld [vmem:[%s18482_s21 + $0x8] sm:$0xf] }
0x101c   : > { %v14084_v14 = vmul.f32 -1.442695, %v8262_v11  ;;  %v14085_v30 = vmul.f32 -1.442695, %v8263_v20 }
0x101e   : > { %15784 = vpow2.f32 %v14084_v14  ;;  %v17491_v14 = vrot.slane %v14096_v12, %v16322_v6 }
0x101f   : > { %15786 = vpow2.f32 %v14085_v30 }
0x1028   : > { %v15785_v15 = vpop.eup %15784 }
0x1029   : > { %v15787_v16 = vpop.eup %15786  ;;  %v8270_v17 = vadd.f32 1.0, %v15785_v15 }
0x102a   : > { %v8271_v2 = vadd.f32 1.0, %v15787_v16 }
0x102b   : > { %15788 = vrcp.f32 %v8270_v17  ;;  %v14094_v17 = vld [vmem:[%s18482_s21 + $0xc] sm:$0xf] }
0x102c   : > { %15790 = vrcp.f32 %v8271_v2 }
0x1035   : > { %v15789_v18 = vpop.eup %15788 }
0x1036   : > { %v17385_v40 = vmul.f32 %v15789_v18, %v8262_v11  ;;  %v15791_v19 = vpop.eup %15790  ;;  %v14099_v11 = vld [vmem:[%s16050_s29 + $0xa] sm:$0x3] }
0x1037   : > { %v17391_v23 = vmul.f32 %v15791_v19, %v8263_v20  ;;  %v17494_v15 = vrot.slane %v14099_v11, %v16325_v7  ;;  %v14102_v19 = vld [vmem:[%s16050_s29 + $0xc] sm:$0x3] }
0x1038   : > { %8278 = vrot.lane.b32.xlu0 %v17385_v40, %s18471_s1  ;;  %8299 = vrot.lane.b32.xlu1 %v17385_v40, %s18476_s5  ;;  %v8677_v2 = vmul.f32 %v17491_v14, %v17385_v40 }
0x1039   : > { %v8678_v22 = vmul.f32 %v17481_v3, %v17391_v23 }
0x103c   : > { %8469 = vrot.lane.b32.xlu0 %v17385_v40, %s18469_s18  ;;  %8301 = vrot.lane.b32.xlu1 %v17391_v23, %s18476_s5 }
0x1040   : > { %8567 = vrot.lane.b32.xlu0 %v17385_v40, %s18472_s23  ;;  %8280 = vrot.lane.b32.xlu1 %v17391_v23, %s18471_s1 }
0x1044   : > { %8757 = vrot.lane.b32.xlu0 %v17385_v40, %s18473_s2  ;;  %8471 = vrot.lane.b32.xlu1 %v17391_v23, %s18469_s18 }
0x1048   : > { %8855 = vrot.lane.b32.xlu0 %v17385_v40, %s18474_s28  ;;  %8569 = vrot.lane.b32.xlu1 %v17391_v23, %s18472_s23 }
0x104c   : > { %8953 = vrot.lane.b32.xlu0 %v17385_v40, %s18475_s11  ;;  %8759 = vrot.lane.b32.xlu1 %v17391_v23, %s18473_s2 }
0x1050   : > { %9051 = vrot.lane.b32.xlu0 %v17385_v40, %s18477_s9  ;;  %8857 = vrot.lane.b32.xlu1 %v17391_v23, %s18474_s28  ;;  %v17511_v40 = vrot.slane %v14102_v19, %v16325_v7 }
0x1054   : > { %9152 = vperm.xlu0 %15755, %v9149_v25   ;;  %8955 = vrot.lane.b32.xlu1 %v17391_v23, %s18475_s11  ;;  %v17506_v25 = vrot.slane %v14099_v11, %v16322_v6 }
0x1058   : > { %9053 = vrot.lane.b32.xlu1 %v17391_v23, %s18477_s9 }
0x10aa   : > { %v8300_v50 = vpop.permute.xlu1 %8299  ;;  %v8279_v29 = vpop.permute.xlu0 %8278 }
0x10ae   : > { %v8302_v26 = vpop.permute.xlu1 %8301  ;;  %v8470_v43 = vpop.permute.xlu0 %8469 }
0x10af   : > { %v8303_v62 = vsel %vm2860_vm5, %v8300_v50, %v8302_v26  ;;  %v8304_v9 = vsel %vm2860_vm5, %v8302_v26, %v8300_v50 }
0x10b0   : > { %v8317_v60 = vmul.f32 %v17424_v27, %v8304_v9  ;;  %v8318_v61 = vmul.f32 %v17427_v1, %v8303_v62  ;;  %v14105_v9 = vld [vmem:[%s16050_s29 + $0xe] sm:$0x3] }
0x10b2   : > { %8324 = vmatprep.subr.mxu1 %v8318_v61  ;;  %v8281_v24 = vpop.permute.xlu1 %8280  ;;  %v8568_v58 = vpop.permute.xlu0 %8567  ;;  %v17522_v61 = vrot.slane %v14102_v19, %v16322_v6 }
0x10b3   : > { %v8282_v41 = vsel %vm2754_vm3, %v8279_v29, %v8281_v24  ;;  %v8283_v42 = vsel %vm2754_vm3, %v8281_v24, %v8279_v29  ;;  %8325 = vmatpush1.msra.mxu1 %v8317_v60  ;;  %v14097_v29 = vld [vmem:[%s18482_s21 + $0x10] sm:$0xf]  ;;  %v17527_v24 = vrot.slane %v14105_v9, %v16325_v7 }
0x10b4   : > { %v8296_v45 = vmul.f32 %v17437_v32, %v8283_v42  ;;  %v8297_v31 = vmul.f32 %v17440_v36, %v8282_v41  ;;  %14088 = vmatmul.mubr.msk.f32.vlgmr.msra.gmra.mrb[4].mxu1 %vm6415_vm9, %v14087_v21  ;;  %v14100_v42 = vld [vmem:[%s18482_s21 + $0x14] sm:$0xf] }
0x10b5   : > { %8462 = vmatprep.mubr.f32.mxu1 %v15956_v0 }
0x10b6   : > { %8398 = vmatprep.subr.mxu1 %v8297_v31  ;;  %v8472_v47 = vpop.permute.xlu1 %8471  ;;  %v8758_v30 = vpop.permute.xlu0 %8757  ;;  %v14108_v31 = vld [vmem:[%s16050_s29 + $0x10] sm:$0x3] }
0x10b7   : > { %v8473_v49 = vsel %vm2966_vm6, %v8470_v43, %v8472_v47  ;;  %8399 = vmatpush1.msra.mxu1 %v8296_v45  ;;  %v8474_v53 = vsel %vm2966_vm6, %v8472_v47, %v8470_v43  ;;  %v17538_v47 = vrot.slane %v14105_v9, %v16322_v6 }
0x10b8   : > { %v8488_v57 = vmul.f32 %v17452_v38, %v8473_v49  ;;  %v8487_v55 = vmul.f32 %v17457_v44, %v8474_v53 }
0x10ba   : > { %8494 = vmatprep.subr.mxu1 %v8488_v57  ;;  %v8570_v54 = vpop.permute.xlu1 %8569  ;;  %v8856_v48 = vpop.permute.xlu0 %8855  ;;  %v17543_v57 = vrot.slane %v14108_v31, %v16325_v7 }
0x10bb   : > { %v8571_v56 = vsel %vm3496_vm11, %v8568_v58, %v8570_v54  ;;  %v8572_v63 = vsel %vm3496_vm11, %v8570_v54, %v8568_v58  ;;  %v14103_v58 = vld [vmem:[%s18482_s21 + $0x18] sm:$0xf] }
0x10bc   : > { %v8586_v13 = vmul.f32 %v17465_v34, %v8571_v56  ;;  %14089 = vmatmul.mubr.msk.f32.vlgmr.msra.gmra.mrb[4].mxu1 %vm6415_vm9, %v8298_v35  ;;  %v8585_v10 = vmul.f32 %v17476_v59, %v8572_v63  ;;  %v17553_v56 = vrot.slane %v14108_v31, %v16322_v6  ;;  %v14109_v63 = vld [vmem:[%s18482_s21 + $0x20] sm:$0xf] }
0x10bd   : > { %8495 = vmatpush1.msra.mxu1 %v8487_v55  ;;  %8558 = vmatprep.mubr.f32.mxu1 %v15956_v0 }
0x10be   : > { %8592 = vmatprep.subr.mxu1 %v8586_v13  ;;  %v8760_v20 = vpop.permute.xlu1 %8759  ;;  %v8954_v21 = vpop.permute.xlu0 %8953  ;;  %v14106_v13 = vld [vmem:[%s18482_s21 + $0x1c] sm:$0xf] }
0x10bf   : > { %v8762_v16 = vsel %vm3700_vm12, %v8760_v20, %v8758_v30  ;;  %v8761_v50 = vsel %vm3700_vm12, %v8758_v30, %v8760_v20 }
0x10c0   : > { %v8776_v18 = vmul.f32 %v17494_v15, %v8762_v16  ;;  %v8775_v26 = vmul.f32 %v17506_v25, %v8761_v50 }
0x10c2   : > { %v8858_v23 = vpop.permute.xlu1 %8857  ;;  %v9052_v49 = vpop.permute.xlu0 %9051 }
0x10c3   : > { %v8860_v28 = vsel %vm4230_vm1, %v8858_v23, %v8856_v48  ;;  %v8859_v39 = vsel %vm4230_vm1, %v8856_v48, %v8858_v23 }
0x10c4   : > { %14092 = vmatmul.mubr.msk.f32.vlgmr.msra.gmra.mrb[4].mxu1 %vm6415_vm9, %v14091_v8  ;;  %v8874_v62 = vmul.f32 %v17511_v40, %v8860_v28  ;;  %v8873_v43 = vmul.f32 %v17522_v61, %v8859_v39 }
0x10c5   : > { %8593 = vmatpush1.msra.mxu1 %v8585_v10  ;;  %8656 = vmatprep.mubr.f32.mxu1 %v15956_v0 }
0x10c6   : > { %8684 = vmatprep.subr.mxu1 %v8678_v22  ;;  %v8956_v60 = vpop.permute.xlu1 %8955 }
0x10c7   : > { %v8958_v41 = vsel %vm4336_vm7, %v8956_v60, %v8954_v21  ;;  %v8957_v53 = vsel %vm4336_vm7, %v8954_v21, %v8956_v60 }
0x10c8   : > { %v8972_v45 = vmul.f32 %v17527_v24, %v8958_v41  ;;  %v8971_v54 = vmul.f32 %v17538_v47, %v8957_v53 }
0x10ca   : > { %v9054_v46 = vpop.permute.xlu1 %9053 }
0x10cb   : > { %v9056_v35 = vsel %vm4442_vm8, %v9054_v46, %v9052_v49  ;;  %v9055_v7 = vsel %vm4442_vm8, %v9052_v49, %v9054_v46 }
0x10cc   : > { %14095 = vmatmul.mubr.msk.f32.vlgmr.msra.gmra.mrb[4].mxu1 %vm6415_vm9, %v14094_v17  ;;  %v9070_v55 = vmul.f32 %v17543_v57, %v9056_v35  ;;  %v9069_v12 = vmul.f32 %v17553_v56, %v9055_v7 }
0x10cd   : > { %8685 = vmatpush1.msra.mxu1 %v8677_v2  ;;  %8748 = vmatprep.mubr.f32.mxu1 %v15956_v0 }
0x10ce   : > { %8782 = vmatprep.subr.mxu1 %v8776_v18  ;;  %v9212_v18 = vld [vmem:[%s18483_s14] sm:$0xf] }
0x10d3   : > { %v9153_v8 = vpop.permute.xlu0 %9152 }
0x10d4   : > { %14098 = vmatmul.mubr.msk.f32.vlgmr.msra.gmra.mrb[4].mxu1 %vm6415_vm9, %v14097_v29 }
0x10d5   : > { %8783 = vmatpush1.msra.mxu1 %v8775_v26  ;;  %8846 = vmatprep.mubr.f32.mxu1 %v15956_v0 }
0x10d6   : > { %8880 = vmatprep.subr.mxu1 %v8874_v62 }
0x10dc   : > { %14101 = vmatmul.mubr.msk.f32.vlgmr.msra.gmra.mrb[4].mxu1 %vm6415_vm9, %v14100_v42 }
0x10dd   : > { %8881 = vmatpush1.msra.mxu1 %v8873_v43  ;;  %8944 = vmatprep.mubr.f32.mxu1 %v15956_v0 }
0x10de   : > { %8978 = vmatprep.subr.mxu1 %v8972_v45 }
0x10e4   : > { %14104 = vmatmul.mubr.msk.f32.vlgmr.msra.gmra.mrb[4].mxu1 %vm6415_vm9, %v14103_v58 }
0x10e5   : > { %8979 = vmatpush1.msra.mxu1 %v8971_v54  ;;  %9042 = vmatprep.mubr.f32.mxu1 %v15956_v0 }
0x10e6   : > { %9076 = vmatprep.subr.mxu1 %v9070_v55 }
0x10ec   : > { %14107 = vmatmul.mubr.msk.f32.vlgmr.msra.gmra.mrb[4].mxu1 %vm6415_vm9, %v14106_v13 }
0x10ed   : > { %9077 = vmatpush1.msra.mxu1 %v9069_v12  ;;  %9140 = vmatprep.mubr.f32.mxu1 %v15956_v0 }
0x10f4   : > { %14110 = vmatmul.mubr.msk.f32.vlgmr.msra.gmra.mrb[4].mxu1 %vm6415_vm9, %v14109_v63  ;;  %v9203_v63 = vld [vmem:[%s18484_s8] sm:$0xf]  ;;  %s18485_s8 = sld [smem:[#allocation24_spill]] }
0x10f5   : > { %9331 = vmatprep.mubr.f32.mxu1 %v15956_v0 }
0x11c7   : > { %v9142_v6 = vpop.f32.mrb[4].mxu1 }
0x11c8   : > { %v9155_v10 = vadd.f32 %v9153_v8, %v9142_v6  ;;  %v9144_v22 = vpop.f32.mrb[5].mxu1 }
0x11c9   : > { %v9156_v11 = vadd.f32 %v9153_v8, %v9144_v22 }
0x11ca   : > { %v9157_v20 = vmul.f32 %v9155_v10, %v17001_v33 }
0x11cb   : > { %v9158_v30 = vmul.f32 %v9156_v11, %v17001_v33 }
0x11cc   : > { %v9159_v16 = vsel %vm1108_vm2, %v9157_v20, 0.0 }
0x11cd   : > { %v9160_v17 = vsel %vm1108_vm2, %v9158_v30, 0.0 }
0x11ce   : > { %v9161_v2 = vadd.f32 %v9160_v17, %v9159_v16 }
0x11d0   : > { %9162 = vadd.xlane.f32.xlu1 %v9161_v2 }
0x11e1   : > { %9215 = vperm.xlu1 %15756, %v9212_v18  }
0x125d   : > { %v9163_v19 = vpop.xlane.xlu1 %9162 }
0x125e   : > { %v9164_v23 = vrot.slane %v9163_v19, 4 }
0x1260   : > { %v9165_v48 = vadd.f32 %v9164_v23, %v9163_v19 }
0x1261   : > { %v9216_v18 = vpop.permute.xlu1 %9215 }
0x1262   : > { %v9166_v50 = vrot.slane %v9165_v48, 2 }
0x1264   : > { %v9167_v28 = vadd.f32 %v9166_v50, %v9165_v48 }
0x1266   : > { %v9168_v29 = vrot.slane %v9167_v28, 1 }
0x1268   : > { %v9169_v26 = vadd.f32 %v9168_v29, %v9167_v28 }
0x126a   : > { %15581 = vpush %v9169_v26 }
0x129b   : > { %s15582_s24 = spop %15581 }
0x129c   : > { %s9171_s17 = smul.f32 0.0009765625, %s15582_s24 }
0x129e   : > { %v9172_v62 = vstv %s9171_s17 }
0x129f   : > { %v9173_v9 = vsub.f32 %v9155_v10, %v9172_v62  ;;  %v9174_v60 = vsub.f32 %v9156_v11, %v9172_v62  ;;  %v9192_v22 = vmul.f32 %v9172_v62, %v17001_v33 }
0x12a1   : > { %v9175_v21 = vmul.f32 %v9173_v9, %v9173_v9  ;;  %v9176_v39 = vmul.f32 %v9174_v60, %v9174_v60  ;;  %v9201_v20 = vsub.f32 %v9155_v10, %v9192_v22  ;;  %v9202_v30 = vsub.f32 %v9156_v11, %v9192_v22 }
0x12a3   : > { %v9177_v41 = vmul.f32 %v9175_v21, %v17001_v33  ;;  %v9178_v42 = vmul.f32 %v9176_v39, %v17001_v33  ;;  %v10155_v21 = vld [vmem:[%s18485_s8] sm:$0xff] }
0x12a5   : > { %v9179_v43 = vsel %vm1108_vm2, %v9177_v41, 0.0  ;;  %v9180_v45 = vsel %vm1108_vm2, %v9178_v42, 0.0  ;;  %v10156_v41 = vld [vmem:[%s18485_s8 + $0x8] sm:$0xff] }
0x12a6   : > { %v9181_v31 = vadd.f32 %v9180_v45, %v9179_v43 }
0x12a8   : > { %9182 = vadd.xlane.f32.xlu0 %v9181_v31 }
0x1335   : > { %v9183_v46 = vpop.xlane.xlu0 %9182 }
0x1336   : > { %v9184_v49 = vrot.slane %v9183_v46, 4 }
0x1338   : > { %v9185_v53 = vadd.f32 %v9184_v49, %v9183_v46 }
0x133a   : > { %v9186_v35 = vrot.slane %v9185_v53, 2 }
0x133c   : > { %v9187_v58 = vadd.f32 %v9186_v35, %v9185_v53 }
0x133e   : > { %v9188_v54 = vrot.slane %v9187_v58, 1 }
0x1340   : > { %v9189_v55 = vadd.f32 %v9188_v54, %v9187_v58 }
0x1342   : > { %15583 = vpush %v9189_v55 }
0x1373   : > { %s15584_s19 = spop %15583 }
0x1374   : > { %s9191_s14 = smul.f32 0.0009765625, %s15584_s19  ;;  %s18486_s19 = sld [smem:[#allocation26_spill]] }
0x1376   : > { %s9194_s24 = sadd.f32 1e-05, %s9191_s14 }
0x1378   : > { %v9195_v7 = vstv %s9194_s24 }
0x1379   : > { %15792 = vrsqrt.f32 %v9195_v7 }
0x137a   : > { %v10173_v39 = vld [vmem:[%s18486_s19] sm:$0xff]  ;;  %v10174_v42 = vld [vmem:[%s18486_s19 + $0x8] sm:$0xff] }
0x1383   : > { %v15793_v13 = vpop.eup %15792 }
0x1384   : > { %15585 = vpush %v15793_v13 }
0x13b5   : > { %s15586_s17 = spop %15585 }
0x13b6   : > { %v9198_v12 = vstv %s15586_s17 }
0x13b7   : > { %v9199_v8 = vmul.f32 %v9198_v12, %v17001_v33 }
0x13b9   : > { %v9204_v6 = vmul.f32 %v9203_v63, %v9199_v8 }
0x13bb   : > { %9207 = vperm.xlu0 %15755, %v9204_v6  }
0x143a   : > { %v9208_v16 = vpop.permute.xlu0 %9207 }
0x143b   : > { %v9210_v17 = vmul.f32 %v9208_v16, %v9201_v20  ;;  %v9211_v2 = vmul.f32 %v9208_v16, %v9202_v30 }
0x143d   : > { %v9218_v19 = vadd.f32 %v9216_v18, %v9210_v17  ;;  %v9219_v23 = vadd.f32 %v9216_v18, %v9211_v2 }
0x143f   : > { %v14111_v48 = vmul.f32 -1.442695, %v9218_v19  ;;  %v14112_v50 = vmul.f32 -1.442695, %v9219_v23 }
0x1441   : > { %15794 = vpow2.f32 %v14111_v48 }
0x1442   : > { %15796 = vpow2.f32 %v14112_v50 }
0x144b   : > { %v15795_v28 = vpop.eup %15794 }
0x144c   : > { %v15797_v29 = vpop.eup %15796  ;;  %v9226_v26 = vadd.f32 1.0, %v15795_v28 }
0x144d   : > { %v9227_v9 = vadd.f32 1.0, %v15797_v29 }
0x144e   : > { %15798 = vrcp.f32 %v9226_v26 }
0x144f   : > { %15800 = vrcp.f32 %v9227_v9 }
0x1458   : > { %v15799_v60 = vpop.eup %15798 }
0x1459   : > { %v15801_v62 = vpop.eup %15800  ;;  %v17576_v10 = vmul.f32 %v15799_v60, %v9218_v19 }
0x145a   : > { %v17578_v11 = vmul.f32 %v15801_v62, %v9219_v23 }
0x145b   : > { %9244 = vrot.lane.b32.xlu1 %v17576_v10, %s18476_s5 }
0x145c   : > { %9246 = vrot.lane.b32.xlu0 %v17578_v11, %s18476_s5  ;;  %s18487_s5 = sld [smem:[#allocation23_spill]]  ;;  %v9642_v18 = vmul.f32 %v17578_v11, %v17481_v3  ;;  %v9641_v3 = vmul.f32 %v17576_v10, %v17491_v14 }
0x145f   : > { %9234 = vrot.lane.b32.xlu1 %v17576_v10, %s18471_s1 }
0x1460   : > { %9236 = vrot.lane.b32.xlu0 %v17578_v11, %s18471_s1 }
0x1462   : > { %v14113_v58 = vld [vmem:[%s18487_s5 + $0x10] sm:$0xff]  ;;  %v14114_v12 = vld [vmem:[%s18487_s5 + $0x18] sm:$0xff]  ;;  %v9242_v22 = vld [vmem:[%s18487_s5] sm:$0xff] }
0x1463   : > { %9433 = vrot.lane.b32.xlu1 %v17576_v10, %s18469_s18  ;;  %v14124_v19 = vld [vmem:[%s18487_s5 + $0x28] sm:$0xff]  ;;  %v14129_v50 = vld [vmem:[%s18487_s5 + $0x30] sm:$0xff]  ;;  %v14130_v29 = vld [vmem:[%s18487_s5 + $0x38] sm:$0xff] }
0x1464   : > { %9435 = vrot.lane.b32.xlu0 %v17578_v11, %s18469_s18  ;;  %s18489_s18 = sld [smem:[#allocation25_spill]] }
0x1467   : > { %9537 = vrot.lane.b32.xlu1 %v17576_v10, %s18472_s23 }
0x1468   : > { %9539 = vrot.lane.b32.xlu0 %v17578_v11, %s18472_s23 }
0x146a   : > { %s18490_s1 = smov %s18489_s18 }
0x146b   : > { %9739 = vrot.lane.b32.xlu1 %v17576_v10, %s18473_s2 }
0x146c   : > { %9741 = vrot.lane.b32.xlu0 %v17578_v11, %s18473_s2 }
0x146f   : > { %9843 = vrot.lane.b32.xlu1 %v17576_v10, %s18474_s28 }
0x1470   : > { %9845 = vrot.lane.b32.xlu0 %v17578_v11, %s18474_s28 }
0x1473   : > { %9947 = vrot.lane.b32.xlu1 %v17576_v10, %s18475_s11 }
0x1474   : > { %9949 = vrot.lane.b32.xlu0 %v17578_v11, %s18475_s11 }
0x1477   : > { %10051 = vrot.lane.b32.xlu1 %v17576_v10, %s18477_s9 }
0x1478   : > { %10053 = vrot.lane.b32.xlu0 %v17578_v11, %s18477_s9  ;;  %v14136_v11 = vld [vmem:[%s18487_s5 + $0x48] sm:$0xff]  ;;  %s18488_s9 = sld [smem:[#allocation27_spill]] }
0x147b   : > { %10159 = vperm.xlu1 %15756, %v10155_v21  }
0x147c   : > { %10177 = vperm.xlu0 %15755, %v10173_v39  }
0x147e   : > { %v10288_v5 = vld [vmem:[%s18488_s9 + $0x80] sm:$0xff] }
0x147f   : > { %10164 = vperm.xlu1 %15756, %v10156_v41  }
0x1480   : > { %10182 = vperm.xlu0 %15755, %v10174_v42  }
0x14cd   : > { %v9245_v43 = vpop.permute.xlu1 %9244 }
0x14ce   : > { %v9247_v45 = vpop.permute.xlu0 %9246 }
0x14cf   : > { %v9248_v31 = vsel %vm2860_vm5, %v9245_v43, %v9247_v45  ;;  %v9249_v46 = vsel %vm2860_vm5, %v9247_v45, %v9245_v43  ;;  %v14142_v45 = vld [vmem:[%s18487_s5 + $0x58] sm:$0xff]  ;;  %vm16007_vm5 = vmmov 0  }
0x14d0   : > { %v9250_v49 = vmul.f32 %v9249_v46, %v17424_v27  ;;  %v9251_v53 = vmul.f32 %v9248_v31, %v17427_v1 }
0x14d1   : > { %v9235_v35 = vpop.permute.xlu1 %9234 }
0x14d2   : > { %v9237_v54 = vpop.permute.xlu0 %9236  ;;  %14115 = vmatprep.subr.msk.mxu1 %vm1108_vm2, %v9251_v53 }
0x14d3   : > { %v9238_v55 = vsel %vm2754_vm3, %v9235_v35, %v9237_v54  ;;  %v9239_v7 = vsel %vm2754_vm3, %v9237_v54, %v9235_v35  ;;  %14116 = vmatpush1.msk.msra.mxu1 %vm1108_vm2, %v9250_v49 }
0x14d4   : > { %v9240_v13 = vmul.f32 %v9239_v7, %v17437_v32  ;;  %v9241_v27 = vmul.f32 %v9238_v55, %v17440_v36  ;;  %14117 = vmatmul.mubr.msk.f32.vlgmr.msra.gmra.mrb[6].mxu1 %vm1104_vm4, %v14113_v58  ;;  %v14148_v58 = vld [vmem:[%s18487_s5 + $0x68] sm:$0xff]  ;;  %v14154_v55 = vld [vmem:[%s18487_s5 + $0x78] sm:$0xff] }
0x14d5   : > { %v9434_v1 = vpop.permute.xlu1 %9433  ;;  %9337 = vmatprep.mubr.f32.mxu1 %v15956_v0  ;;  %v10289_v7 = vld [vmem:[%s18488_s9 + $0x88] sm:$0xff] }
0x14d6   : > { %v9436_v63 = vpop.permute.xlu0 %9435  ;;  %14119 = vmatprep.subr.msk.mxu1 %vm1108_vm2, %v9241_v27  ;;  %v10272_v27 = vld [vmem:[%s18488_s9] sm:$0xff] }
0x14d7   : > { %v9437_v8 = vsel %vm2966_vm6, %v9434_v1, %v9436_v63  ;;  %14120 = vmatpush1.msk.msra.mxu1 %vm1108_vm2, %v9240_v13  ;;  %v9438_v32 = vsel %vm2966_vm6, %v9436_v63, %v9434_v1  ;;  %v15036_v13 = vpack.c.bf16 %v10289_v7, %v10288_v5  ;;  %v10273_v1 = vld [vmem:[%s18488_s9 + $0x8] sm:$0xff]  ;;  %v10291_v63 = vld [vmem:[%s18488_s9 + $0x98] sm:$0xff]  ;;  %vm10819_vm6 = vcmask 130048  }
0x14d8   : > { %v9440_v36 = vmul.f32 %v9437_v8, %v17452_v38  ;;  %14118 = vmatmul.mubr.msk.f32.gmra.mrb[8].mxu1 %vm1104_vm4, %v14114_v12  ;;  %v9439_v30 = vmul.f32 %v9438_v32, %v17457_v44  ;;  %v9243_v38 = vld [vmem:[%s18487_s5 + $0x8] sm:$0xff]  ;;  %v14123_v44 = vld [vmem:[%s18487_s5 + $0x20] sm:$0xff]  ;;  %v10290_v12 = vld [vmem:[%s18488_s9 + $0x90] sm:$0xff]  ;;  %v15038_v32 = vpack.c.bf16 %v10273_v1, %v10272_v27 }
0x14d9   : > { %v9538_v6 = vpop.permute.xlu1 %9537  ;;  %9420 = vmatprep.mubr.f32.mxu1 %v15956_v0  ;;  %v10171_v8 = vld [vmem:[%s18489_s18] sm:$0xff] }
0x14da   : > { %v9540_v20 = vpop.permute.xlu0 %9539  ;;  %14125 = vmatprep.subr.msk.mxu1 %vm1108_vm2, %v9440_v36  ;;  %v10274_v36 = vld [vmem:[%s18488_s9 + $0x10] sm:$0xff] }
0x14db   : > { %v9541_v16 = vsel %vm3496_vm11, %v9538_v6, %v9540_v20  ;;  %v9542_v2 = vsel %vm3496_vm11, %v9540_v20, %v9538_v6  ;;  %v10275_v6 = vld [vmem:[%s18488_s9 + $0x18] sm:$0xff]  ;;  %v10293_v20 = vld [vmem:[%s18488_s9 + $0xa8] sm:$0xff] }
0x14dc   : > { %v9544_v17 = vmul.f32 %v9541_v16, %v17465_v34  ;;  %14121 = vmatmul.mubr.msk.f32.vlgmr.msra.gmra.mrb[6].mxu1 %vm1104_vm4, %v9242_v22  ;;  %v9543_v34 = vmul.f32 %v9542_v2, %v17476_v59  ;;  %v10292_v22 = vld [vmem:[%s18488_s9 + $0xa0] sm:$0xff]  ;;  %v15042_v16 = vpack.c.bf16 %v10275_v6, %v10274_v36  ;;  %v10277_v2 = vld [vmem:[%s18488_s9 + $0x28] sm:$0xff] }
0x14dd   : > { %14126 = vmatpush1.msk.msra.mxu1 %vm1108_vm2, %v9439_v30  ;;  %9426 = vmatprep.mubr.f32.mxu1 %v15956_v0  ;;  %v9740_v48 = vpop.permute.xlu1 %9739  ;;  %v10172_v30 = vld [vmem:[%s18490_s1 + $0x8] sm:$0xff] }
0x14de   : > { %14131 = vmatprep.subr.msk.mxu1 %vm1108_vm2, %v9544_v17  ;;  %v9742_v23 = vpop.permute.xlu0 %9741  ;;  %v15044_v17 = vpack.c.bf16 %v10293_v20, %v10292_v22 }
0x14df   : > { %v9744_v59 = vsel %vm3700_vm12, %v9742_v23, %v9740_v48  ;;  %v9743_v60 = vsel %vm3700_vm12, %v9740_v48, %v9742_v23  ;;  %v10278_v23 = vld [vmem:[%s18488_s9 + $0x30] sm:$0xff]  ;;  %v10279_v48 = vld [vmem:[%s18488_s9 + $0x38] sm:$0xff] }
0x14e0   : > { %14122 = vmatmul.mubr.msk.f32.gmra.mrb[8].mxu1 %vm1104_vm4, %v9243_v38  ;;  %v9746_v28 = vmul.f32 %v9744_v59, %v17494_v15  ;;  %v14135_v15 = vld [vmem:[%s18487_s5 + $0x40] sm:$0xff]  ;;  %v9745_v62 = vmul.f32 %v9743_v60, %v17506_v25  ;;  %v10299_v60 = vld [vmem:[%s18488_s9 + $0xd8] sm:$0xff] }
0x14e1   : > { %9520 = vmatprep.mubr.f32.mxu1 %v15956_v0  ;;  %v9844_v9 = vpop.permute.xlu1 %9843  ;;  %v10276_v38 = vld [vmem:[%s18488_s9 + $0x20] sm:$0xff] }
0x14e2   : > { %v9846_v26 = vpop.permute.xlu0 %9845  ;;  %v10296_v59 = vld [vmem:[%s18488_s9 + $0xc0] sm:$0xff] }
0x14e3   : > { %v9848_v14 = vsel %vm4230_vm1, %v9846_v26, %v9844_v9  ;;  %v9847_v41 = vsel %vm4230_vm1, %v9844_v9, %v9846_v26  ;;  %v10281_v26 = vld [vmem:[%s18488_s9 + $0x48] sm:$0xff]  ;;  %v10298_v9 = vld [vmem:[%s18488_s9 + $0xd0] sm:$0xff] }
0x14e4   : > { %14127 = vmatmul.mubr.msk.f32.vlgmr.msra.gmra.mrb[6].mxu1 %vm1104_vm4, %v14123_v44  ;;  %v9850_v10 = vmul.f32 %v9848_v14, %v17511_v40  ;;  %v14141_v40 = vld [vmem:[%s18487_s5 + $0x50] sm:$0xff]  ;;  %v9849_v42 = vmul.f32 %v9847_v41, %v17522_v61 }
0x14e5   : > { %14132 = vmatpush1.msk.msra.mxu1 %vm1108_vm2, %v9543_v34  ;;  %9526 = vmatprep.mubr.f32.mxu1 %v15956_v0  ;;  %v9948_v39 = vpop.permute.xlu1 %9947  ;;  %v10294_v44 = vld [vmem:[%s18488_s9 + $0xb0] sm:$0xff]  ;;  %v10295_v34 = vld [vmem:[%s18488_s9 + $0xb8] sm:$0xff] }
0x14e6   : > { %14137 = vmatprep.subr.msk.mxu1 %vm1108_vm2, %v9642_v18  ;;  %v9950_v21 = vpop.permute.xlu0 %9949  ;;  %v15046_v18 = vpack.c.bf16 %v10277_v2, %v10276_v38 }
0x14e7   : > { %v9952_v25 = vsel %vm4336_vm7, %v9950_v21, %v9948_v39  ;;  %v9951_v49 = vsel %vm4336_vm7, %v9948_v39, %v9950_v21  ;;  %v10301_v21 = vld [vmem:[%s18488_s9 + $0xe8] sm:$0xff] }
0x14e8   : > { %14128 = vmatmul.mubr.msk.f32.gmra.mrb[8].mxu1 %vm1104_vm4, %v14124_v19  ;;  %v9954_v43 = vmul.f32 %v9952_v25, %v17527_v24  ;;  %v14147_v24 = vld [vmem:[%s18487_s5 + $0x60] sm:$0xff]  ;;  %v9953_v53 = vmul.f32 %v9951_v49, %v17538_v47  ;;  %v14153_v47 = vld [vmem:[%s18487_s5 + $0x70] sm:$0xff]  ;;  %v15048_v19 = vpack.c.bf16 %v10295_v34, %v10294_v44  ;;  %v10287_v49 = vld [vmem:[%s18488_s9 + $0x78] sm:$0xff] }
0x14e9   : > { %9624 = vmatprep.mubr.f32.mxu1 %v15956_v0  ;;  %v10052_v46 = vpop.permute.xlu1 %10051  ;;  %v10284_v25 = vld [vmem:[%s18488_s9 + $0x60] sm:$0xff] }
0x14ea   : > { %v10054_v31 = vpop.permute.xlu0 %10053 }
0x14eb   : > { %v10056_v61 = vsel %vm4442_vm8, %v10054_v31, %v10052_v46  ;;  %v10055_v54 = vsel %vm4442_vm8, %v10052_v46, %v10054_v31  ;;  %v10286_v46 = vld [vmem:[%s18488_s9 + $0x70] sm:$0xff] }
0x14ec   : > { %14133 = vmatmul.mubr.msk.f32.vlgmr.msra.gmra.mrb[6].mxu1 %vm1104_vm4, %v14129_v50  ;;  %v10058_v35 = vmul.f32 %v10056_v61, %v17543_v57  ;;  %v10057_v57 = vmul.f32 %v10055_v54, %v17553_v56  ;;  %v14159_v56 = vld [vmem:[%s18487_s5 + $0x80] sm:$0xff]  ;;  %v10297_v50 = vld [vmem:[%s18488_s9 + $0xc8] sm:$0xff]  ;;  %v15066_v61 = vpack.c.bf16 %v10287_v49, %v10286_v46 }
0x14ed   : > { %14138 = vmatpush1.msk.msra.mxu1 %vm1108_vm2, %v9641_v3  ;;  %9630 = vmatprep.mubr.f32.mxu1 %v15956_v0  ;;  %v15050_v3 = vpack.c.bf16 %v10279_v48, %v10278_v23 }
0x14ee   : > { %14143 = vmatprep.subr.msk.mxu1 %vm1108_vm2, %v9746_v28  ;;  %v15052_v28 = vpack.c.bf16 %v10297_v50, %v10296_v59 }
0x14f0   : > { %14134 = vmatmul.mubr.msk.f32.gmra.mrb[8].mxu1 %vm1104_vm4, %v14130_v29  ;;  %v10280_v29 = vld [vmem:[%s18488_s9 + $0x40] sm:$0xff] }
0x14f1   : > { %9722 = vmatprep.mubr.f32.mxu1 %v15956_v0  ;;  %v15054_v14 = vpack.c.bf16 %v10281_v26, %v10280_v29 }
0x14f4   : > { %14139 = vmatmul.mubr.msk.f32.vlgmr.msra.gmra.mrb[6].mxu1 %vm1104_vm4, %v14135_v15  ;;  %v15056_v15 = vpack.c.bf16 %v10299_v60, %v10298_v9 }
0x14f5   : > { %14144 = vmatpush1.msk.msra.mxu1 %vm1108_vm2, %v9745_v62  ;;  %9728 = vmatprep.mubr.f32.mxu1 %v15956_v0  ;;  %v10282_v62 = vld [vmem:[%s18488_s9 + $0x50] sm:$0xff] }
0x14f6   : > { %14149 = vmatprep.subr.msk.mxu1 %vm1108_vm2, %v9850_v10  ;;  %v10283_v10 = vld [vmem:[%s18488_s9 + $0x58] sm:$0xff] }
0x14f7   : > { %v15058_v39 = vpack.c.bf16 %v10283_v10, %v10282_v62 }
0x14f8   : > { %14140 = vmatmul.mubr.msk.f32.gmra.mrb[8].mxu1 %vm1104_vm4, %v14136_v11  ;;  %v10300_v11 = vld [vmem:[%s18488_s9 + $0xe0] sm:$0xff] }
0x14f9   : > { %9826 = vmatprep.mubr.f32.mxu1 %v15956_v0  ;;  %v15060_v41 = vpack.c.bf16 %v10301_v21, %v10300_v11 }
0x14fc   : > { %14145 = vmatmul.mubr.msk.f32.vlgmr.msra.gmra.mrb[6].mxu1 %vm1104_vm4, %v14141_v40  ;;  %v10285_v40 = vld [vmem:[%s18488_s9 + $0x68] sm:$0xff] }
0x14fd   : > { %14150 = vmatpush1.msk.msra.mxu1 %vm1108_vm2, %v9849_v42  ;;  %9832 = vmatprep.mubr.f32.mxu1 %v15956_v0  ;;  %v15062_v42 = vpack.c.bf16 %v10285_v40, %v10284_v25 }
0x14fe   : > { %14155 = vmatprep.subr.msk.mxu1 %vm1108_vm2, %v9954_v43  ;;  %v10302_v43 = vld [vmem:[%s18488_s9 + $0xf0] sm:$0xff] }
0x1500   : > { %14146 = vmatmul.mubr.msk.f32.gmra.mrb[8].mxu1 %vm1104_vm4, %v14142_v45  ;;  %v10303_v45 = vld [vmem:[%s18488_s9 + $0xf8] sm:$0xff] }
0x1501   : > { %9930 = vmatprep.mubr.f32.mxu1 %v15956_v0  ;;  %v15064_v31 = vpack.c.bf16 %v10303_v45, %v10302_v43 }
0x1504   : > { %14151 = vmatmul.mubr.msk.f32.vlgmr.msra.gmra.mrb[6].mxu1 %vm1104_vm4, %v14147_v24  ;;  %v10160_v24 = vpop.permute.xlu1 %10159 }
0x1505   : > { %14156 = vmatpush1.msk.msra.mxu1 %vm1108_vm2, %v9953_v53  ;;  %9936 = vmatprep.mubr.f32.mxu1 %v15956_v0  ;;  %v10178_v53 = vpop.permute.xlu0 %10177 }
0x1506   : > { %14161 = vmatprep.subr.msk.mxu1 %vm1108_vm2, %v10058_v35  ;;  %v15349_v35 = vadd.f32 %v10178_v53, %v10160_v24 }
0x1508   : > { %14152 = vmatmul.mubr.msk.f32.gmra.mrb[8].mxu1 %vm1104_vm4, %v14148_v58  ;;  %v10165_v58 = vpop.permute.xlu1 %10164 }
0x1509   : > { %10034 = vmatprep.mubr.f32.mxu1 %v15956_v0 }
0x150c   : > { %14157 = vmatmul.mubr.msk.f32.vlgmr.msra.gmra.mrb[6].mxu1 %vm1104_vm4, %v14153_v47  ;;  %v10183_v47 = vpop.permute.xlu0 %10182 }
0x150d   : > { %14162 = vmatpush1.msk.msra.mxu1 %vm1108_vm2, %v10057_v57  ;;  %10040 = vmatprep.mubr.f32.mxu1 %v15956_v0  ;;  %v15353_v7 = vadd.f32 %v10183_v47, %v10165_v58  ;;  %vm10386_vm2 = vcmask 523264  }
0x150e   : > { %10191 = vmatprep.subr.mxu1 %v17348_v52  ;;  %v14160_v52 = vld [vmem:[%s18487_s5 + $0x88] sm:$0xff] }
0x1510   : > { %14158 = vmatmul.mubr.msk.f32.gmra.mrb[8].mxu1 %vm1104_vm4, %v14154_v55 }
0x1511   : > { %10138 = vmatprep.mubr.f32.mxu1 %v15956_v0 }
0x1514   : > { %14163 = vmatmul.mubr.msk.f32.vlgmr.msra.gmra.mrb[6].mxu1 %vm1104_vm4, %v14159_v56 }
0x1515   : > { %10192 = vmatpush1.msra.mxu1 %v17345_v51  ;;  %10144 = vmatprep.mubr.f32.mxu1 %v15956_v0  ;;  %v15040_v51 = vpack.c.bf16 %v10291_v63, %v10290_v12 }
0x1516   : > { %15037 = vmatprep.subr.bf16.mxu1 %v15036_v13 }
0x1518   : > { %14164 = vmatmul.mubr.msk.f32.gmra.mrb[8].mxu1 %vm1104_vm4, %v14160_v52 }
0x1519   : > { %10255 = vmatprep.mubr.f32.mxu1 %v15956_v0 }
0x151c   : > { %14165 = vmatmul.mubr.msk.f32.vlgmr.msra.gmra.mrb[6].mxu1 %vm6415_vm9, %v10171_v8 }
0x151d   : > { %10261 = vmatprep.mubr.f32.mxu1 %v15956_v0  ;;  %15039 = vmatpush3.bf16.msra.mxu1 %v15038_v32 }
0x151e   : > { %15041 = vmatprep.subr.bf16.mxu1 %v15040_v51 }
0x1520   : > { %14166 = vmatmul.mubr.msk.f32.gmra.mrb[8].mxu1 %vm6415_vm9, %v10172_v30 }
0x1521   : > { %15043 = vmatpush3.bf16.msra.mxu1 %v15042_v16 }
0x1522   : > { %15045 = vmatprep.subr.bf16.mxu1 %v15044_v17 }
0x1525   : > { %15047 = vmatpush3.bf16.msra.mxu1 %v15046_v18 }
0x1526   : > { %15049 = vmatprep.subr.bf16.mxu1 %v15048_v19  ;;  %v10379_v19 = vadd.s32 8, %v16315_v4 }
0x1528   : > { %vm10488_vm4 = vcmp.lt.s32.totalorder %v10379_v19, 12  ;;  %vm10542_vm3 = vcmp.ge.s32.totalorder %v10379_v19, 12 }
0x1529   : > { %15051 = vmatpush3.bf16.msra.mxu1 %v15050_v3  ;;  %v17793_v26 = vsel %vm10488_vm4, 1.0, %v15956_v0  ;;  %v17802_v62 = vsel %vm10542_vm3, 1.0, %v15956_v0 }
0x152a   : > { %15053 = vmatprep.subr.bf16.mxu1 %v15052_v28 }
0x152d   : > { %15055 = vmatpush3.bf16.msra.mxu1 %v15054_v14 }
0x152e   : > { %15057 = vmatprep.subr.bf16.mxu1 %v15056_v15 }
0x1531   : > { %15059 = vmatpush3.bf16.msra.mxu1 %v15058_v39 }
0x1532   : > { %15061 = vmatprep.subr.bf16.mxu1 %v15060_v41 }
0x1535   : > { %15063 = vmatpush3.bf16.msra.mxu1 %v15062_v42 }
0x1536   : > { %15065 = vmatprep.subr.bf16.mxu1 %v15064_v31 }
0x1539   : > { %15067 = vmatpush3.bf16.msra.mxu1 %v15066_v61 }
0x15ef   : > { %v10257_v54 = vpop.f32.mrb[6].mxu1 }
0x15f0   : > { %v10259_v57 = vpop.f32.mrb[7].mxu1  ;;  %v15350_v5 = vadd.f32 %v15349_v35, %v10257_v54 }
0x15f1   : > { %v15352_v55 = vadd.f32 %v15349_v35, %v10259_v57 }
0x15f3   : > { %v10263_v56 = vpop.f32.mrb[8].mxu1  ;;  %10368 = vmatprep.mubr.f32.mxu1 %v15352_v55 }
0x15f4   : > { %v10265_v13 = vpop.f32.mrb[9].mxu1  ;;  %10369 = vmatmul.mubr.f32.vlgmr.msra.gmra.mrb[10].mxu1 %v15350_v5  ;;  %v15354_v27 = vadd.f32 %v15353_v7, %v10263_v56 }
0x15f5   : > { %v15356_v52 = vadd.f32 %v15353_v7, %v10265_v13 }
0x15f7   : > { %10373 = vmatprep.mubr.f32.mxu1 %v15356_v52 }
0x15f8   : > { %10374 = vmatmul.mubr.f32.gmra.mrb[12].mxu1 %v15354_v27 }
0x15f9   : > { %14628 = vmatprep.mubr.msk.f32.mxu1 %vm16007_vm5, %v15956_v0 }
0x16c7   : > { %v14355_v1 = vpop.f32.mrb[10].mxu1 }
0x16c8   : > { %v14356_v12 = vpop.f32.mrb[11].mxu1 }
0x16c9   : > { %v17779_v63 = vadd.f32 %v14356_v12, %v14355_v1 }
0x16cb   : > { %v14358_v8 = vpop.f32.mrb[12].mxu1  ;;  %v10384_v36 = vmul.f32 %v17779_v63, %v17001_v33  ;;  %v10437_v4 = vmul.f32 %v17779_v63, %v17011_v37  ;;  %v10493_v11 = vmul.f32 0.0, %v17779_v63 }
0x16cc   : > { %v14359_v32 = vpop.f32.mrb[13].mxu1 }
0x16cd   : > { %v17781_v51 = vadd.f32 %v14359_v32, %v14358_v8  ;;  %v10387_v22 = vsel %vm10386_vm2, %v10384_v36, 0.0  ;;  %v10439_v10 = vsel %vm10386_vm2, %v10437_v4, 0.0  ;;  %v10495_v25 = vsel %vm10386_vm2, %v10493_v11, 0.0 }
0x16cf   : > { %v10385_v6 = vmul.f32 0.0, %v17781_v51  ;;  %v10494_v15 = vmul.f32 %v17781_v51, %v17793_v26  ;;  %v10550_v41 = vmul.f32 %v17781_v51, %v17802_v62 }
0x16d1   : > { %v10388_v20 = vsel %vm10386_vm2, %v10385_v6, 0.0  ;;  %v10496_v39 = vsel %vm10386_vm2, %v10494_v15, 0.0  ;;  %v10552_v42 = vsel %vm10386_vm2, %v10550_v41, 0.0 }
0x16d2   : > { %v10389_v30 = vadd.f32 %v10388_v20, %v10387_v22  ;;  %v10441_v21 = vadd.f32 %v10439_v10, %v10388_v20  ;;  %v10497_v40 = vadd.f32 %v10496_v39, %v10495_v25  ;;  %v10553_v43 = vadd.f32 %v10552_v42, %v10495_v25 }
0x16d4   : > { %10390 = vadd.xlane.f32.xlu1 %v10389_v30 }
0x1761   : > { %v10391_v16 = vpop.xlane.xlu1 %10390 }
0x1762   : > { %v10392_v17 = vrot.slane %v10391_v16, 4 }
0x1764   : > { %v10393_v38 = vadd.f32 %v10392_v17, %v10391_v16 }
0x1766   : > { %v10394_v2 = vrot.slane %v10393_v38, 2 }
0x1768   : > { %v10395_v44 = vadd.f32 %v10394_v2, %v10393_v38 }
0x176a   : > { %v10396_v34 = vrot.slane %v10395_v44, 1 }
0x176c   : > { %v10397_v18 = vadd.f32 %v10396_v34, %v10395_v44 }
0x176e   : > { %15587 = vpush %v10397_v18 }
0x179f   : > { %s15588_s23 = spop %15587 }
0x17a0   : > { %s10399_s2 = smul.f32 0.00390625, %s15588_s23 }
0x17a2   : > { %v10400_v23 = vstv %s10399_s2 }
0x17a3   : > { %v10401_v48 = vsub.f32 %v17779_v63, %v10400_v23  ;;  %v10402_v59 = vsub.f32 %v17781_v51, %v10400_v23  ;;  %v10420_v13 = vmul.f32 %v10400_v23, %v17001_v33  ;;  %v10421_v52 = vmul.f32 0.0, %v10400_v23 }
0x17a5   : > { %v10403_v50 = vmul.f32 %v10401_v48, %v10401_v48  ;;  %v10404_v3 = vmul.f32 %v10402_v59, %v10402_v59 }
0x17a7   : > { %v10406_v28 = vmul.f32 0.0, %v10404_v3  ;;  %v10405_v29 = vmul.f32 %v10403_v50, %v17001_v33 }
0x17a9   : > { %v10407_v9 = vsel %vm10386_vm2, %v10405_v29, 0.0  ;;  %v10408_v60 = vsel %vm10386_vm2, %v10406_v28, 0.0 }
0x17aa   : > { %v10409_v14 = vadd.f32 %v10408_v60, %v10407_v9 }
0x17ac   : > { %10410 = vadd.xlane.f32.xlu0 %v10409_v14 }
0x17b0   : > { %10442 = vadd.xlane.f32.xlu0 %v10441_v21 }
0x17b4   : > { %10498 = vadd.xlane.f32.xlu0 %v10497_v40 }
0x17b8   : > { %10554 = vadd.xlane.f32.xlu0 %v10553_v43 }
0x1839   : > { %v10411_v45 = vpop.xlane.xlu0 %10410 }
0x183a   : > { %v10412_v31 = vrot.slane %v10411_v45, 4 }
0x183c   : > { %v10413_v46 = vadd.f32 %v10412_v31, %v10411_v45 }
0x183d   : > { %v10443_v35 = vpop.xlane.xlu0 %10442 }
0x183e   : > { %v10414_v49 = vrot.slane %v10413_v46, 2  ;;  %v10444_v58 = vrot.slane %v10443_v35, 4 }
0x1840   : > { %v10415_v61 = vadd.f32 %v10414_v49, %v10413_v46  ;;  %v10445_v54 = vadd.f32 %v10444_v58, %v10443_v35 }
0x1841   : > { %v10499_v50 = vpop.xlane.xlu0 %10498 }
0x1842   : > { %v10416_v24 = vrot.slane %v10415_v61, 1  ;;  %v10446_v47 = vrot.slane %v10445_v54, 2  ;;  %v10500_v3 = vrot.slane %v10499_v50, 4 }
0x1844   : > { %v10417_v53 = vadd.f32 %v10416_v24, %v10415_v61  ;;  %v10447_v55 = vadd.f32 %v10446_v47, %v10445_v54  ;;  %v10501_v28 = vadd.f32 %v10500_v3, %v10499_v50 }
0x1846   : > { %15589 = vpush %v10417_v53  ;;  %v10448_v5 = vrot.slane %v10447_v55, 1  ;;  %v10502_v29 = vrot.slane %v10501_v28, 2 }
0x1848   : > { %v10449_v56 = vadd.f32 %v10448_v5, %v10447_v55  ;;  %v10503_v60 = vadd.f32 %v10502_v29, %v10501_v28 }
0x184a   : > { %v10504_v4 = vrot.slane %v10503_v60, 1 }
0x184c   : > { %v10505_v15 = vadd.f32 %v10504_v4, %v10503_v60 }
0x1877   : > { %s15590_s28 = spop %15589 }
0x1878   : > { %s10419_s11 = smul.f32 0.00390625, %s15590_s28 }
0x187a   : > { %s10424_s14 = sadd.f32 1e-05, %s10419_s11 }
0x187c   : > { %v10425_v57 = vstv %s10424_s14 }
0x187d   : > { %15802 = vrsqrt.f32 %v10425_v57 }
0x1887   : > { %v15803_v7 = vpop.eup %15802 }
0x1888   : > { %15591 = vpush %v15803_v7 }
0x1889   : > { %15593 = vpush %v10449_v56 }
0x18b9   : > { %s17811_s24 = spop %15591 }
0x18ba   : > { %s15594_s17 = spop %15593  ;;  %v10428_v10 = vstv %s17811_s24 }
0x18bb   : > { %s10451_s18 = smul.f32 0.00390625, %s15594_s17  ;;  %v10429_v21 = vmul.f32 %v10428_v10, %v17001_v33  ;;  %v10430_v39 = vmul.f32 0.0, %v10428_v10 }
0x18bd   : > { %v10452_v27 = vstv %s10451_s18 }
0x18be   : > { %v10453_v1 = vsub.f32 %v17779_v63, %v10452_v27  ;;  %v10454_v12 = vsub.f32 %v17781_v51, %v10452_v27  ;;  %v10472_v8 = vmul.f32 %v10452_v27, %v17011_v37  ;;  %v10473_v32 = vmul.f32 0.0, %v10452_v27 }
0x18c0   : > { %v10455_v36 = vmul.f32 %v10453_v1, %v10453_v1  ;;  %v10456_v6 = vmul.f32 %v10454_v12, %v10454_v12  ;;  %v10474_v22 = vadd.f32 %v10472_v8, %v10420_v13  ;;  %v10475_v20 = vadd.f32 %v10473_v32, %v10421_v52  ;;  %v10555_v12 = vpop.xlane.xlu0 %10554 }
0x18c1   : > { %v10556_v8 = vrot.slane %v10555_v12, 4 }
0x18c2   : > { %v10458_v30 = vmul.f32 0.0, %v10456_v6  ;;  %v10457_v16 = vmul.f32 %v10455_v36, %v17011_v37 }
0x18c3   : > { %v10557_v32 = vadd.f32 %v10556_v8, %v10555_v12 }
0x18c4   : > { %v10459_v17 = vsel %vm10386_vm2, %v10457_v16, 0.0  ;;  %v10460_v38 = vsel %vm10386_vm2, %v10458_v30, 0.0 }
0x18c5   : > { %v10461_v2 = vadd.f32 %v10460_v38, %v10459_v17  ;;  %v10558_v36 = vrot.slane %v10557_v32, 2 }
0x18c7   : > { %10462 = vadd.xlane.f32.xlu1 %v10461_v2 }
0x1954   : > { %v10463_v44 = vpop.xlane.xlu1 %10462 }
0x1955   : > { %v10464_v34 = vrot.slane %v10463_v44, 4 }
0x1957   : > { %v10465_v18 = vadd.f32 %v10464_v34, %v10463_v44 }
0x1959   : > { %v10466_v19 = vrot.slane %v10465_v18, 2 }
0x195b   : > { %v10467_v23 = vadd.f32 %v10466_v19, %v10465_v18 }
0x195d   : > { %v10468_v48 = vrot.slane %v10467_v23, 1 }
0x195f   : > { %v10469_v59 = vadd.f32 %v10468_v48, %v10467_v23 }
0x1961   : > { %15595 = vpush %v10469_v59 }
0x1992   : > { %s15596_s23 = spop %15595 }
0x1993   : > { %s10471_s2 = smul.f32 0.00390625, %s15596_s23 }
0x1995   : > { %s10476_s28 = sadd.f32 1e-05, %s10471_s2 }
0x1997   : > { %v10477_v9 = vstv %s10476_s28 }
0x1998   : > { %15804 = vrsqrt.f32 %v10477_v9 }
0x19a2   : > { %v15805_v14 = vpop.eup %15804 }
0x19a3   : > { %15597 = vpush %v15805_v14 }
0x19a4   : > { %15599 = vpush %v10505_v15 }
0x19d4   : > { %s15598_s11 = spop %15597 }
0x19d5   : > { %v10480_v11 = vstv %s15598_s11  ;;  %s15600_s14 = spop %15599 }
0x19d6   : > { %v10481_v41 = vmul.f32 %v10480_v11, %v17011_v37  ;;  %v10482_v25 = vmul.f32 0.0, %v10480_v11  ;;  %s10507_s17 = smul.f32 0.00390625, %s15600_s14  ;;  %s18491_s14 = sld [smem:[#allocation28_spill]] }
0x19d8   : > { %v10483_v40 = vadd.f32 %v10481_v41, %v10429_v21  ;;  %v10484_v42 = vadd.f32 %v10482_v25, %v10430_v39  ;;  %v10508_v43 = vstv %s10507_s17 }
0x19d9   : > { %v10509_v45 = vsub.f32 %v17779_v63, %v10508_v43  ;;  %v10510_v31 = vsub.f32 %v17781_v51, %v10508_v43  ;;  %v10528_v46 = vmul.f32 0.0, %v10508_v43  ;;  %v10529_v49 = vmul.f32 %v10508_v43, %v17793_v26 }
0x19db   : > { %v10511_v61 = vmul.f32 %v10509_v45, %v10509_v45  ;;  %v10512_v24 = vmul.f32 %v10510_v31, %v10510_v31  ;;  %v10531_v53 = vadd.f32 %v10529_v49, %v10475_v20  ;;  %v10530_v35 = vadd.f32 %v10528_v46, %v10474_v22 }
0x19dc   : > { %v10559_v22 = vadd.f32 %v10558_v36, %v10557_v32  ;;  %v10599_v46 = vld [vmem:[%s18491_s14] sm:$0xff]  ;;  %v10600_v49 = vld [vmem:[%s18491_s14 + $0x8] sm:$0xff] }
0x19dd   : > { %v10513_v58 = vmul.f32 0.0, %v10511_v61  ;;  %v10514_v54 = vmul.f32 %v10512_v24, %v17793_v26 }
0x19de   : > { %v10560_v20 = vrot.slane %v10559_v22, 1 }
0x19df   : > { %v10515_v47 = vsel %vm10386_vm2, %v10513_v58, 0.0  ;;  %v10516_v57 = vsel %vm10386_vm2, %v10514_v54, 0.0 }
0x19e0   : > { %v10517_v55 = vadd.f32 %v10516_v57, %v10515_v47  ;;  %v10561_v16 = vadd.f32 %v10560_v20, %v10559_v22 }
0x19e2   : > { %10518 = vadd.xlane.f32.xlu1 %v10517_v55 }
0x1a6f   : > { %v10519_v5 = vpop.xlane.xlu1 %10518 }
0x1a70   : > { %v10520_v7 = vrot.slane %v10519_v5, 4 }
0x1a72   : > { %v10521_v56 = vadd.f32 %v10520_v7, %v10519_v5 }
0x1a74   : > { %v10522_v13 = vrot.slane %v10521_v56, 2 }
0x1a76   : > { %v10523_v52 = vadd.f32 %v10522_v13, %v10521_v56 }
0x1a78   : > { %v10524_v27 = vrot.slane %v10523_v52, 1 }
0x1a7a   : > { %v10525_v1 = vadd.f32 %v10524_v27, %v10523_v52 }
0x1a7c   : > { %15601 = vpush %v10525_v1 }
0x1aad   : > { %s15602_s24 = spop %15601 }
0x1aae   : > { %s10527_s18 = smul.f32 0.00390625, %s15602_s24 }
0x1ab0   : > { %s10532_s23 = sadd.f32 1e-05, %s10527_s18 }
0x1ab2   : > { %v10533_v6 = vstv %s10532_s23  ;;  %s18492_s23 = sld [smem:[#allocation29_spill]] }
0x1ab3   : > { %15806 = vrsqrt.f32 %v10533_v6 }
0x1ab8   : > { %v10615_v58 = vld [vmem:[%s18492_s23] sm:$0xff]  ;;  %v10616_v54 = vld [vmem:[%s18492_s23 + $0x8] sm:$0xff] }
0x1abd   : > { %v15807_v30 = vpop.eup %15806 }
0x1abe   : > { %15603 = vpush %v15807_v30 }
0x1abf   : > { %15605 = vpush %v10561_v16 }
0x1aef   : > { %s15604_s2 = spop %15603 }
0x1af0   : > { %v10536_v17 = vstv %s15604_s2  ;;  %s15606_s28 = spop %15605 }
0x1af1   : > { %v10537_v38 = vmul.f32 0.0, %v10536_v17  ;;  %v10538_v2 = vmul.f32 %v10536_v17, %v17793_v26  ;;  %s10563_s11 = smul.f32 0.00390625, %s15606_s28  ;;  %s18493_s28 = sld [smem:[#allocation32_spill]] }
0x1af3   : > { %v10539_v44 = vadd.f32 %v10537_v38, %v10483_v40  ;;  %v10540_v34 = vadd.f32 %v10538_v2, %v10484_v42  ;;  %v10564_v18 = vstv %s10563_s11  ;;  %s18494_s11 = sld [smem:[#allocation30_spill]] }
0x1af4   : > { %v10565_v19 = vsub.f32 %v17779_v63, %v10564_v18  ;;  %v10566_v23 = vsub.f32 %v17781_v51, %v10564_v18  ;;  %v10584_v48 = vmul.f32 0.0, %v10564_v18  ;;  %v10585_v59 = vmul.f32 %v10564_v18, %v17802_v62 }
0x1af6   : > { %v10567_v50 = vmul.f32 %v10565_v19, %v10565_v19  ;;  %v10568_v3 = vmul.f32 %v10566_v23, %v10566_v23  ;;  %v17833_v28 = vadd.f32 %v10585_v59, %v10531_v53  ;;  %v17835_v29 = vadd.f32 %v10584_v48, %v10530_v35 }
0x1af7   : > { %v12086_v47 = vld [vmem:[%s18493_s28] sm:$0xff] }
0x1af8   : > { %v10569_v9 = vmul.f32 0.0, %v10567_v50  ;;  %v10570_v26 = vmul.f32 %v10568_v3, %v17802_v62  ;;  %v10598_v30 = vsub.f32 %v17781_v51, %v17833_v28  ;;  %v10597_v16 = vsub.f32 %v17779_v63, %v17835_v29 }
0x1af9   : > { %v10644_v57 = vld [vmem:[%s18494_s11 + $0x8] sm:$0xff]  ;;  %v10645_v5 = vld [vmem:[%s18494_s11 + $0x10] sm:$0xff]  ;;  %v10646_v7 = vld [vmem:[%s18494_s11 + $0x18] sm:$0xff] }
0x1afa   : > { %v10571_v60 = vsel %vm10386_vm2, %v10569_v9, 0.0  ;;  %v10572_v4 = vsel %vm10386_vm2, %v10570_v26, 0.0  ;;  %v17854_v56 = vpack.c.bf16 %v10646_v7, %v10645_v5  ;;  %v10647_v13 = vld [vmem:[%s18494_s11 + $0x20] sm:$0xff]  ;;  %v10648_v52 = vld [vmem:[%s18494_s11 + $0x28] sm:$0xff]  ;;  %v10649_v1 = vld [vmem:[%s18494_s11 + $0x30] sm:$0xff] }
0x1afb   : > { %v10573_v14 = vadd.f32 %v10572_v4, %v10571_v60  ;;  %v17860_v27 = vpack.c.bf16 %v10648_v52, %v10647_v13  ;;  %v10650_v12 = vld [vmem:[%s18494_s11 + $0x38] sm:$0xff]  ;;  %v14171_v32 = vld [vmem:[%s18494_s11 + $0x40] sm:$0xff]  ;;  %v14172_v36 = vld [vmem:[%s18494_s11 + $0x48] sm:$0xff] }
0x1afc   : > { %v17866_v8 = vpack.c.bf16 %v10650_v12, %v10649_v1  ;;  %v17872_v6 = vpack.c.bf16 %v14172_v36, %v14171_v32  ;;  %v14173_v28 = vld [vmem:[%s18494_s11 + $0x50] sm:$0xff]  ;;  %v14174_v29 = vld [vmem:[%s18494_s11 + $0x58] sm:$0xff]  ;;  %v14196_v1 = vld [vmem:[%s18494_s11 + $0xc0] sm:$0xff] }
0x1afd   : > { %10574 = vadd.xlane.f32.xlu1 %v10573_v14  ;;  %v17885_v14 = vpack.c.bf16 %v14174_v29, %v14173_v28  ;;  %v14197_v12 = vld [vmem:[%s18494_s11 + $0xc8] sm:$0xff] }
0x1b8a   : > { %v10575_v15 = vpop.xlane.xlu1 %10574 }
0x1b8b   : > { %v10576_v10 = vrot.slane %v10575_v15, 4 }
0x1b8d   : > { %v10577_v11 = vadd.f32 %v10576_v10, %v10575_v15  ;;  %v14175_v15 = vld [vmem:[%s18494_s11 + $0x60] sm:$0xff]  ;;  %v14176_v10 = vld [vmem:[%s18494_s11 + $0x68] sm:$0xff] }
0x1b8f   : > { %v10578_v21 = vrot.slane %v10577_v11, 2 }
0x1b91   : > { %v10579_v39 = vadd.f32 %v10578_v21, %v10577_v11  ;;  %v17897_v11 = vpack.c.bf16 %v14176_v10, %v14175_v15  ;;  %v14177_v21 = vld [vmem:[%s18494_s11 + $0x70] sm:$0xff]  ;;  %v14208_v15 = vld [vmem:[%s18494_s11 + $0x100] sm:$0xff]  ;;  %v14209_v10 = vld [vmem:[%s18494_s11 + $0x108] sm:$0xff] }
0x1b93   : > { %v10580_v41 = vrot.slane %v10579_v39, 1 }
0x1b95   : > { %v10581_v25 = vadd.f32 %v10580_v41, %v10579_v39  ;;  %v14178_v39 = vld [vmem:[%s18494_s11 + $0x78] sm:$0xff] }
0x1b96   : > { %v17903_v41 = vpack.c.bf16 %v14178_v39, %v14177_v21 }
0x1b97   : > { %15607 = vpush %v10581_v25  ;;  %v14184_v25 = vld [vmem:[%s18494_s11 + $0x80] sm:$0xff] }
0x1bc8   : > { %s15608_s17 = spop %15607 }
0x1bc9   : > { %s10583_s24 = smul.f32 0.00390625, %s15608_s17  ;;  %s18495_s17 = sld [smem:[#allocation31_spill]] }
0x1bcb   : > { %s10588_s18 = sadd.f32 1e-05, %s10583_s24 }
0x1bcd   : > { %v10589_v40 = vstv %s10588_s18 }
0x1bce   : > { %15808 = vrsqrt.f32 %v10589_v40  ;;  %v14185_v40 = vld [vmem:[%s18494_s11 + $0x88] sm:$0xff] }
0x1bcf   : > { %v14181_v13 = vld [vmem:[%s18495_s17 + $0x8] sm:$0xff]  ;;  %v10732_v52 = vld [vmem:[%s18495_s17] sm:$0xff] }
0x1bd8   : > { %v15809_v42 = vpop.eup %15808 }
0x1bd9   : > { %15609 = vpush %v15809_v42  ;;  %v17909_v42 = vpack.c.bf16 %v14185_v40, %v14184_v25  ;;  %v17989_v25 = vpack.c.bf16 %v14209_v10, %v14208_v15 }
0x1c0a   : > { %s15610_s2 = spop %15609 }
0x1c0b   : > { %v10592_v43 = vstv %s15610_s2 }
0x1c0c   : > { %v10593_v45 = vmul.f32 0.0, %v10592_v43  ;;  %v10594_v31 = vmul.f32 %v10592_v43, %v17802_v62  ;;  %v10643_v62 = vld [vmem:[%s18494_s11] sm:$0xff]  ;;  %v14186_v43 = vld [vmem:[%s18494_s11 + $0x90] sm:$0xff] }
0x1c0d   : > { %v17848_v55 = vpack.c.bf16 %v10644_v57, %v10643_v62 }
0x1c0e   : > { %v10595_v61 = vadd.f32 %v10593_v45, %v10539_v44  ;;  %v10596_v24 = vadd.f32 %v10594_v31, %v10540_v34  ;;  %v14187_v45 = vld [vmem:[%s18494_s11 + $0x98] sm:$0xff] }
0x1c0f   : > { %15069 = vmatprep.subr.bf16.mxu0 %v17848_v55  ;;  %v17915_v31 = vpack.c.bf16 %v14187_v45, %v14186_v43  ;;  %v14210_v43 = vld [vmem:[%s18494_s11 + $0x110] sm:$0xff]  ;;  %v14211_v45 = vld [vmem:[%s18494_s11 + $0x118] sm:$0xff] }
0x1c10   : > { %v10601_v53 = vmul.f32 %v10599_v46, %v10595_v61  ;;  %v10602_v35 = vmul.f32 %v10600_v49, %v10596_v24  ;;  %15071 = vmatpush3.bf16.msra.mxu0 %v17848_v55  ;;  %v14188_v46 = vld [vmem:[%s18494_s11 + $0xa0] sm:$0xff]  ;;  %v14189_v49 = vld [vmem:[%s18494_s11 + $0xa8] sm:$0xff]  ;;  %v14190_v24 = vld [vmem:[%s18494_s11 + $0xb0] sm:$0xff] }
0x1c11   : > { %15073 = vmatprep.subr.bf16.mxu0 %v17854_v56  ;;  %v17925_v61 = vpack.c.bf16 %v14189_v49, %v14188_v46  ;;  %v14206_v46 = vld [vmem:[%s18495_s17 + $0x18] sm:$0xff]  ;;  %v17995_v49 = vpack.c.bf16 %v14211_v45, %v14210_v43  ;;  %v14230_v45 = vld [vmem:[%s18495_s17 + $0x28] sm:$0xff] }
0x1c12   : > { %10610 = vperm.xlu1 %15756, %v10602_v35   ;;  %10605 = vperm.xlu0 %15755, %v10601_v53   ;;  %v14191_v53 = vld [vmem:[%s18494_s11 + $0xb8] sm:$0xff] }
0x1c13   : > { %v17931_v35 = vpack.c.bf16 %v14191_v53, %v14190_v24  ;;  %v14212_v24 = vld [vmem:[%s18494_s11 + $0x120] sm:$0xff]  ;;  %v14213_v53 = vld [vmem:[%s18494_s11 + $0x128] sm:$0xff]  ;;  %v14235_v43 = vld [vmem:[%s18494_s11 + $0x198] sm:$0xff] }
0x1c14   : > { %15075 = vmatpush3.bf16.msra.mxu0 %v17854_v56 }
0x1c15   : > { %15077 = vmatprep.subr.bf16.mxu0 %v17860_v27 }
0x1c16   : > { %10619 = vperm.xlu1 %15756, %v10615_v58   ;;  %10624 = vperm.xlu0 %15755, %v10616_v54   ;;  %v16006_v58 = vmov 0.0|0.0  }
0x1c17   : > { %15100 = vmatprep.subr.bf16.mxu1 %v16006_v58 }
0x1c18   : > { %15079 = vmatpush3.bf16.msra.mxu0 %v17860_v27 }
0x1c19   : > { %15081 = vmatprep.subr.bf16.mxu0 %v17866_v8 }
0x1c1a   : > { %12089 = vperm.xlu1 %15756, %v12086_v47  }
0x1c1c   : > { %15083 = vmatpush3.bf16.msra.mxu0 %v17866_v8 }
0x1c1d   : > { %15085 = vmatprep.subr.bf16.mxu0 %v17872_v6 }
0x1c91   : > { %v10611_v22 = vpop.permute.xlu1 %10610  ;;  %v10606_v20 = vpop.permute.xlu0 %10605 }
0x1c92   : > { %v10614_v17 = vmul.f32 %v10611_v22, %v10598_v30  ;;  %v10613_v38 = vmul.f32 %v10606_v20, %v10597_v16  ;;  %v17956_v22 = vpack.c.bf16 %v14197_v12, %v14196_v1  ;;  %v14198_v30 = vld [vmem:[%s18494_s11 + $0xd0] sm:$0xff]  ;;  %v14199_v16 = vld [vmem:[%s18494_s11 + $0xd8] sm:$0xff]  ;;  %v14221_v1 = vld [vmem:[%s18494_s11 + $0x148] sm:$0xff] }
0x1c95   : > { %v10620_v2 = vpop.permute.xlu1 %10619  ;;  %v10625_v44 = vpop.permute.xlu0 %10624 }
0x1c96   : > { %v10627_v34 = vadd.f32 %v10620_v2, %v10613_v38  ;;  %v10628_v18 = vadd.f32 %v10625_v44, %v10614_v17  ;;  %v14194_v17 = vld [vmem:[%s18495_s17 + $0x10] sm:$0xff]  ;;  %v17962_v38 = vpack.c.bf16 %v14199_v16, %v14198_v30  ;;  %v14200_v2 = vld [vmem:[%s18494_s11 + $0xe0] sm:$0xff]  ;;  %v14201_v44 = vld [vmem:[%s18494_s11 + $0xe8] sm:$0xff] }
0x1c97   : > { %v14222_v30 = vld [vmem:[%s18494_s11 + $0x150] sm:$0xff]  ;;  %v14223_v16 = vld [vmem:[%s18494_s11 + $0x158] sm:$0xff] }
0x1c98   : > { %v14167_v19 = vmul.f32 -1.442695, %v10627_v34  ;;  %v14168_v23 = vmul.f32 -1.442695, %v10628_v18 }
0x1c9a   : > { %15810 = vpow2.f32 %v14167_v19  ;;  %v14203_v19 = vld [vmem:[%s18494_s11 + $0xf8] sm:$0xff] }
0x1c9b   : > { %15812 = vpow2.f32 %v14168_v23 }
0x1ca4   : > { %v15811_v48 = vpop.eup %15810 }
0x1ca5   : > { %v15813_v59 = vpop.eup %15812  ;;  %v10635_v50 = vadd.f32 1.0, %v15811_v48 }
0x1ca6   : > { %v10636_v3 = vadd.f32 1.0, %v15813_v59 }
0x1ca7   : > { %15814 = vrcp.f32 %v10635_v50 }
0x1ca8   : > { %15816 = vrcp.f32 %v10636_v3 }
0x1cb1   : > { %v15815_v9 = vpop.eup %15814 }
0x1cb2   : > { %v15817_v26 = vpop.eup %15816  ;;  %v17881_v60 = vmul.f32 %v15815_v9, %v10627_v34  ;;  %v17971_v34 = vpack.c.bf16 %v14201_v44, %v14200_v2  ;;  %v18028_v2 = vpack.c.bf16 %v14223_v16, %v14222_v30  ;;  %v14224_v44 = vld [vmem:[%s18494_s11 + $0x160] sm:$0xff] }
0x1cb3   : > { %v17883_v4 = vmul.f32 %v15817_v26, %v10628_v18  ;;  %v14202_v18 = vld [vmem:[%s18494_s11 + $0xf0] sm:$0xff] }
0x1cb4   : > { %14602 = vmatprep.mubr.msk.f32.mxu0 %vm10386_vm2, %v17881_v60  ;;  %v17977_v23 = vpack.c.bf16 %v14203_v19, %v14202_v18  ;;  %v14225_v18 = vld [vmem:[%s18494_s11 + $0x168] sm:$0xff] }
0x1cb5   : > { %14603 = vmatmul.mubr.msk.f32.vlgmr.msra.gmra.mrb[4].mxu0 %vm10386_vm2, %v17883_v4  ;;  %v18037_v19 = vpack.c.bf16 %v14225_v18, %v14224_v44  ;;  %v14246_v44 = vld [vmem:[%s18494_s11 + $0x1d0] sm:$0xff]  ;;  %v14247_v18 = vld [vmem:[%s18494_s11 + $0x1d8] sm:$0xff] }
0x1cb6   : > { %15087 = vmatpush3.bf16.msra.mxu0 %v17872_v6  ;;  %14621 = vmatprep.mubr.msk.f32.mxu0 %vm10386_vm2, %v17881_v60 }
0x1cb7   : > { %15089 = vmatprep.subr.bf16.mxu0 %v17885_v14 }
0x1cba   : > { %15091 = vmatpush3.bf16.msra.mxu0 %v17885_v14 }
0x1cbb   : > { %15093 = vmatprep.subr.bf16.mxu0 %v17897_v11 }
0x1cbe   : > { %15095 = vmatpush3.bf16.msra.mxu0 %v17897_v11 }
0x1cbf   : > { %15097 = vmatprep.subr.bf16.mxu0 %v17903_v41 }
0x1cc2   : > { %15099 = vmatpush3.bf16.msra.mxu0 %v17903_v41 }
0x1cc3   : > { %15107 = vmatprep.subr.bf16.mxu0 %v17909_v42 }
0x1cc5   : > { %14622 = vmatmul.mubr.msk.f32.vlgmr.msra.gmra.mrb[6].mxu0 %vm10386_vm2, %v17883_v4 }
0x1cc6   : > { %15109 = vmatpush3.bf16.msra.mxu0 %v17909_v42  ;;  %14654 = vmatprep.mubr.msk.f32.mxu0 %vm10386_vm2, %v17881_v60 }
0x1cc7   : > { %15111 = vmatprep.subr.bf16.mxu0 %v17915_v31 }
0x1cca   : > { %15113 = vmatpush3.bf16.msra.mxu0 %v17915_v31 }
0x1ccb   : > { %15115 = vmatprep.subr.bf16.mxu0 %v17925_v61 }
0x1cce   : > { %15117 = vmatpush3.bf16.msra.mxu0 %v17925_v61 }
0x1ccf   : > { %15119 = vmatprep.subr.bf16.mxu0 %v17931_v35 }
0x1cd2   : > { %15121 = vmatpush3.bf16.msra.mxu0 %v17931_v35 }
0x1cd3   : > { %15141 = vmatprep.subr.bf16.mxu0 %v16006_v58 }
0x1cd5   : > { %14655 = vmatmul.mubr.msk.f32.vlgmr.msra.gmra.mrb[8].mxu0 %vm10386_vm2, %v17883_v4 }
0x1cd6   : > { %14687 = vmatprep.mubr.msk.f32.mxu0 %vm16007_vm5, %v15956_v0 }
0x1d88   : > { %v14604_v54 = vpop.f32.mrb[4].mxu0 }
0x1d89   : > { %v10723_v47 = vpop.f32.mrb[5].mxu0 }
0x1d8a   : > { %v15104_v62 = vpack.c.bf16 %v14604_v54, %v10723_v47  ;;  %v18004_v54 = vpack.c.bf16 %v14213_v53, %v14212_v24  ;;  %v14214_v47 = vld [vmem:[%s18494_s11 + $0x130] sm:$0xff]  ;;  %v14236_v24 = vld [vmem:[%s18494_s11 + $0x1a0] sm:$0xff]  ;;  %v14237_v53 = vld [vmem:[%s18494_s11 + $0x1a8] sm:$0xff] }
0x1d98   : > { %v14623_v57 = vpop.f32.mrb[6].mxu0 }
0x1d99   : > { %v10808_v5 = vpop.f32.mrb[7].mxu0 }
0x1d9a   : > { %v15101_v7 = vpack.c.bf16 %v14623_v57, %v10808_v5 }
0x1d9c   : > { %15102 = vmatpush3.bf16.msra.mxu1 %v15101_v7 }
0x1d9d   : > { %15103 = vmatprep.subr.bf16.mxu1 %v16006_v58 }
0x1d9f   : > { %14629 = vmatmul.mubr.msk.f32.vlgmr.msra.gmra.mrb[14].mxu1 %vm10819_vm6, %v14181_v13 }
0x1da0   : > { %15105 = vmatpush3.bf16.msra.mxu1 %v15104_v62  ;;  %14635 = vmatprep.mubr.msk.f32.mxu1 %vm16007_vm5, %v15956_v0  ;;  %v14215_v62 = vld [vmem:[%s18494_s11 + $0x138] sm:$0xff] }
0x1da1   : > { %15122 = vmatprep.subr.bf16.mxu1 %v16006_v58  ;;  %v18010_v57 = vpack.c.bf16 %v14215_v62, %v14214_v47  ;;  %v18070_v47 = vpack.c.bf16 %v14237_v53, %v14236_v24  ;;  %v14238_v62 = vld [vmem:[%s18494_s11 + $0x1b0] sm:$0xff] }
0x1da3   : > { %14636 = vmatmul.mubr.msk.f32.vlgmr.msra.gmra.mrb[16].mxu1 %vm10819_vm6, %v10732_v52  ;;  %v14220_v52 = vld [vmem:[%s18494_s11 + $0x140] sm:$0xff] }
0x1da4   : > { %14661 = vmatprep.mubr.msk.f32.mxu1 %vm16007_vm5, %v15956_v0 }
0x1da8   : > { %v14656_v32 = vpop.f32.mrb[8].mxu0 }
0x1da9   : > { %v11041_v36 = vpop.f32.mrb[9].mxu0 }
0x1daa   : > { %v15123_v20 = vpack.c.bf16 %v14656_v32, %v11041_v36  ;;  %v18022_v36 = vpack.c.bf16 %v14221_v1, %v14220_v52 }
0x1dac   : > { %15124 = vmatpush3.bf16.msra.mxu1 %v15123_v20 }
0x1dad   : > { %15126 = vmatprep.subr.bf16.mxu1 %v17956_v22 }
0x1daf   : > { %14662 = vmatmul.mubr.msk.f32.vlgmr.msra.gmra.mrb[18].mxu1 %vm10819_vm6, %v14194_v17  ;;  %v14218_v17 = vld [vmem:[%s18495_s17 + $0x20] sm:$0xff] }
0x1db0   : > { %15128 = vmatpush3.bf16.msra.mxu1 %v17956_v22  ;;  %14680 = vmatprep.mubr.msk.f32.mxu1 %vm10386_vm2, %v17881_v60 }
0x1db1   : > { %15130 = vmatprep.subr.bf16.mxu1 %v17962_v38 }
0x1db4   : > { %15132 = vmatpush3.bf16.msra.mxu1 %v17962_v38 }
0x1db5   : > { %15134 = vmatprep.subr.bf16.mxu1 %v17971_v34 }
0x1db8   : > { %15136 = vmatpush3.bf16.msra.mxu1 %v17971_v34 }
0x1db9   : > { %15138 = vmatprep.subr.bf16.mxu1 %v17977_v23 }
0x1dbc   : > { %15140 = vmatpush3.bf16.msra.mxu1 %v17977_v23 }
0x1dbd   : > { %15160 = vmatprep.subr.bf16.mxu1 %v16006_v58 }
0x1dbf   : > { %14681 = vmatmul.mubr.msk.f32.vlgmr.msra.gmra.mrb[20].mxu1 %vm10386_vm2, %v17883_v4 }
0x1dc0   : > { %14713 = vmatprep.mubr.msk.f32.mxu1 %vm16007_vm5, %v15956_v0 }
0x1e72   : > { %v10889_v48 = vpop.f32.mrb[14].mxu1 }
0x1e73   : > { %v14630_v59 = vpop.f32.mrb[15].mxu1 }
0x1e74   : > { %v14227_v59 = vld [vmem:[%s18494_s11 + $0x178] sm:$0xff] }
0x1e76   : > { %v10962_v50 = vpop.f32.mrb[16].mxu1 }
0x1e77   : > { %v10963_v3 = vadd.f32 %v10962_v50, %v10889_v48  ;;  %v14637_v28 = vpop.f32.mrb[17].mxu1  ;;  %v14226_v48 = vld [vmem:[%s18494_s11 + $0x170] sm:$0xff] }
0x1e78   : > { %v18043_v50 = vpack.c.bf16 %v14227_v59, %v14226_v48  ;;  %v14242_v48 = vld [vmem:[%s18495_s17 + $0x30] sm:$0xff]  ;;  %v18094_v59 = vpack.c.bf16 %v14247_v18, %v14246_v44  ;;  %v14263_v44 = vld [vmem:[%s18494_s11 + $0x238] sm:$0xff] }
0x1e82   : > { %v11121_v29 = vpop.f32.mrb[18].mxu1 }
0x1e83   : > { %v11125_v9 = vadd.f32 %v11121_v29, %v10963_v3  ;;  %v14663_v26 = vpop.f32.mrb[19].mxu1 }
0x1e84   : > { %v14233_v26 = vld [vmem:[%s18494_s11 + $0x188] sm:$0xff] }
0x1e92   : > { %v14682_v21 = vpop.f32.mrb[20].mxu1 }
0x1e93   : > { %v11201_v39 = vpop.f32.mrb[21].mxu1 }
0x1e94   : > { %v15142_v40 = vpack.c.bf16 %v14682_v21, %v11201_v39 }
0x1e96   : > { %15143 = vmatpush3.bf16.msra.mxu0 %v15142_v40  ;;  %v14234_v40 = vld [vmem:[%s18494_s11 + $0x190] sm:$0xff] }
0x1e97   : > { %15145 = vmatprep.subr.bf16.mxu0 %v17989_v25 }
0x1e99   : > { %14688 = vmatmul.mubr.msk.f32.vlgmr.msra.gmra.mrb[10].mxu0 %vm10819_vm6, %v14206_v46  ;;  %v18061_v46 = vpack.c.bf16 %v14235_v43, %v14234_v40  ;;  %v14256_v43 = vld [vmem:[%s18494_s11 + $0x200] sm:$0xff] }
0x1e9a   : > { %15147 = vmatpush3.bf16.msra.mxu0 %v17989_v25  ;;  %14706 = vmatprep.mubr.msk.f32.mxu0 %vm10386_vm2, %v17881_v60 }
0x1e9b   : > { %15149 = vmatprep.subr.bf16.mxu0 %v17995_v49 }
0x1e9e   : > { %15151 = vmatpush3.bf16.msra.mxu0 %v17995_v49 }
0x1e9f   : > { %15153 = vmatprep.subr.bf16.mxu0 %v18004_v54 }
0x1ea2   : > { %15155 = vmatpush3.bf16.msra.mxu0 %v18004_v54 }
0x1ea3   : > { %15157 = vmatprep.subr.bf16.mxu0 %v18010_v57 }
0x1ea6   : > { %15159 = vmatpush3.bf16.msra.mxu0 %v18010_v57 }
0x1ea7   : > { %15179 = vmatprep.subr.bf16.mxu0 %v16006_v58 }
0x1ea9   : > { %14707 = vmatmul.mubr.msk.f32.vlgmr.msra.gmra.mrb[12].mxu0 %vm10386_vm2, %v17883_v4 }
0x1eaa   : > { %14739 = vmatprep.mubr.msk.f32.mxu0 %vm16007_vm5, %v15956_v0 }
0x1f6c   : > { %v11281_v5 = vpop.f32.mrb[10].mxu0 }
0x1f6d   : > { %v11285_v7 = vadd.f32 %v11281_v5, %v11125_v9  ;;  %v14689_v13 = vpop.f32.mrb[11].mxu0  ;;  %v14232_v9 = vld [vmem:[%s18494_s11 + $0x180] sm:$0xff]  ;;  %v14239_v5 = vld [vmem:[%s18494_s11 + $0x1b8] sm:$0xff] }
0x1f6e   : > { %v18055_v21 = vpack.c.bf16 %v14233_v26, %v14232_v9  ;;  %v14250_v9 = vld [vmem:[%s18494_s11 + $0x1f0] sm:$0xff]  ;;  %v14251_v26 = vld [vmem:[%s18494_s11 + $0x1f8] sm:$0xff] }
0x1f7c   : > { %v14708_v12 = vpop.f32.mrb[12].mxu0 }
0x1f7d   : > { %v11361_v32 = vpop.f32.mrb[13].mxu0 }
0x1f7e   : > { %v15161_v20 = vpack.c.bf16 %v14708_v12, %v11361_v32  ;;  %v14244_v12 = vld [vmem:[%s18494_s11 + $0x1c0] sm:$0xff]  ;;  %v14245_v32 = vld [vmem:[%s18494_s11 + $0x1c8] sm:$0xff] }
0x1f7f   : > { %v18088_v16 = vpack.c.bf16 %v14245_v32, %v14244_v12  ;;  %v14254_v12 = vld [vmem:[%s18495_s17 + $0x38] sm:$0xff] }
0x1f80   : > { %15162 = vmatpush3.bf16.msra.mxu1 %v15161_v20 }
0x1f81   : > { %15164 = vmatprep.subr.bf16.mxu1 %v18022_v36 }
0x1f83   : > { %14714 = vmatmul.mubr.msk.f32.vlgmr.msra.gmra.mrb[22].mxu1 %vm10819_vm6, %v14218_v17 }
0x1f84   : > { %15166 = vmatpush3.bf16.msra.mxu1 %v18022_v36  ;;  %14732 = vmatprep.mubr.msk.f32.mxu1 %vm10386_vm2, %v17881_v60 }
0x1f85   : > { %15168 = vmatprep.subr.bf16.mxu1 %v18028_v2 }
0x1f88   : > { %15170 = vmatpush3.bf16.msra.mxu1 %v18028_v2 }
0x1f89   : > { %15172 = vmatprep.subr.bf16.mxu1 %v18037_v19 }
0x1f8c   : > { %15174 = vmatpush3.bf16.msra.mxu1 %v18037_v19 }
0x1f8d   : > { %15176 = vmatprep.subr.bf16.mxu1 %v18043_v50 }
0x1f90   : > { %15178 = vmatpush3.bf16.msra.mxu1 %v18043_v50 }
0x1f91   : > { %15198 = vmatprep.subr.bf16.mxu1 %v16006_v58 }
0x1f93   : > { %14733 = vmatmul.mubr.msk.f32.vlgmr.msra.gmra.mrb[24].mxu1 %vm10386_vm2, %v17883_v4 }
0x1f94   : > { %14765 = vmatprep.mubr.msk.f32.mxu1 %vm16007_vm5, %v15956_v0 }
0x2056   : > { %v11441_v3 = vpop.f32.mrb[22].mxu1 }
0x2057   : > { %v11445_v28 = vadd.f32 %v11441_v3, %v11285_v7  ;;  %v14715_v29 = vpop.f32.mrb[23].mxu1  ;;  %v18076_v7 = vpack.c.bf16 %v14239_v5, %v14238_v62  ;;  %v14248_v3 = vld [vmem:[%s18494_s11 + $0x1e0] sm:$0xff] }
0x2066   : > { %v14734_v15 = vpop.f32.mrb[24].mxu1 }
0x2067   : > { %v11521_v10 = vpop.f32.mrb[25].mxu1 }
0x2068   : > { %v15180_v39 = vpack.c.bf16 %v14734_v15, %v11521_v10  ;;  %v18109_v15 = vpack.c.bf16 %v14251_v26, %v14250_v9  ;;  %v14266_v9 = vld [vmem:[%s18495_s17 + $0x40] sm:$0xff]  ;;  %v12090_v26 = vpop.permute.xlu1 %12089 }
0x206a   : > { %15181 = vmatpush3.bf16.msra.mxu0 %v15180_v39 }
0x206b   : > { %15183 = vmatprep.subr.bf16.mxu0 %v18055_v21 }
0x206d   : > { %14740 = vmatmul.mubr.msk.f32.vlgmr.msra.gmra.mrb[14].mxu0 %vm10819_vm6, %v14230_v45  ;;  %v14257_v45 = vld [vmem:[%s18494_s11 + $0x208] sm:$0xff] }
0x206e   : > { %15185 = vmatpush3.bf16.msra.mxu0 %v18055_v21  ;;  %14758 = vmatprep.mubr.msk.f32.mxu0 %vm10386_vm2, %v17881_v60  ;;  %v18121_v62 = vpack.c.bf16 %v14257_v45, %v14256_v43 }
0x206f   : > { %15187 = vmatprep.subr.bf16.mxu0 %v18061_v46 }
0x2072   : > { %15189 = vmatpush3.bf16.msra.mxu0 %v18061_v46 }
0x2073   : > { %15191 = vmatprep.subr.bf16.mxu0 %v18070_v47 }
0x2076   : > { %15193 = vmatpush3.bf16.msra.mxu0 %v18070_v47 }
0x2077   : > { %15195 = vmatprep.subr.bf16.mxu0 %v18076_v7 }
0x207a   : > { %15197 = vmatpush3.bf16.msra.mxu0 %v18076_v7 }
0x207b   : > { %15217 = vmatprep.subr.bf16.mxu0 %v16006_v58 }
0x207d   : > { %14759 = vmatmul.mubr.msk.f32.vlgmr.msra.gmra.mrb[16].mxu0 %vm10386_vm2, %v17883_v4 }
0x207e   : > { %14791 = vmatprep.mubr.msk.f32.mxu0 %vm16007_vm5, %v15956_v0 }
0x2140   : > { %v11601_v13 = vpop.f32.mrb[14].mxu0 }
0x2141   : > { %v11605_v52 = vadd.f32 %v11601_v13, %v11445_v28  ;;  %v14741_v1 = vpop.f32.mrb[15].mxu0  ;;  %v14249_v28 = vld [vmem:[%s18494_s11 + $0x1e8] sm:$0xff]  ;;  %v14258_v13 = vld [vmem:[%s18494_s11 + $0x210] sm:$0xff] }
0x2142   : > { %v18103_v29 = vpack.c.bf16 %v14249_v28, %v14248_v3  ;;  %v14259_v1 = vld [vmem:[%s18494_s11 + $0x218] sm:$0xff] }
0x2143   : > { %v18127_v32 = vpack.c.bf16 %v14259_v1, %v14258_v13 }
0x2150   : > { %v14760_v20 = vpop.f32.mrb[16].mxu0 }
0x2151   : > { %v11681_v30 = vpop.f32.mrb[17].mxu0 }
0x2152   : > { %v15199_v17 = vpack.c.bf16 %v14760_v20, %v11681_v30  ;;  %v14260_v20 = vld [vmem:[%s18494_s11 + $0x220] sm:$0xff] }
0x2154   : > { %15200 = vmatpush3.bf16.msra.mxu1 %v15199_v17  ;;  %v14262_v17 = vld [vmem:[%s18494_s11 + $0x230] sm:$0xff] }
0x2155   : > { %15202 = vmatprep.subr.bf16.mxu1 %v18088_v16  ;;  %v18142_v18 = vpack.c.bf16 %v14263_v44, %v14262_v17 }
0x2157   : > { %14766 = vmatmul.mubr.msk.f32.vlgmr.msra.gmra.mrb[26].mxu1 %vm10819_vm6, %v14242_v48 }
0x2158   : > { %15204 = vmatpush3.bf16.msra.mxu1 %v18088_v16  ;;  %14784 = vmatprep.mubr.msk.f32.mxu1 %vm10386_vm2, %v17881_v60 }
0x2159   : > { %15206 = vmatprep.subr.bf16.mxu1 %v18094_v59 }
0x215c   : > { %15208 = vmatpush3.bf16.msra.mxu1 %v18094_v59 }
0x215d   : > { %15210 = vmatprep.subr.bf16.mxu1 %v18103_v29 }
0x2160   : > { %15212 = vmatpush3.bf16.msra.mxu1 %v18103_v29 }
0x2161   : > { %15214 = vmatprep.subr.bf16.mxu1 %v18109_v15 }
0x2164   : > { %15216 = vmatpush3.bf16.msra.mxu1 %v18109_v15 }
0x2165   : > { %15236 = vmatprep.subr.bf16.mxu1 %v16006_v58 }
0x2167   : > { %14785 = vmatmul.mubr.msk.f32.vlgmr.msra.gmra.mrb[28].mxu1 %vm10386_vm2, %v17883_v4 }
0x2168   : > { %14817 = vmatprep.mubr.msk.f32.mxu1 %vm16007_vm5, %v15956_v0 }
0x222a   : > { %v11761_v10 = vpop.f32.mrb[26].mxu1 }
0x222b   : > { %v11765_v39 = vadd.f32 %v11761_v10, %v11605_v52  ;;  %v14767_v40 = vpop.f32.mrb[27].mxu1  ;;  %v14261_v52 = vld [vmem:[%s18494_s11 + $0x228] sm:$0xff] }
0x222c   : > { %v18136_v30 = vpack.c.bf16 %v14261_v52, %v14260_v20 }
0x223a   : > { %v14786_v24 = vpop.f32.mrb[28].mxu1 }
0x223b   : > { %v11841_v53 = vpop.f32.mrb[29].mxu1 }
0x223c   : > { %v15218_v5 = vpack.c.bf16 %v14786_v24, %v11841_v53 }
0x223e   : > { %15219 = vmatpush3.bf16.msra.mxu0 %v15218_v5 }
0x223f   : > { %15221 = vmatprep.subr.bf16.mxu0 %v18121_v62 }
0x2241   : > { %14792 = vmatmul.mubr.msk.f32.vlgmr.msra.gmra.mrb[18].mxu0 %vm10819_vm6, %v14254_v12 }
0x2242   : > { %15223 = vmatpush3.bf16.msra.mxu0 %v18121_v62  ;;  %14810 = vmatprep.mubr.msk.f32.mxu0 %vm10386_vm2, %v17881_v60 }
0x2243   : > { %15225 = vmatprep.subr.bf16.mxu0 %v18127_v32 }
0x2246   : > { %15227 = vmatpush3.bf16.msra.mxu0 %v18127_v32 }
0x2247   : > { %15229 = vmatprep.subr.bf16.mxu0 %v18136_v30 }
0x224a   : > { %15231 = vmatpush3.bf16.msra.mxu0 %v18136_v30 }
0x224b   : > { %15233 = vmatprep.subr.bf16.mxu0 %v18142_v18 }
0x224e   : > { %15235 = vmatpush3.bf16.msra.mxu0 %v18142_v18 }
0x224f   : > { %15251 = vmatprep.subr.bf16.mxu0 %v16006_v58 }
0x2251   : > { %14811 = vmatmul.mubr.msk.f32.vlgmr.msra.gmra.mrb[20].mxu0 %vm10386_vm2, %v17883_v4 }
0x2252   : > { %15253 = vmatpush3.bf16.msra.mxu0 %v17872_v6  ;;  %14855 = vmatprep.mubr.msk.f32.mxu0 %vm16007_vm5, %v15956_v0 }
0x2253   : > { %15254 = vmatprep.subr.bf16.mxu0 %v16006_v58 }
0x2256   : > { %15256 = vmatpush3.bf16.msra.mxu0 %v17885_v14 }
0x2257   : > { %15257 = vmatprep.subr.bf16.mxu0 %v16006_v58 }
0x225a   : > { %15259 = vmatpush3.bf16.msra.mxu0 %v17897_v11 }
0x225b   : > { %15260 = vmatprep.subr.bf16.mxu0 %v16006_v58 }
0x225e   : > { %15262 = vmatpush3.bf16.msra.mxu0 %v17903_v41 }
0x225f   : > { %15275 = vmatprep.subr.bf16.mxu0 %v16006_v58 }
0x2314   : > { %v11921_v60 = vpop.f32.mrb[18].mxu0 }
0x2315   : > { %v11925_v6 = vadd.f32 %v11921_v60, %v11765_v39  ;;  %v14793_v4 = vpop.f32.mrb[19].mxu0 }
0x2324   : > { %v14812_v48 = vpop.f32.mrb[20].mxu0 }
0x2325   : > { %v12001_v3 = vpop.f32.mrb[21].mxu0 }
0x2326   : > { %v15237_v28 = vpack.c.bf16 %v14812_v48, %v12001_v3 }
0x2328   : > { %15238 = vmatpush3.bf16.msra.mxu1 %v15237_v28 }
0x2329   : > { %15239 = vmatprep.subr.bf16.mxu1 %v16006_v58 }
0x232b   : > { %14818 = vmatmul.mubr.msk.f32.vlgmr.msra.gmra.mrb[30].mxu1 %vm10819_vm6, %v14266_v9 }
0x232c   : > { %15241 = vmatpush3.bf16.msra.mxu1 %v17848_v55  ;;  %14836 = vmatprep.mubr.msk.f32.mxu1 %vm16007_vm5, %v15956_v0 }
0x232d   : > { %15242 = vmatprep.subr.bf16.mxu1 %v16006_v58 }
0x2330   : > { %15244 = vmatpush3.bf16.msra.mxu1 %v17854_v56 }
0x2331   : > { %15245 = vmatprep.subr.bf16.mxu1 %v16006_v58 }
0x2334   : > { %15247 = vmatpush3.bf16.msra.mxu1 %v17860_v27 }
0x2335   : > { %15248 = vmatprep.subr.bf16.mxu1 %v16006_v58 }
0x2338   : > { %15250 = vmatpush3.bf16.msra.mxu1 %v17866_v8 }
0x23fe   : > { %v12081_v14 = vpop.f32.mrb[30].mxu1 }
0x23ff   : > { %v12085_v11 = vadd.f32 %v12081_v14, %v11925_v6  ;;  %v14819_v41 = vpop.f32.mrb[31].mxu1 }
0x2401   : > { %v18172_v55 = vadd.f32 %v12090_v26, %v12085_v11 }
0x2403   : > { %v12093_v10 = vmul.f32 %v18172_v55, %v17001_v33  ;;  %v12129_v56 = vmul.f32 %v18172_v55, %v17011_v37 }
0x2405   : > { %v12094_v39 = vsel %vm10386_vm2, %v12093_v10, 0.0  ;;  %v12130_v27 = vsel %vm10386_vm2, %v12129_v56, 0.0 }
0x2406   : > { %12095 = vadd.xlane.f32.xlu0 %v12094_v39 }
0x240a   : > { %12131 = vadd.xlane.f32.xlu0 %v12130_v27 }
0x2493   : > { %v12096_v40 = vpop.xlane.xlu0 %12095 }
0x2494   : > { %v12097_v8 = vrot.slane %v12096_v40, 4 }
0x2496   : > { %v12098_v43 = vadd.f32 %v12097_v8, %v12096_v40 }
0x2497   : > { %v12132_v28 = vpop.xlane.xlu0 %12131 }
0x2498   : > { %v12099_v45 = vrot.slane %v12098_v43, 2  ;;  %v12133_v9 = vrot.slane %v12132_v28, 4 }
0x249a   : > { %v12100_v24 = vadd.f32 %v12099_v45, %v12098_v43  ;;  %v12134_v14 = vadd.f32 %v12133_v9, %v12132_v28 }
0x249c   : > { %v12101_v53 = vrot.slane %v12100_v24, 1  ;;  %v12135_v11 = vrot.slane %v12134_v14, 2 }
0x249e   : > { %v12102_v5 = vadd.f32 %v12101_v53, %v12100_v24  ;;  %v12136_v26 = vadd.f32 %v12135_v11, %v12134_v14 }
0x24a0   : > { %15611 = vpush %v12102_v5  ;;  %v12137_v10 = vrot.slane %v12136_v26, 1 }
0x24a2   : > { %v12138_v56 = vadd.f32 %v12137_v10, %v12136_v26  ;;  %v13590_v26 = vld [vmem:[%s16180_s27] sm:$0xff]  ;;  %v13591_v10 = vld [vmem:[%s16180_s27 + $0x8] sm:$0xff] }
0x24d1   : > { %s15612_s24 = spop %15611 }
0x24d2   : > { %s12104_s18 = smul.f32 0.00390625, %s15612_s24 }
0x24d4   : > { %v12105_v13 = vstv %s12104_s18  ;;  %s18496_s18 = sld [smem:[#allocation34_spill]] }
0x24d5   : > { %v12106_v1 = vsub.f32 %v18172_v55, %v12105_v13  ;;  %v12120_v40 = vmul.f32 %v12105_v13, %v17001_v33 }
0x24d7   : > { %v12107_v12 = vmul.f32 %v12106_v1, %v12106_v1 }
0x24d9   : > { %v12108_v20 = vmul.f32 %v12107_v12, %v17001_v33 }
0x24da   : > { %v12174_v1 = vld [vmem:[%s18496_s18] sm:$0xff] }
0x24db   : > { %v12109_v52 = vsel %vm10386_vm2, %v12108_v20, 0.0 }
0x24dc   : > { %12110 = vadd.xlane.f32.xlu1 %v12109_v52 }
0x2569   : > { %v12111_v17 = vpop.xlane.xlu1 %12110 }
0x256a   : > { %v12112_v44 = vrot.slane %v12111_v17, 4 }
0x256c   : > { %v12113_v60 = vadd.f32 %v12112_v44, %v12111_v17 }
0x256e   : > { %v12114_v6 = vrot.slane %v12113_v60, 2 }
0x2570   : > { %v12115_v4 = vadd.f32 %v12114_v6, %v12113_v60 }
0x2572   : > { %v12116_v48 = vrot.slane %v12115_v4, 1 }
0x2574   : > { %v12117_v3 = vadd.f32 %v12116_v48, %v12115_v4 }
0x2576   : > { %15613 = vpush %v12117_v3 }
0x25a7   : > { %s15614_s2 = spop %15613 }
0x25a8   : > { %s12119_s28 = smul.f32 0.00390625, %s15614_s2 }
0x25aa   : > { %s12122_s24 = sadd.f32 1e-05, %s12119_s28 }
0x25ac   : > { %v12123_v41 = vstv %s12122_s24 }
0x25ad   : > { %15818 = vrsqrt.f32 %v12123_v41 }
0x25b7   : > { %v15819_v39 = vpop.eup %15818 }
0x25b8   : > { %15615 = vpush %v15819_v39 }
0x25b9   : > { %15617 = vpush %v12138_v56 }
0x25e9   : > { %s18183_s1 = spop %15615 }
0x25ea   : > { %s15618_s5 = spop %15617  ;;  %v12126_v48 = vstv %s18183_s1  ;;  %s14321_s1 = sshll.u32 %s16213_s0, 8 }
0x25eb   : > { %s12140_s8 = smul.f32 0.00390625, %s15618_s5  ;;  %v12127_v28 = vmul.f32 %v12126_v48, %v17001_v33  ;;  %s18327_s18 = scalar_lea.hbm %s16185_s4, %s14321_s1 }
0x25ed   : > { %v12141_v27 = vstv %s12140_s8  ;;  %s18497_s8 = sld [smem:[#allocation33_spill]] }
0x25ee   : > { %v12142_v8 = vsub.f32 %v18172_v55, %v12141_v27  ;;  %v12156_v43 = vmul.f32 %v12141_v27, %v17011_v37 }
0x25f0   : > { %v12143_v45 = vmul.f32 %v12142_v8, %v12142_v8  ;;  %v12157_v24 = vadd.f32 %v12156_v43, %v12120_v40 }
0x25f2   : > { %v12144_v53 = vmul.f32 %v12143_v45, %v17011_v37  ;;  %v12165_v39 = vsub.f32 %v18172_v55, %v12157_v24  ;;  %v14284_v24 = vld [vmem:[%s16175_s20 + $0x38] sm:$0xff] }
0x25f3   : > { %v12166_v14 = vld [vmem:[%s18497_s8] sm:$0xff]  ;;  %s13628_s8 = sshll.u32 %s17354_s3, 4  ;;  %s13629_s8 = int_to_ptr.vmem [resolvable:$true] %s13628_s8 }
0x25f4   : > { %v12145_v5 = vsel %vm10386_vm2, %v12144_v53, 0.0 }
0x25f5   : > { %12146 = vadd.xlane.f32.xlu0 %v12145_v5  ;;  %v14288_v5 = vld [vmem:[%s16175_s20 + $0x40] sm:$0xff] }
0x260b   : > { %12177 = vperm.xlu0 %15755, %v12174_v1   ;;  %v14289_v1 = vld [vmem:[%s16175_s20 + $0x48] sm:$0xff] }
0x2682   : > { %v12147_v12 = vpop.xlane.xlu0 %12146 }
0x2683   : > { %v12148_v20 = vrot.slane %v12147_v12, 4 }
0x2685   : > { %v12149_v52 = vadd.f32 %v12148_v20, %v12147_v12  ;;  %v14294_v20 = vld [vmem:[%s16175_s20 + $0x58] sm:$0xff] }
0x2687   : > { %v12150_v17 = vrot.slane %v12149_v52, 2 }
0x2689   : > { %v12151_v44 = vadd.f32 %v12150_v17, %v12149_v52  ;;  %v14298_v52 = vld [vmem:[%s16175_s20 + $0x60] sm:$0xff]  ;;  %v14304_v17 = vld [vmem:[%s16175_s20 + $0x78] sm:$0xff] }
0x268a   : > { %v12178_v40 = vpop.permute.xlu0 %12177 }
0x268b   : > { %v12152_v13 = vrot.slane %v12151_v44, 1 }
0x268d   : > { %v12153_v60 = vadd.f32 %v12152_v13, %v12151_v44  ;;  %v14309_v44 = vld [vmem:[%s16175_s20 + $0x88] sm:$0xff] }
0x268f   : > { %15619 = vpush %v12153_v60 }
0x26c0   : > { %s15620_s5 = spop %15619 }
0x26c1   : > { %s12155_s2 = smul.f32 0.00390625, %s15620_s5  ;;  %s13609_s5 = scalar_lea.sflag [#allocation3], %s17341_s13 }
0x26c3   : > { %s12158_s28 = sadd.f32 1e-05, %s12155_s2  ;;  %s15826_s2 = scalar_lea.vmem %s13629_s8, 256 }
0x26c4   : > { %p15827_p11 = scmp.ne.s32.totalorder %s13629_s8, %s15826_s2 }
0x26c5   : > { %v12159_v6 = vstv %s12158_s28  ;;  %s16008_s28 = smov [#allocation2]  }
0x26c6   : > { %15820 = vrsqrt.f32 %v12159_v6  ;;  %p15828_p12 = pnand %p15827_p11, %p16230_p5 }
0x26c8   : > { %p15829_p13 = pneg %p15828_p12 }
0x26d0   : > { %v15821_v4 = vpop.eup %15820 }
0x26d1   : > { %15621 = vpush %v15821_v4 }
0x2702   : > { %s15622_s24 = spop %15621 }
0x2703   : > { %v12162_v3 = vstv %s15622_s24  ;;  %s15830_s24 = sshll.u32 %s16008_s28, 4  ;;  %s15831_s24 = int_to_ptr.vmem [resolvable:$false] %s15830_s24 }
0x2704   : > { %v12163_v9 = vmul.f32 %v12162_v3, %v17011_v37  ;;  %s15832_s9 = scalar_lea.vmem %s15831_s24, 512  ;;  %p15833_p0 = scmp.lt.s32.totalorder %s13629_s8, %s15831_s24 }
0x2705   : > { %p15834_p1 = scmp.lt.s32.totalorder %s15832_s9, %s15826_s2 }
0x2706   : > { %v12164_v11 = vadd.f32 %v12163_v9, %v12127_v28 }
0x2707   : > { %p15835_p2 = por %p15834_p1, %p15833_p0 }
0x2708   : > { %v12167_v41 = vmul.f32 %v12166_v14, %v12164_v11 }
0x2709   : > { %p15836_p3 = pnand %p15835_p2, %p15829_p13 }
0x270a   : > { %12170 = vperm.xlu1 %15756, %v12167_v41  }
0x270e   : > { %13594 = vperm.xlu1 %15756, %v13590_v26  }
0x2712   : > { %13599 = vperm.xlu1 %15756, %v13591_v10  }
0x2789   : > { %v12171_v56 = vpop.permute.xlu1 %12170 }
0x278a   : > { %v12173_v27 = vmul.f32 %v12171_v56, %v12165_v39 }
0x278c   : > { %v12180_v8 = vadd.f32 %v12178_v40, %v12173_v27 }
0x278e   : > { %v14268_v43 = vmul.f32 -1.442695, %v12180_v8 }
0x2790   : > { %15822 = vpow2.f32 %v14268_v43 }
0x279a   : > { %v15823_v45 = vpop.eup %15822 }
0x279b   : > { %v12184_v33 = vadd.f32 1.0, %v15823_v45 }
0x279d   : > { %15824 = vrcp.f32 %v12184_v33 }
0x27a7   : > { %v15825_v37 = vpop.eup %15824 }
0x27a8   : > { %v18198_v53 = vmul.f32 %v15825_v37, %v12180_v8 }
0x27aa   : > { %14837 = vmatmul.mubr.msk.f32.vlgmr.msra.gmra.mrb[32].mxu1 %vm10386_vm2, %v18198_v53  ;;  %14856 = vmatmul.mubr.msk.f32.vlgmr.msra.gmra.mrb[22].mxu0 %vm10386_vm2, %v18198_v53 }
0x27ab   : > { %15277 = vmatpush3.bf16.msra.mxu0 %v17956_v22  ;;  %14908 = vmatprep.mubr.msk.f32.mxu0 %vm16007_vm5, %v15956_v0  ;;  %v14271_v22 = vld [vmem:[%s16175_s20 + $0x10] sm:$0xff] }
0x27ac   : > { %15278 = vmatprep.subr.bf16.mxu0 %v16006_v58  ;;  %14860 = vmatprep.mubr.msk.f32.mxu1 %vm6415_vm9, %v14271_v22 }
0x27af   : > { %15280 = vmatpush3.bf16.msra.mxu0 %v17962_v38 }
0x27b0   : > { %15281 = vmatprep.subr.bf16.mxu0 %v16006_v58 }
0x27b3   : > { %15283 = vmatpush3.bf16.msra.mxu0 %v17971_v34 }
0x27b4   : > { %15284 = vmatprep.subr.bf16.mxu0 %v16006_v58 }
0x27b7   : > { %15286 = vmatpush3.bf16.msra.mxu0 %v17977_v23  ;;  %v14272_v23 = vld [vmem:[%s16175_s20 + $0x18] sm:$0xff] }
0x27b8   : > { %15287 = vmatprep.subr.bf16.mxu0 %v16006_v58 }
0x27ba   : > { %14909 = vmatmul.mubr.msk.f32.vlgmr.msra.gmra.mrb[24].mxu0 %vm10386_vm2, %v18198_v53 }
0x27bb   : > { %15289 = vmatpush3.bf16.msra.mxu0 %v17989_v25  ;;  %14932 = vmatprep.mubr.msk.f32.mxu0 %vm16007_vm5, %v15956_v0 }
0x27bc   : > { %15290 = vmatprep.subr.bf16.mxu0 %v16006_v58 }
0x27bf   : > { %15292 = vmatpush3.bf16.msra.mxu0 %v17995_v49 }
0x27c0   : > { %15293 = vmatprep.subr.bf16.mxu0 %v16006_v58 }
0x27c3   : > { %15295 = vmatpush3.bf16.msra.mxu0 %v18004_v54  ;;  %v12261_v54 = vld [vmem:[%s16175_s20] sm:$0xff] }
0x27c4   : > { %15296 = vmatprep.subr.bf16.mxu0 %v16006_v58 }
0x27c7   : > { %15298 = vmatpush3.bf16.msra.mxu0 %v18010_v57  ;;  %v12262_v57 = vld [vmem:[%s16175_s20 + $0x8] sm:$0xff] }
0x27c8   : > { %15311 = vmatprep.subr.bf16.mxu0 %v16006_v58 }
0x27ca   : > { %14933 = vmatmul.mubr.msk.f32.vlgmr.msra.gmra.mrb[26].mxu0 %vm10386_vm2, %v18198_v53 }
0x27cb   : > { %15313 = vmatpush3.bf16.msra.mxu0 %v18055_v21  ;;  %14980 = vmatprep.mubr.msk.f32.mxu0 %vm16007_vm5, %v15956_v0 }
0x27cc   : > { %15314 = vmatprep.subr.bf16.mxu0 %v16006_v58 }
0x27cf   : > { %15316 = vmatpush3.bf16.msra.mxu0 %v18061_v46 }
0x27d0   : > { %15317 = vmatprep.subr.bf16.mxu0 %v16006_v58 }
0x27d3   : > { %15319 = vmatpush3.bf16.msra.mxu0 %v18070_v47 }
0x27d4   : > { %15320 = vmatprep.subr.bf16.mxu0 %v16006_v58 }
0x27d7   : > { %15322 = vmatpush3.bf16.msra.mxu0 %v18076_v7 }
0x27d8   : > { %15323 = vmatprep.subr.bf16.mxu0 %v16006_v58 }
0x27da   : > { %14981 = vmatmul.mubr.msk.f32.vlgmr.msra.gmra.mrb[28].mxu0 %vm10386_vm2, %v18198_v53 }
0x27db   : > { %15325 = vmatpush3.bf16.msra.mxu0 %v18088_v16  ;;  %15004 = vmatprep.mubr.msk.f32.mxu0 %vm16007_vm5, %v15956_v0 }
0x27dc   : > { %15326 = vmatprep.subr.bf16.mxu0 %v16006_v58 }
0x27df   : > { %15328 = vmatpush3.bf16.msra.mxu0 %v18094_v59 }
0x27e0   : > { %15329 = vmatprep.subr.bf16.mxu0 %v16006_v58 }
0x27e3   : > { %15331 = vmatpush3.bf16.msra.mxu0 %v18103_v29  ;;  %v14278_v29 = vld [vmem:[%s16175_s20 + $0x20] sm:$0xff] }
0x27e4   : > { %15332 = vmatprep.subr.bf16.mxu0 %v16006_v58 }
0x27e7   : > { %15334 = vmatpush3.bf16.msra.mxu0 %v18109_v15  ;;  %v14279_v15 = vld [vmem:[%s16175_s20 + $0x28] sm:$0xff] }
0x27ea   : > { %15005 = vmatmul.mubr.msk.f32.vlgmr.msra.gmra.mrb[30].mxu0 %vm10386_vm2, %v18198_v53 }
0x287d   : > { %v12257_v38 = vpop.f32.mrb[32].mxu1  ;;  %v12329_v34 = vpop.f32.mrb[22].mxu0 }
0x287e   : > { %v14838_v25 = vpop.f32.mrb[33].mxu1  ;;  %v14857_v49 = vpop.f32.mrb[23].mxu0  ;;  %14858 = vmatprep.subr.mxu1 %v12329_v34 }
0x287f   : > { %14859 = vmatpush3.msra.mxu1 %v12329_v34 }
0x2880   : > { %14861 = vmatmul.mubr.msk.f32.vlgmr.msra.gmra.mrb[34].mxu1 %vm6415_vm9, %v14272_v23  ;;  %14863 = vmatprep.subr.mxu1 %v12257_v38 }
0x2881   : > { %14864 = vmatpush3.msra.mxu1 %v12257_v38  ;;  %14865 = vmatprep.mubr.msk.f32.mxu1 %vm6415_vm9, %v12261_v54 }
0x2882   : > { %15263 = vmatprep.subr.bf16.mxu1 %v16006_v58 }
0x2888   : > { %14866 = vmatmul.mubr.msk.f32.vlgmr.msra.gmra.mrb[34].mxu1 %vm6415_vm9, %v12262_v57 }
0x2889   : > { %15265 = vmatpush3.bf16.msra.mxu1 %v17909_v42  ;;  %14884 = vmatprep.mubr.msk.f32.mxu1 %vm16007_vm5, %v15956_v0 }
0x288a   : > { %15266 = vmatprep.subr.bf16.mxu1 %v16006_v58 }
0x288d   : > { %15268 = vmatpush3.bf16.msra.mxu1 %v17915_v31  ;;  %v12720_v21 = vpop.f32.mrb[24].mxu0 }
0x288e   : > { %v14910_v46 = vpop.f32.mrb[25].mxu0  ;;  %15269 = vmatprep.subr.bf16.mxu1 %v16006_v58 }
0x2891   : > { %15271 = vmatpush3.bf16.msra.mxu1 %v17925_v61 }
0x2892   : > { %15272 = vmatprep.subr.bf16.mxu1 %v16006_v58 }
0x2895   : > { %15274 = vmatpush3.bf16.msra.mxu1 %v17931_v35  ;;  %v14283_v35 = vld [vmem:[%s16175_s20 + $0x30] sm:$0xff] }
0x2898   : > { %14885 = vmatmul.mubr.msk.f32.vlgmr.msra.gmra.mrb[36].mxu1 %vm10386_vm2, %v18198_v53 }
0x2899   : > { %14889 = vmatprep.mubr.msk.f32.mxu1 %vm6415_vm9, %v14278_v29 }
0x289d   : > { %v12876_v42 = vpop.f32.mrb[26].mxu0 }
0x289e   : > { %v14934_v47 = vpop.f32.mrb[27].mxu0 }
0x28ad   : > { %v13188_v7 = vpop.f32.mrb[28].mxu0 }
0x28ae   : > { %v14982_v16 = vpop.f32.mrb[29].mxu0 }
0x28bd   : > { %v13344_v31 = vpop.f32.mrb[30].mxu0 }
0x28be   : > { %v15006_v59 = vpop.f32.mrb[31].mxu0 }
0x296b   : > { %v12564_v61 = vpop.f32.mrb[36].mxu1 }
0x296c   : > { %v14886_v55 = vpop.f32.mrb[37].mxu1  ;;  %14887 = vmatprep.subr.mxu1 %v12564_v61 }
0x296d   : > { %14888 = vmatpush3.msra.mxu1 %v12564_v61 }
0x296e   : > { %14890 = vmatmul.mubr.msk.f32.vlgmr.msra.gmra.mrb[34].mxu1 %vm6415_vm9, %v14279_v15  ;;  %14911 = vmatprep.subr.mxu1 %v12720_v21 }
0x296f   : > { %14912 = vmatpush3.msra.mxu1 %v12720_v21  ;;  %14913 = vmatprep.mubr.msk.f32.mxu1 %vm6415_vm9, %v14283_v35 }
0x2970   : > { %14935 = vmatprep.subr.mxu1 %v12876_v42 }
0x2976   : > { %14914 = vmatmul.mubr.msk.f32.vlgmr.msra.gmra.mrb[34].mxu1 %vm6415_vm9, %v14284_v24 }
0x2977   : > { %14936 = vmatpush3.msra.mxu1 %v12876_v42  ;;  %14937 = vmatprep.mubr.msk.f32.mxu1 %vm6415_vm9, %v14288_v5 }
0x2978   : > { %15299 = vmatprep.subr.bf16.mxu1 %v16006_v58 }
0x297e   : > { %14938 = vmatmul.mubr.msk.f32.vlgmr.msra.gmra.mrb[34].mxu1 %vm6415_vm9, %v14289_v1 }
0x297f   : > { %15301 = vmatpush3.bf16.msra.mxu1 %v18022_v36  ;;  %14956 = vmatprep.mubr.msk.f32.mxu1 %vm16007_vm5, %v15956_v0  ;;  %v14293_v36 = vld [vmem:[%s16175_s20 + $0x50] sm:$0xff] }
0x2980   : > { %15302 = vmatprep.subr.bf16.mxu1 %v16006_v58 }
0x2983   : > { %15304 = vmatpush3.bf16.msra.mxu1 %v18028_v2 }
0x2984   : > { %15305 = vmatprep.subr.bf16.mxu1 %v16006_v58 }
0x2987   : > { %15307 = vmatpush3.bf16.msra.mxu1 %v18037_v19  ;;  %v14299_v19 = vld [vmem:[%s16175_s20 + $0x68] sm:$0xff] }
0x2988   : > { %15308 = vmatprep.subr.bf16.mxu1 %v16006_v58 }
0x298b   : > { %15310 = vmatpush3.bf16.msra.mxu1 %v18043_v50  ;;  %v14303_v50 = vld [vmem:[%s16175_s20 + $0x70] sm:$0xff] }
0x298e   : > { %14957 = vmatmul.mubr.msk.f32.vlgmr.msra.gmra.mrb[38].mxu1 %vm10386_vm2, %v18198_v53 }
0x298f   : > { %14961 = vmatprep.mubr.msk.f32.mxu1 %vm6415_vm9, %v14293_v36 }
0x2a61   : > { %v13032_v12 = vpop.f32.mrb[38].mxu1 }
0x2a62   : > { %v14958_v2 = vpop.f32.mrb[39].mxu1  ;;  %14959 = vmatprep.subr.mxu1 %v13032_v12 }
0x2a63   : > { %14960 = vmatpush3.msra.mxu1 %v13032_v12 }
0x2a64   : > { %14962 = vmatmul.mubr.msk.f32.vlgmr.msra.gmra.mrb[34].mxu1 %vm6415_vm9, %v14294_v20  ;;  %14983 = vmatprep.subr.mxu1 %v13188_v7 }
0x2a65   : > { %14984 = vmatpush3.msra.mxu1 %v13188_v7  ;;  %14985 = vmatprep.mubr.msk.f32.mxu1 %vm6415_vm9, %v14298_v52 }
0x2a66   : > { %15007 = vmatprep.subr.mxu1 %v13344_v31 }
0x2a6c   : > { %14986 = vmatmul.mubr.msk.f32.vlgmr.msra.gmra.mrb[34].mxu1 %vm6415_vm9, %v14299_v19 }
0x2a6d   : > { %15008 = vmatpush3.msra.mxu1 %v13344_v31  ;;  %15009 = vmatprep.mubr.msk.f32.mxu1 %vm6415_vm9, %v14303_v50 }
0x2a6e   : > { %15335 = vmatprep.subr.bf16.mxu1 %v16006_v58 }
0x2a74   : > { %15010 = vmatmul.mubr.msk.f32.vlgmr.msra.gmra.mrb[34].mxu1 %vm6415_vm9, %v14304_v17 }
0x2a75   : > { %15337 = vmatpush3.bf16.msra.mxu1 %v18121_v62  ;;  %15028 = vmatprep.mubr.msk.f32.mxu1 %vm16007_vm5, %v15956_v0  ;;  %v14308_v0 = vld [vmem:[%s16175_s20 + $0x80] sm:$0xff] }
0x2a76   : > { %15338 = vmatprep.subr.bf16.mxu1 %v16006_v58 }
0x2a79   : > { %15340 = vmatpush3.bf16.msra.mxu1 %v18127_v32 }
0x2a7a   : > { %15341 = vmatprep.subr.bf16.mxu1 %v16006_v58 }
0x2a7d   : > { %15343 = vmatpush3.bf16.msra.mxu1 %v18136_v30 }
0x2a7e   : > { %15344 = vmatprep.subr.bf16.mxu1 %v16006_v58 }
0x2a81   : > { %15346 = vmatpush3.bf16.msra.mxu1 %v18142_v18 }
0x2a84   : > { %15029 = vmatmul.mubr.msk.f32.vlgmr.msra.gmra.mrb[40].mxu1 %vm10386_vm2, %v18198_v53 }
0x2a85   : > { %15033 = vmatprep.mubr.msk.f32.mxu1 %vm6415_vm9, %v14308_v0 }
0x2b57   : > { %v13500_v62 = vpop.f32.mrb[40].mxu1 }
0x2b58   : > { %v15030_v32 = vpop.f32.mrb[41].mxu1  ;;  %15031 = vmatprep.subr.mxu1 %v13500_v62 }
0x2b59   : > { %15032 = vmatpush3.msra.mxu1 %v13500_v62 }
0x2b5a   : > { %15034 = vmatmul.mubr.msk.f32.vlgmr.msra.gmra.mrb[34].mxu1 %vm6415_vm9, %v14309_v44 }
0x2b5b   : > { %15839 = shalt.err (!%p15836_p3)
}
0x2b5c   : > { %s15840_s3 = scalar_lea.hbm %s18327_s18, 256  ;;  %s15844_s28 = scalar_lea.hbm %s16185_s4, 512 }
0x2b5d   : > { %p15841_p4 = scmp.ne.s32.totalorder %s18327_s18, %s15840_s3  ;;  %p15845_p9 = scmp.lt.u32.totalorder %s18327_s18, %s16185_s4 }
0x2b5e   : > { %p15846_p10 = scmp.lt.u32.totalorder %s15844_s28, %s15840_s3  ;;  %p15848_p12 = scmp.lt.u32.totalorder %s15840_s3, %s18327_s18 }
0x2b5f   : > { %p15842_p7 = pnand %p15841_p4, %p16230_p5 }
0x2b60   : > { %p15847_p11 = por %p15846_p10, %p15845_p9 }
0x2b61   : > { %p15843_p8 = pneg %p15842_p7 }
0x2b62   : > { %p15849_p0 = por %p15848_p12, %p15847_p11 }
0x2b64   : > { %p15850_p13 = pnand %p15849_p0, %p15843_p8 }
0x2b66   : > { %15853 = shalt.err (!%p15850_p13)
}
0x2b67   : > { %15623 = dma.vmem_to_hbm [thread:$0]  (%p16230_p5), %s13629_s8, 256, %s18327_s18, %s13609_s5   ;;  %v13595_v58 = vpop.permute.xlu1 %13594 }
0x2b68   : > { %s18498_s9 = sshll.u32 %s17341_s13, 4  ;;  %s18349_s3 = scalar_lea.hbm %s16190_s6, %s14321_s1 }
0x2b69   : > { %s1046_s2 = scalar_lea.vmem [#allocation4], %s18498_s9  ;;  %s13614_s18 = scalar_lea.sflag [#allocation5], %s17341_s13 }
0x2b6a   : > { %s13641_s24 = sshll.u32 %s1046_s2, 4  ;;  %s16009_s0 = smov [#allocation4]   ;;  %s18352_s24 = int_to_ptr.vmem [resolvable:$true] %s13641_s24 }
0x2b6b   : > { %v13600_v30 = vpop.permute.xlu1 %13599  ;;  %s15854_s8 = scalar_lea.vmem %s18352_s24, 256  ;;  %s15858_s1 = sshll.u32 %s16009_s0, 4  ;;  %s15859_s1 = int_to_ptr.vmem [resolvable:$false] %s15858_s1 }
0x2b6c   : > { %p15855_p1 = scmp.ne.s32.totalorder %s18352_s24, %s15854_s8  ;;  %s15860_s5 = scalar_lea.vmem %s15859_s1, 512 }
0x2b6d   : > { %p15861_p4 = scmp.lt.s32.totalorder %s18352_s24, %s15859_s1  ;;  %p15862_p7 = scmp.lt.s32.totalorder %s15860_s5, %s15854_s8 }
0x2b6e   : > { %p15856_p2 = pnand %p15855_p1, %p16230_p5 }
0x2b6f   : > { %p15863_p8 = por %p15862_p7, %p15861_p4 }
0x2b70   : > { %p15857_p3 = pneg %p15856_p2 }
0x2b72   : > { %p15864_p9 = pnand %p15863_p8, %p15857_p3 }
0x2c2d   : > { %v15035_v18 = vpop.f32.mrb[34].mxu1 }
0x2c2e   : > { %v13603_v13 = vadd.f32 %v15035_v18, %v13600_v30  ;;  %v13579_v60 = vpop.f32.mrb[35].mxu1 }
0x2c2f   : > { %v13602_v6 = vadd.f32 %v13595_v58, %v13579_v60 }
0x2c30   : > { %v13605_v4 = vadd.f32 %v17781_v51, %v13603_v13 }
0x2c31   : > { %v13604_v48 = vadd.f32 %v17779_v63, %v13602_v6 }
0x2c32   : > { %13607 = vst.msk [vmem:[%s1046_s2 + $0x8] sm:$0xff] %vm10386_vm2, %v13605_v4 }
0x2c33   : > { %13606 = vst.msk [vmem:[%s1046_s2] sm:$0xff] %vm10386_vm2, %v13604_v48 }
0x2c34   : > { %15867 = shalt.err (!%p15864_p9)
}
0x2c35   : > { %s15868_s28 = scalar_lea.hbm %s18349_s3, 256  ;;  %s15872_s9 = scalar_lea.hbm %s16190_s6, 512 }
0x2c36   : > { %p15869_p10 = scmp.ne.s32.totalorder %s18349_s3, %s15868_s28  ;;  %p15873_p0 = scmp.lt.u32.totalorder %s18349_s3, %s16190_s6 }
0x2c37   : > { %p15874_p13 = scmp.lt.u32.totalorder %s15872_s9, %s15868_s28  ;;  %p15876_p2 = scmp.lt.u32.totalorder %s15868_s28, %s18349_s3 }
0x2c38   : > { %p15870_p11 = pnand %p15869_p10, %p16230_p5 }
0x2c39   : > { %p15875_p1 = por %p15874_p13, %p15873_p0 }
0x2c3a   : > { %p15871_p12 = pneg %p15870_p11 }
0x2c3b   : > { %p15877_p4 = por %p15876_p2, %p15875_p1 }
0x2c3d   : > { %p15878_p3 = pnand %p15877_p4, %p15871_p12 }
0x2c3f   : > { %15881 = shalt.err (!%p15878_p3)
}
0x2c40   : > { %s16010_s2 = smov 128   ;;  %s16011_s8 = smov 8  }
0x2c41   : > { %15624 = dma.vmem_to_hbm [thread:$0]  (%p16230_p5), %s18352_s24, 256, %s18349_s3, %s13614_s18, %s16010_s2, %s16010_s2, %s16011_s8  }
0x2c42 PF: > { %p15634_p7 = scmp.ge.s32.totalorder %s15920_s22, 2  ;;  %s13656_s0 = sand.u32 1, %s15908_s15  }
0x2c43   : > { %s13657_s1 = scalar_lea.sflag [#allocation3], %s13656_s0 }
0x2c44   : > { %p15628_p8 = pnand %p15634_p7, %p16234_p6 }
0x2c46   : > { %15899 = dma.done.wait (!%p15628_p8), %s13657_s1, 256  }
0x2c47   : > { %15901 = vsyncadd (!%p15628_p8), %s13657_s1, 4294967040  ;;  %s13666_s5 = scalar_lea.sflag [#allocation5], %s13656_s0 }
0x2c48   : > { %15903 = dma.done.wait (!%p15628_p8), %s13666_s5, 256  }
0x2c49   : > { %15905 = vsyncadd (!%p15628_p8), %s13666_s5, 4294967040  ;;  %s18499_s28 = sld [smem:[#allocation35_spill]]  ;;  %s18500_s18 = sld [smem:[#allocation36_spill]] }
0x2c4a   : > { %p83_p5 = scmp.ge.s32.totalorder %s16217_s26, 4   ;;  %s18501_s15 = smov %s15912_s16 }
0x2c4b   : > { %s18503_s22 = smov %s16217_s26 }
0x2c4c   :  { %85 = sbr.rel (!%p83_p5) target bundleno = 72 (0x48), region = 398 }
0x2c4f   : > { %s18502_s16 = smov %s18499_s28 }
0x2c53   :  { %13671 = vsyncpa [#allocation3], 1 }
0x2c54   :  { %13673 = vsyncpa [#allocation3 + $0x1], 1 }
0x2c55   :  { %13674 = vsyncpa [#allocation5], 1 }
0x2c56   :  { %13676 = vsyncpa [#allocation5 + $0x1], 1 }

</bundles_post_ra>
